<compile_context>
chip_gen: v5e
topology: v5e:2x2
jax: 0.10.0
libtpu: 0.0.40
codegen_flags: <defaults>
</compile_context>

<pallas_src>
import functools

import jax
import jax.numpy as jnp
from jax.experimental import pallas as pl
from jax.experimental.pallas import tpu as pltpu


def _fused_add_conv_bn_kernel(x1_ref, x2_ref, w_ref, gamma_ref, beta_ref,
                              o_ref, *, eps):
    # Elementwise add (VPU) + bf16 cast for the MXU fast path.
    s = (x1_ref[...] + x2_ref[...]).astype(jnp.bfloat16)            # [P, Cin]

    # 1x1 conv == channel matmul (MXU). Weight is pre-transposed offline to
    # [Cin, TN] bf16, so this is a native (1,0) contraction (no vxpose).
    y = jnp.dot(s, w_ref[...], preferred_element_type=jnp.float32)  # [P, TN]

    # Stage y through VMEM (the output ref) so the BN epilogue re-reads it
    # instead of holding the full [P, TN] f32 tile + y*y temp in vregs.
    o_ref[...] = y

    # BatchNorm2d (training mode): per-channel batch stats over all P = N*H*W
    # rows. All rows of this Cout tile are in-block, so stats are exact.
    p = o_ref.shape[0]
    inv_p = 1.0 / p
    yv = o_ref[...]
    sum_y = jnp.sum(yv, axis=0, keepdims=True)                       # [1, TN]
    sum_y2 = jnp.sum(yv * yv, axis=0, keepdims=True)                 # [1, TN]
    mean = sum_y * inv_p
    var = jnp.maximum(sum_y2 * inv_p - mean * mean, 0.0)             # clamp >= 0
    scale = jax.lax.rsqrt(var + eps) * gamma_ref[...]                # [1, TN]
    bias = beta_ref[...] - mean * scale                              # [1, TN]
    # single FMA sweep epilogue, in place
    o_ref[...] = (o_ref[...] * scale + bias).astype(o_ref.dtype)


def prepare_conv_weight(weight):
    """One-time (parameter init / load-time) prep:
    [Cout, Cin, 1, 1] f32  ->  [Cin, Cout] bf16.

    Must NOT be called per forward pass — a per-call cast/transpose would add
    its own weight read+write to HBM and eat the bandwidth win."""
    cout, cin = weight.shape[0], weight.shape[1]
    return jnp.transpose(weight.reshape(cout, cin), (1, 0)).astype(jnp.bfloat16)


def fused_add_conv1x1_bn(x1, x2, w_t_bf16, gamma, beta, eps=1e-3, tile_n=1920):
    """x1, x2: NCHW [N, Cin, H, W]; w_t_bf16: pre-transposed [Cin, Cout] bf16."""
    N, Cin, H, W = x1.shape
    Cin_w, Cout = w_t_bf16.shape
    assert Cin_w == Cin
    P = N * H * W
    assert Cout % tile_n == 0 and tile_n % 128 == 0

    # NCHW -> [P, Cin] (rows = pixels, lanes = channels)
    def to_rows(x):
        return jnp.transpose(x.reshape(N, Cin, H * W), (0, 2, 1)).reshape(P, Cin)

    x1r = to_rows(x1)
    x2r = to_rows(x2)
    gamma2 = gamma.reshape(1, Cout)
    beta2 = beta.reshape(1, Cout)

    kernel = functools.partial(_fused_add_conv_bn_kernel, eps=eps)

    out_rows = pl.pallas_call(
        kernel,
        out_shape=jax.ShapeDtypeStruct((P, Cout), jnp.float32),
        grid_spec=pl.GridSpec(
            grid=(Cout // tile_n,),
            in_specs=[
                # activations stay resident (constant block index across grid)
                pl.BlockSpec((P, Cin), lambda j: (0, 0)),
                pl.BlockSpec((P, Cin), lambda j: (0, 0)),
                # bf16 weight streamed tile-by-tile over Cout (double-buffered)
                pl.BlockSpec((Cin, tile_n), lambda j: (0, j)),
                pl.BlockSpec((1, tile_n), lambda j: (0, j)),
                pl.BlockSpec((1, tile_n), lambda j: (0, j)),
            ],
            out_specs=pl.BlockSpec((P, tile_n), lambda j: (0, j)),
        ),
        compiler_params=pltpu.CompilerParams(
            dimension_semantics=("parallel",),   # Cout tiles independent -> megacore
            vmem_limit_bytes=32 << 20,
        ),
    )(x1r, x2r, w_t_bf16, gamma2, beta2)

    # [P, Cout] -> NCHW (kept to match the PyTorch module's output layout)
    return jnp.transpose(out_rows.reshape(N, H * W, Cout), (0, 2, 1)).reshape(
        N, Cout, H, W)


def reference(x1, x2, weight, gamma, beta, eps=1e-3):
    s = x1 + x2
    # 1x1 conv via einsum (NCHW), f32 weights
    y = jnp.einsum('nchw,oc->nohw', s, weight.reshape(weight.shape[0], -1))
    mean = jnp.mean(y, axis=(0, 2, 3), keepdims=True)
    var = jnp.mean((y - mean) ** 2, axis=(0, 2, 3), keepdims=True)
    return (y - mean) * jax.lax.rsqrt(var + eps) * gamma.reshape(1, -1, 1, 1) \
        + beta.reshape(1, -1, 1, 1)


if __name__ == "__main__":
    N, Cin, H, W = 1, 640, 7, 7
    Cout = 3840

    key = jax.random.PRNGKey(0)
    k1, k2, k3, k4, k5 = jax.random.split(key, 5)

    x1004 = jax.random.normal(k1, (N, Cin, H, W), dtype=jnp.float32)
    x989 = jax.random.normal(k2, (N, Cin, H, W), dtype=jnp.float32)

    # Conv2d(640, 3840, kernel_size=1, bias=False) weight, deterministic init.
    weight = jax.random.normal(k3, (Cout, Cin, 1, 1), dtype=jnp.float32) * 0.02
    # BatchNorm2d(3840) affine params (perturbed from ones/zeros to exercise
    # the affine path, still deterministic).
    gamma = 1.0 + 0.1 * jax.random.normal(k4, (Cout,), dtype=jnp.float32)
    beta = 0.1 * jax.random.normal(k5, (Cout,), dtype=jnp.float32)

    # One-time parameter prep (init/load time, outside the per-call hot path).
    w_t_bf16 = jax.block_until_ready(prepare_conv_weight(weight))

    out = fused_add_conv1x1_bn(x1004, x989, w_t_bf16, gamma, beta, eps=1e-3)
    out = jax.block_until_ready(out)

    ref = reference(x1004, x989, weight, gamma, beta, eps=1e-3)
    assert out.shape == (N, Cout, H, W)
    err = float(jnp.max(jnp.abs(out - ref)))
    assert jnp.allclose(out, ref, atol=2e-2, rtol=2e-2), err

    # TODO(synk): BatchNorm running_mean/running_var buffer updates are stateful
    # PyTorch-module side effects and are not reproduced (forward output only).
    print("KERNEL_OK")
</pallas_src>

<mosaic_0001>
module attributes {stable_mosaic.version = 11 : i64} {
  func.func @_fused_add_conv_bn_kernel(%arg0: i32, %arg1: memref<49x640xf32, #tpu.memory_space<vmem>>, %arg2: memref<49x640xf32, #tpu.memory_space<vmem>>, %arg3: memref<640x1920xbf16, #tpu.memory_space<vmem>>, %arg4: memref<1x1920xf32, #tpu.memory_space<vmem>>, %arg5: memref<1x1920xf32, #tpu.memory_space<vmem>>, %arg6: memref<49x1920xf32, #tpu.memory_space<vmem>>) attributes {dimension_semantics = [#tpu.dimension_semantics<parallel>], iteration_bounds = array<i64: 2>, scalar_prefetch = 0 : i64, scratch_operands = 0 : i64, tpu.core_type = #tpu.core_type<tc>, window_params = [{pipeline_mode = #tpu.pipeline_mode<synchronous>, transform_indices = @transform_0, window_bounds = array<i64: 49, 640>}, {pipeline_mode = #tpu.pipeline_mode<synchronous>, transform_indices = @transform_1, window_bounds = array<i64: 49, 640>}, {transform_indices = @transform_2, window_bounds = array<i64: 640, 1920>}, {transform_indices = @transform_3, window_bounds = array<i64: 1, 1920>}, {transform_indices = @transform_4, window_bounds = array<i64: 1, 1920>}, {transform_indices = @transform_5, window_bounds = array<i64: 49, 1920>}]} {
    %c0 = arith.constant 0 : index
    %c0_0 = arith.constant 0 : index
    %0 = vector.load %arg1[%c0, %c0_0] : memref<49x640xf32, #tpu.memory_space<vmem>>, vector<49x640xf32>
    %c0_1 = arith.constant 0 : index
    %c0_2 = arith.constant 0 : index
    %1 = vector.load %arg2[%c0_1, %c0_2] : memref<49x640xf32, #tpu.memory_space<vmem>>, vector<49x640xf32>
    %2 = arith.addf %0, %1 : vector<49x640xf32>
    %3 = arith.truncf %2 : vector<49x640xf32> to vector<49x640xbf16>
    %c0_3 = arith.constant 0 : index
    %c0_4 = arith.constant 0 : index
    %4 = vector.load %arg3[%c0_3, %c0_4] : memref<640x1920xbf16, #tpu.memory_space<vmem>>, vector<640x1920xbf16>
    %cst = arith.constant dense<0.000000e+00> : vector<49x1920xf32>
    %5 = tpu.matmul %3, %4, %cst {dimension_numbers = #tpu.dot_dimension_numbers<[1], [0], [0], [1], [0, 0, 1, 1], [], []>} : vector<49x640xbf16>, vector<640x1920xbf16>, vector<49x1920xf32> -> vector<49x1920xf32>
    %c0_5 = arith.constant 0 : index
    %c0_6 = arith.constant 0 : index
    %6 = vector.load %arg6[%c0_5, %c0_6] : memref<49x1920xf32, #tpu.memory_space<vmem>>, vector<49x1920xf32>
    tpu.vector_store %arg6[%c0_5, %c0_6], %5 {strides = array<i32>} : memref<49x1920xf32, #tpu.memory_space<vmem>>, vector<49x1920xf32>,
    %c0_7 = arith.constant 0 : index
    %c0_8 = arith.constant 0 : index
    %7 = vector.load %arg6[%c0_7, %c0_8] : memref<49x1920xf32, #tpu.memory_space<vmem>>, vector<49x1920xf32>
    %cst_9 = arith.constant dense<0.000000e+00> : vector<1920xf32>
    %8 = vector.multi_reduction <add>, %7, %cst_9 [0] : vector<49x1920xf32> to vector<1920xf32>
    %9 = vector.shape_cast %8 : vector<1920xf32> to vector<1x1920xf32>
    %10 = arith.mulf %7, %7 : vector<49x1920xf32>
    %cst_10 = arith.constant dense<0.000000e+00> : vector<1920xf32>
    %11 = vector.multi_reduction <add>, %10, %cst_10 [0] : vector<49x1920xf32> to vector<1920xf32>
    %12 = vector.shape_cast %11 : vector<1920xf32> to vector<1x1920xf32>
    %cst_11 = arith.constant 0.0204081628 : f32
    %13 = vector.broadcast %cst_11 : f32 to vector<1x1920xf32>
    %14 = arith.mulf %9, %13 : vector<1x1920xf32>
    %cst_12 = arith.constant 0.0204081628 : f32
    %15 = vector.broadcast %cst_12 : f32 to vector<1x1920xf32>
    %16 = arith.mulf %12, %15 : vector<1x1920xf32>
    %17 = arith.mulf %14, %14 : vector<1x1920xf32>
    %18 = arith.subf %16, %17 : vector<1x1920xf32>
    %cst_13 = arith.constant 0.000000e+00 : f32
    %19 = vector.broadcast %cst_13 : f32 to vector<1x1920xf32>
    %20 = arith.maximumf %18, %19 : vector<1x1920xf32>
    %cst_14 = arith.constant 1.000000e-03 : f32
    %21 = vector.broadcast %cst_14 : f32 to vector<1x1920xf32>
    %22 = arith.addf %20, %21 : vector<1x1920xf32>
    %23 = math.rsqrt %22 : vector<1x1920xf32>
    %c0_15 = arith.constant 0 : index
    %c0_16 = arith.constant 0 : index
    %24 = vector.load %arg4[%c0_15, %c0_16] : memref<1x1920xf32, #tpu.memory_space<vmem>>, vector<1x1920xf32>
    %25 = arith.mulf %23, %24 : vector<1x1920xf32>
    %c0_17 = arith.constant 0 : index
    %c0_18 = arith.constant 0 : index
    %26 = vector.load %arg5[%c0_17, %c0_18] : memref<1x1920xf32, #tpu.memory_space<vmem>>, vector<1x1920xf32>
    %27 = arith.mulf %14, %25 : vector<1x1920xf32>
    %28 = arith.subf %26, %27 : vector<1x1920xf32>
    %c0_19 = arith.constant 0 : index
    %c0_20 = arith.constant 0 : index
    %29 = vector.load %arg6[%c0_19, %c0_20] : memref<49x1920xf32, #tpu.memory_space<vmem>>, vector<49x1920xf32>
    %30 = vector.broadcast %25 : vector<1x1920xf32> to vector<49x1920xf32>
    %31 = arith.mulf %29, %30 : vector<49x1920xf32>
    %32 = vector.broadcast %28 : vector<1x1920xf32> to vector<49x1920xf32>
    %33 = arith.addf %31, %32 : vector<49x1920xf32>
    %c0_21 = arith.constant 0 : index
    %c0_22 = arith.constant 0 : index
    %34 = vector.load %arg6[%c0_21, %c0_22] : memref<49x1920xf32, #tpu.memory_space<vmem>>, vector<49x1920xf32>
    tpu.vector_store %arg6[%c0_21, %c0_22], %33 {strides = array<i32>} : memref<49x1920xf32, #tpu.memory_space<vmem>>, vector<49x1920xf32>,
    return
  }
  func.func @transform_0(%arg0: i32) -> (i32, i32) {
    %c0_i32 = arith.constant 0 : i32
    %c0_i32_0 = arith.constant 0 : i32
    %c0_i32_1 = arith.constant 0 : i32
    return %c0_i32, %c0_i32_0 : i32, i32
  }
  func.func @transform_1(%arg0: i32) -> (i32, i32) {
    %c0_i32 = arith.constant 0 : i32
    %c0_i32_0 = arith.constant 0 : i32
    %c0_i32_1 = arith.constant 0 : i32
    return %c0_i32, %c0_i32_0 : i32, i32
  }
  func.func @transform_2(%arg0: i32) -> (i32, i32) {
    %c0_i32 = arith.constant 0 : i32
    %c0_i32_0 = arith.constant 0 : i32
    return %c0_i32, %arg0 : i32, i32
  }
  func.func @transform_3(%arg0: i32) -> (i32, i32) {
    %c0_i32 = arith.constant 0 : i32
    %c0_i32_0 = arith.constant 0 : i32
    return %c0_i32, %arg0 : i32, i32
  }
  func.func @transform_4(%arg0: i32) -> (i32, i32) {
    %c0_i32 = arith.constant 0 : i32
    %c0_i32_0 = arith.constant 0 : i32
    return %c0_i32, %arg0 : i32, i32
  }
  func.func @transform_5(%arg0: i32) -> (i32, i32) {
    %c0_i32 = arith.constant 0 : i32
    %c0_i32_0 = arith.constant 0 : i32
    return %c0_i32, %arg0 : i32, i32
  }
}

</mosaic_0001>

<bundles_post_ra>
// kernel: tpu_custom_call.1
= control target key start
LH: loop header
LB: loop body
LE: loop exit
PB: predicated region body
PF: predicated region fallthrough
CT: control target
= control target key end

     0   :  { %s15314_s0 = inlined_call_operand.hbm [shape: f32[49,640], index: 0, kind: input, shape index: {}]   ;;  %s15315_s1 = inlined_call_operand.hbm [shape: f32[49,640], index: 1, kind: input, shape index: {}]   ;;  %s15316_s2 = inlined_call_operand.hbm [shape: bf16[640,3840], index: 2, kind: input, shape index: {}]   ;;  %s15317_s3 = inlined_call_operand.hbm [shape: f32[1,3840], index: 3, kind: input, shape index: {}]   ;;  %s15318_s4 = inlined_call_operand.hbm [shape: f32[1,3840], index: 4, kind: input, shape index: {}]   ;;  %s15319_s5 = inlined_call_operand.hbm [shape: f32[49,3840], index: 5, kind: output, shape index: {}]  }
   0x1   :  { %15442 = sst [smem:[#allocation94_spill]] %s15314_s0 }
   0x2   :  { %15443 = sst [smem:[#allocation95_spill]] %s15316_s2 }
   0x3   :  { %10 = vsyncpa [#allocation3], 0 }
   0x4   :  { %11 = vsyncpa [#allocation6], 0 }
   0x5   :  { %12 = vsyncpa [#allocation4], 0 }
   0x6   :  { %14 = vsyncpa [#allocation4 + $0x1], 0  ;;  %s11268_s18 = smov 0   ;;  %s11270_s19 = smov 0  }
   0x7   :  { %s11272_s20 = smov 0   ;;  %s11274_s21 = smov 0  }
   0x8 LB: > { %15444 = sst [smem:[#allocation15_spill]] %s11214_s18  ;;  %s11289_s22 = sadd.s32 4294967295, %s11226_s21   ;;  %s11226_s21 = sphi %s11274_s21, %s15741_s21   ;;  %s11222_s20 = sphi %s11272_s20, %s15745_s20   ;;  %s11218_s19 = sphi %s11270_s19, %s15744_s19   ;;  %s11214_s18 = sphi %s11268_s18, %s15743_s18  }
   0x9   : > { %s7830_s23 = sadd.s32 4294967294, %s11226_s21   ;;  %s11293_s24 = sadd.s32 1, %s11226_s21  }
   0xa   : > { %15445 = sst [smem:[#allocation16_spill]] %s11293_s24  ;;  %s69_s25 = sadd.s32 1, %s11222_s20 }
   0xb   : > { %s66_s26 = ssub.s32 %s11226_s21, %s11293_s24  ;;  %p76_p0 = scmp.ne.s32.totalorder %s11222_s20, %s11218_s19 }
   0xc   : > { %p67_p1 = scmp.eq.s32.totalorder %s66_s26, 0  ;;  %p77_p2 = scmp.eq.s32.totalorder %s11226_s21, 0 }
   0xd   : > { %p82_p3 = scmp.ne.s32.totalorder %s11218_s19, %s11214_s18  ;;  %p15323_p4 = scmp.eq.s32.totalorder %s11289_s22, 0 }
   0xe   : > { %s11305_s27 = scalar_select %p67_p1, %s11222_s20, %s69_s25  }
   0xf   : > { %p11307_p5 = por %p77_p2, %p76_p0  ;;  %p11313_p6 = por %p15323_p4, %p82_p3 }
  0x10   : > { %15446 = sst [smem:[#allocation17_spill]] %s11305_s27  ;;  %p158_p7 = scmp.eq.s32.totalorder %s11289_s22, 1 }
  0x11   : > { %p164_p8 = scmp.eq.s32.totalorder %s7830_s23, 1  ;;  %p7831_p9 = scmp.ge.s32.totalorder %s11226_s21, 1 }
  0x12   : > { %p171_p10 = scmp.lt.s32.totalorder %s11226_s21, 3  ;;  %p11320_p11 = por %p158_p7, %p76_p0 }
  0x13   : > { %p11324_p12 = por %p164_p8, %p82_p3  ;;  %s15453_s0 = sld [smem:[#allocation94_spill]] }
  0x14   : > { %p11328_p13 = pnand %p7831_p9, %p171_p10  ;;  %s11228_s11 = smov [#allocation2]  }
  0x15   : > { %s15450_s6 = scalar_select %p11324_p12, 1, 0 }
  0x16   : > { %p10890_p0 = pneg %p11328_p13  ;;  %s184_s12 = sshll.u32 %s11228_s11, 4  ;;  %s185_s12 = int_to_ptr.vmem [resolvable:$true] %s184_s12 }
  0x17   : > { %15451 = sst [smem:[#allocation18_spill]] %s15450_s6  ;;  %p10913_p3 = scmp.lt.s32.totalorder %s11226_s21, 2 }
  0x18   : > { %p11339_p1 = pnand %p10890_p0, %p15323_p4  ;;  %s15322_s14 = smov 640  }
  0x19   : > { %s182_s10 = sshll.u32 %s15453_s0, 4  ;;  %s15324_s15 = smov 40   ;;  %s183_s10 = int_to_ptr.hbm [resolvable:$true] %s182_s10 }
  0x1a   : > { %10893 = dma.hbm_to_vmem [thread:$0]  (!%p11339_p1), %s183_s10, 4480, %s185_s12, [#allocation3], %s15322_s14, %s15322_s14, %s15324_s15  }
  0x1b   : > { %p11352_p7 = pnand %p10913_p3, %p11307_p5  ;;  %s212_s17 = sand.u32 1, %s11226_s21  }
  0x1c   : > { %s214_s23 = sand.u32 1, %s11222_s20   ;;  %s10242_s26 = smul.u32 60, %s11226_s21 }
  0x1d   : > { %s10868_s25 = smul.u32 4800, %s214_s23  ;;  %s15456_s2 = sld [smem:[#allocation95_spill]] }
  0x1e   : > { %s11364_s28 = scalar_lea.sflag [#allocation3], %s212_s17  ;;  %p11036_p8 = pneg %p11352_p7 }
  0x1f   : > { %s216_s0 = scalar_lea.vmem [#allocation7], %s10868_s25 }
  0x20   : > { %s224_s27 = sshll.u32 %s216_s0, 4  ;;  %s225_s27 = int_to_ptr.vmem [resolvable:$true] %s224_s27 }
  0x23   : > { %s221_s11 = scalar_lea.hbm %s15456_s2, %s10242_s26  ;;  %s11039_s25 = scalar_lea.hbm %s15456_s2, 9600 }
  0x24   : > { %s222_s24 = sshll.u32 %s221_s11, 4  ;;  %s223_s24 = int_to_ptr.hbm [resolvable:$true] %s222_s24 }
  0x25   : > { %s11032_s10 = sshra.s32 %s223_s24, 4  ;;  %s11033_s10 = int_to_ptr.hbm [resolvable:$true] %s11032_s10 }
  0x26   : > { %s11034_s12 = scalar_lea.hbm %s11033_s10, 4800  ;;  %p11040_p0 = scmp.lt.s32.totalorder %s11033_s10, %s15456_s2 }
  0x27   : > { %p11035_p5 = scmp.ne.s32.totalorder %s11033_s10, %s11034_s12  ;;  %p11041_p3 = scmp.lt.s32.totalorder %s11039_s25, %s11034_s12 }
  0x29   : > { %p11037_p9 = pnand %p11036_p8, %p11035_p5  ;;  %p11042_p2 = por %p11041_p3, %p11040_p0 }
  0x2b   : > { %p11038_p10 = pneg %p11037_p9 }
  0x2d   : > { %p11043_p4 = pnand %p11042_p2, %p11038_p10 }
  0x2f   : > { %11046 = shalt.err (!%p11043_p4)
}
  0x30   : > { %s11231_s17 = smov 1920   ;;  %s11232_s9 = smov 960  }
  0x31   : > { %s11233_s11 = smov 60   ;;  %s11382_s14 = smul.u32 15, %s214_s23 }
  0x32   : > { %10900 = dma.hbm_to_vmem [thread:$0]  (!%p11352_p7), %s223_s24, 76800, %s225_s27, %s11364_s28, %s11231_s17, %s11232_s9, %s11233_s11  }
  0x33   : > { %s196_s10 = sshll.u32 %s15315_s1, 4  ;;  %s239_s12 = smul.u32 15, %s11226_s21  ;;  %s197_s10 = int_to_ptr.hbm [resolvable:$true] %s196_s10 }
  0x34   : > { %s238_s2 = scalar_lea.vmem [#allocation8], %s11382_s14  ;;  %s11234_s24 = smov [#allocation5]  }
  0x35   : > { %s242_s26 = scalar_lea.hbm %s15317_s3, %s239_s12  ;;  %s246_s6 = sshll.u32 %s238_s2, 4  ;;  %s247_s6 = int_to_ptr.vmem [resolvable:$true] %s246_s6 }
  0x36   : > { %s244_s18 = sshll.u32 %s242_s26, 4  ;;  %s198_s27 = sshll.u32 %s11234_s24, 4  ;;  %s245_s18 = int_to_ptr.hbm [resolvable:$true] %s244_s18  ;;  %s199_s27 = int_to_ptr.vmem [resolvable:$true] %s198_s27 }
  0x37   : > { %s11062_s23 = sshra.s32 %s245_s18, 4  ;;  %s11069_s11 = scalar_lea.hbm %s15317_s3, 30  ;;  %s11063_s23 = int_to_ptr.hbm [resolvable:$true] %s11062_s23 }
  0x38   : > { %s11064_s17 = scalar_lea.hbm %s11063_s23, 15  ;;  %p11070_p9 = scmp.lt.s32.totalorder %s11063_s23, %s15317_s3 }
  0x39   : > { %p11065_p4 = scmp.ne.s32.totalorder %s11063_s23, %s11064_s17  ;;  %p11071_p10 = scmp.lt.s32.totalorder %s11069_s11, %s11064_s17 }
  0x3b   : > { %p11067_p2 = pnand %p11065_p4, %p11036_p8  ;;  %p11072_p0 = por %p11071_p10, %p11070_p9 }
  0x3d   : > { %p11068_p5 = pneg %p11067_p2 }
  0x3f   : > { %p11073_p3 = pnand %p11072_p0, %p11068_p5 }
  0x41   : > { %11076 = shalt.err (!%p11073_p3)
}
  0x42   : > { %10903 = dma.hbm_to_vmem [thread:$0]  (!%p11352_p7), %s245_s18, 240, %s247_s6, %s11364_s28  }
  0x43   : > { %s15457_s2 = smov 40   ;;  %s15458_s0 = smov 640  }
  0x44   : > { %10896 = dma.hbm_to_vmem [thread:$0]  (!%p11339_p1), %s197_s10, 4480, %s199_s27, [#allocation6], %s15458_s0, %s15458_s0, %s15457_s2  }
  0x45   : > { %s261_s23 = scalar_lea.hbm %s15318_s4, %s239_s12  ;;  %s257_s17 = scalar_lea.vmem [#allocation9], %s11382_s14 }
  0x46   : > { %s265_s15 = sshll.u32 %s257_s17, 4  ;;  %s263_s9 = sshll.u32 %s261_s23, 4  ;;  %s266_s15 = int_to_ptr.vmem [resolvable:$true] %s265_s15  ;;  %s264_s9 = int_to_ptr.hbm [resolvable:$true] %s263_s9 }
  0x47   : > { %s11122_s11 = sshra.s32 %s264_s9, 4  ;;  %s11129_s13 = scalar_lea.hbm %s15318_s4, 30  ;;  %s11123_s11 = int_to_ptr.hbm [resolvable:$true] %s11122_s11 }
  0x48   : > { %s11124_s8 = scalar_lea.hbm %s11123_s11, 15  ;;  %p11130_p1 = scmp.lt.s32.totalorder %s11123_s11, %s15318_s4 }
  0x49   : > { %p11125_p4 = scmp.ne.s32.totalorder %s11123_s11, %s11124_s8  ;;  %p11131_p9 = scmp.lt.s32.totalorder %s11129_s13, %s11124_s8 }
  0x4b   : > { %p11127_p2 = pnand %p11125_p4, %p11036_p8  ;;  %p11132_p10 = por %p11131_p9, %p11130_p1 }
  0x4d   : > { %p11128_p5 = pneg %p11127_p2 }
  0x4f   : > { %p11133_p0 = pnand %p11132_p10, %p11128_p5 }
  0x51   : > { %11136 = shalt.err (!%p11133_p0)
}
  0x52   : > { %10906 = dma.hbm_to_vmem [thread:$0]  (!%p11352_p7), %s264_s9, 240, %s266_s15, %s11364_s28  }
  0x53   : > { %274 = sbr.rel (%p11328_p13) target bundleno = 1613 (0x64d), region = 40 }
  0x58   : > { %p15459_p8 = scmp.eq.s32.totalorder %s11289_s22, 0 }
  0x5a   : > { %11197 = dma.done.wait (%p15459_p8), [#allocation3], 4480   ;;  %p15460_p3 = pmov %p15459_p8 }
  0x5c   : > { %11199 = vsyncadd (%p15460_p3), [#allocation3], 4294962816  ;;  %p15461_p4 = pmov %p15460_p3 }
  0x5d   : > { %p15462_p2 = pmov %p15460_p3 }
  0x5e   : > { %11201 = dma.done.wait (%p15461_p4), [#allocation6], 4480  }
  0x5f   : > { %11203 = vsyncadd (%p15462_p2), [#allocation6], 4294962816  ;;  %s286_s16 = sand.u32 1, %s11289_s22   ;;  %s11437_s28 = sand.u32 1, %s11218_s19  }
  0x60   : > { %s10871_s7 = smul.u32 4800, %s11437_s28  ;;  %s287_s14 = scalar_lea.sflag [#allocation3], %s286_s16 }
  0x62   : > { %s11440_s12 = scalar_lea.vmem [#allocation7], %s10871_s7 }
  0x63   : > { %11205 = dma.done.wait (%p11313_p6), %s287_s14, 77280  }
  0x64   : > { %11207 = vsyncadd (%p11313_p6), %s287_s14, 4294890016  ;;  %v8261_v0 = vld [vmem:[%s11440_s12 + $0x348] sm:$0xf]  ;;  %v10355_v1 = vld [vmem:[%s11440_s12 + $0x380] sm:$0xf0]  ;;  %s10873_s29 = smul.u32 840, %s11437_s28 }
  0x65   : > { %v8741_v2 = vld [vmem:[%s11440_s12 + $0x708] sm:$0xf]  ;;  %v8262_v3 = vor.u32 %v10355_v1, %v8261_v0  ;;  %v10475_v4 = vld [vmem:[%s11440_s12 + $0x740] sm:$0xf0]  ;;  %v8201_v9 = vld [vmem:[%s11440_s12 + $0x2d0] sm:$0xf] }
  0x66   : > { %v9221_v5 = vld [vmem:[%s11440_s12 + $0xac8] sm:$0xf]  ;;  %v10595_v6 = vld [vmem:[%s11440_s12 + $0xb00] sm:$0xf0]  ;;  %v8742_v7 = vor.u32 %v10475_v4, %v8741_v2  ;;  %v10340_v10 = vld [vmem:[%s11440_s12 + $0x308] sm:$0xf0] }
  0x67   : > { %v9222_v8 = vor.u32 %v10595_v6, %v9221_v5  ;;  %v8681_v11 = vld [vmem:[%s11440_s12 + $0x690] sm:$0xf]  ;;  %4157 = vmatpush.bf16.msra.mxu0 %v8262_v3  ;;  %10844 = vmatpush.bf16.msra.mxu3 %v8262_v3  ;;  %v8202_v12 = vor.u32 %v10340_v10, %v8201_v9  ;;  %v10460_v13 = vld [vmem:[%s11440_s12 + $0x6c8] sm:$0xf0]  ;;  %v8141_v18 = vld [vmem:[%s11440_s12 + $0x258] sm:$0xf] }
  0x68   : > { %v9161_v14 = vld [vmem:[%s11440_s12 + $0xa50] sm:$0xf]  ;;  %v10580_v15 = vld [vmem:[%s11440_s12 + $0xa88] sm:$0xf0]  ;;  %4185 = vmatpush.bf16.msra.mxu1 %v8742_v7  ;;  %v8682_v16 = vor.u32 %v10460_v13, %v8681_v11  ;;  %v10325_v19 = vld [vmem:[%s11440_s12 + $0x290] sm:$0xf0] }
  0x69   : > { %4213 = vmatpush.bf16.msra.mxu2 %v9222_v8  ;;  %v9162_v17 = vor.u32 %v10580_v15, %v9161_v14  ;;  %v8621_v20 = vld [vmem:[%s11440_s12 + $0x618] sm:$0xf]  ;;  %v10445_v21 = vld [vmem:[%s11440_s12 + $0x650] sm:$0xf0]  ;;  %v8142_v24 = vor.u32 %v10325_v19, %v8141_v18  ;;  %v8081_v27 = vld [vmem:[%s11440_s12 + $0x1e0] sm:$0xf] }
  0x6a   : > { %v9101_v22 = vld [vmem:[%s11440_s12 + $0x9d8] sm:$0xf]  ;;  %v10565_v23 = vld [vmem:[%s11440_s12 + $0xa10] sm:$0xf0]  ;;  %v8622_v25 = vor.u32 %v10445_v21, %v8621_v20  ;;  %v10310_v28 = vld [vmem:[%s11440_s12 + $0x218] sm:$0xf0] }
  0x6b   : > { %4158 = vmatpush.bf16.msra.mxu0 %v8202_v12  ;;  %10845 = vmatpush.bf16.msra.mxu3 %v8202_v12  ;;  %v9102_v26 = vor.u32 %v10565_v23, %v9101_v22  ;;  %v8561_v29 = vld [vmem:[%s11440_s12 + $0x5a0] sm:$0xf]  ;;  %v10430_v30 = vld [vmem:[%s11440_s12 + $0x5d8] sm:$0xf0]  ;;  %v8082_v33 = vor.u32 %v10310_v28, %v8081_v27  ;;  %v8021_v36 = vld [vmem:[%s11440_s12 + $0x168] sm:$0xf] }
  0x6c   : > { %4186 = vmatpush.bf16.msra.mxu1 %v8682_v16  ;;  %v9041_v31 = vld [vmem:[%s11440_s12 + $0x960] sm:$0xf]  ;;  %v10550_v32 = vld [vmem:[%s11440_s12 + $0x998] sm:$0xf0]  ;;  %v8562_v34 = vor.u32 %v10430_v30, %v8561_v29  ;;  %v10295_v37 = vld [vmem:[%s11440_s12 + $0x1a0] sm:$0xf0] }
  0x6d   : > { %4214 = vmatpush.bf16.msra.mxu2 %v9162_v17  ;;  %v9042_v35 = vor.u32 %v10550_v32, %v9041_v31  ;;  %v8501_v38 = vld [vmem:[%s11440_s12 + $0x528] sm:$0xf]  ;;  %v10415_v39 = vld [vmem:[%s11440_s12 + $0x560] sm:$0xf0]  ;;  %v8022_v42 = vor.u32 %v10295_v37, %v8021_v36  ;;  %v7961_v45 = vld [vmem:[%s11440_s12 + $0xf0] sm:$0xf] }
  0x6e   : > { %v8981_v40 = vld [vmem:[%s11440_s12 + $0x8e8] sm:$0xf]  ;;  %v10535_v41 = vld [vmem:[%s11440_s12 + $0x920] sm:$0xf0]  ;;  %v8502_v43 = vor.u32 %v10415_v39, %v8501_v38  ;;  %v10280_v46 = vld [vmem:[%s11440_s12 + $0x128] sm:$0xf0] }
  0x6f   : > { %4159 = vmatpush.bf16.msra.mxu0 %v8142_v24  ;;  %10846 = vmatpush.bf16.msra.mxu3 %v8142_v24  ;;  %v8982_v44 = vor.u32 %v10535_v41, %v8981_v40  ;;  %v8441_v47 = vld [vmem:[%s11440_s12 + $0x4b0] sm:$0xf]  ;;  %v10400_v48 = vld [vmem:[%s11440_s12 + $0x4e8] sm:$0xf0]  ;;  %v7901_v51 = vld [vmem:[%s11440_s12 + $0x78] sm:$0xf]  ;;  %v7962_v53 = vor.u32 %v10280_v46, %v7961_v45 }
  0x70   : > { %4187 = vmatpush.bf16.msra.mxu1 %v8622_v25  ;;  %v8921_v49 = vld [vmem:[%s11440_s12 + $0x870] sm:$0xf]  ;;  %v10520_v50 = vld [vmem:[%s11440_s12 + $0x8a8] sm:$0xf0]  ;;  %v10265_v52 = vld [vmem:[%s11440_s12 + $0xb0] sm:$0xf0]  ;;  %v8442_v58 = vor.u32 %v10400_v48, %v8441_v47 }
  0x71   : > { %4215 = vmatpush.bf16.msra.mxu2 %v9102_v26  ;;  %v8381_v54 = vld [vmem:[%s11440_s12 + $0x438] sm:$0xf]  ;;  %v10385_v55 = vld [vmem:[%s11440_s12 + $0x470] sm:$0xf0]  ;;  %v8922_v59 = vor.u32 %v10520_v50, %v8921_v49  ;;  %v7841_v60 = vld [vmem:[%s11440_s12] sm:$0xf]  ;;  %v7902_v8 = vor.u32 %v10265_v52, %v7901_v51 }
  0x72   : > { %v8861_v56 = vld [vmem:[%s11440_s12 + $0x7f8] sm:$0xf]  ;;  %v10505_v57 = vld [vmem:[%s11440_s12 + $0x830] sm:$0xf0]  ;;  %v10250_v61 = vld [vmem:[%s11440_s12 + $0x38] sm:$0xf0]  ;;  %v8382_v14 = vor.u32 %v10385_v55, %v8381_v54 }
  0x73   : > { %4160 = vmatpush.bf16.msra.mxu0 %v8082_v33  ;;  %10847 = vmatpush.bf16.msra.mxu3 %v8082_v33  ;;  %v352_v62 = vld [vmem:[#allocation2] sm:$0xff]  ;;  %v387_v63 = vld [vmem:[#allocation5] sm:$0xff]  ;;  %v357_v0 = vld [vmem:[#allocation2 + $0x28] sm:$0xff]  ;;  %v8862_v15 = vor.u32 %v10505_v57, %v8861_v56  ;;  %v7842_v19 = vor.u32 %v10250_v61, %v7841_v60  ;;  %s11916_s25 = scalar_lea.vmem [#allocation10], %s10873_s29  ;;  %vm6472_vm0 = vcmask 1040384   ;;  %s10872_s2 = smul.u32 15, %s11437_s28 }
  0x74   : > { %4188 = vmatpush.bf16.msra.mxu1 %v8562_v34  ;;  %v392_v1 = vld [vmem:[#allocation5 + $0x28] sm:$0xff]  ;;  %v377_v3 = vld [vmem:[#allocation2 + $0xc8] sm:$0xff]  ;;  %v407_v4 = vld [vmem:[#allocation5 + $0xa0] sm:$0xff]  ;;  %v422_v22 = vadd.f32 %v387_v63, %v352_v62  ;;  %vm7298_vm13 = vcmask 1042434   ;;  %vm7300_vm14 = vcmask 1041408   ;;  %s10843_s24 = smul.u32 120, %s11289_s22 }
  0x75   : > { %4216 = vmatpush.bf16.msra.mxu2 %v9042_v35  ;;  %v372_v2 = vld [vmem:[#allocation2 + $0xa0] sm:$0xff]  ;;  %v353_v6 = vld [vmem:[#allocation2 + $0x8] sm:$0xff]  ;;  %v358_v7 = vld [vmem:[#allocation2 + $0x30] sm:$0xff]  ;;  %v427_v24 = vadd.f32 %v392_v1, %v357_v0  ;;  %s12023_s0 = scalar_lea.vmem [#allocation8], %s10872_s2  ;;  %s13627_s26 = scalar_lea.vmem [#allocation9], %s10872_s2 }
  0x76   : > { %v412_v5 = vld [vmem:[#allocation5 + $0xc8] sm:$0xff]  ;;  %v8321_v9 = vld [vmem:[%s11440_s12 + $0x3c0] sm:$0xf]  ;;  %v10370_v10 = vld [vmem:[%s11440_s12 + $0x3f8] sm:$0xf0]  ;;  %v442_v25 = vadd.f32 %v407_v4, %v372_v2  ;;  %s7694_s15 = scalar_lea.hbm %s15319_s5, %s10843_s24  ;;  %s7695_s9 = sshll.u32 %s11916_s25, 4  ;;  %s7696_s9 = int_to_ptr.vmem [resolvable:$true] %s7695_s9 }
  0x77   : > { %4161 = vmatpush.bf16.msra.mxu0 %v8022_v42  ;;  %10848 = vmatpush.bf16.msra.mxu3 %v8022_v42  ;;  %v388_v11 = vld [vmem:[#allocation5 + $0x8] sm:$0xff]  ;;  %v393_v12 = vld [vmem:[#allocation5 + $0x30] sm:$0xff]  ;;  %v354_v13 = vld [vmem:[#allocation2 + $0x10] sm:$0xff]  ;;  %v447_v26 = vadd.f32 %v412_v5, %v377_v3  ;;  %v8322_v34 = vor.u32 %v10370_v10, %v8321_v9  ;;  %v11501_v41 = vpack.c.bf16 %v427_v24, %v422_v22  ;;  %s7697_s11 = sshll.u32 %s7694_s15, 4  ;;  %s7683_s22 = scalar_lea.sflag [#allocation4], %s11437_s28  ;;  %s7698_s11 = int_to_ptr.hbm [resolvable:$true] %s7697_s11 }
  0x78   : > { %4189 = vmatpush.bf16.msra.mxu1 %v8502_v43  ;;  %v359_v16 = vld [vmem:[#allocation2 + $0x38] sm:$0xff]  ;;  %v389_v17 = vld [vmem:[#allocation5 + $0x10] sm:$0xff]  ;;  %v394_v18 = vld [vmem:[#allocation5 + $0x38] sm:$0xff]  ;;  %v423_v27 = vadd.f32 %v388_v11, %v353_v6  ;;  %v428_v31 = vadd.f32 %v393_v12, %v358_v7  ;;  %s11166_s8 = sshra.s32 %s7698_s11, 4  ;;  %s11172_s10 = scalar_lea.hbm %s15319_s5, 1680  ;;  %s11167_s8 = int_to_ptr.hbm [resolvable:$true] %s11166_s8 }
  0x79   : > { %4217 = vmatpush.bf16.msra.mxu2 %v8982_v44  ;;  %v8801_v20 = vld [vmem:[%s11440_s12 + $0x780] sm:$0xf]  ;;  %v10490_v21 = vld [vmem:[%s11440_s12 + $0x7b8] sm:$0xf0]  ;;  %v10181_v23 = vld [vmem:[%s11440_s12 + $0x1248] sm:$0xf]  ;;  %v424_v32 = vadd.f32 %v389_v17, %v354_v13  ;;  %v429_v33 = vadd.f32 %v394_v18, %v359_v16  ;;  %v11503_v42 = vpack.c.bf16 %v447_v26, %v442_v25  ;;  %p11173_p5 = scmp.lt.s32.totalorder %s11167_s8, %s15319_s5 }
  0x7a   : > { %v10835_v28 = vld [vmem:[%s11440_s12 + $0x1280] sm:$0xf0]  ;;  %v9701_v29 = vld [vmem:[%s11440_s12 + $0xe88] sm:$0xf]  ;;  %v8802_v35 = vor.u32 %v10490_v21, %v8801_v20  ;;  %v10121_v38 = vld [vmem:[%s11440_s12 + $0x11d0] sm:$0xf]  ;;  %v11508_v46 = vpack.c.bf16 %v428_v31, %v423_v27 }
  0x7b   : > { %4162 = vmatpush.bf16.msra.mxu0 %v7962_v53  ;;  %10849 = vmatpush.bf16.msra.mxu3 %v7962_v53  ;;  %v10715_v30 = vld [vmem:[%s11440_s12 + $0xec0] sm:$0xf0]  ;;  %v10182_v36 = vor.u32 %v10835_v28, %v10181_v23  ;;  %v10468_v39 = vld [vmem:[%s11440_s12 + $0x70c] sm:$0xf]  ;;  %v8743_v40 = vld [vmem:[%s11440_s12 + $0x744] sm:$0xf0]  ;;  %v11510_v47 = vpack.c.bf16 %v429_v33, %v424_v32 }
  0x7c   : > { %4190 = vmatpush.bf16.msra.mxu1 %v8442_v58  ;;  %v9702_v37 = vor.u32 %v10715_v30, %v9701_v29  ;;  %15463 = vst [vmem:[#allocation19_spill] sm:$0xff] %v11501_v41  ;;  %v10820_v43 = vld [vmem:[%s11440_s12 + $0x1208] sm:$0xf0]  ;;  %v9641_v44 = vld [vmem:[%s11440_s12 + $0xe10] sm:$0xf]  ;;  %v8746_v48 = vor.u32 %v10468_v39, %v8743_v40  ;;  %v362_v3 = vld [vmem:[#allocation2 + $0x50] sm:$0xff] }
  0x7d   : > { %4218 = vmatpush.bf16.msra.mxu2 %v8922_v59  ;;  %15464 = vst [vmem:[#allocation20_spill] sm:$0xff] %v11503_v42  ;;  %v10700_v45 = vld [vmem:[%s11440_s12 + $0xe48] sm:$0xf0]  ;;  %v10061_v49 = vld [vmem:[%s11440_s12 + $0x1158] sm:$0xf]  ;;  %v10122_v51 = vor.u32 %v10820_v43, %v10121_v38  ;;  %v402_v6 = vld [vmem:[#allocation5 + $0x78] sm:$0xff] }
  0x7e   : > { %15465 = vst [vmem:[#allocation21_spill] sm:$0xff] %v11508_v46  ;;  %v10805_v50 = vld [vmem:[%s11440_s12 + $0x1190] sm:$0xf0]  ;;  %v9642_v52 = vor.u32 %v10700_v45, %v9641_v44  ;;  %v9581_v53 = vld [vmem:[%s11440_s12 + $0xd98] sm:$0xf]  ;;  %v367_v4 = vld [vmem:[#allocation2 + $0x78] sm:$0xff] }
  0x7f   : > { %4163 = vmatpush.bf16.msra.mxu0 %v7902_v8  ;;  %10850 = vmatpush.bf16.msra.mxu3 %v7902_v8  ;;  %15466 = vst [vmem:[#allocation22_spill] sm:$0xff] %v11510_v47  ;;  %v10453_v54 = vld [vmem:[%s11440_s12 + $0x694] sm:$0xf]  ;;  %v8683_v55 = vld [vmem:[%s11440_s12 + $0x6cc] sm:$0xf0]  ;;  %v10062_v1 = vor.u32 %v10805_v50, %v10061_v49  ;;  %v397_v5 = vld [vmem:[#allocation5 + $0x50] sm:$0xff]  ;;  %v437_v29 = vadd.f32 %v402_v6, %v367_v4 }
  0x80   : > { %4191 = vmatpush.bf16.msra.mxu1 %v8382_v14  ;;  %v10685_v56 = vld [vmem:[%s11440_s12 + $0xdd0] sm:$0xf0]  ;;  %v10348_v57 = vld [vmem:[%s11440_s12 + $0x34c] sm:$0xf]  ;;  %v8263_v58 = vld [vmem:[%s11440_s12 + $0x384] sm:$0xf0]  ;;  %v8686_v62 = vor.u32 %v10453_v54, %v8683_v55  ;;  %v432_v28 = vadd.f32 %v397_v5, %v362_v3 }
  0x81   : > { %4219 = vmatpush.bf16.msra.mxu2 %v8862_v15  ;;  %v8266_v59 = vor.u32 %v10348_v57, %v8263_v58  ;;  %v10001_v60 = vld [vmem:[%s11440_s12 + $0x10e0] sm:$0xf]  ;;  %v10790_v61 = vld [vmem:[%s11440_s12 + $0x1118] sm:$0xf0]  ;;  %v9582_v2 = vor.u32 %v10685_v56, %v9581_v53  ;;  %v417_v8 = vld [vmem:[#allocation5 + $0xf0] sm:$0x1] }
  0x82   : > { %v9521_v63 = vld [vmem:[%s11440_s12 + $0xd20] sm:$0xf]  ;;  %v10670_v0 = vld [vmem:[%s11440_s12 + $0xd58] sm:$0xf0]  ;;  %v8623_v10 = vld [vmem:[%s11440_s12 + $0x654] sm:$0xf0]  ;;  %v10002_v23 = vor.u32 %v10790_v61, %v10001_v60  ;;  %v11540_v45 = vpack.c.bf16 %v437_v29, %v432_v28 }
  0x83   : > { %4164 = vmatpush.bf16.msra.mxu0 %v7842_v19  ;;  %10851 = vmatpush.bf16.msra.mxu3 %v7842_v19  ;;  %v382_v7 = vld [vmem:[#allocation2 + $0xf0] sm:$0x1]  ;;  %v10438_v9 = vld [vmem:[%s11440_s12 + $0x61c] sm:$0xf]  ;;  %v363_v11 = vld [vmem:[#allocation2 + $0x58] sm:$0xff]  ;;  %v9522_v24 = vor.u32 %v10670_v0, %v9521_v63  ;;  %s11168_s18 = scalar_lea.hbm %s11167_s8, 840 }
  0x84   : > { %4192 = vmatpush.bf16.msra.mxu1 %v8322_v34  ;;  %v368_v12 = vld [vmem:[#allocation2 + $0x80] sm:$0xff]  ;;  %v398_v15 = vld [vmem:[#allocation5 + $0x58] sm:$0xff]  ;;  %v403_v16 = vld [vmem:[#allocation5 + $0x80] sm:$0xff]  ;;  %v8626_v22 = vor.u32 %v10438_v9, %v8623_v10  ;;  %v452_v30 = vadd.f32 %v417_v8, %v382_v7  ;;  %15467 = vst [vmem:[#allocation23_spill] sm:$0xff] %v11540_v45  ;;  %p11169_p6 = scmp.ne.s32.totalorder %s11167_s8, %s11168_s18  ;;  %p11174_p1 = scmp.lt.s32.totalorder %s11172_s10, %s11168_s18 }
  0x85   : > { %4220 = vmatpush.bf16.msra.mxu2 %v8802_v35  ;;  %v10333_v13 = vld [vmem:[%s11440_s12 + $0x2d4] sm:$0xf]  ;;  %v8203_v14 = vld [vmem:[%s11440_s12 + $0x30c] sm:$0xf0]  ;;  %v369_v19 = vld [vmem:[#allocation2 + $0x88] sm:$0xff]  ;;  %v433_v34 = vadd.f32 %v398_v15, %v363_v11  ;;  %v438_v35 = vadd.f32 %v403_v16, %v368_v12 }
  0x86   : > { %4165 = vmatmul.bf16.vlgmr.msra.gmra.mxu0 %v11501_v41  ;;  %4175 = vmatmul.bf16.vlgmr.msra.gmra.mxu3 %v11503_v42  ;;  %v364_v17 = vld [vmem:[#allocation2 + $0x60] sm:$0xff]  ;;  %v8206_v18 = vor.u32 %v10333_v13, %v8203_v14  ;;  %v399_v20 = vld [vmem:[#allocation5 + $0x60] sm:$0xff]  ;;  %v10423_v26 = vld [vmem:[%s11440_s12 + $0x5a4] sm:$0xf]  ;;  %p11170_p13 = pnand %p11169_p6, %p11320_p11  ;;  %p11175_p9 = por %p11174_p1, %p11173_p5 }
  0x87   : > { %4269 = vmatpush.bf16.msrb.mxu0 %v10182_v36  ;;  %4241 = vmatpush.bf16.msrb.mxu3 %v9702_v37  ;;  %v404_v21 = vld [vmem:[#allocation5 + $0x88] sm:$0xff]  ;;  %v9941_v25 = vld [vmem:[%s11440_s12 + $0x1068] sm:$0xf]  ;;  %v8563_v27 = vld [vmem:[%s11440_s12 + $0x5dc] sm:$0xf0]  ;;  %v434_v36 = vadd.f32 %v399_v20, %v364_v17 }
  0x88   : > { %4193 = vmatmul.bf16.vlgmr.msra.gmra.mxu1 %v11508_v46  ;;  %4221 = vmatmul.bf16.vlgmr.msra.gmra.mxu2 %v11510_v47  ;;  %v10775_v31 = vld [vmem:[%s11440_s12 + $0x10a0] sm:$0xf0]  ;;  %v9461_v32 = vld [vmem:[%s11440_s12 + $0xca8] sm:$0xf]  ;;  %v439_v37 = vadd.f32 %v404_v21, %v369_v19  ;;  %v8566_v38 = vor.u32 %v10423_v26, %v8563_v27  ;;  %v9881_v43 = vld [vmem:[%s11440_s12 + $0xff0] sm:$0xf]  ;;  %p11171_p7 = pneg %p11170_p13 }
  0x89   : > { %4325 = vmatpush.bf16.msrb.mxu2 %v8746_v48  ;;  %4297 = vmatpush.bf16.msrb.mxu1 %v8266_v59  ;;  %v10655_v33 = vld [vmem:[%s11440_s12 + $0xce0] sm:$0xf0]  ;;  %v9942_v39 = vor.u32 %v10775_v31, %v9941_v25  ;;  %v10760_v44 = vld [vmem:[%s11440_s12 + $0x1028] sm:$0xf0]  ;;  %v11542_v48 = vpack.c.bf16 %v452_v30, %v452_v30  ;;  %v9401_v49 = vld [vmem:[%s11440_s12 + $0xc30] sm:$0xf] }
  0x8a   : > { %v9462_v40 = vor.u32 %v10655_v33, %v9461_v32  ;;  %v10640_v50 = vld [vmem:[%s11440_s12 + $0xc68] sm:$0xf0]  ;;  %v11549_v53 = vpack.c.bf16 %v439_v37, %v434_v36  ;;  %v8143_v54 = vld [vmem:[%s11440_s12 + $0x294] sm:$0xf0]  ;;  %v8503_v56 = vld [vmem:[%s11440_s12 + $0x564] sm:$0xf0]  ;;  %v9882_v61 = vor.u32 %v10760_v44, %v9881_v43  ;;  %p11176_p10 = pnand %p11175_p9, %p11171_p7 }
  0x8b   : > { %4270 = vmatpush.bf16.msrb.mxu0 %v10122_v51  ;;  %4242 = vmatpush.bf16.msrb.mxu3 %v9642_v52  ;;  %15468 = vst [vmem:[#allocation24_spill] sm:$0xff] %v11542_v48  ;;  %v10318_v51 = vld [vmem:[%s11440_s12 + $0x25c] sm:$0xf]  ;;  %v11547_v52 = vpack.c.bf16 %v438_v35, %v433_v34  ;;  %v10408_v55 = vld [vmem:[%s11440_s12 + $0x52c] sm:$0xf]  ;;  %v360_v10 = vld [vmem:[#allocation2 + $0x40] sm:$0xff] }
  0x8c   : > { %15470 = vst [vmem:[#allocation26_spill] sm:$0xff] %v11549_v53  ;;  %v9821_v57 = vld [vmem:[%s11440_s12 + $0xf78] sm:$0xf]  ;;  %v8146_v58 = vor.u32 %v10318_v51, %v8143_v54  ;;  %v8506_v59 = vor.u32 %v10408_v55, %v8503_v56  ;;  %v10303_v60 = vld [vmem:[%s11440_s12 + $0x1e4] sm:$0xf]  ;;  %v355_v9 = vld [vmem:[#allocation2 + $0x18] sm:$0xff] }
  0x8d   : > { %4326 = vmatpush.bf16.msrb.mxu2 %v8686_v62  ;;  %4298 = vmatpush.bf16.msrb.mxu1 %v8206_v18  ;;  %15469 = vst [vmem:[#allocation25_spill] sm:$0xff] %v11547_v52  ;;  %v9402_v62 = vor.u32 %v10640_v50, %v9401_v49  ;;  %v8083_v63 = vld [vmem:[%s11440_s12 + $0x21c] sm:$0xf0]  ;;  %v10393_v0 = vld [vmem:[%s11440_s12 + $0x4b4] sm:$0xf]  ;;  %v395_v12 = vld [vmem:[#allocation5 + $0x40] sm:$0xff] }
  0x8e   : > { %v9341_v3 = vld [vmem:[%s11440_s12 + $0xbb8] sm:$0xf]  ;;  %v10625_v4 = vld [vmem:[%s11440_s12 + $0xbf0] sm:$0xf0]  ;;  %v11567_v5 = vld [vmem:[%s11440_s12 + $0xf00] sm:$0xf]  ;;  %v8086_v13 = vor.u32 %v10303_v60, %v8083_v63  ;;  %v430_v43 = vadd.f32 %v395_v12, %v360_v10 }
  0x8f   : > { %4271 = vmatpush.bf16.msrb.mxu0 %v10062_v1  ;;  %4243 = vmatpush.bf16.msrb.mxu3 %v9582_v2  ;;  %v8443_v1 = vld [vmem:[%s11440_s12 + $0x4ec] sm:$0xf0]  ;;  %v10745_v2 = vld [vmem:[%s11440_s12 + $0xfb0] sm:$0xf0]  ;;  %v10730_v6 = vld [vmem:[%s11440_s12 + $0xf38] sm:$0xf0]  ;;  %v9342_v16 = vor.u32 %v10625_v4, %v9341_v3 }
  0x90   : > { %v9281_v7 = vld [vmem:[%s11440_s12 + $0xb40] sm:$0xf]  ;;  %v10610_v8 = vld [vmem:[%s11440_s12 + $0xb78] sm:$0xf0]  ;;  %v8446_v14 = vor.u32 %v10393_v0, %v8443_v1  ;;  %v9822_v15 = vor.u32 %v10745_v2, %v9821_v57  ;;  %v356_v17 = vld [vmem:[#allocation2 + $0x20] sm:$0xff]  ;;  %v9762_v34 = vor.u32 %v10730_v6, %v11567_v5 }
  0x91   : > { %4327 = vmatpush.bf16.msrb.mxu2 %v8626_v22  ;;  %v390_v11 = vld [vmem:[#allocation5 + $0x18] sm:$0xff]  ;;  %4299 = vmatpush.bf16.msrb.mxu1 %v8146_v58  ;;  %v361_v18 = vld [vmem:[#allocation2 + $0x48] sm:$0xff]  ;;  %v391_v19 = vld [vmem:[#allocation5 + $0x20] sm:$0xff]  ;;  %v9282_v35 = vor.u32 %v10610_v8, %v9281_v7 }
  0x92   : > { %v396_v20 = vld [vmem:[#allocation5 + $0x48] sm:$0xff]  ;;  %v373_v21 = vld [vmem:[#allocation2 + $0xa8] sm:$0xff]  ;;  %v378_v22 = vld [vmem:[#allocation2 + $0xd0] sm:$0xff]  ;;  %v426_v51 = vadd.f32 %v391_v19, %v356_v17 }
  0x93   : > { %4272 = vmatpush.bf16.msrb.mxu0 %v10002_v23  ;;  %4244 = vmatpush.bf16.msrb.mxu3 %v9522_v24  ;;  %v408_v23 = vld [vmem:[#allocation5 + $0xa8] sm:$0xff]  ;;  %v413_v24 = vld [vmem:[#allocation5 + $0xd0] sm:$0xff]  ;;  %v374_v25 = vld [vmem:[#allocation2 + $0xb0] sm:$0xff]  ;;  %v431_v54 = vadd.f32 %v396_v20, %v361_v18 }
  0x94   : > { %v379_v26 = vld [vmem:[#allocation2 + $0xd8] sm:$0xff]  ;;  %v409_v27 = vld [vmem:[#allocation5 + $0xb0] sm:$0xff]  ;;  %v414_v36 = vld [vmem:[#allocation5 + $0xd8] sm:$0xff]  ;;  %v443_v57 = vadd.f32 %v408_v23, %v373_v21  ;;  %v448_v58 = vadd.f32 %v413_v24, %v378_v22 }
  0x95   : > { %4328 = vmatpush.bf16.msrb.mxu2 %v8566_v38  ;;  %v10708_v28 = vld [vmem:[%s11440_s12 + $0xe8c] sm:$0xf]  ;;  %v9703_v29 = vld [vmem:[%s11440_s12 + $0xec4] sm:$0xf0]  ;;  %4300 = vmatpush.bf16.msrb.mxu1 %v8086_v13  ;;  %v10378_v38 = vld [vmem:[%s11440_s12 + $0x43c] sm:$0xf]  ;;  %v449_v60 = vadd.f32 %v414_v36, %v379_v26  ;;  %v11591_v6 = vpack.c.bf16 %v431_v54, %v426_v51 }
  0x96   : > { %4170 = vmatmul.bf16.gmra.mxu0 %v11540_v45  ;;  %4180 = vmatmul.bf16.gmra.mxu3 %v11542_v48  ;;  %v10588_v30 = vld [vmem:[%s11440_s12 + $0xacc] sm:$0xf]  ;;  %v9223_v31 = vld [vmem:[%s11440_s12 + $0xb04] sm:$0xf0]  ;;  %v10273_v49 = vld [vmem:[%s11440_s12 + $0xf4] sm:$0xf]  ;;  %v9706_v55 = vor.u32 %v10708_v28, %v9703_v29 }
  0x97   : > { %4273 = vmatpush.bf16.msrb.mxu0 %v9942_v39  ;;  %4245 = vmatpush.bf16.msrb.mxu3 %v9462_v40  ;;  %v10288_v32 = vld [vmem:[%s11440_s12 + $0x16c] sm:$0xf]  ;;  %v8023_v33 = vld [vmem:[%s11440_s12 + $0x1a4] sm:$0xf0]  ;;  %v8383_v39 = vld [vmem:[%s11440_s12 + $0x474] sm:$0xf0]  ;;  %v425_v40 = vadd.f32 %v390_v11, %v355_v9  ;;  %v9226_v56 = vor.u32 %v10588_v30, %v9223_v31  ;;  %v11595_v9 = vpack.c.bf16 %v448_v58, %v443_v57 }
  0x98   : > { %4198 = vmatmul.bf16.gmra.mxu1 %v11547_v52  ;;  %4226 = vmatmul.bf16.gmra.mxu2 %v11549_v53  ;;  %v8026_v37 = vor.u32 %v10288_v32, %v8023_v33  ;;  %v8386_v44 = vor.u32 %v10378_v38, %v8383_v39  ;;  %v7963_v50 = vld [vmem:[%s11440_s12 + $0x12c] sm:$0xf0]  ;;  %v10693_v63 = vld [vmem:[%s11440_s12 + $0xe14] sm:$0xf]  ;;  %15472 = vst [vmem:[#allocation28_spill] sm:$0xff] %v11591_v6  ;;  %v365_v26 = vld [vmem:[#allocation2 + $0x68] sm:$0xff] }
  0x99   : > { %4329 = vmatpush.bf16.msrb.mxu2 %v8506_v59  ;;  %v444_v59 = vadd.f32 %v409_v27, %v374_v25  ;;  %v7966_v0 = vor.u32 %v10273_v49, %v7963_v50  ;;  %v9643_v2 = vld [vmem:[%s11440_s12 + $0xe4c] sm:$0xf0]  ;;  %v10573_v3 = vld [vmem:[%s11440_s12 + $0xa54] sm:$0xf]  ;;  %v11589_v5 = vpack.c.bf16 %v430_v43, %v425_v40  ;;  %v10258_v7 = vld [vmem:[%s11440_s12 + $0x7c] sm:$0xf] }
  0x9a   : > { %4301 = vmatpush.bf16.msrb.mxu1 %v8026_v37  ;;  %v9163_v4 = vld [vmem:[%s11440_s12 + $0xa8c] sm:$0xf0]  ;;  %v7903_v8 = vld [vmem:[%s11440_s12 + $0xb4] sm:$0xf0]  ;;  %15473 = vst [vmem:[#allocation29_spill] sm:$0xff] %v11595_v9  ;;  %v9646_v11 = vor.u32 %v10693_v63, %v9643_v2  ;;  %v370_v27 = vld [vmem:[#allocation2 + $0x90] sm:$0xff] }
  0x9b   : > { %4274 = vmatpush.bf16.msrb.mxu0 %v9882_v61  ;;  %4246 = vmatpush.bf16.msrb.mxu3 %v9402_v62  ;;  %v10363_v61 = vld [vmem:[%s11440_s12 + $0x3c4] sm:$0xf]  ;;  %v8323_v62 = vld [vmem:[%s11440_s12 + $0x3fc] sm:$0xf0]  ;;  %15471 = vst [vmem:[#allocation27_spill] sm:$0xff] %v11589_v5  ;;  %v11597_v10 = vpack.c.bf16 %v449_v60, %v444_v59  ;;  %v9166_v13 = vor.u32 %v10573_v3, %v9163_v4  ;;  %v400_v28 = vld [vmem:[#allocation5 + $0x68] sm:$0xff] }
  0x9c   : > { %v8326_v1 = vor.u32 %v10363_v61, %v8323_v62  ;;  %v10678_v12 = vld [vmem:[%s11440_s12 + $0xd9c] sm:$0xf]  ;;  %v9103_v17 = vld [vmem:[%s11440_s12 + $0xa14] sm:$0xf0]  ;;  %v10243_v18 = vld [vmem:[%s11440_s12 + $0x4] sm:$0xf]  ;;  %v435_v59 = vadd.f32 %v400_v28, %v365_v26 }
  0x9d   : > { %4330 = vmatpush.bf16.msrb.mxu2 %v8446_v14  ;;  %15474 = vst [vmem:[#allocation30_spill] sm:$0xff] %v11597_v10  ;;  %v9583_v14 = vld [vmem:[%s11440_s12 + $0xdd4] sm:$0xf0]  ;;  %v7843_v19 = vld [vmem:[%s11440_s12 + $0x3c] sm:$0xf0]  ;;  %v371_v39 = vld [vmem:[#allocation2 + $0x98] sm:$0xff] }
  0x9e   : > { %4302 = vmatpush.bf16.msrb.mxu1 %v7966_v0  ;;  %v8269_v20 = vld [vmem:[%s11440_s12 + $0x350] sm:$0xf]  ;;  %v9586_v21 = vor.u32 %v10678_v12, %v9583_v14  ;;  %v10663_v22 = vld [vmem:[%s11440_s12 + $0xd24] sm:$0xf]  ;;  %v9523_v23 = vld [vmem:[%s11440_s12 + $0xd5c] sm:$0xf0]  ;;  %v7846_v29 = vor.u32 %v10243_v18, %v7843_v19 }
  0x9f   : > { %4275 = vmatpush.bf16.msrb.mxu0 %v9822_v15  ;;  %4247 = vmatpush.bf16.msrb.mxu3 %v9342_v16  ;;  %v7906_v15 = vor.u32 %v10258_v7, %v7903_v8  ;;  %v10558_v16 = vld [vmem:[%s11440_s12 + $0x9dc] sm:$0xf]  ;;  %v10356_v25 = vld [vmem:[%s11440_s12 + $0x388] sm:$0xf0]  ;;  %v10543_v31 = vld [vmem:[%s11440_s12 + $0x964] sm:$0xf]  ;;  %v9526_v51 = vor.u32 %v10663_v22, %v9523_v23 }
  0xa0   : > { %v9106_v24 = vor.u32 %v10558_v16, %v9103_v17  ;;  %v8270_v30 = vor.u32 %v10356_v25, %v8269_v20  ;;  %v9043_v32 = vld [vmem:[%s11440_s12 + $0x99c] sm:$0xf0]  ;;  %v8209_v33 = vld [vmem:[%s11440_s12 + $0x2d8] sm:$0xf]  ;;  %v10341_v38 = vld [vmem:[%s11440_s12 + $0x310] sm:$0xf0] }
  0xa1   : > { %4331 = vmatpush.bf16.msrb.mxu2 %v8386_v44  ;;  %v405_v36 = vld [vmem:[#allocation5 + $0x90] sm:$0xff]  ;;  %v366_v37 = vld [vmem:[#allocation2 + $0x70] sm:$0xff]  ;;  %v8210_v44 = vor.u32 %v10341_v38, %v8209_v33  ;;  %v384_v49 = vld [vmem:[#allocation2 + $0x100] sm:$0x1] }
  0xa2   : > { %4303 = vmatpush.bf16.msrb.mxu1 %v7906_v15  ;;  %v401_v40 = vld [vmem:[#allocation5 + $0x70] sm:$0xff]  ;;  %v406_v43 = vld [vmem:[#allocation5 + $0x98] sm:$0xff]  ;;  %v419_v50 = vld [vmem:[#allocation5 + $0x100] sm:$0x1]  ;;  %v440_v60 = vadd.f32 %v405_v36, %v370_v27 }
  0xa3   : > { %4276 = vmatpush.bf16.msrb.mxu0 %v9762_v34  ;;  %4248 = vmatpush.bf16.msrb.mxu3 %v9282_v35  ;;  %v383_v34 = vld [vmem:[#allocation2 + $0xf8] sm:$0x1]  ;;  %v418_v35 = vld [vmem:[#allocation5 + $0xf8] sm:$0x1]  ;;  %v10648_v54 = vld [vmem:[%s11440_s12 + $0xcac] sm:$0xf]  ;;  %v436_v61 = vadd.f32 %v401_v40, %v366_v37  ;;  %v441_v62 = vadd.f32 %v406_v43, %v371_v39  ;;  %v454_v0 = vadd.f32 %v419_v50, %v384_v49 }
  0xa4   : > { %v10528_v57 = vld [vmem:[%s11440_s12 + $0x8ec] sm:$0xf]  ;;  %v8983_v58 = vld [vmem:[%s11440_s12 + $0x924] sm:$0xf0]  ;;  %v453_v63 = vadd.f32 %v418_v35, %v383_v34  ;;  %v10633_v3 = vld [vmem:[%s11440_s12 + $0xc34] sm:$0xf]  ;;  %v11623_v7 = vpack.c.bf16 %v440_v60, %v435_v59 }
  0xa5   : > { %4332 = vmatpush.bf16.msrb.mxu2 %v8326_v1  ;;  %v8986_v2 = vor.u32 %v10528_v57, %v8983_v58  ;;  %v9403_v4 = vld [vmem:[%s11440_s12 + $0xc6c] sm:$0xf0]  ;;  %v11625_v8 = vpack.c.bf16 %v441_v62, %v436_v61  ;;  %v11629_v12 = vpack.c.bf16 %v454_v0, %v454_v0  ;;  %v10618_v14 = vld [vmem:[%s11440_s12 + $0xbbc] sm:$0xf]  ;;  %v9343_v15 = vld [vmem:[%s11440_s12 + $0xbf4] sm:$0xf0] }
  0xa6   : > { %4249 = vmatmul.bf16.vlgmr.msrb.gmra.mxu3 %v11589_v5  ;;  %4277 = vmatmul.bf16.vlgmr.msrb.gmra.mxu0 %v11591_v6  ;;  %15475 = vst [vmem:[#allocation31_spill] sm:$0xff] %v11623_v7  ;;  %v10828_v16 = vld [vmem:[%s11440_s12 + $0x124c] sm:$0xf]  ;;  %v9346_v17 = vor.u32 %v10618_v14, %v9343_v15  ;;  %v10183_v18 = vld [vmem:[%s11440_s12 + $0x1284] sm:$0xf0]  ;;  %v380_v22 = vld [vmem:[#allocation2 + $0xe0] sm:$0xff] }
  0xa7   : > { %4381 = vmatpush.bf16.msra.mxu0 %v9706_v55  ;;  %4353 = vmatpush.bf16.msra.mxu3 %v9226_v56  ;;  %v9046_v55 = vor.u32 %v10543_v31, %v9043_v32  ;;  %v9463_v56 = vld [vmem:[%s11440_s12 + $0xce4] sm:$0xf0]  ;;  %15476 = vst [vmem:[#allocation32_spill] sm:$0xff] %v11625_v8  ;;  %v8149_v19 = vld [vmem:[%s11440_s12 + $0x260] sm:$0xf]  ;;  %v376_v25 = vld [vmem:[#allocation2 + $0xc0] sm:$0xff] }
  0xa8   : > { %4203 = vmatmul.bf16.gmra.mxu1 %v11595_v9  ;;  %4231 = vmatmul.bf16.gmra.mxu2 %v11597_v10  ;;  %v9466_v1 = vor.u32 %v10648_v54, %v9463_v56  ;;  %15478 = vst [vmem:[#allocation34_spill] sm:$0xff] %v11629_v12  ;;  %v10326_v20 = vld [vmem:[%s11440_s12 + $0x298] sm:$0xf0]  ;;  %v410_v23 = vld [vmem:[#allocation5 + $0xb8] sm:$0xff]  ;;  %v411_v27 = vld [vmem:[#allocation5 + $0xc0] sm:$0xff] }
  0xa9   : > { %4437 = vmatpush.bf16.msra.mxu2 %v8270_v30  ;;  %4304 = vmatpush.bf16.msrb.mxu1 %v7846_v29  ;;  %v381_v26 = vld [vmem:[#allocation2 + $0xe8] sm:$0xff]  ;;  %v416_v28 = vld [vmem:[#allocation5 + $0xe8] sm:$0xff]  ;;  %v10186_v29 = vor.u32 %v10828_v16, %v10183_v18  ;;  %v8150_v30 = vor.u32 %v10326_v20, %v8149_v19  ;;  %v10603_v33 = vld [vmem:[%s11440_s12 + $0xb44] sm:$0xf]  ;;  %v446_v58 = vadd.f32 %v411_v27, %v376_v25 }
  0xaa   : > { %v10513_v31 = vld [vmem:[%s11440_s12 + $0x874] sm:$0xf]  ;;  %v8923_v32 = vld [vmem:[%s11440_s12 + $0x8ac] sm:$0xf0]  ;;  %v9283_v35 = vld [vmem:[%s11440_s12 + $0xb7c] sm:$0xf0]  ;;  %v451_v59 = vadd.f32 %v416_v28, %v381_v26 }
  0xab   : > { %4382 = vmatpush.bf16.msra.mxu0 %v9646_v11  ;;  %4354 = vmatpush.bf16.msra.mxu3 %v9166_v13  ;;  %v11627_v11 = vpack.c.bf16 %v453_v63, %v453_v63  ;;  %v9406_v13 = vor.u32 %v10633_v3, %v9403_v4  ;;  %v8926_v34 = vor.u32 %v10513_v31, %v8923_v32  ;;  %v10498_v36 = vld [vmem:[%s11440_s12 + $0x7fc] sm:$0xf]  ;;  %v8863_v37 = vld [vmem:[%s11440_s12 + $0x834] sm:$0xf0]  ;;  %v10813_v38 = vld [vmem:[%s11440_s12 + $0x11d4] sm:$0xf] }
  0xac   : > { %v10123_v39 = vld [vmem:[%s11440_s12 + $0x120c] sm:$0xf0]  ;;  %v8089_v40 = vld [vmem:[%s11440_s12 + $0x1e8] sm:$0xf]  ;;  %v9286_v43 = vor.u32 %v10603_v33, %v9283_v35  ;;  %v10311_v50 = vld [vmem:[%s11440_s12 + $0x220] sm:$0xf0]  ;;  %v11655_v62 = vpack.c.bf16 %v451_v59, %v446_v58 }
  0xad   : > { %4438 = vmatpush.bf16.msra.mxu2 %v8210_v44  ;;  %15477 = vst [vmem:[#allocation33_spill] sm:$0xff] %v11627_v11  ;;  %4409 = vmatpush.bf16.msra.mxu1 %v10186_v29  ;;  %v8866_v44 = vor.u32 %v10498_v36, %v8863_v37  ;;  %v10126_v49 = vor.u32 %v10813_v38, %v10123_v39  ;;  %v10483_v54 = vld [vmem:[%s11440_s12 + $0x784] sm:$0xf]  ;;  %v9229_v63 = vld [vmem:[%s11440_s12 + $0xad0] sm:$0xf] }
  0xae   : > { %15480 = vst [vmem:[#allocation36_spill] sm:$0xff] %v11655_v62  ;;  %v10596_v0 = vld [vmem:[%s11440_s12 + $0xb08] sm:$0xf0]  ;;  %v10063_v3 = vld [vmem:[%s11440_s12 + $0x1194] sm:$0xf0] }
  0xaf   : > { %4383 = vmatpush.bf16.msra.mxu0 %v9586_v21  ;;  %4355 = vmatpush.bf16.msra.mxu3 %v9106_v24  ;;  %v375_v21 = vld [vmem:[#allocation2 + $0xb8] sm:$0xff]  ;;  %v8029_v4 = vld [vmem:[%s11440_s12 + $0x170] sm:$0xf]  ;;  %v385_v14 = vld [vmem:[#allocation2 + $0x108] sm:$0x1] }
  0xb0   : > { %v415_v24 = vld [vmem:[#allocation5 + $0xe0] sm:$0xff]  ;;  %v445_v56 = vadd.f32 %v410_v23, %v375_v21  ;;  %v420_v15 = vld [vmem:[#allocation5 + $0x108] sm:$0x1]  ;;  %v386_v16 = vld [vmem:[#allocation2 + $0x110] sm:$0x1] }
  0xb1   : > { %4439 = vmatpush.bf16.msra.mxu2 %v8150_v30  ;;  %v450_v57 = vadd.f32 %v415_v24, %v380_v22  ;;  %4410 = vmatpush.bf16.msra.mxu1 %v10126_v49  ;;  %v9169_v19 = vld [vmem:[%s11440_s12 + $0xa58] sm:$0xf]  ;;  %v10581_v20 = vld [vmem:[%s11440_s12 + $0xa90] sm:$0xf0]  ;;  %v10783_v21 = vld [vmem:[%s11440_s12 + $0x10e4] sm:$0xf]  ;;  %v455_v32 = vadd.f32 %v420_v15, %v385_v14 }
  0xb2   : > { %v9170_v22 = vor.u32 %v10581_v20, %v9169_v19  ;;  %v10003_v23 = vld [vmem:[%s11440_s12 + $0x111c] sm:$0xf0]  ;;  %v7969_v24 = vld [vmem:[%s11440_s12 + $0xf8] sm:$0xf]  ;;  %v10281_v25 = vld [vmem:[%s11440_s12 + $0x130] sm:$0xf0] }
  0xb3   : > { %4384 = vmatpush.bf16.msra.mxu0 %v9526_v51  ;;  %4356 = vmatpush.bf16.msra.mxu3 %v9046_v55  ;;  %v8090_v51 = vor.u32 %v10311_v50, %v8089_v40  ;;  %v8803_v55 = vld [vmem:[%s11440_s12 + $0x7bc] sm:$0xf0]  ;;  %v11653_v61 = vpack.c.bf16 %v450_v57, %v445_v56  ;;  %v421_v26 = vld [vmem:[#allocation5 + $0x110] sm:$0x1]  ;;  %v10006_v27 = vor.u32 %v10783_v21, %v10003_v23  ;;  %v8749_v29 = vld [vmem:[%s11440_s12 + $0x710] sm:$0xf] }
  0xb4   : > { %v8806_v60 = vor.u32 %v10483_v54, %v8803_v55  ;;  %v7970_v28 = vor.u32 %v10281_v25, %v7969_v24  ;;  %v10476_v30 = vld [vmem:[%s11440_s12 + $0x748] sm:$0xf0]  ;;  %v456_v33 = vadd.f32 %v421_v26, %v386_v16  ;;  %v9943_v37 = vld [vmem:[%s11440_s12 + $0x10a4] sm:$0xf0]  ;;  %v9109_v39 = vld [vmem:[%s11440_s12 + $0x9e0] sm:$0xf] }
  0xb5   : > { %4440 = vmatpush.bf16.msra.mxu2 %v8090_v51  ;;  %15479 = vst [vmem:[#allocation35_spill] sm:$0xff] %v11653_v61  ;;  %v8750_v31 = vor.u32 %v10476_v30, %v8749_v29  ;;  %v10768_v36 = vld [vmem:[%s11440_s12 + $0x106c] sm:$0xf]  ;;  %v10566_v40 = vld [vmem:[%s11440_s12 + $0xa18] sm:$0xf0] }
  0xb6   : > { %4254 = vmatmul.bf16.gmra.mxu3 %v11623_v7  ;;  %4282 = vmatmul.bf16.gmra.mxu0 %v11625_v8  ;;  %v11677_v35 = vpack.c.bf16 %v456_v33, %v456_v33  ;;  %v9946_v38 = vor.u32 %v10768_v36, %v9943_v37  ;;  %v10266_v49 = vld [vmem:[%s11440_s12 + $0xb8] sm:$0xf0]  ;;  %v10753_v50 = vld [vmem:[%s11440_s12 + $0xff4] sm:$0xf]  ;;  %v9883_v51 = vld [vmem:[%s11440_s12 + $0x102c] sm:$0xf0] }
  0xb7   : > { %4385 = vmatpush.bf16.msra.mxu0 %v9466_v1  ;;  %4357 = vmatpush.bf16.msra.mxu3 %v8986_v2  ;;  %v10798_v1 = vld [vmem:[%s11440_s12 + $0x115c] sm:$0xf]  ;;  %v9230_v2 = vor.u32 %v10596_v0, %v9229_v63  ;;  %v9886_v55 = vor.u32 %v10753_v50, %v9883_v51  ;;  %v8689_v56 = vld [vmem:[%s11440_s12 + $0x698] sm:$0xf]  ;;  %v10461_v57 = vld [vmem:[%s11440_s12 + $0x6d0] sm:$0xf0] }
  0xb8   : > { %4208 = vmatmul.bf16.gmra.mxu1 %v11627_v11  ;;  %4236 = vmatmul.bf16.gmra.mxu2 %v11629_v12  ;;  %15482 = vst [vmem:[#allocation38_spill] sm:$0xff] %v11677_v35  ;;  %v9049_v58 = vld [vmem:[%s11440_s12 + $0x968] sm:$0xf]  ;;  %v8690_v59 = vor.u32 %v10461_v57, %v8689_v56  ;;  %v10738_v63 = vld [vmem:[%s11440_s12 + $0xf7c] sm:$0xf] }
  0xb9   : > { %v9823_v0 = vld [vmem:[%s11440_s12 + $0xfb4] sm:$0xf0]  ;;  %v10723_v14 = vld [vmem:[%s11440_s12 + $0xf04] sm:$0xf]  ;;  %v9763_v15 = vld [vmem:[%s11440_s12 + $0xf3c] sm:$0xf0] }
  0xba   : > { %v9766_v16 = vor.u32 %v10723_v14, %v9763_v15  ;;  %v8989_v20 = vld [vmem:[%s11440_s12 + $0x8f0] sm:$0xf]  ;;  %v10536_v21 = vld [vmem:[%s11440_s12 + $0x928] sm:$0xf0]  ;;  %v8569_v26 = vld [vmem:[%s11440_s12 + $0x5a8] sm:$0xf] }
  0xbb   : > { %4386 = vmatpush.bf16.msra.mxu0 %v9406_v13  ;;  %4358 = vmatpush.bf16.msra.mxu3 %v8926_v34  ;;  %v10296_v13 = vld [vmem:[%s11440_s12 + $0x1a8] sm:$0xf0]  ;;  %v11675_v34 = vpack.c.bf16 %v455_v32, %v455_v32  ;;  %v10189_v23 = vld [vmem:[%s11440_s12 + $0x1250] sm:$0xf]  ;;  %v10521_v30 = vld [vmem:[%s11440_s12 + $0x8b0] sm:$0xf0] }
  0xbc   : > { %v8030_v18 = vor.u32 %v10296_v13, %v8029_v4  ;;  %v9826_v4 = vor.u32 %v10738_v63, %v9823_v0  ;;  %v10836_v24 = vld [vmem:[%s11440_s12 + $0x1288] sm:$0xf0]  ;;  %v10129_v32 = vld [vmem:[%s11440_s12 + $0x11d8] sm:$0xf]  ;;  %v10821_v33 = vld [vmem:[%s11440_s12 + $0x1210] sm:$0xf0] }
  0xbd   : > { %15481 = vst [vmem:[#allocation37_spill] sm:$0xff] %v11675_v34  ;;  %v10190_v25 = vor.u32 %v10836_v24, %v10189_v23  ;;  %v10130_v36 = vor.u32 %v10821_v33, %v10129_v32  ;;  %v8509_v37 = vld [vmem:[%s11440_s12 + $0x530] sm:$0xf]  ;;  %v10716_v50 = vld [vmem:[%s11440_s12 + $0xec8] sm:$0xf0] }
  0xbe   : > { %4441 = vmatpush.bf16.msra.mxu2 %v8030_v18  ;;  %v10446_v18 = vld [vmem:[%s11440_s12 + $0x658] sm:$0xf0]  ;;  %v10069_v57 = vld [vmem:[%s11440_s12 + $0x1160] sm:$0xf]  ;;  %v10491_v63 = vld [vmem:[%s11440_s12 + $0x7c0] sm:$0xf0] }
  0xbf   : > { %4387 = vmatpush.bf16.msra.mxu0 %v9346_v17  ;;  %4359 = vmatpush.bf16.msra.mxu3 %v8866_v44  ;;  %v10066_v17 = vor.u32 %v10798_v1, %v10063_v3  ;;  %v9110_v44 = vor.u32 %v10566_v40, %v9109_v39  ;;  %v10251_v3 = vld [vmem:[%s11440_s12 + $0x40] sm:$0xf0]  ;;  %v8869_v40 = vld [vmem:[%s11440_s12 + $0x800] sm:$0xf]  ;;  %v8329_v15 = vld [vmem:[%s11440_s12 + $0x3c8] sm:$0xf] }
  0xc0   : > { %v8389_v0 = vld [vmem:[%s11440_s12 + $0x440] sm:$0xf]  ;;  %v10469_v24 = vld [vmem:[%s11440_s12 + $0x714] sm:$0xf] }
  0xc1   : > { %4411 = vmatpush.bf16.msra.mxu1 %v10066_v17  ;;  %v8629_v17 = vld [vmem:[%s11440_s12 + $0x620] sm:$0xf] }
  0xc2   : > { %4442 = vmatpush.bf16.msra.mxu2 %v7970_v28  ;;  %v8630_v19 = vor.u32 %v10446_v18, %v8629_v17  ;;  %v8929_v28 = vld [vmem:[%s11440_s12 + $0x878] sm:$0xf] }
  0xc3   : > { %4388 = vmatpush.bf16.msra.mxu0 %v9286_v43  ;;  %4360 = vmatpush.bf16.msra.mxu3 %v8806_v60  ;;  %v7909_v43 = vld [vmem:[%s11440_s12 + $0x80] sm:$0xf]  ;;  %v10551_v60 = vld [vmem:[%s11440_s12 + $0x9a0] sm:$0xf0] }
  0xc4   : > { %v7910_v54 = vor.u32 %v10266_v49, %v7909_v43  ;;  %v9050_v1 = vor.u32 %v10551_v60, %v9049_v58  ;;  %v10506_v43 = vld [vmem:[%s11440_s12 + $0x838] sm:$0xf0]  ;;  %v8809_v60 = vld [vmem:[%s11440_s12 + $0x788] sm:$0xf] }
  0xc5   : > { %4412 = vmatpush.bf16.msra.mxu1 %v10006_v27  ;;  %v10431_v27 = vld [vmem:[%s11440_s12 + $0x5e0] sm:$0xf0]  ;;  %v8870_v49 = vor.u32 %v10506_v43, %v8869_v40  ;;  %v10806_v58 = vld [vmem:[%s11440_s12 + $0x1198] sm:$0xf0] }
  0xc6   : > { %4259 = vmatmul.bf16.gmra.mxu3 %v11653_v61  ;;  %4287 = vmatmul.bf16.gmra.mxu0 %v11655_v62  ;;  %v8570_v29 = vor.u32 %v10431_v27, %v8569_v26  ;;  %v9589_v26 = vld [vmem:[%s11440_s12 + $0xda0] sm:$0xf]  ;;  %v10454_v40 = vld [vmem:[%s11440_s12 + $0x69c] sm:$0xf] }
  0xc7   : > { %4493 = vmatpush.bf16.msrb.mxu0 %v9230_v2  ;;  %4465 = vmatpush.bf16.msrb.mxu3 %v8750_v31  ;;  %v7849_v2 = vld [vmem:[%s11440_s12 + $0x8] sm:$0xf]  ;;  %v8930_v31 = vor.u32 %v10521_v30, %v8929_v28  ;;  %v10686_v28 = vld [vmem:[%s11440_s12 + $0xdd8] sm:$0xf0] }
  0xc8   : > { %4305 = vmatmul.bf16.vlgmr.msrb.gmra.mxu1 %v11501_v41  ;;  %4333 = vmatmul.bf16.vlgmr.msrb.gmra.mxu2 %v11508_v46  ;;  %v7850_v13 = vor.u32 %v10251_v3, %v7849_v2  ;;  %v10386_v2 = vld [vmem:[%s11440_s12 + $0x478] sm:$0xf0]  ;;  %v9649_v3 = vld [vmem:[%s11440_s12 + $0xe18] sm:$0xf]  ;;  %v9590_v30 = vor.u32 %v10686_v28, %v9589_v26  ;;  %v9829_v28 = vld [vmem:[%s11440_s12 + $0xf80] sm:$0xf] }
  0xc9   : > { %4413 = vmatpush.bf16.msra.mxu1 %v9946_v38  ;;  %4443 = vmatpush.bf16.msra.mxu2 %v7910_v54  ;;  %v10416_v38 = vld [vmem:[%s11440_s12 + $0x568] sm:$0xf0]  ;;  %v8449_v54 = vld [vmem:[%s11440_s12 + $0x4b8] sm:$0xf] }
  0xca   : > { %v8510_v39 = vor.u32 %v10416_v38, %v8509_v37  ;;  %v9949_v38 = vld [vmem:[%s11440_s12 + $0x1070] sm:$0xf] }
  0xcb   : > { %4494 = vmatpush.bf16.msrb.mxu0 %v9170_v22  ;;  %4466 = vmatpush.bf16.msrb.mxu3 %v8690_v59  ;;  %v8990_v22 = vor.u32 %v10536_v21, %v8989_v20  ;;  %v10070_v59 = vor.u32 %v10806_v58, %v10069_v57  ;;  %v10791_v20 = vld [vmem:[%s11440_s12 + $0x1120] sm:$0xf0] }
  0xcd   : > { %4414 = vmatpush.bf16.msra.mxu1 %v9886_v55  ;;  %4444 = vmatpush.bf16.msra.mxu2 %v7850_v13  ;;  %v10401_v55 = vld [vmem:[%s11440_s12 + $0x4f0] sm:$0xf0]  ;;  %v8390_v13 = vor.u32 %v10386_v2, %v8389_v0  ;;  %v10656_v0 = vld [vmem:[%s11440_s12 + $0xce8] sm:$0xf0]  ;;  %v9889_v2 = vld [vmem:[%s11440_s12 + $0xff8] sm:$0xf] }
  0xce   : > { %v8450_v56 = vor.u32 %v10401_v55, %v8449_v54 }
  0xcf   : > { %4495 = vmatpush.bf16.msrb.mxu0 %v9110_v44  ;;  %4467 = vmatpush.bf16.msrb.mxu3 %v8630_v19  ;;  %v9709_v44 = vld [vmem:[%s11440_s12 + $0xe90] sm:$0xf]  ;;  %v10009_v19 = vld [vmem:[%s11440_s12 + $0x10e8] sm:$0xf] }
  0xd0   : > { %v9710_v51 = vor.u32 %v10716_v50, %v9709_v44  ;;  %v8691_v44 = vld [vmem:[%s11440_s12 + $0x6d4] sm:$0xf0]  ;;  %v10671_v50 = vld [vmem:[%s11440_s12 + $0xd60] sm:$0xf0] }
  0xd1   : > { %4415 = vmatpush.bf16.msra.mxu1 %v9826_v4  ;;  %4549 = vmatpush.bf16.msrb.mxu2 %v10190_v25  ;;  %v10701_v4 = vld [vmem:[%s11440_s12 + $0xe50] sm:$0xf0]  ;;  %v8751_v25 = vld [vmem:[%s11440_s12 + $0x74c] sm:$0xf0] }
  0xd2   : > { %v9650_v14 = vor.u32 %v10701_v4, %v9649_v3  ;;  %v8754_v27 = vor.u32 %v10469_v24, %v8751_v25  ;;  %v10761_v3 = vld [vmem:[%s11440_s12 + $0x1030] sm:$0xf0] }
  0xd3   : > { %4496 = vmatpush.bf16.msrb.mxu0 %v9050_v1  ;;  %4468 = vmatpush.bf16.msrb.mxu3 %v8570_v29  ;;  %v8810_v1 = vor.u32 %v10491_v63, %v8809_v60  ;;  %v9469_v63 = vld [vmem:[%s11440_s12 + $0xcb0] sm:$0xf]  ;;  %v10349_v4 = vld [vmem:[%s11440_s12 + $0x354] sm:$0xf] }
  0xd5   : > { %4416 = vmatpush.bf16.msra.mxu1 %v9766_v16  ;;  %4550 = vmatpush.bf16.msrb.mxu2 %v10130_v36  ;;  %v10371_v16 = vld [vmem:[%s11440_s12 + $0x400] sm:$0xf0] }
  0xd6   : > { %4264 = vmatmul.bf16.gmra.mxu3 %v11675_v34  ;;  %4292 = vmatmul.bf16.gmra.mxu0 %v11677_v35  ;;  %v8330_v17 = vor.u32 %v10371_v16, %v8329_v15  ;;  %v8271_v15 = vld [vmem:[%s11440_s12 + $0x38c] sm:$0xf0]  ;;  %v10439_v16 = vld [vmem:[%s11440_s12 + $0x624] sm:$0xf] }
  0xd7   : > { %4497 = vmatpush.bf16.msrb.mxu0 %v8990_v22  ;;  %4469 = vmatpush.bf16.msrb.mxu3 %v8510_v39  ;;  %v10010_v22 = vor.u32 %v10791_v20, %v10009_v19  ;;  %v10776_v39 = vld [vmem:[%s11440_s12 + $0x10a8] sm:$0xf0]  ;;  %v8274_v19 = vor.u32 %v10349_v4, %v8271_v15  ;;  %v10319_v4 = vld [vmem:[%s11440_s12 + $0x264] sm:$0xf]  ;;  %v10409_v15 = vld [vmem:[%s11440_s12 + $0x534] sm:$0xf] }
  0xd8   : > { %4310 = vmatmul.bf16.gmra.mxu1 %v11540_v45  ;;  %4338 = vmatmul.bf16.gmra.mxu2 %v11547_v52  ;;  %v9950_v43 = vor.u32 %v10776_v39, %v9949_v38  ;;  %v10334_v38 = vld [vmem:[%s11440_s12 + $0x2dc] sm:$0xf]  ;;  %v8211_v39 = vld [vmem:[%s11440_s12 + $0x314] sm:$0xf0] }
  0xd9   : > { %4521 = vmatpush.bf16.msrb.mxu1 %v9710_v51  ;;  %4551 = vmatpush.bf16.msrb.mxu2 %v10070_v59  ;;  %v8694_v51 = vor.u32 %v10454_v40, %v8691_v44  ;;  %v10424_v40 = vld [vmem:[%s11440_s12 + $0x5ac] sm:$0xf]  ;;  %v8214_v44 = vor.u32 %v10334_v38, %v8211_v39 }
  0xdb   : > { %4498 = vmatpush.bf16.msrb.mxu0 %v8930_v31  ;;  %4470 = vmatpush.bf16.msrb.mxu3 %v8450_v56 }
  0xdd   : > { %4522 = vmatpush.bf16.msrb.mxu1 %v9650_v14  ;;  %4552 = vmatpush.bf16.msrb.mxu2 %v10010_v22  ;;  %v9890_v14 = vor.u32 %v10761_v3, %v9889_v2  ;;  %v10641_v22 = vld [vmem:[%s11440_s12 + $0xc70] sm:$0xf0] }
  0xdf   : > { %4499 = vmatpush.bf16.msrb.mxu0 %v8870_v49  ;;  %4471 = vmatpush.bf16.msrb.mxu3 %v8390_v13  ;;  %v9529_v49 = vld [vmem:[%s11440_s12 + $0xd28] sm:$0xf] }
  0xe0   : > { %v9530_v54 = vor.u32 %v10671_v50, %v9529_v49  ;;  %v8571_v49 = vld [vmem:[%s11440_s12 + $0x5e4] sm:$0xf0] }
  0xe1   : > { %4523 = vmatpush.bf16.msrb.mxu1 %v9590_v30  ;;  %4553 = vmatpush.bf16.msrb.mxu2 %v9950_v43  ;;  %v10746_v30 = vld [vmem:[%s11440_s12 + $0xfb8] sm:$0xf0]  ;;  %v9769_v50 = vld [vmem:[%s11440_s12 + $0xf08] sm:$0xf] }
  0xe3   : > { %4500 = vmatpush.bf16.msrb.mxu0 %v8810_v1  ;;  %4472 = vmatpush.bf16.msrb.mxu3 %v8330_v17  ;;  %v9470_v1 = vor.u32 %v10656_v0, %v9469_v63  ;;  %v8631_v17 = vld [vmem:[%s11440_s12 + $0x65c] sm:$0xf0] }
  0xe4   : > { %v8634_v20 = vor.u32 %v10439_v16, %v8631_v17 }
  0xe5   : > { %4524 = vmatpush.bf16.msrb.mxu1 %v9530_v54  ;;  %4554 = vmatpush.bf16.msrb.mxu2 %v9890_v14  ;;  %v8151_v14 = vld [vmem:[%s11440_s12 + $0x29c] sm:$0xf0] }
  0xe6   : > { %4361 = vmatmul.bf16.vlgmr.msra.gmra.mxu3 %v11510_v47  ;;  %4389 = vmatmul.bf16.vlgmr.msra.gmra.mxu0 %v11589_v5  ;;  %v8154_v17 = vor.u32 %v10319_v4, %v8151_v14 }
  0xe7   : > { %4605 = vmatpush.bf16.msra.mxu0 %v8754_v27  ;;  %4577 = vmatpush.bf16.msra.mxu3 %v8274_v19 }
  0xe8   : > { %4315 = vmatmul.bf16.gmra.mxu1 %v11503_v42  ;;  %4343 = vmatmul.bf16.gmra.mxu2 %v11595_v9 }
  0xe9   : > { %4525 = vmatpush.bf16.msrb.mxu1 %v9470_v1 }
  0xeb   : > { %4606 = vmatpush.bf16.msra.mxu0 %v8694_v51  ;;  %v10731_v51 = vld [vmem:[%s11440_s12 + $0xf40] sm:$0xf0]  ;;  %4578 = vmatpush.bf16.msra.mxu3 %v8214_v44 }
  0xef   : > { %4607 = vmatpush.bf16.msra.mxu0 %v8634_v20  ;;  %4579 = vmatpush.bf16.msra.mxu3 %v8154_v17  ;;  %v10274_v17 = vld [vmem:[%s11440_s12 + $0xfc] sm:$0xf] }
  0xf6   : > { %4366 = vmatmul.bf16.gmra.mxu3 %v11549_v53  ;;  %4394 = vmatmul.bf16.gmra.mxu0 %v11623_v7 }
  0xf8   : > { %4320 = vmatmul.bf16.gmra.mxu1 %v11542_v48  ;;  %4348 = vmatmul.bf16.gmra.mxu2 %v11627_v11 }
 0x103   : > { %v4166_v18 = vpop.f32.mrf.mxu0 }
 0x105   : > { %v4194_v21 = vpop.f32.mrf.mxu1 }
 0x106   : > { %v4195_v23 = vadd.f32 %v4194_v21, %v4166_v18  ;;  %4371 = vmatmul.bf16.gmra.mxu3 %v11597_v10  ;;  %4399 = vmatmul.bf16.gmra.mxu0 %v11653_v61  ;;  %v9409_v21 = vld [vmem:[%s11440_s12 + $0xc38] sm:$0xf] }
 0x107   : > { %v9410_v25 = vor.u32 %v10641_v22, %v9409_v21 }
 0x108   : > { %4417 = vmatmul.bf16.vlgmr.msra.gmra.mxu1 %v11591_v6  ;;  %4445 = vmatmul.bf16.vlgmr.msra.gmra.mxu2 %v11501_v41 }
 0x109   : > { %v11749_v29 = vpop.f32.mrf.mxu3  ;;  %4526 = vmatpush.bf16.msrb.mxu1 %v9410_v25 }
 0x10b   : > { %v4222_v31 = vpop.f32.mrf.mxu2  ;;  %v4168_v33 = vpop.f32.mrf.mxu0 }
 0x10c   : > { %v11751_v32 = vadd.f32 %v4222_v31, %v4195_v23  ;;  %v9349_v31 = vld [vmem:[%s11440_s12 + $0xbc0] sm:$0xf] }
 0x10d   : > { %v4196_v36 = vpop.f32.mrf.mxu1 }
 0x10e   : > { %v4197_v37 = vadd.f32 %v4196_v36, %v4168_v33  ;;  %v9830_v33 = vor.u32 %v10746_v30, %v9829_v28  ;;  %v10626_v36 = vld [vmem:[%s11440_s12 + $0xbf8] sm:$0xf0]  ;;  %v9711_v28 = vld [vmem:[%s11440_s12 + $0xecc] sm:$0xf0]  ;;  %v10304_v30 = vld [vmem:[%s11440_s12 + $0x1ec] sm:$0xf] }
 0x110   : > { %4555 = vmatpush.bf16.msrb.mxu2 %v9830_v33 }
 0x111   : > { %v11759_v55 = vpop.f32.mrf.mxu3 }
 0x113   : > { %v4224_v56 = vpop.f32.mrf.mxu2  ;;  %v4171_v58 = vpop.f32.mrf.mxu0 }
 0x114   : > { %v11761_v57 = vadd.f32 %v4224_v56, %v4197_v37  ;;  %v9350_v37 = vor.u32 %v10626_v36, %v9349_v31  ;;  %v8574_v56 = vor.u32 %v10424_v40, %v8571_v49  ;;  %v10394_v36 = vld [vmem:[%s11440_s12 + $0x4bc] sm:$0xf] }
 0x115   : > { %v4199_v59 = vpop.f32.mrf.mxu1 }
 0x116   : > { %v4200_v60 = vadd.f32 %v4199_v59, %v4171_v58  ;;  %4376 = vmatmul.bf16.gmra.mxu3 %v11629_v12  ;;  %4404 = vmatmul.bf16.gmra.mxu0 %v11675_v34  ;;  %v9770_v58 = vor.u32 %v10731_v51, %v9769_v50  ;;  %v9289_v59 = vld [vmem:[%s11440_s12 + $0xb48] sm:$0xf]  ;;  %v10289_v51 = vld [vmem:[%s11440_s12 + $0x174] sm:$0xf] }
 0x117   : > { %4527 = vmatpush.bf16.msrb.mxu1 %v9350_v37  ;;  %4608 = vmatpush.bf16.msra.mxu0 %v8574_v56  ;;  %v8451_v37 = vld [vmem:[%s11440_s12 + $0x4f4] sm:$0xf0]  ;;  %v10694_v56 = vld [vmem:[%s11440_s12 + $0xe1c] sm:$0xf] }
 0x118   : > { %4422 = vmatmul.bf16.gmra.mxu1 %v11625_v8  ;;  %4450 = vmatmul.bf16.gmra.mxu2 %v11540_v45 }
 0x119   : > { %v11772_v13 = vpop.f32.mrf.mxu3  ;;  %4556 = vmatpush.bf16.msrb.mxu2 %v9770_v58  ;;  %v9651_v58 = vld [vmem:[%s11440_s12 + $0xe54] sm:$0xf0] }
 0x11b   : > { %v4227_v18 = vpop.f32.mrf.mxu2  ;;  %v4173_v24 = vpop.f32.mrf.mxu0 }
 0x11c   : > { %v11779_v23 = vadd.f32 %v4227_v18, %v4200_v60  ;;  %v10611_v60 = vld [vmem:[%s11440_s12 + $0xb80] sm:$0xf0]  ;;  %v8511_v18 = vld [vmem:[%s11440_s12 + $0x56c] sm:$0xf0] }
 0x11d   : > { %v4201_v26 = vpop.f32.mrf.mxu1  ;;  %v9290_v1 = vor.u32 %v10611_v60, %v9289_v59  ;;  %v8514_v20 = vor.u32 %v10409_v15, %v8511_v18  ;;  %v10379_v59 = vld [vmem:[%s11440_s12 + $0x444] sm:$0xf]  ;;  %v7971_v18 = vld [vmem:[%s11440_s12 + $0x134] sm:$0xf0] }
 0x11e   : > { %v4202_v27 = vadd.f32 %v4201_v26, %v4173_v24 }
 0x11f   : > { %4528 = vmatpush.bf16.msrb.mxu1 %v9290_v1  ;;  %4609 = vmatpush.bf16.msra.mxu0 %v8514_v20  ;;  %v8391_v1 = vld [vmem:[%s11440_s12 + $0x47c] sm:$0xf0] }
 0x120   : > { %v8394_v15 = vor.u32 %v10379_v59, %v8391_v1 }
 0x121   : > { %v4183_v43 = vpop.f32.mrf.mxu3 }
 0x122   : > { %v8454_v43 = vor.u32 %v10394_v36, %v8451_v37  ;;  %v7851_v37 = vld [vmem:[%s11440_s12 + $0x44] sm:$0xf0] }
 0x123   : > { %v4229_v54 = vpop.f32.mrf.mxu2  ;;  %v4278_v0 = vpop.f32.mrf.mxu0 }
 0x124   : > { %v11793_v63 = vadd.f32 %v4229_v54, %v4202_v27  ;;  %v10709_v27 = vld [vmem:[%s11440_s12 + $0xe94] sm:$0xf]  ;;  %4610 = vmatpush.bf16.msra.mxu0 %v8454_v43 }
 0x125   : > { %v4204_v2 = vpop.f32.mrf.mxu1  ;;  %v9714_v33 = vor.u32 %v10709_v27, %v9711_v28  ;;  %v10364_v28 = vld [vmem:[%s11440_s12 + $0x3cc] sm:$0xf] }
 0x126   : > { %v4205_v3 = vadd.f32 %v4204_v2, %v11749_v29  ;;  %4473 = vmatmul.bf16.vlgmr.msrb.gmra.mxu3 %v11508_v46  ;;  %4501 = vmatmul.bf16.vlgmr.msrb.gmra.mxu0 %v11510_v47  ;;  %v10589_v2 = vld [vmem:[%s11440_s12 + $0xad4] sm:$0xf] }
 0x127   : > { %4661 = vmatpush.bf16.msra.mxu2 %v9714_v33 }
 0x128   : > { %4427 = vmatmul.bf16.gmra.mxu1 %v11655_v62  ;;  %4455 = vmatmul.bf16.gmra.mxu2 %v11503_v42 }
 0x129   : > { %v4250_v16 = vpop.f32.mrf.mxu3  ;;  %4611 = vmatpush.bf16.msra.mxu0 %v8394_v15  ;;  %v10559_v15 = vld [vmem:[%s11440_s12 + $0x9e4] sm:$0xf] }
 0x12a   : > { %v4251_v19 = vadd.f32 %v4250_v16, %v11751_v32  ;;  %v8091_v32 = vld [vmem:[%s11440_s12 + $0x224] sm:$0xf0] }
 0x12b   : > { %v4232_v29 = vpop.f32.mrf.mxu2  ;;  %v4280_v22 = vpop.f32.mrf.mxu0  ;;  %v8094_v40 = vor.u32 %v10304_v30, %v8091_v32  ;;  %v8331_v30 = vld [vmem:[%s11440_s12 + $0x404] sm:$0xf0] }
 0x12c   : > { %v11805_v21 = vadd.f32 %v4232_v29, %v4205_v3  ;;  %v11807_v24 = vadd.f32 %v4278_v0, %v4251_v19  ;;  %v9654_v0 = vor.u32 %v10694_v56, %v9651_v58  ;;  %v9231_v3 = vld [vmem:[%s11440_s12 + $0xb0c] sm:$0xf0]  ;;  %v7974_v19 = vor.u32 %v10274_v17, %v7971_v18  ;;  %v9111_v18 = vld [vmem:[%s11440_s12 + $0xa1c] sm:$0xf0] }
 0x12d   : > { %v4206_v25 = vpop.f32.mrf.mxu1  ;;  %4580 = vmatpush.bf16.msra.mxu3 %v8094_v40  ;;  %v9234_v16 = vor.u32 %v10589_v2, %v9231_v3  ;;  %v8334_v36 = vor.u32 %v10364_v28, %v8331_v30  ;;  %v10679_v3 = vld [vmem:[%s11440_s12 + $0xda4] sm:$0xf]  ;;  %v10664_v28 = vld [vmem:[%s11440_s12 + $0xd2c] sm:$0xf]  ;;  %v9531_v30 = vld [vmem:[%s11440_s12 + $0xd64] sm:$0xf0] }
 0x12e   : > { %v4207_v26 = vadd.f32 %v4206_v25, %v11759_v55  ;;  %4662 = vmatpush.bf16.msra.mxu2 %v9654_v0  ;;  %v10259_v25 = vld [vmem:[%s11440_s12 + $0x84] sm:$0xf]  ;;  %v6663_v2 = vmul.f32 %v11807_v24, %v11807_v24 }
 0x12f   : > { %4633 = vmatpush.bf16.msra.mxu1 %v9234_v16  ;;  %4612 = vmatpush.bf16.msra.mxu0 %v8334_v36 }
 0x131   : > { %v4252_v31 = vpop.f32.mrf.mxu3 }
 0x132   : > { %v4253_v39 = vadd.f32 %v4252_v31, %v11761_v57  ;;  %v8031_v57 = vld [vmem:[%s11440_s12 + $0x1ac] sm:$0xf0]  ;;  %v10244_v31 = vld [vmem:[%s11440_s12 + $0xc] sm:$0xf] }
 0x133   : > { %v4234_v38 = vpop.f32.mrf.mxu2  ;;  %v4283_v55 = vpop.f32.mrf.mxu0  ;;  %v8034_v54 = vor.u32 %v10289_v51, %v8031_v57  ;;  %v9171_v51 = vld [vmem:[%s11440_s12 + $0xa94] sm:$0xf0] }
 0x134   : > { %v11817_v44 = vadd.f32 %v4234_v38, %v4207_v26  ;;  %v11819_v49 = vadd.f32 %v4280_v22, %v4253_v39  ;;  %v7911_v26 = vld [vmem:[%s11440_s12 + $0xbc] sm:$0xf0]  ;;  %v7854_v39 = vor.u32 %v10244_v31, %v7851_v37  ;;  %v10544_v31 = vld [vmem:[%s11440_s12 + $0x96c] sm:$0xf]  ;;  %v9534_v37 = vor.u32 %v10664_v28, %v9531_v30 }
 0x135   : > { %v11821_v50 = vpop.f32.mrf.mxu1  ;;  %4581 = vmatpush.bf16.msra.mxu3 %v8034_v54 }
 0x136   : > { %4478 = vmatmul.bf16.gmra.mxu3 %v11547_v52  ;;  %4506 = vmatmul.bf16.gmra.mxu0 %v11549_v53  ;;  %v6678_v58 = vmul.f32 %v11819_v49, %v11819_v49  ;;  %v6467_v16 = vadd.f32 %v11819_v49, %v11807_v24 }
 0x138   : > { %4432 = vmatmul.bf16.gmra.mxu1 %v11677_v35  ;;  %4460 = vmatmul.bf16.gmra.mxu2 %v11542_v48 }
 0x139   : > { %v4255_v60 = vpop.f32.mrf.mxu3  ;;  %4582 = vmatpush.bf16.msra.mxu3 %v7974_v19 }
 0x13a   : > { %v4256_v14 = vadd.f32 %v4255_v60, %v11779_v23  ;;  %v7914_v23 = vor.u32 %v10259_v25, %v7911_v26 }
 0x13b   : > { %v11835_v4 = vpop.f32.mrf.mxu2  ;;  %v4285_v29 = vpop.f32.mrf.mxu0 }
 0x13c   : > { %v11840_v20 = vadd.f32 %v4283_v55, %v4256_v14  ;;  %v10574_v55 = vld [vmem:[%s11440_s12 + $0xa5c] sm:$0xf]  ;;  %v9591_v14 = vld [vmem:[%s11440_s12 + $0xddc] sm:$0xf0] }
 0x13d   : > { %v4211_v22 = vpop.f32.mrf.mxu1  ;;  %4583 = vmatpush.bf16.msra.mxu3 %v7914_v23  ;;  %v9174_v56 = vor.u32 %v10574_v55, %v9171_v51  ;;  %v9594_v17 = vor.u32 %v10679_v3, %v9591_v14 }
 0x13e   : > { %v9114_v22 = vor.u32 %v10559_v15, %v9111_v18  ;;  %v6468_v25 = vadd.f32 %v6467_v16, %v11840_v20  ;;  %v9411_v18 = vld [vmem:[%s11440_s12 + $0xc74] sm:$0xf0] }
 0x13f   : > { %4634 = vmatpush.bf16.msra.mxu1 %v9174_v56  ;;  %4663 = vmatpush.bf16.msra.mxu2 %v9594_v17  ;;  %v10634_v17 = vld [vmem:[%s11440_s12 + $0xc3c] sm:$0xf] }
 0x141   : > { %v4257_v27 = vpop.f32.mrf.mxu3  ;;  %4584 = vmatpush.bf16.msra.mxu3 %v7854_v39 }
 0x142   : > { %v4258_v32 = vadd.f32 %v4257_v27, %v11793_v63 }
 0x143   : > { %v4239_v33 = vpop.f32.mrf.mxu2  ;;  %v4288_v38 = vpop.f32.mrf.mxu0  ;;  %4635 = vmatpush.bf16.msra.mxu1 %v9114_v22  ;;  %4664 = vmatpush.bf16.msra.mxu2 %v9534_v37  ;;  %v8871_v37 = vld [vmem:[%s11440_s12 + $0x83c] sm:$0xf0] }
 0x144   : > { %v11849_v40 = vadd.f32 %v4285_v29, %v4258_v32  ;;  %v6768_v29 = vadd.f32 %v6678_v58, %v6663_v2  ;;  %v10649_v58 = vld [vmem:[%s11440_s12 + $0xcb4] sm:$0xf]  ;;  %v9471_v2 = vld [vmem:[%s11440_s12 + $0xcec] sm:$0xf0] }
 0x145   : > { %v4306_v43 = vpop.f32.mrf.mxu1 }
 0x146   : > { %4483 = vmatmul.bf16.gmra.mxu3 %v11595_v9  ;;  %4511 = vmatmul.bf16.gmra.mxu0 %v11597_v10  ;;  %v6708_v19 = vmul.f32 %v11849_v40, %v11849_v40  ;;  %v6469_v33 = vadd.f32 %v6468_v25, %v11849_v40  ;;  %v9414_v25 = vor.u32 %v10634_v17, %v9411_v18  ;;  %v10829_v18 = vld [vmem:[%s11440_s12 + $0x1254] sm:$0xf] }
 0x148   : > { %4529 = vmatmul.bf16.vlgmr.msrb.gmra.mxu1 %v11589_v5  ;;  %4557 = vmatmul.bf16.vlgmr.msrb.gmra.mxu2 %v11591_v6 }
 0x149   : > { %v4260_v63 = vpop.f32.mrf.mxu3 }
 0x14a   : > { %v4261_v57 = vadd.f32 %v4260_v63, %v11805_v21  ;;  %v6693_v21 = vmul.f32 %v11840_v20, %v11840_v20 }
 0x14b   : > { %v4334_v54 = vpop.f32.mrf.mxu2  ;;  %v4290_v60 = vpop.f32.mrf.mxu0 }
 0x14c   : > { %v11860_v59 = vadd.f32 %v4334_v54, %v4306_v43  ;;  %v11862_v0 = vadd.f32 %v4288_v38, %v4261_v57  ;;  %v6769_v26 = vadd.f32 %v6768_v29, %v6693_v21  ;;  %v9051_v38 = vld [vmem:[%s11440_s12 + $0x9a4] sm:$0xf0]  ;;  %v10514_v29 = vld [vmem:[%s11440_s12 + $0x87c] sm:$0xf] }
 0x14d   : > { %v4308_v1 = vpop.f32.mrf.mxu1  ;;  %v9054_v55 = vor.u32 %v10544_v31, %v9051_v38  ;;  %v10619_v31 = vld [vmem:[%s11440_s12 + $0xbc4] sm:$0xf] }
 0x14e   : > { %15483 = vst [vmem:[#allocation39_spill] sm:$0xff] %v11862_v0  ;;  %v6723_v23 = vmul.f32 %v11862_v0, %v11862_v0  ;;  %v6770_v39 = vadd.f32 %v6769_v26, %v6708_v19  ;;  %v6470_v51 = vadd.f32 %v6469_v33, %v11862_v0  ;;  %v8931_v26 = vld [vmem:[%s11440_s12 + $0x8b4] sm:$0xf0]  ;;  %v9351_v33 = vld [vmem:[%s11440_s12 + $0xbfc] sm:$0xf0] }
 0x14f   : > { %4636 = vmatpush.bf16.msra.mxu1 %v9054_v55  ;;  %v8934_v28 = vor.u32 %v10514_v29, %v8931_v26  ;;  %v9291_v55 = vld [vmem:[%s11440_s12 + $0xb84] sm:$0xf0]  ;;  %v10191_v29 = vld [vmem:[%s11440_s12 + $0x128c] sm:$0xf0] }
 0x150   : > { %v6771_v56 = vadd.f32 %v6770_v39, %v6723_v23 }
 0x151   : > { %v4262_v27 = vpop.f32.mrf.mxu3 }
 0x152   : > { %v4263_v32 = vadd.f32 %v4262_v27, %v11817_v44  ;;  %v4210_v44 = vadd.f32 %v11821_v50, %v11772_v13  ;;  %v8991_v13 = vld [vmem:[%s11440_s12 + $0x92c] sm:$0xf0] }
 0x153   : > { %v4336_v36 = vpop.f32.mrf.mxu2  ;;  %v4293_v63 = vpop.f32.mrf.mxu0 }
 0x154   : > { %v11885_v43 = vadd.f32 %v4336_v36, %v4308_v1  ;;  %v11888_v57 = vadd.f32 %v4290_v60, %v4263_v32  ;;  %v10529_v1 = vld [vmem:[%s11440_s12 + $0x8f4] sm:$0xf]  ;;  %v9474_v60 = vor.u32 %v10649_v58, %v9471_v2  ;;  %v4238_v14 = vadd.f32 %v11835_v4, %v4210_v44  ;;  %v10499_v32 = vld [vmem:[%s11440_s12 + $0x804] sm:$0xf] }
 0x155   : > { %v4311_v54 = vpop.f32.mrf.mxu1  ;;  %v8994_v50 = vor.u32 %v10529_v1, %v8991_v13  ;;  %v9354_v36 = vor.u32 %v10619_v31, %v9351_v33  ;;  %v8874_v38 = vor.u32 %v10499_v32, %v8871_v37  ;;  %v8277_v13 = vld [vmem:[%s11440_s12 + $0x358] sm:$0xf]  ;;  %v10814_v32 = vld [vmem:[%s11440_s12 + $0x11dc] sm:$0xf] }
 0x156   : > { %v11896_v21 = vadd.f32 %v6470_v51, %v11888_v57  ;;  %v6738_v3 = vmul.f32 %v11888_v57, %v11888_v57  ;;  %4488 = vmatmul.bf16.gmra.mxu3 %v11627_v11  ;;  %4516 = vmatmul.bf16.gmra.mxu0 %v11629_v12  ;;  %v10484_v51 = vld [vmem:[%s11440_s12 + $0x78c] sm:$0xf] }
 0x157   : > { %4665 = vmatpush.bf16.msra.mxu2 %v9474_v60  ;;  %4637 = vmatpush.bf16.msra.mxu1 %v8994_v50  ;;  %v10357_v50 = vld [vmem:[%s11440_s12 + $0x390] sm:$0xf0] }
 0x158   : > { %4534 = vmatmul.bf16.gmra.mxu1 %v11623_v7  ;;  %4562 = vmatmul.bf16.gmra.mxu2 %v11625_v8  ;;  %v6772_v15 = vadd.f32 %v6771_v56, %v6738_v3  ;;  %v8811_v56 = vld [vmem:[%s11440_s12 + $0x7c4] sm:$0xf0]  ;;  %v8278_v17 = vor.u32 %v10357_v50, %v8277_v13  ;;  %v10071_v13 = vld [vmem:[%s11440_s12 + $0x119c] sm:$0xf0] }
 0x159   : > { %v4265_v16 = vpop.f32.mrf.mxu3  ;;  %v8814_v1 = vor.u32 %v10484_v51, %v8811_v56  ;;  %v10327_v56 = vld [vmem:[%s11440_s12 + $0x2a0] sm:$0xf0] }
 0x15a   : > { %v4266_v19 = vadd.f32 %v4265_v16, %v4238_v14  ;;  %4717 = vmatpush.bf16.msrb.mxu0 %v8278_v17 }
 0x15b   : > { %v4339_v22 = vpop.f32.mrf.mxu2  ;;  %v4295_v27 = vpop.f32.mrf.mxu0  ;;  %4666 = vmatpush.bf16.msra.mxu2 %v9414_v25  ;;  %4638 = vmatpush.bf16.msra.mxu1 %v8934_v28 }
 0x15c   : > { %v11911_v23 = vadd.f32 %v4339_v22, %v4311_v54  ;;  %v4294_v4 = vadd.f32 %v4293_v63, %v4266_v19  ;;  %v10604_v63 = vld [vmem:[%s11440_s12 + $0xb4c] sm:$0xf]  ;;  %v10194_v22 = vor.u32 %v10829_v18, %v10191_v29  ;;  %v8097_v18 = vld [vmem:[%s11440_s12 + $0x1f0] sm:$0xf] }
 0x15d   : > { %v4313_v30 = vpop.f32.mrf.mxu1  ;;  %v9294_v44 = vor.u32 %v10604_v63, %v9291_v55  ;;  %v10312_v29 = vld [vmem:[%s11440_s12 + $0x228] sm:$0xf0] }
 0x15e   : > { %6347 = vst [vmem:[%s11916_s25 + $0x2d0] sm:$0x1] %v4294_v4  ;;  %v8217_v4 = vld [vmem:[%s11440_s12 + $0x2e0] sm:$0xf]  ;;  %4689 = vmatpush.bf16.msrb.mxu3 %v10194_v22 }
 0x15f   : > { %4667 = vmatpush.bf16.msra.mxu2 %v9354_v36  ;;  %4639 = vmatpush.bf16.msra.mxu1 %v8874_v38  ;;  %v10131_v36 = vld [vmem:[%s11440_s12 + $0x1214] sm:$0xf0] }
 0x161   : > { %v4267_v39 = vpop.f32.mrf.mxu3 }
 0x163   : > { %v4341_v54 = vpop.f32.mrf.mxu2  ;;  %v4390_v2 = vpop.f32.mrf.mxu0  ;;  %4668 = vmatpush.bf16.msra.mxu2 %v9294_v44  ;;  %4640 = vmatpush.bf16.msra.mxu1 %v8814_v1 }
 0x164   : > { %v11924_v58 = vadd.f32 %v4341_v54, %v4313_v30  ;;  %v10342_v30 = vld [vmem:[%s11440_s12 + $0x318] sm:$0xf0] }
 0x165   : > { %v4316_v3 = vpop.f32.mrf.mxu1  ;;  %v6452_v60 = vld [vmem:[%s11916_s25 + $0x2d0] sm:$0x1]  ;;  %v8218_v33 = vor.u32 %v10342_v30, %v8217_v4 }
 0x166   : > { %v6473_v14 = vsel %vm6472_vm0, %v6452_v60, 0.0  ;;  %v6753_v16 = vmul.f32 %v6452_v60, %v6452_v60  ;;  %4585 = vmatmul.bf16.vlgmr.msra.gmra.mxu3 %v11501_v41  ;;  %4613 = vmatmul.bf16.vlgmr.msra.gmra.mxu0 %v11508_v46  ;;  %v10799_v60 = vld [vmem:[%s11440_s12 + $0x1164] sm:$0xf] }
 0x167   : > { %v6474_v19 = vadd.f32 %v6473_v14, %v11896_v21  ;;  %4718 = vmatpush.bf16.msrb.mxu0 %v8218_v33  ;;  %v10074_v14 = vor.u32 %v10799_v60, %v10071_v13  ;;  %v9177_v60 = vld [vmem:[%s11440_s12 + $0xa60] sm:$0xf] }
 0x168   : > { %4539 = vmatmul.bf16.gmra.mxu1 %v11653_v61  ;;  %4567 = vmatmul.bf16.gmra.mxu2 %v11655_v62  ;;  %v6773_v25 = vsel %vm6472_vm0, %v6753_v16, 0.0 }
 0x169   : > { %v6475_v26 = vrot.slane %v6474_v19, 4  ;;  %v6774_v27 = vadd.f32 %v6773_v25, %v6772_v15  ;;  %v4362_v28 = vpop.f32.mrf.mxu3  ;;  %v10134_v15 = vor.u32 %v10814_v32, %v10131_v36  ;;  %v8098_v25 = vor.u32 %v10312_v29, %v8097_v18 }
 0x16a   : > { %v4363_v21 = vadd.f32 %v4362_v28, %v11860_v59  ;;  %v8157_v59 = vld [vmem:[%s11440_s12 + $0x268] sm:$0xf] }
 0x16b   : > { %v4344_v31 = vpop.f32.mrf.mxu2  ;;  %v6476_v37 = vadd.f32 %v6475_v26, %v6474_v19  ;;  %v6775_v38 = vrot.slane %v6774_v27, 4  ;;  %v4392_v63 = vpop.f32.mrf.mxu0  ;;  %4690 = vmatpush.bf16.msrb.mxu3 %v10134_v15  ;;  %v8158_v1 = vor.u32 %v10327_v56, %v8157_v59  ;;  %v10784_v26 = vld [vmem:[%s11440_s12 + $0x10ec] sm:$0xf] }
 0x16c   : > { %v11943_v39 = vadd.f32 %v4344_v31, %v4316_v3  ;;  %v11945_v51 = vadd.f32 %v4390_v2, %v4363_v21 }
 0x16d   : > { %v4318_v55 = vpop.f32.mrf.mxu1  ;;  %v6477_v54 = vrot.slane %v6476_v37, 2  ;;  %v6776_v44 = vadd.f32 %v6775_v38, %v6774_v27  ;;  %4719 = vmatpush.bf16.msrb.mxu0 %v8158_v1  ;;  %v10011_v27 = vld [vmem:[%s11440_s12 + $0x1124] sm:$0xf0]  ;;  %v10297_v38 = vld [vmem:[%s11440_s12 + $0x1b0] sm:$0xf0] }
 0x16e   : > { %v10014_v21 = vor.u32 %v10784_v26, %v10011_v27  ;;  %v10282_v1 = vld [vmem:[%s11440_s12 + $0x138] sm:$0xf0]  ;;  %v8757_v26 = vld [vmem:[%s11440_s12 + $0x718] sm:$0xf] }
 0x16f   : > { %v6478_v3 = vadd.f32 %v6477_v54, %v6476_v37  ;;  %v6777_v50 = vrot.slane %v6776_v44, 2  ;;  %4691 = vmatpush.bf16.msrb.mxu3 %v10074_v14  ;;  %v8037_v37 = vld [vmem:[%s11440_s12 + $0x178] sm:$0xf]  ;;  %v10597_v54 = vld [vmem:[%s11440_s12 + $0xb10] sm:$0xf0] }
 0x170   : > { %v8038_v15 = vor.u32 %v10297_v38, %v8037_v37  ;;  %v9951_v14 = vld [vmem:[%s11440_s12 + $0x10ac] sm:$0xf0] }
 0x171   : > { %v6479_v16 = vrot.slane %v6478_v3, 1  ;;  %v6778_v17 = vadd.f32 %v6777_v50, %v6776_v44  ;;  %v4364_v2 = vpop.f32.mrf.mxu3  ;;  %4720 = vmatpush.bf16.msrb.mxu0 %v8098_v25  ;;  %v10769_v50 = vld [vmem:[%s11440_s12 + $0x1074] sm:$0xf]  ;;  %v10267_v25 = vld [vmem:[%s11440_s12 + $0xc0] sm:$0xf0] }
 0x172   : > { %v4365_v22 = vadd.f32 %v4364_v2, %v11885_v43  ;;  %v9954_v18 = vor.u32 %v10769_v50, %v9951_v14  ;;  %v8697_v50 = vld [vmem:[%s11440_s12 + $0x6a0] sm:$0xf] }
 0x173   : > { %v4346_v19 = vpop.f32.mrf.mxu2  ;;  %v6480_v28 = vadd.f32 %v6479_v16, %v6478_v3  ;;  %v6779_v4 = vrot.slane %v6778_v17, 1  ;;  %v4395_v31 = vpop.f32.mrf.mxu0  ;;  %4692 = vmatpush.bf16.msrb.mxu3 %v10014_v21  ;;  %v10582_v3 = vld [vmem:[%s11440_s12 + $0xa98] sm:$0xf0]  ;;  %v9117_v21 = vld [vmem:[%s11440_s12 + $0x9e8] sm:$0xf] }
 0x174   : > { %v11956_v30 = vadd.f32 %v4346_v19, %v4318_v55  ;;  %v11960_v32 = vadd.f32 %v4392_v63, %v4365_v22  ;;  %v9237_v55 = vld [vmem:[%s11440_s12 + $0xad8] sm:$0xf]  ;;  %v7977_v63 = vld [vmem:[%s11440_s12 + $0x100] sm:$0xf]  ;;  %v9178_v2 = vor.u32 %v10582_v3, %v9177_v60  ;;  %v7917_v22 = vld [vmem:[%s11440_s12 + $0x88] sm:$0xf] }
 0x175   : > { %v11958_v33 = vpop.f32.mrf.mxu1  ;;  %v6780_v36 = vadd.f32 %v6779_v4, %v6778_v17  ;;  %v11962_v43 = vmul.f32 0.020408163, %v6480_v28  ;;  %v9238_v56 = vor.u32 %v10597_v54, %v9237_v55  ;;  %4721 = vmatpush.bf16.msrb.mxu0 %v8038_v15  ;;  %v7978_v13 = vor.u32 %v10282_v1, %v7977_v63  ;;  %v10477_v4 = vld [vmem:[%s11440_s12 + $0x750] sm:$0xf0]  ;;  %v10567_v55 = vld [vmem:[%s11440_s12 + $0xa20] sm:$0xf0] }
 0x176   : > { %4590 = vmatmul.bf16.gmra.mxu3 %v11540_v45  ;;  %4618 = vmatmul.bf16.gmra.mxu0 %v11547_v52  ;;  %v7918_v38 = vor.u32 %v10267_v25, %v7917_v22  ;;  %v8758_v15 = vor.u32 %v10477_v4, %v8757_v26  ;;  %v9891_v54 = vld [vmem:[%s11440_s12 + $0x1034] sm:$0xf0]  ;;  %v10252_v3 = vld [vmem:[%s11440_s12 + $0x48] sm:$0xf0]  ;;  %v9771_v4 = vld [vmem:[%s11440_s12 + $0xf44] sm:$0xf0] }
 0x177   : > { %v6978_v44 = vmul.f32 0.020408163, %v6780_v36  ;;  %v6993_v59 = vmul.f32 %v11962_v43, %v11962_v43  ;;  %4773 = vmatpush.bf16.msrb.mxu2 %v9238_v56  ;;  %4693 = vmatpush.bf16.msrb.mxu3 %v9954_v18  ;;  %v10739_v56 = vld [vmem:[%s11440_s12 + $0xf84] sm:$0xf]  ;;  %v9057_v18 = vld [vmem:[%s11440_s12 + $0x970] sm:$0xf] }
 0x178   : > { %4544 = vmatmul.bf16.gmra.mxu1 %v11675_v34  ;;  %4572 = vmatmul.bf16.gmra.mxu2 %v11677_v35 }
 0x179   : > { %v7008_v16 = vsub.f32 %v6978_v44, %v6993_v59  ;;  %v4367_v17 = vpop.f32.mrf.mxu3  ;;  %4722 = vmatpush.bf16.msrb.mxu0 %v7978_v13  ;;  %v9118_v44 = vor.u32 %v10567_v55, %v9117_v21  ;;  %4745 = vmatpush.bf16.msrb.mxu1 %v8758_v15  ;;  %v7857_v13 = vld [vmem:[%s11440_s12 + $0x10] sm:$0xf] }
 0x17a   : > { %v4368_v19 = vadd.f32 %v4367_v17, %v11911_v23  ;;  %v10754_v23 = vld [vmem:[%s11440_s12 + $0xffc] sm:$0xf]  ;;  %v7858_v17 = vor.u32 %v10252_v3, %v7857_v13  ;;  %v10447_v13 = vld [vmem:[%s11440_s12 + $0x660] sm:$0xf0]  ;;  %v8997_v3 = vld [vmem:[%s11440_s12 + $0x8f8] sm:$0xf] }
 0x17b   : > { %v11980_v29 = vpop.f32.mrf.mxu2  ;;  %v7023_v27 = vmax.f32 %v7008_v16, 0.0  ;;  %v4397_v28 = vpop.f32.mrf.mxu0  ;;  %4774 = vmatpush.bf16.msrb.mxu2 %v9178_v2  ;;  %v9894_v59 = vor.u32 %v10754_v23, %v9891_v54  ;;  %v10462_v2 = vld [vmem:[%s11440_s12 + $0x6d8] sm:$0xf0]  ;;  %v10837_v54 = vld [vmem:[%s11440_s12 + $0x1290] sm:$0xf0] }
 0x17c   : > { %v11988_v37 = vadd.f32 %v4395_v31, %v4368_v19  ;;  %v9831_v31 = vld [vmem:[%s11440_s12 + $0xfbc] sm:$0xf0]  ;;  %v10552_v19 = vld [vmem:[%s11440_s12 + $0x9a8] sm:$0xf0]  ;;  %v8698_v25 = vor.u32 %v10462_v2, %v8697_v50 }
 0x17d   : > { %v4323_v36 = vpop.f32.mrf.mxu1  ;;  %v11993_v63 = vadd.f32 0.001, %v7023_v27  ;;  %4694 = vmatpush.bf16.msrb.mxu3 %v9894_v59  ;;  %v9834_v1 = vor.u32 %v10739_v56, %v9831_v31  ;;  %4723 = vmatpush.bf16.msrb.mxu0 %v7918_v38  ;;  %v9058_v26 = vor.u32 %v10552_v19, %v9057_v18  ;;  %v10724_v27 = vld [vmem:[%s11440_s12 + $0xf0c] sm:$0xf] }
 0x17e   : > { %v9774_v38 = vor.u32 %v10724_v27, %v9771_v4  ;;  %4746 = vmatpush.bf16.msrb.mxu1 %v8698_v25  ;;  %v12026_v56 = vld [vmem:[%s12023_s0] sm:$0xff] }
 0x17f   : > { %10959 = vrsqrt.f32 %v11993_v63  ;;  %4775 = vmatpush.bf16.msrb.mxu2 %v9118_v44  ;;  %v8637_v44 = vld [vmem:[%s11440_s12 + $0x628] sm:$0xf]  ;;  %vm7059_vm2 = vweird.f32 %v11993_v63 }
 0x181   : > { %v4369_v60 = vpop.f32.mrf.mxu3  ;;  %4695 = vmatpush.bf16.msrb.mxu3 %v9834_v1  ;;  %4724 = vmatpush.bf16.msrb.mxu0 %v7858_v17 }
 0x182   : > { %v4370_v16 = vadd.f32 %v4369_v60, %v11924_v58 }
 0x183   : > { %v4351_v14 = vpop.f32.mrf.mxu2  ;;  %v4400_v22 = vpop.f32.mrf.mxu0  ;;  %4776 = vmatpush.bf16.msrb.mxu2 %v9058_v26 }
 0x184   : > { %v12008_v36 = vadd.f32 %v4397_v28, %v4370_v16  ;;  %v8638_v14 = vor.u32 %v10447_v13, %v8637_v44  ;;  %v10537_v16 = vld [vmem:[%s11440_s12 + $0x930] sm:$0xf0]  ;;  %v10522_v44 = vld [vmem:[%s11440_s12 + $0x8b8] sm:$0xf0] }
 0x185   : > { %v4418_v21 = vpop.f32.mrf.mxu1  ;;  %v10960_v58 = vpop.eup %10959  ;;  %4696 = vmatpush.bf16.msrb.mxu3 %v9774_v38  ;;  %v8998_v19 = vor.u32 %v10537_v16, %v8997_v3  ;;  %v10822_v38 = vld [vmem:[%s11440_s12 + $0x1218] sm:$0xf0] }
 0x186   : > { %v12011_v15 = vadd.f32 %v4418_v21, %v11945_v51  ;;  %v7054_v55 = vmul.f32 %v10960_v58, %v11993_v63  ;;  %4595 = vmatmul.bf16.gmra.mxu3 %v11503_v42  ;;  %4623 = vmatmul.bf16.gmra.mxu0 %v11595_v9  ;;  %v10197_v51 = vld [vmem:[%s11440_s12 + $0x1258] sm:$0xf]  ;;  %vm7060_vm1 = vweird.f32 %v10960_v58  ;;  %v10137_v21 = vld [vmem:[%s11440_s12 + $0x11e0] sm:$0xf] }
 0x187   : > { %v10198_v60 = vor.u32 %v10837_v54, %v10197_v51  ;;  %4747 = vmatpush.bf16.msrb.mxu1 %v8638_v14  ;;  %4777 = vmatpush.bf16.msrb.mxu2 %v8998_v19  ;;  %vm7061_vm3 = vmor %vm7059_vm2, %vm7060_vm1  ;;  %v10432_v51 = vld [vmem:[%s11440_s12 + $0x5e8] sm:$0xf0]  ;;  %v8937_v54 = vld [vmem:[%s11440_s12 + $0x880] sm:$0xf] }
 0x188   : > { %4641 = vmatmul.bf16.vlgmr.msra.gmra.mxu1 %v11510_v47  ;;  %4669 = vmatmul.bf16.vlgmr.msra.gmra.mxu2 %v11589_v5  ;;  %v7055_v28 = vmul.f32 %v10960_v58, %v7054_v55  ;;  %v8577_v55 = vld [vmem:[%s11440_s12 + $0x5b0] sm:$0xf]  ;;  %v8938_v3 = vor.u32 %v10522_v44, %v8937_v54  ;;  %v10492_v44 = vld [vmem:[%s11440_s12 + $0x7c8] sm:$0xf0] }
 0x189   : > { %v4372_v23 = vpop.f32.mrf.mxu3  ;;  %4829 = vmatpush.bf16.msra.mxu0 %v10198_v60  ;;  %v8817_v54 = vld [vmem:[%s11440_s12 + $0x790] sm:$0xf] }
 0x18a   : > { %v7056_v59 = vmul.f32 0.5, %v7055_v28  ;;  %v4373_v31 = vadd.f32 %v4372_v23, %v11943_v39  ;;  %v7207_v39 = vperm.slane %v12026_v56, 0 }
 0x18b   : > { %v12029_v1 = vpop.f32.mrf.mxu2  ;;  %v4402_v50 = vpop.f32.mrf.mxu0  ;;  %4778 = vmatpush.bf16.msrb.mxu2 %v8938_v3  ;;  %v10372_v3 = vld [vmem:[%s11440_s12 + $0x408] sm:$0xf0] }
 0x18c   : > { %v7057_v17 = vsub.f32 1.5, %v7056_v59  ;;  %v12034_v18 = vadd.f32 %v4400_v22, %v4373_v31 }
 0x18d   : > { %v4420_v2 = vpop.f32.mrf.mxu1 }
 0x18e   : > { %v12038_v25 = vadd.f32 %v4420_v2, %v11960_v32  ;;  %v7058_v26 = vmul.f32 %v10960_v58, %v7057_v17  ;;  %v10138_v32 = vor.u32 %v10822_v38, %v10137_v21  ;;  %v8457_v17 = vld [vmem:[%s11440_s12 + $0x4c0] sm:$0xf]  ;;  %v10402_v2 = vld [vmem:[%s11440_s12 + $0x4f8] sm:$0xf0]  ;;  %v8397_v21 = vld [vmem:[%s11440_s12 + $0x448] sm:$0xf] }
 0x190   : > { %15484 = vst [vmem:[#allocation40_spill] sm:$0xff] %v12038_v25  ;;  %v7062_v27 = vsel %vm7061_vm3, %v10960_v58, %v7058_v26  ;;  %v8578_v58 = vor.u32 %v10432_v51, %v8577_v55  ;;  %4830 = vmatpush.bf16.msra.mxu0 %v10138_v32  ;;  %v10387_v55 = vld [vmem:[%s11440_s12 + $0x480] sm:$0xf0] }
 0x191   : > { %v7237_v4 = vmul.f32 %v7207_v39, %v7062_v27  ;;  %v4374_v22 = vpop.f32.mrf.mxu3  ;;  %v8458_v39 = vor.u32 %v10402_v2, %v8457_v17  ;;  %v6664_v2 = vmul.f32 %v12011_v15, %v12011_v15 }
 0x192   : > { %v4375_v28 = vadd.f32 %v4374_v22, %v11956_v30  ;;  %4748 = vmatpush.bf16.msrb.mxu1 %v8578_v58  ;;  %v10507_v22 = vld [vmem:[%s11440_s12 + $0x840] sm:$0xf0]  ;;  %v8337_v58 = vld [vmem:[%s11440_s12 + $0x3d0] sm:$0xf] }
 0x193   : > { %v12045_v23 = vpop.f32.mrf.mxu2  ;;  %v12050_v59 = vperm.slane %v7237_v4, 0  ;;  %v12052_v63 = vpop.f32.mrf.mxu0  ;;  %v12055_v31 = vmul.f32 %v7237_v4, %v11962_v43  ;;  %v8517_v43 = vld [vmem:[%s11440_s12 + $0x538] sm:$0xf]  ;;  %v8877_v4 = vld [vmem:[%s11440_s12 + $0x808] sm:$0xf] }
 0x194   : > { %v12057_v13 = vadd.f32 %v4402_v50, %v4375_v28  ;;  %v10417_v50 = vld [vmem:[%s11440_s12 + $0x570] sm:$0xf0]  ;;  %v8878_v38 = vor.u32 %v10507_v22, %v8877_v4  ;;  %v8398_v28 = vor.u32 %v10387_v55, %v8397_v21 }
 0x195   : > { %v4423_v60 = vpop.f32.mrf.mxu1  ;;  %v12061_v30 = vmul.f32 %v12050_v59, %v11807_v24  ;;  %v12065_v14 = vmul.f32 %v12050_v59, %v11888_v57  ;;  %v8518_v24 = vor.u32 %v10417_v50, %v8517_v43  ;;  %v8338_v50 = vor.u32 %v10372_v3, %v8337_v58 }
 0x196   : > { %v12068_v16 = vadd.f32 %v4423_v60, %v11988_v37  ;;  %4600 = vmatmul.bf16.gmra.mxu3 %v11542_v48  ;;  %4628 = vmatmul.bf16.gmra.mxu0 %v11627_v11  ;;  %v8818_v60 = vor.u32 %v10492_v44, %v8817_v54  ;;  %v9657_v54 = vld [vmem:[%s11440_s12 + $0xe20] sm:$0xf]  ;;  %v10702_v44 = vld [vmem:[%s11440_s12 + $0xe58] sm:$0xf0] }
 0x197   : > { %15485 = vst [vmem:[#allocation41_spill] sm:$0xff] %v12061_v30  ;;  %4749 = vmatpush.bf16.msrb.mxu1 %v8518_v24  ;;  %4779 = vmatpush.bf16.msrb.mxu2 %v8878_v38  ;;  %v6679_v24 = vmul.f32 %v12038_v25, %v12038_v25 }
 0x198   : > { %15486 = vst [vmem:[#allocation42_spill] sm:$0xff] %v12065_v14  ;;  %4646 = vmatmul.bf16.gmra.mxu1 %v11549_v53  ;;  %4674 = vmatmul.bf16.gmra.mxu2 %v11623_v7  ;;  %v6694_v4 = vmul.f32 %v12068_v16, %v12068_v16  ;;  %v10612_v14 = vld [vmem:[%s11440_s12 + $0xb88] sm:$0xf0] }
 0x199   : > { %15487 = vst [vmem:[#allocation43_spill] sm:$0xff] %v12068_v16  ;;  %v12076_v57 = vpop.f32.mrf.mxu3  ;;  %v6781_v22 = vadd.f32 %v6679_v24, %v6664_v2  ;;  %v4350_v24 = vadd.f32 %v11980_v29, %v11958_v33 }
 0x19b   : > { %v12078_v37 = vpop.f32.mrf.mxu2  ;;  %v4407_v19 = vpop.f32.mrf.mxu0  ;;  %4750 = vmatpush.bf16.msrb.mxu1 %v8458_v39  ;;  %4780 = vmatpush.bf16.msrb.mxu2 %v8818_v60  ;;  %v10717_v39 = vld [vmem:[%s11440_s12 + $0xed0] sm:$0xf0]  ;;  %v6782_v58 = vadd.f32 %v6781_v22, %v6694_v4  ;;  %v4378_v4 = vadd.f32 %v12076_v57, %v4350_v24  ;;  %v10807_v22 = vld [vmem:[%s11440_s12 + $0x11a0] sm:$0xf0] }
 0x19c   : > { %v9717_v19 = vld [vmem:[%s11440_s12 + $0xe98] sm:$0xf] }
 0x19d   : > { %v4425_v26 = vpop.f32.mrf.mxu1 }
 0x19e   : > { %v12083_v27 = vadd.f32 %v4425_v26, %v12008_v36  ;;  %v6481_v26 = vadd.f32 %v12038_v25, %v12011_v15  ;;  %v10720_v25 = vld [vmem:[%s11440_s12 + $0xee8] sm:$0xf0] }
 0x19f   : > { %4751 = vmatpush.bf16.msrb.mxu1 %v8398_v28 }
 0x1a0   : > { %15488 = vst [vmem:[#allocation44_spill] sm:$0xff] %v12083_v27  ;;  %v6482_v21 = vadd.f32 %v6481_v26, %v12068_v16  ;;  %v6709_v38 = vmul.f32 %v12083_v27, %v12083_v27 }
 0x1a1   : > { %v4379_v32 = vpop.f32.mrf.mxu3 }
 0x1a2   : > { %v6483_v60 = vadd.f32 %v6482_v21, %v12083_v27  ;;  %v9597_v21 = vld [vmem:[%s11440_s12 + $0xda8] sm:$0xf] }
 0x1a3   : > { %v12089_v51 = vpop.f32.mrf.mxu2  ;;  %v4502_v36 = vpop.f32.mrf.mxu0  ;;  %4752 = vmatpush.bf16.msrb.mxu1 %v8338_v50  ;;  %v9658_v50 = vor.u32 %v10702_v44, %v9657_v54 }
 0x1a5   : > { %v4428_v43 = vpop.f32.mrf.mxu1 }
 0x1a6   : > { %v12098_v17 = vadd.f32 %v4428_v43, %v12034_v18  ;;  %4697 = vmatmul.bf16.vlgmr.msrb.gmra.mxu3 %v11591_v6  ;;  %4725 = vmatmul.bf16.vlgmr.msrb.gmra.mxu0 %v11501_v41  ;;  %v9718_v18 = vor.u32 %v10717_v39, %v9717_v19 }
 0x1a8   : > { %15489 = vst [vmem:[#allocation45_spill] sm:$0xff] %v12098_v17  ;;  %4651 = vmatmul.bf16.gmra.mxu1 %v11597_v10  ;;  %4679 = vmatmul.bf16.gmra.mxu2 %v11653_v61  ;;  %v6724_v3 = vmul.f32 %v12098_v17, %v12098_v17  ;;  %v6484_v39 = vadd.f32 %v6483_v60, %v12098_v17  ;;  %v10792_v60 = vld [vmem:[%s11440_s12 + $0x1128] sm:$0xf0] }
 0x1a9   : > { %v4474_v55 = vpop.f32.mrf.mxu3  ;;  %4801 = vmatpush.bf16.msra.mxu3 %v9718_v18  ;;  %v10077_v18 = vld [vmem:[%s11440_s12 + $0x1168] sm:$0xf] }
 0x1aa   : > { %v4475_v32 = vadd.f32 %v4474_v55, %v12029_v1  ;;  %v6783_v1 = vadd.f32 %v6782_v58, %v6709_v38  ;;  %v10687_v38 = vld [vmem:[%s11440_s12 + $0xde0] sm:$0xf0]  ;;  %v10017_v58 = vld [vmem:[%s11440_s12 + $0x10f0] sm:$0xf] }
 0x1ab   : > { %v12115_v28 = vpop.f32.mrf.mxu2  ;;  %v4504_v43 = vpop.f32.mrf.mxu0 }
 0x1ac   : > { %v12125_v19 = vadd.f32 %v4502_v36, %v4475_v32  ;;  %v6784_v55 = vadd.f32 %v6783_v1, %v6724_v3  ;;  %v10078_v36 = vor.u32 %v10807_v22, %v10077_v18  ;;  %v9537_v3 = vld [vmem:[%s11440_s12 + $0xd30] sm:$0xf]  ;;  %v10672_v1 = vld [vmem:[%s11440_s12 + $0xd68] sm:$0xf0] }
 0x1ad   : > { %v4430_v2 = vpop.f32.mrf.mxu1  ;;  %4802 = vmatpush.bf16.msra.mxu3 %v9658_v50  ;;  %v4406_v50 = vadd.f32 %v12052_v63, %v4378_v4  ;;  %v9538_v22 = vor.u32 %v10672_v1, %v9537_v3 }
 0x1ae   : > { %v12129_v26 = vadd.f32 %v4430_v2, %v12057_v13  ;;  %v9598_v13 = vor.u32 %v10687_v38, %v9597_v21  ;;  %4831 = vmatpush.bf16.msra.mxu0 %v10078_v36  ;;  %v10018_v2 = vor.u32 %v10792_v60, %v10017_v58  ;;  %v9417_v58 = vld [vmem:[%s11440_s12 + $0xc40] sm:$0xf] }
 0x1b0   : > { %v6485_v33 = vadd.f32 %v6484_v39, %v12129_v26  ;;  %v6739_v29 = vmul.f32 %v12129_v26, %v12129_v26 }
 0x1b1   : > { %v4476_v54 = vpop.f32.mrf.mxu3  ;;  %4803 = vmatpush.bf16.msra.mxu3 %v9598_v13 }
 0x1b2   : > { %v6785_v32 = vadd.f32 %v6784_v55, %v6739_v29  ;;  %v4477_v57 = vadd.f32 %v4476_v54, %v12045_v23  ;;  %4832 = vmatpush.bf16.msra.mxu0 %v10018_v2  ;;  %v9957_v23 = vld [vmem:[%s11440_s12 + $0x1078] sm:$0xf]  ;;  %v10777_v55 = vld [vmem:[%s11440_s12 + $0x10b0] sm:$0xf0]  ;;  %v9897_v54 = vld [vmem:[%s11440_s12 + $0x1000] sm:$0xf] }
 0x1b3   : > { %v12139_v44 = vpop.f32.mrf.mxu2  ;;  %v4507_v24 = vpop.f32.mrf.mxu0  ;;  %v9477_v29 = vld [vmem:[%s11440_s12 + $0xcb8] sm:$0xf]  ;;  %v9958_v63 = vor.u32 %v10777_v55, %v9957_v23  ;;  %v10747_v23 = vld [vmem:[%s11440_s12 + $0xfc0] sm:$0xf0] }
 0x1b4   : > { %v12147_v18 = vadd.f32 %v4504_v43, %v4477_v57  ;;  %v10657_v43 = vld [vmem:[%s11440_s12 + $0xcf0] sm:$0xf0]  ;;  %v10762_v57 = vld [vmem:[%s11440_s12 + $0x1038] sm:$0xf0] }
 0x1b5   : > { %v4433_v39 = vpop.f32.mrf.mxu1  ;;  %4804 = vmatpush.bf16.msra.mxu3 %v9538_v22  ;;  %v9478_v4 = vor.u32 %v10657_v43, %v9477_v29  ;;  %v9898_v3 = vor.u32 %v10762_v57, %v9897_v54  ;;  %v10627_v43 = vld [vmem:[%s11440_s12 + $0xc00] sm:$0xf0] }
 0x1b6   : > { %v4434_v21 = vadd.f32 %v4433_v39, %v4406_v50  ;;  %4702 = vmatmul.bf16.gmra.mxu3 %v11625_v8  ;;  %4730 = vmatmul.bf16.gmra.mxu0 %v11540_v45  ;;  %v10642_v50 = vld [vmem:[%s11440_s12 + $0xc78] sm:$0xf0] }
 0x1b7   : > { %4833 = vmatpush.bf16.msra.mxu0 %v9958_v63  ;;  %v9418_v39 = vor.u32 %v10642_v50, %v9417_v58  ;;  %v9357_v63 = vld [vmem:[%s11440_s12 + $0xbc8] sm:$0xf]  ;;  %v9777_v50 = vld [vmem:[%s11440_s12 + $0xf10] sm:$0xf] }
 0x1b8   : > { %6348 = vst [vmem:[%s11916_s25 + $0x2d8] sm:$0x1] %v4434_v21  ;;  %4656 = vmatmul.bf16.gmra.mxu1 %v11629_v12  ;;  %4684 = vmatmul.bf16.gmra.mxu2 %v11675_v34  ;;  %v9837_v21 = vld [vmem:[%s11440_s12 + $0xf88] sm:$0xf] }
 0x1b9   : > { %v4479_v36 = vpop.f32.mrf.mxu3  ;;  %4805 = vmatpush.bf16.msra.mxu3 %v9478_v4  ;;  %v9838_v29 = vor.u32 %v10747_v23, %v9837_v21  ;;  %v9297_v23 = vld [vmem:[%s11440_s12 + $0xb50] sm:$0xf] }
 0x1ba   : > { %v4480_v13 = vadd.f32 %v4479_v36, %v12078_v37 }
 0x1bb   : > { %v12158_v38 = vpop.f32.mrf.mxu2  ;;  %v4509_v60 = vpop.f32.mrf.mxu0  ;;  %4834 = vmatpush.bf16.msra.mxu0 %v9898_v3 }
 0x1bc   : > { %v12165_v1 = vadd.f32 %v4507_v24, %v4480_v13  ;;  %v9358_v24 = vor.u32 %v10627_v43, %v9357_v63  ;;  %v10470_v43 = vld [vmem:[%s11440_s12 + $0x71c] sm:$0xf] }
 0x1bd   : > { %v4435_v2 = vpop.f32.mrf.mxu1  ;;  %4806 = vmatpush.bf16.msra.mxu3 %v9418_v39 }
 0x1be   : > { %v10732_v2 = vld [vmem:[%s11440_s12 + $0xf48] sm:$0xf0] }
 0x1bf   : > { %v6453_v22 = vld [vmem:[%s11916_s25 + $0x2d8] sm:$0x1]  ;;  %4835 = vmatpush.bf16.msra.mxu0 %v9838_v29  ;;  %v9778_v21 = vor.u32 %v10732_v2, %v9777_v50  ;;  %v10455_v2 = vld [vmem:[%s11440_s12 + $0x6a4] sm:$0xf] }
 0x1c0   : > { %v6486_v37 = vsel %vm6472_vm0, %v6453_v22, 0.0  ;;  %v6754_v55 = vmul.f32 %v6453_v22, %v6453_v22 }
 0x1c1   : > { %v6487_v36 = vadd.f32 %v6486_v37, %v6485_v33  ;;  %v4481_v13 = vpop.f32.mrf.mxu3  ;;  %4807 = vmatpush.bf16.msra.mxu3 %v9358_v24 }
 0x1c2   : > { %v6786_v4 = vsel %vm6472_vm0, %v6754_v55, 0.0  ;;  %v4482_v3 = vadd.f32 %v4481_v13, %v12089_v51  ;;  %v8279_v13 = vld [vmem:[%s11440_s12 + $0x394] sm:$0xf0] }
 0x1c3   : > { %v6488_v54 = vrot.slane %v6487_v36, 4  ;;  %v6787_v57 = vadd.f32 %v6786_v4, %v6785_v32  ;;  %v4463_v58 = vpop.f32.mrf.mxu2  ;;  %v4512_v22 = vpop.f32.mrf.mxu0  ;;  %v9298_v32 = vor.u32 %v10612_v14, %v9297_v23  ;;  %4836 = vmatpush.bf16.msra.mxu0 %v9778_v21  ;;  %v8759_v4 = vld [vmem:[%s11440_s12 + $0x754] sm:$0xf0]  ;;  %v8699_v21 = vld [vmem:[%s11440_s12 + $0x6dc] sm:$0xf0] }
 0x1c4   : > { %v12179_v55 = vadd.f32 %v4509_v60, %v4482_v3  ;;  %v10350_v60 = vld [vmem:[%s11440_s12 + $0x35c] sm:$0xf] }
 0x1c5   : > { %v6489_v33 = vadd.f32 %v6488_v54, %v6487_v36  ;;  %v6788_v39 = vrot.slane %v6787_v57, 4  ;;  %v4530_v37 = vpop.f32.mrf.mxu1  ;;  %v8762_v36 = vor.u32 %v10470_v43, %v8759_v4  ;;  %4808 = vmatpush.bf16.msra.mxu3 %v9298_v32  ;;  %v8219_v32 = vld [vmem:[%s11440_s12 + $0x31c] sm:$0xf0] }
 0x1c6   : > { %v4531_v29 = vadd.f32 %v4530_v37, %v12125_v19  ;;  %4707 = vmatmul.bf16.gmra.mxu3 %v11655_v62  ;;  %4735 = vmatmul.bf16.gmra.mxu0 %v11503_v42  ;;  %v8282_v19 = vor.u32 %v10350_v60, %v8279_v13  ;;  %v10335_v37 = vld [vmem:[%s11440_s12 + $0x2e4] sm:$0xf]  ;;  %v10440_v13 = vld [vmem:[%s11440_s12 + $0x62c] sm:$0xf] }
 0x1c7   : > { %v6490_v51 = vrot.slane %v6489_v33, 2  ;;  %v6789_v63 = vadd.f32 %v6788_v39, %v6787_v57  ;;  %4885 = vmatpush.bf16.msra.mxu2 %v8762_v36  ;;  %v8702_v39 = vor.u32 %v10455_v2, %v8699_v21 }
 0x1c8   : > { %4753 = vmatmul.bf16.vlgmr.msrb.gmra.mxu1 %v11508_v46  ;;  %4781 = vmatmul.bf16.vlgmr.msrb.gmra.mxu2 %v11510_v47 }
 0x1c9   : > { %v6491_v24 = vadd.f32 %v6490_v51, %v6489_v33  ;;  %v6790_v14 = vrot.slane %v6789_v63, 2  ;;  %v4484_v54 = vpop.f32.mrf.mxu3  ;;  %4857 = vmatpush.bf16.msra.mxu1 %v8282_v19  ;;  %v10425_v19 = vld [vmem:[%s11440_s12 + $0x5b4] sm:$0xf] }
 0x1ca   : > { %v4485_v3 = vadd.f32 %v4484_v54, %v12115_v28  ;;  %v8222_v28 = vor.u32 %v10335_v37, %v8219_v32  ;;  %v8579_v54 = vld [vmem:[%s11440_s12 + $0x5ec] sm:$0xf0]  ;;  %v10410_v37 = vld [vmem:[%s11440_s12 + $0x53c] sm:$0xf]  ;;  %v8519_v32 = vld [vmem:[%s11440_s12 + $0x574] sm:$0xf0] }
 0x1cb   : > { %v6492_v57 = vrot.slane %v6491_v24, 1  ;;  %v6791_v58 = vadd.f32 %v6790_v14, %v6789_v63  ;;  %v4558_v50 = vpop.f32.mrf.mxu2  ;;  %v4514_v33 = vpop.f32.mrf.mxu0  ;;  %4886 = vmatpush.bf16.msra.mxu2 %v8702_v39  ;;  %v8639_v14 = vld [vmem:[%s11440_s12 + $0x664] sm:$0xf0]  ;;  %v8582_v2 = vor.u32 %v10425_v19, %v8579_v54 }
 0x1cc   : > { %v12193_v23 = vadd.f32 %v4558_v50, %v4531_v29  ;;  %v12197_v4 = vadd.f32 %v4512_v22, %v4485_v3  ;;  %v9719_v22 = vld [vmem:[%s11440_s12 + $0xed4] sm:$0xf0]  ;;  %v8159_v39 = vld [vmem:[%s11440_s12 + $0x2a4] sm:$0xf0] }
 0x1cd   : > { %v6493_v51 = vadd.f32 %v6492_v57, %v6491_v24  ;;  %v6792_v43 = vrot.slane %v6791_v58, 1  ;;  %v4532_v63 = vpop.f32.mrf.mxu1  ;;  %4858 = vmatpush.bf16.msra.mxu1 %v8222_v28  ;;  %v8642_v24 = vor.u32 %v10440_v13, %v8639_v14  ;;  %v10710_v57 = vld [vmem:[%s11440_s12 + $0xe9c] sm:$0xf]  ;;  %v9659_v13 = vld [vmem:[%s11440_s12 + $0xe5c] sm:$0xf0] }
 0x1ce   : > { %15490 = vst [vmem:[#allocation46_spill] sm:$0xff] %v12193_v23  ;;  %v4533_v36 = vadd.f32 %v4532_v63, %v12147_v18  ;;  %v9722_v21 = vor.u32 %v10710_v57, %v9719_v22  ;;  %v10305_v14 = vld [vmem:[%s11440_s12 + $0x1f4] sm:$0xf] }
 0x1cf   : > { %v6793_v29 = vadd.f32 %v6792_v43, %v6791_v58  ;;  %v12200_v60 = vmul.f32 0.020408163, %v6493_v51  ;;  %v10320_v58 = vld [vmem:[%s11440_s12 + $0x26c] sm:$0xf]  ;;  %4887 = vmatpush.bf16.msra.mxu2 %v8642_v24  ;;  %v8099_v24 = vld [vmem:[%s11440_s12 + $0x22c] sm:$0xf0] }
 0x1d0   : > { %v8162_v28 = vor.u32 %v10320_v58, %v8159_v39  ;;  %4941 = vmatpush.bf16.msrb.mxu0 %v9722_v21  ;;  %v10290_v58 = vld [vmem:[%s11440_s12 + $0x17c] sm:$0xf]  ;;  %v8459_v21 = vld [vmem:[%s11440_s12 + $0x4fc] sm:$0xf0]  ;;  %v10680_v39 = vld [vmem:[%s11440_s12 + $0xdac] sm:$0xf] }
 0x1d1   : > { %v6979_v50 = vmul.f32 0.020408163, %v6793_v29  ;;  %v6994_v18 = vmul.f32 %v12200_v60, %v12200_v60  ;;  %v4486_v3 = vpop.f32.mrf.mxu3  ;;  %v10695_v29 = vld [vmem:[%s11440_s12 + $0xe24] sm:$0xf] }
 0x1d2   : > { %v4487_v43 = vadd.f32 %v4486_v3, %v12139_v44  ;;  %4859 = vmatpush.bf16.msra.mxu1 %v8162_v28  ;;  %v9662_v57 = vor.u32 %v10695_v29, %v9659_v13  ;;  %v8039_v3 = vld [vmem:[%s11440_s12 + $0x1b4] sm:$0xf0]  ;;  %v10275_v13 = vld [vmem:[%s11440_s12 + $0x104] sm:$0xf] }
 0x1d3   : > { %v7009_v51 = vsub.f32 %v6979_v50, %v6994_v18  ;;  %v4560_v63 = vpop.f32.mrf.mxu2  ;;  %v12220_v17 = vpop.f32.mrf.mxu0  ;;  %4888 = vmatpush.bf16.msra.mxu2 %v8582_v2  ;;  %v8102_v18 = vor.u32 %v10305_v14, %v8099_v24  ;;  %v9239_v2 = vld [vmem:[%s11440_s12 + $0xb14] sm:$0xf0]  ;;  %v7979_v14 = vld [vmem:[%s11440_s12 + $0x13c] sm:$0xf0] }
 0x1d4   : > { %v12218_v30 = vadd.f32 %v4560_v63, %v4533_v36  ;;  %v12223_v44 = vadd.f32 %v4514_v33, %v4487_v43  ;;  %v8522_v36 = vor.u32 %v10410_v37, %v8519_v32  ;;  %v10395_v33 = vld [vmem:[%s11440_s12 + $0x4c4] sm:$0xf]  ;;  %4942 = vmatpush.bf16.msrb.mxu0 %v9662_v57  ;;  %v9599_v37 = vld [vmem:[%s11440_s12 + $0xde4] sm:$0xf0]  ;;  %v8042_v32 = vor.u32 %v10290_v58, %v8039_v3  ;;  %v10380_v58 = vld [vmem:[%s11440_s12 + $0x44c] sm:$0xf] }
 0x1d5   : > { %v7024_v19 = vmax.f32 %v7009_v51, 0.0  ;;  %v4535_v54 = vpop.f32.mrf.mxu1  ;;  %v8462_v43 = vor.u32 %v10395_v33, %v8459_v21  ;;  %v9602_v28 = vor.u32 %v10680_v39, %v9599_v37  ;;  %v8399_v3 = vld [vmem:[%s11440_s12 + $0x484] sm:$0xf0]  ;;  %v10260_v33 = vld [vmem:[%s11440_s12 + $0x8c] sm:$0xf] }
 0x1d6   : > { %15491 = vst [vmem:[#allocation47_spill] sm:$0xff] %v12218_v30  ;;  %v4536_v50 = vadd.f32 %v4535_v54, %v12165_v1  ;;  %4712 = vmatmul.bf16.gmra.mxu3 %v11677_v35  ;;  %4740 = vmatmul.bf16.gmra.mxu0 %v11542_v48  ;;  %v10590_v1 = vld [vmem:[%s11440_s12 + $0xadc] sm:$0xf] }
 0x1d7   : > { %v12226_v22 = vadd.f32 0.001, %v7024_v19  ;;  %4889 = vmatpush.bf16.msra.mxu2 %v8522_v36  ;;  %4860 = vmatpush.bf16.msra.mxu1 %v8102_v18  ;;  %v9242_v63 = vor.u32 %v10590_v1, %v9239_v2  ;;  %v7982_v36 = vor.u32 %v10275_v13, %v7979_v14  ;;  %v7919_v1 = vld [vmem:[%s11440_s12 + $0xc4] sm:$0xf0] }
 0x1d8   : > { %4758 = vmatmul.bf16.gmra.mxu1 %v11547_v52  ;;  %4786 = vmatmul.bf16.gmra.mxu2 %v11549_v53 }
 0x1d9   : > { %10961 = vrsqrt.f32 %v12226_v22  ;;  %v12241_v51 = vpop.f32.mrf.mxu3  ;;  %4913 = vmatpush.bf16.msrb.mxu3 %v9242_v63  ;;  %4943 = vmatpush.bf16.msrb.mxu0 %v9602_v28  ;;  %v10245_v63 = vld [vmem:[%s11440_s12 + $0x14] sm:$0xf]  ;;  %vm7069_vm5 = vweird.f32 %v12226_v22 }
 0x1db   : > { %v4563_v29 = vpop.f32.mrf.mxu2  ;;  %v4519_v19 = vpop.f32.mrf.mxu0  ;;  %4890 = vmatpush.bf16.msra.mxu2 %v8462_v43  ;;  %4861 = vmatpush.bf16.msra.mxu1 %v8042_v32  ;;  %v10365_v43 = vld [vmem:[%s11440_s12 + $0x3d4] sm:$0xf]  ;;  %v8339_v32 = vld [vmem:[%s11440_s12 + $0x40c] sm:$0xf0] }
 0x1dc   : > { %v12245_v24 = vadd.f32 %v4563_v29, %v4536_v50  ;;  %v8402_v50 = vor.u32 %v10380_v58, %v8399_v3  ;;  %v8342_v14 = vor.u32 %v10365_v43, %v8339_v32  ;;  %v7859_v19 = vld [vmem:[%s11440_s12 + $0x4c] sm:$0xf0]  ;;  %v7208_v3 = vperm.slane %v12026_v56, 1 }
 0x1dd   : > { %v4537_v54 = vpop.f32.mrf.mxu1 }
 0x1de   : > { %15492 = vst [vmem:[#allocation48_spill] sm:$0xff] %v12245_v24  ;;  %v4538_v57 = vadd.f32 %v4537_v54, %v12179_v55  ;;  %v7922_v55 = vor.u32 %v10260_v33, %v7919_v1  ;;  %v10575_v1 = vld [vmem:[%s11440_s12 + $0xa64] sm:$0xf] }
 0x1df   : > { %v10962_v18 = vpop.eup %10961  ;;  %4891 = vmatpush.bf16.msra.mxu2 %v8402_v50  ;;  %4862 = vmatpush.bf16.msra.mxu1 %v7982_v36  ;;  %v7862_v36 = vor.u32 %v10245_v63, %v7859_v19  ;;  %v10560_v63 = vld [vmem:[%s11440_s12 + $0x9ec] sm:$0xf] }
 0x1e0   : > { %v7064_v21 = vmul.f32 %v10962_v18, %v12226_v22  ;;  %vm7070_vm4 = vweird.f32 %v10962_v18 }
 0x1e1   : > { %v4491_v39 = vpop.f32.mrf.mxu3  ;;  %vm7071_vm6 = vmor %vm7069_vm5, %vm7070_vm4 }
 0x1e2   : > { %v7065_v2 = vmul.f32 %v10962_v18, %v7064_v21 }
 0x1e3   : > { %v4565_v37 = vpop.f32.mrf.mxu2  ;;  %v4614_v13 = vpop.f32.mrf.mxu0  ;;  %4863 = vmatpush.bf16.msra.mxu1 %v7922_v55  ;;  %4892 = vmatpush.bf16.msra.mxu2 %v8342_v14 }
 0x1e4   : > { %v7066_v28 = vmul.f32 0.5, %v7065_v2  ;;  %v12256_v29 = vadd.f32 %v4565_v37, %v4538_v57 }
 0x1e5   : > { %v4540_v54 = vpop.f32.mrf.mxu1 }
 0x1e6   : > { %15493 = vst [vmem:[#allocation49_spill] sm:$0xff] %v12256_v29  ;;  %v7067_v27 = vsub.f32 1.5, %v7066_v28  ;;  %v4541_v58 = vadd.f32 %v4540_v54, %v12197_v4  ;;  %4809 = vmatmul.bf16.vlgmr.msra.gmra.mxu3 %v11589_v5  ;;  %4837 = vmatmul.bf16.vlgmr.msra.gmra.mxu0 %v11591_v6  ;;  %v9119_v28 = vld [vmem:[%s11440_s12 + $0xa24] sm:$0xf0] }
 0x1e7   : > { %4864 = vmatpush.bf16.msra.mxu1 %v7862_v36  ;;  %v9122_v14 = vor.u32 %v10560_v63, %v9119_v28  ;;  %v9539_v36 = vld [vmem:[%s11440_s12 + $0xd6c] sm:$0xf0]  ;;  %v10635_v28 = vld [vmem:[%s11440_s12 + $0xc44] sm:$0xf] }
 0x1e8   : > { %v7068_v33 = vmul.f32 %v10962_v18, %v7067_v27  ;;  %4763 = vmatmul.bf16.gmra.mxu1 %v11595_v9  ;;  %4791 = vmatmul.bf16.gmra.mxu2 %v11597_v10  ;;  %v9179_v27 = vld [vmem:[%s11440_s12 + $0xa9c] sm:$0xf0] }
 0x1e9   : > { %v4586_v57 = vpop.f32.mrf.mxu3  ;;  %v9182_v39 = vor.u32 %v10575_v1, %v9179_v27  ;;  %v10650_v27 = vld [vmem:[%s11440_s12 + $0xcbc] sm:$0xf] }
 0x1ea   : > { %v7072_v4 = vsel %vm7071_vm6, %v10962_v18, %v7068_v33  ;;  %v12266_v56 = vadd.f32 %v4614_v13, %v4586_v57  ;;  %vm7302_vm6 = vcmask 1044484  }
 0x1eb   : > { %v7238_v21 = vmul.f32 %v7208_v3, %v7072_v4  ;;  %v4568_v50 = vpop.f32.mrf.mxu2  ;;  %v4616_v22 = vpop.f32.mrf.mxu0  ;;  %4914 = vmatpush.bf16.msrb.mxu3 %v9182_v39 }
 0x1ec   : > { %v12270_v2 = vadd.f32 %v4568_v50, %v4541_v58 }
 0x1ed   : > { %v12272_v55 = vperm.slane %v7238_v21, 0  ;;  %v4542_v37 = vpop.f32.mrf.mxu1  ;;  %v7255_v18 = vmul.f32 %v7238_v21, %v12200_v60  ;;  %v9059_v21 = vld [vmem:[%s11440_s12 + $0x9ac] sm:$0xf0] }
 0x1ee   : > { %15494 = vst [vmem:[#allocation50_spill] sm:$0xff] %v12270_v2  ;;  %v4543_v43 = vadd.f32 %v4542_v37, %v12223_v44  ;;  %v10665_v44 = vld [vmem:[%s11440_s12 + $0xd34] sm:$0xf] }
 0x1ef   : > { %15495 = vst [vmem:[#allocation51_spill] sm:$0xff] %v12272_v55  ;;  %v12278_v32 = vmul.f32 %v12272_v55, %v12011_v15  ;;  %v12284_v13 = vmul.f32 %v12272_v55, %v12129_v26  ;;  %v7284_v19 = vrot.slane %v7255_v18, 7  ;;  %4915 = vmatpush.bf16.msrb.mxu3 %v9122_v14  ;;  %v10545_v15 = vld [vmem:[%s11440_s12 + $0x974] sm:$0xf]  ;;  %v4490_v26 = vadd.f32 %v12241_v51, %v12158_v38  ;;  %v8999_v51 = vld [vmem:[%s11440_s12 + $0x934] sm:$0xf0] }
 0x1f0   : > { %v9542_v57 = vor.u32 %v10665_v44, %v9539_v36  ;;  %v9062_v1 = vor.u32 %v10545_v15, %v9059_v21  ;;  %v9419_v14 = vld [vmem:[%s11440_s12 + $0xc7c] sm:$0xf0]  ;;  %v10500_v21 = vld [vmem:[%s11440_s12 + $0x80c] sm:$0xf] }
 0x1f1   : > { %15496 = vst [vmem:[#allocation52_spill] sm:$0xff] %v12278_v32  ;;  %v4588_v54 = vpop.f32.mrf.mxu3  ;;  %v12293_v3 = vsel %vm6472_vm0, %v12055_v31, %v7284_v19  ;;  %v10530_v31 = vld [vmem:[%s11440_s12 + $0x8fc] sm:$0xf]  ;;  %v4518_v39 = vadd.f32 %v12220_v17, %v4490_v26  ;;  %v10515_v19 = vld [vmem:[%s11440_s12 + $0x884] sm:$0xf]  ;;  %v9422_v44 = vor.u32 %v10635_v28, %v9419_v14 }
 0x1f2   : > { %15497 = vst [vmem:[#allocation53_spill] sm:$0xff] %v12284_v13  ;;  %v12286_v60 = vadd.f32 %v4616_v22, %v4588_v54  ;;  %4944 = vmatpush.bf16.msrb.mxu0 %v9542_v57  ;;  %v9479_v22 = vld [vmem:[%s11440_s12 + $0xcf4] sm:$0xf0]  ;;  %v9002_v37 = vor.u32 %v10530_v31, %v8999_v51  ;;  %v8939_v36 = vld [vmem:[%s11440_s12 + $0x8bc] sm:$0xf0] }
 0x1f3   : > { %v4570_v58 = vpop.f32.mrf.mxu2  ;;  %v4619_v4 = vpop.f32.mrf.mxu0  ;;  %v9482_v38 = vor.u32 %v10650_v27, %v9479_v22  ;;  %4916 = vmatpush.bf16.msrb.mxu3 %v9062_v1  ;;  %v8942_v26 = vor.u32 %v10515_v19, %v8939_v36  ;;  %v10620_v57 = vld [vmem:[%s11440_s12 + $0xbcc] sm:$0xf]  ;;  %v8879_v1 = vld [vmem:[%s11440_s12 + $0x844] sm:$0xf0]  ;;  %v9299_v51 = vld [vmem:[%s11440_s12 + $0xb8c] sm:$0xf0] }
 0x1f4   : > { %v12297_v33 = vadd.f32 %v4570_v58, %v4543_v43  ;;  %v8882_v27 = vor.u32 %v10500_v21, %v8879_v1  ;;  %v8225_v21 = vld [vmem:[%s11440_s12 + $0x2e8] sm:$0xf]  ;;  %v8885_v32 = vld [vmem:[%s11440_s12 + $0x810] sm:$0xf]  ;;  %v10276_v55 = vld [vmem:[%s11440_s12 + $0x10c] sm:$0xf] }
 0x1f5   : > { %v4545_v50 = vpop.f32.mrf.mxu1 }
 0x1f6   : > { %15498 = vst [vmem:[#allocation54_spill] sm:$0xff] %v12297_v33  ;;  %4814 = vmatmul.bf16.gmra.mxu3 %v11623_v7  ;;  %4842 = vmatmul.bf16.gmra.mxu0 %v11625_v8  ;;  %v4546_v18 = vadd.f32 %v4545_v50, %v4518_v39 }
 0x1f7   : > { %4945 = vmatpush.bf16.msrb.mxu0 %v9482_v38  ;;  %4917 = vmatpush.bf16.msrb.mxu3 %v9002_v37  ;;  %v10605_v38 = vld [vmem:[%s11440_s12 + $0xb54] sm:$0xf] }
 0x1f8   : > { %4768 = vmatmul.bf16.gmra.mxu1 %v11627_v11  ;;  %4796 = vmatmul.bf16.gmra.mxu2 %v11629_v12  ;;  %v10485_v37 = vld [vmem:[%s11440_s12 + $0x794] sm:$0xf] }
 0x1f9   : > { %v4591_v43 = vpop.f32.mrf.mxu3 }
 0x1fa   : > { %v12309_v17 = vadd.f32 %v4619_v4, %v4591_v43  ;;  %v9359_v4 = vld [vmem:[%s11440_s12 + $0xc04] sm:$0xf0]  ;;  %v9302_v43 = vor.u32 %v10605_v38, %v9299_v51  ;;  %v10139_v38 = vld [vmem:[%s11440_s12 + $0x121c] sm:$0xf0] }
 0x1fb   : > { %v4573_v63 = vpop.f32.mrf.mxu2  ;;  %v4621_v58 = vpop.f32.mrf.mxu0  ;;  %4946 = vmatpush.bf16.msrb.mxu0 %v9422_v44  ;;  %v9362_v50 = vor.u32 %v10620_v57, %v9359_v4  ;;  %4918 = vmatpush.bf16.msrb.mxu3 %v8942_v26  ;;  %v10830_v44 = vld [vmem:[%s11440_s12 + $0x125c] sm:$0xf] }
 0x1fc   : > { %v4574_v54 = vadd.f32 %v4573_v63, %v4546_v18  ;;  %v8819_v63 = vld [vmem:[%s11440_s12 + $0x7cc] sm:$0xf0] }
 0x1fd   : > { %v4547_v15 = vpop.f32.mrf.mxu1  ;;  %v8822_v14 = vor.u32 %v10485_v37, %v8819_v63  ;;  %v10328_v63 = vld [vmem:[%s11440_s12 + $0x2a8] sm:$0xf0] }
 0x1fe   : > { %6349 = vst [vmem:[%s11916_s25 + $0x2e0] sm:$0x1] %v4574_v54  ;;  %v8285_v54 = vld [vmem:[%s11440_s12 + $0x360] sm:$0xf]  ;;  %v10199_v15 = vld [vmem:[%s11440_s12 + $0x1294] sm:$0xf0] }
 0x1ff   : > { %4947 = vmatpush.bf16.msrb.mxu0 %v9362_v50  ;;  %4919 = vmatpush.bf16.msrb.mxu3 %v8882_v27  ;;  %v10202_v26 = vor.u32 %v10830_v44, %v10199_v15  ;;  %v10343_v50 = vld [vmem:[%s11440_s12 + $0x320] sm:$0xf0]  ;;  %v8105_v15 = vld [vmem:[%s11440_s12 + $0x1f8] sm:$0xf] }
 0x201   : > { %v4593_v22 = vpop.f32.mrf.mxu3  ;;  %4969 = vmatpush.bf16.msrb.mxu1 %v10202_v26 }
 0x202   : > { %v12320_v39 = vadd.f32 %v4621_v58, %v4593_v22  ;;  %v10358_v58 = vld [vmem:[%s11440_s12 + $0x398] sm:$0xf0]  ;;  %v8226_v22 = vor.u32 %v10343_v50, %v8225_v21  ;;  %v10019_v21 = vld [vmem:[%s11440_s12 + $0x112c] sm:$0xf0] }
 0x203   : > { %v4575_v31 = vpop.f32.mrf.mxu2  ;;  %v4624_v18 = vpop.f32.mrf.mxu0  ;;  %4948 = vmatpush.bf16.msrb.mxu0 %v9302_v43  ;;  %v8286_v36 = vor.u32 %v10358_v58, %v8285_v54  ;;  %4920 = vmatpush.bf16.msrb.mxu3 %v8822_v14  ;;  %v10800_v14 = vld [vmem:[%s11440_s12 + $0x116c] sm:$0xf] }
 0x204   : > { %v10815_v31 = vld [vmem:[%s11440_s12 + $0x11e4] sm:$0xf] }
 0x205   : > { %v4642_v28 = vpop.f32.mrf.mxu1  ;;  %4997 = vmatpush.bf16.msrb.mxu2 %v8286_v36  ;;  %v10142_v37 = vor.u32 %v10815_v31, %v10139_v38  ;;  %v9245_v38 = vld [vmem:[%s11440_s12 + $0xae0] sm:$0xf] }
 0x206   : > { %v4643_v19 = vadd.f32 %v4642_v28, %v12266_v56  ;;  %4819 = vmatmul.bf16.gmra.mxu3 %v11653_v61  ;;  %4847 = vmatmul.bf16.gmra.mxu0 %v11655_v62 }
 0x207   : > { %4970 = vmatpush.bf16.msrb.mxu1 %v10142_v37  ;;  %v8045_v37 = vld [vmem:[%s11440_s12 + $0x180] sm:$0xf] }
 0x208   : > { %4865 = vmatmul.bf16.vlgmr.msra.gmra.mxu1 %v11501_v41  ;;  %4893 = vmatmul.bf16.vlgmr.msra.gmra.mxu2 %v11508_v46 }
 0x209   : > { %v4596_v56 = vpop.f32.mrf.mxu3  ;;  %4998 = vmatpush.bf16.msrb.mxu2 %v8226_v22 }
 0x20a   : > { %v12335_v57 = vadd.f32 %v4624_v18, %v4596_v56  ;;  %v8165_v18 = vld [vmem:[%s11440_s12 + $0x270] sm:$0xf] }
 0x20b   : > { %v4670_v4 = vpop.f32.mrf.mxu2  ;;  %v4626_v27 = vpop.f32.mrf.mxu0  ;;  %v8166_v28 = vor.u32 %v10328_v63, %v8165_v18  ;;  %v10298_v18 = vld [vmem:[%s11440_s12 + $0x1b8] sm:$0xf0]  ;;  %v9185_v63 = vld [vmem:[%s11440_s12 + $0xa68] sm:$0xf] }
 0x20c   : > { %v12339_v1 = vadd.f32 %v4670_v4, %v4643_v19  ;;  %v10079_v19 = vld [vmem:[%s11440_s12 + $0x11a4] sm:$0xf0]  ;;  %v10785_v4 = vld [vmem:[%s11440_s12 + $0x10f4] sm:$0xf] }
 0x20d   : > { %v4644_v51 = vpop.f32.mrf.mxu1  ;;  %v10082_v54 = vor.u32 %v10800_v14, %v10079_v19  ;;  %4999 = vmatpush.bf16.msrb.mxu2 %v8166_v28  ;;  %v10022_v31 = vor.u32 %v10785_v4, %v10019_v21  ;;  %v10583_v28 = vld [vmem:[%s11440_s12 + $0xaa0] sm:$0xf0]  ;;  %v10770_v14 = vld [vmem:[%s11440_s12 + $0x107c] sm:$0xf]  ;;  %v9959_v19 = vld [vmem:[%s11440_s12 + $0x10b4] sm:$0xf0] }
 0x20e   : > { %v4645_v43 = vadd.f32 %v4644_v51, %v12286_v60  ;;  %v10313_v60 = vld [vmem:[%s11440_s12 + $0x230] sm:$0xf0]  ;;  %v10598_v51 = vld [vmem:[%s11440_s12 + $0xb18] sm:$0xf0] }
 0x20f   : > { %4971 = vmatpush.bf16.msrb.mxu1 %v10082_v54  ;;  %v8106_v56 = vor.u32 %v10313_v60, %v8105_v15  ;;  %v9186_v54 = vor.u32 %v10583_v28, %v9185_v63  ;;  %v8765_v15 = vld [vmem:[%s11440_s12 + $0x720] sm:$0xf]  ;;  %v9962_v60 = vor.u32 %v10770_v14, %v9959_v19  ;;  %v10478_v21 = vld [vmem:[%s11440_s12 + $0x758] sm:$0xf0] }
 0x211   : > { %v4598_v58 = vpop.f32.mrf.mxu3  ;;  %5000 = vmatpush.bf16.msrb.mxu2 %v8106_v56 }
 0x212   : > { %v12348_v44 = vadd.f32 %v4626_v27, %v4598_v58  ;;  %v7985_v58 = vld [vmem:[%s11440_s12 + $0x108] sm:$0xf] }
 0x213   : > { %v4672_v36 = vpop.f32.mrf.mxu2  ;;  %v12356_v50 = vpop.f32.mrf.mxu0  ;;  %4972 = vmatpush.bf16.msrb.mxu1 %v10022_v31  ;;  %v10568_v31 = vld [vmem:[%s11440_s12 + $0xa28] sm:$0xf0] }
 0x214   : > { %v12352_v26 = vadd.f32 %v4672_v36, %v4645_v43  ;;  %v9246_v43 = vor.u32 %v10598_v51, %v9245_v38  ;;  %v10283_v36 = vld [vmem:[%s11440_s12 + $0x140] sm:$0xf0]  ;;  %v8766_v38 = vor.u32 %v10478_v21, %v8765_v15  ;;  %v8705_v15 = vld [vmem:[%s11440_s12 + $0x6a8] sm:$0xf]  ;;  %v9065_v21 = vld [vmem:[%s11440_s12 + $0x978] sm:$0xf] }
 0x215   : > { %v4647_v22 = vpop.f32.mrf.mxu1  ;;  %v7986_v4 = vor.u32 %v10283_v36, %v7985_v58  ;;  %v7925_v58 = vld [vmem:[%s11440_s12 + $0x90] sm:$0xf]  ;;  %v10268_v36 = vld [vmem:[%s11440_s12 + $0xc8] sm:$0xf0] }
 0x216   : > { %v4648_v27 = vadd.f32 %v4647_v22, %v12309_v17  ;;  %4824 = vmatmul.bf16.gmra.mxu3 %v11675_v34  ;;  %4852 = vmatmul.bf16.gmra.mxu0 %v11677_v35  ;;  %v8046_v17 = vor.u32 %v10298_v18, %v8045_v37  ;;  %v9125_v22 = vld [vmem:[%s11440_s12 + $0x9f0] sm:$0xf]  ;;  %v10755_v37 = vld [vmem:[%s11440_s12 + $0x1004] sm:$0xf] }
 0x217   : > { %5053 = vmatpush.bf16.msra.mxu0 %v9246_v43  ;;  %4973 = vmatpush.bf16.msrb.mxu1 %v9962_v60  ;;  %v9899_v43 = vld [vmem:[%s11440_s12 + $0x103c] sm:$0xf0]  ;;  %v7926_v60 = vor.u32 %v10268_v36, %v7925_v58 }
 0x218   : > { %4870 = vmatmul.bf16.gmra.mxu1 %v11540_v45  ;;  %4898 = vmatmul.bf16.gmra.mxu2 %v11547_v52  ;;  %v9902_v14 = vor.u32 %v10755_v37, %v9899_v43  ;;  %v7865_v43 = vld [vmem:[%s11440_s12 + $0x18] sm:$0xf] }
 0x219   : > { %v12374_v56 = vpop.f32.mrf.mxu3  ;;  %5001 = vmatpush.bf16.msrb.mxu2 %v8046_v17  ;;  %5025 = vmatpush.bf16.msra.mxu3 %v8766_v38  ;;  %v9126_v17 = vor.u32 %v10568_v31, %v9125_v22  ;;  %v10740_v22 = vld [vmem:[%s11440_s12 + $0xf8c] sm:$0xf]  ;;  %v9839_v31 = vld [vmem:[%s11440_s12 + $0xfc4] sm:$0xf0] }
 0x21b   : > { %v4675_v51 = vpop.f32.mrf.mxu2  ;;  %v4631_v63 = vpop.f32.mrf.mxu0  ;;  %5054 = vmatpush.bf16.msra.mxu0 %v9186_v54  ;;  %4974 = vmatpush.bf16.msrb.mxu1 %v9902_v14 }
 0x21c   : > { %v12381_v18 = vadd.f32 %v4675_v51, %v4648_v27  ;;  %v10463_v27 = vld [vmem:[%s11440_s12 + $0x6e0] sm:$0xf0]  ;;  %v10553_v51 = vld [vmem:[%s11440_s12 + $0x9b0] sm:$0xf0] }
 0x21d   : > { %v4649_v28 = vpop.f32.mrf.mxu1  ;;  %5002 = vmatpush.bf16.msrb.mxu2 %v7986_v4  ;;  %v8706_v54 = vor.u32 %v10463_v27, %v8705_v15  ;;  %v9066_v38 = vor.u32 %v10553_v51, %v9065_v21  ;;  %v10253_v63 = vld [vmem:[%s11440_s12 + $0x50] sm:$0xf0]  ;;  %v9779_v15 = vld [vmem:[%s11440_s12 + $0xf4c] sm:$0xf0]  ;;  %v10448_v51 = vld [vmem:[%s11440_s12 + $0x668] sm:$0xf0] }
 0x21e   : > { %v4650_v19 = vadd.f32 %v4649_v28, %v12320_v39  ;;  %v9842_v39 = vor.u32 %v10740_v22, %v9839_v31  ;;  %v10725_v28 = vld [vmem:[%s11440_s12 + $0xf14] sm:$0xf]  ;;  %v7866_v36 = vor.u32 %v10253_v63, %v7865_v43  ;;  %v8645_v21 = vld [vmem:[%s11440_s12 + $0x630] sm:$0xf] }
 0x21f   : > { %5055 = vmatpush.bf16.msra.mxu0 %v9126_v17  ;;  %5026 = vmatpush.bf16.msra.mxu3 %v8706_v54  ;;  %v9782_v27 = vor.u32 %v10725_v28, %v9779_v15  ;;  %v9005_v54 = vld [vmem:[%s11440_s12 + $0x900] sm:$0xf] }
 0x220   : > { %4975 = vmatpush.bf16.msrb.mxu1 %v9842_v39  ;;  %v10205_v28 = vld [vmem:[%s11440_s12 + $0x1260] sm:$0xf] }
 0x221   : > { %v4603_v37 = vpop.f32.mrf.mxu3  ;;  %5003 = vmatpush.bf16.msrb.mxu2 %v7926_v60 }
 0x223   : > { %v4677_v4 = vpop.f32.mrf.mxu2  ;;  %v12397_v17 = vpop.f32.mrf.mxu0  ;;  %5056 = vmatpush.bf16.msra.mxu0 %v9066_v38 }
 0x224   : > { %v12395_v14 = vadd.f32 %v4677_v4, %v4650_v19  ;;  %v8646_v19 = vor.u32 %v10448_v51, %v8645_v21  ;;  %4976 = vmatpush.bf16.msrb.mxu1 %v9782_v27  ;;  %v10433_v27 = vld [vmem:[%s11440_s12 + $0x5f0] sm:$0xf0]  ;;  %v8945_v21 = vld [vmem:[%s11440_s12 + $0x888] sm:$0xf]  ;;  %v10523_v51 = vld [vmem:[%s11440_s12 + $0x8c0] sm:$0xf0] }
 0x225   : > { %v4652_v58 = vpop.f32.mrf.mxu1  ;;  %5004 = vmatpush.bf16.msrb.mxu2 %v7866_v36  ;;  %v8585_v36 = vld [vmem:[%s11440_s12 + $0x5b8] sm:$0xf] }
 0x226   : > { %v4653_v60 = vadd.f32 %v4652_v58, %v12335_v57  ;;  %4921 = vmatmul.bf16.vlgmr.msrb.gmra.mxu3 %v11510_v47  ;;  %4949 = vmatmul.bf16.vlgmr.msrb.gmra.mxu0 %v11589_v5  ;;  %v10538_v57 = vld [vmem:[%s11440_s12 + $0x938] sm:$0xf0] }
 0x227   : > { %5027 = vmatpush.bf16.msra.mxu3 %v8646_v19  ;;  %v9006_v22 = vor.u32 %v10538_v57, %v9005_v54  ;;  %v10838_v58 = vld [vmem:[%s11440_s12 + $0x1298] sm:$0xf0]  ;;  %v8586_v19 = vor.u32 %v10433_v27, %v8585_v36  ;;  %v8946_v54 = vor.u32 %v10523_v51, %v8945_v21  ;;  %v6665_v57 = vmul.f32 %v12193_v23, %v12193_v23 }
 0x228   : > { %4875 = vmatmul.bf16.gmra.mxu1 %v11503_v42  ;;  %4903 = vmatmul.bf16.gmra.mxu2 %v11595_v9  ;;  %v10206_v15 = vor.u32 %v10838_v58, %v10205_v28  ;;  %v6710_v36 = vmul.f32 %v12256_v29, %v12256_v29 }
 0x229   : > { %v4698_v38 = vpop.f32.mrf.mxu3  ;;  %5057 = vmatpush.bf16.msra.mxu0 %v9006_v22  ;;  %v6695_v22 = vmul.f32 %v12245_v24, %v12245_v24 }
 0x22a   : > { %v12410_v31 = vadd.f32 %v4698_v38, %v12339_v1  ;;  %v6494_v1 = vadd.f32 %v12218_v30, %v12193_v23  ;;  %5109 = vmatpush.bf16.msra.mxu2 %v10206_v15  ;;  %v6454_v15 = vld [vmem:[%s11916_s25 + $0x2e0] sm:$0x1] }
 0x22b   : > { %v4680_v37 = vpop.f32.mrf.mxu2  ;;  %v12414_v43 = vpop.f32.mrf.mxu0  ;;  %5028 = vmatpush.bf16.msra.mxu3 %v8586_v19  ;;  %v6725_v19 = vmul.f32 %v12270_v2, %v12270_v2 }
 0x22c   : > { %15499 = vst [vmem:[#allocation55_spill] sm:$0xff] %v12410_v31  ;;  %v12412_v39 = vadd.f32 %v4680_v37, %v4653_v60  ;;  %v6680_v60 = vmul.f32 %v12218_v30, %v12218_v30  ;;  %v6495_v38 = vadd.f32 %v6494_v1, %v12245_v24  ;;  %v10718_v30 = vld [vmem:[%s11440_s12 + $0xed8] sm:$0xf0] }
 0x22d   : > { %v4654_v4 = vpop.f32.mrf.mxu1  ;;  %5058 = vmatpush.bf16.msra.mxu0 %v8946_v54  ;;  %v10823_v54 = vld [vmem:[%s11440_s12 + $0x1220] sm:$0xf0] }
 0x22e   : > { %v4655_v63 = vadd.f32 %v4654_v4, %v12348_v44  ;;  %v6794_v28 = vadd.f32 %v6680_v60, %v6665_v57  ;;  %v6496_v58 = vadd.f32 %v6495_v38, %v12256_v29  ;;  %v10145_v60 = vld [vmem:[%s11440_s12 + $0x11e8] sm:$0xf]  ;;  %v8525_v57 = vld [vmem:[%s11440_s12 + $0x540] sm:$0xf]  ;;  %v6755_v38 = vmul.f32 %v6454_v15, %v6454_v15 }
 0x230   : > { %v6497_v1 = vadd.f32 %v6496_v58, %v12270_v2  ;;  %v6740_v58 = vmul.f32 %v12297_v33, %v12297_v33  ;;  %v9725_v2 = vld [vmem:[%s11440_s12 + $0xea0] sm:$0xf] }
 0x231   : > { %v4700_v44 = vpop.f32.mrf.mxu3 }
 0x232   : > { %v12433_v37 = vadd.f32 %v4700_v44, %v12352_v26  ;;  %v6795_v26 = vadd.f32 %v6794_v28, %v6695_v22  ;;  %v6499_v44 = vsel %vm6472_vm0, %v6454_v15, 0.0  ;;  %v10418_v22 = vld [vmem:[%s11440_s12 + $0x578] sm:$0xf0]  ;;  %v6498_v28 = vadd.f32 %v6497_v1, %v12297_v33  ;;  %v10508_v15 = vld [vmem:[%s11440_s12 + $0x848] sm:$0xf0] }
 0x233   : > { %v4682_v4 = vpop.f32.mrf.mxu2  ;;  %v12441_v21 = vpop.f32.mrf.mxu0  ;;  %v8526_v13 = vor.u32 %v10418_v22, %v8525_v57  ;;  %v8886_v24 = vor.u32 %v10508_v15, %v8885_v32  ;;  %v6799_v1 = vsel %vm6472_vm0, %v6755_v38, 0.0  ;;  %v8465_v22 = vld [vmem:[%s11440_s12 + $0x4c8] sm:$0xf]  ;;  %v10403_v33 = vld [vmem:[%s11440_s12 + $0x500] sm:$0xf0] }
 0x234   : > { %15500 = vst [vmem:[#allocation56_spill] sm:$0xff] %v12433_v37  ;;  %v12443_v51 = vadd.f32 %v4682_v4, %v4655_v63  ;;  %v10146_v63 = vor.u32 %v10823_v54, %v10145_v60  ;;  %v6796_v4 = vadd.f32 %v6795_v26, %v6710_v36  ;;  %v6500_v54 = vadd.f32 %v6499_v44, %v6498_v28  ;;  %v10493_v15 = vld [vmem:[%s11440_s12 + $0x7d0] sm:$0xf0] }
 0x235   : > { %v12439_v27 = vpop.f32.mrf.mxu1  ;;  %5029 = vmatpush.bf16.msra.mxu3 %v8526_v13  ;;  %v9726_v26 = vor.u32 %v10718_v30, %v9725_v2  ;;  %5059 = vmatpush.bf16.msra.mxu0 %v8886_v24  ;;  %v8405_v30 = vld [vmem:[%s11440_s12 + $0x450] sm:$0xf]  ;;  %v10388_v2 = vld [vmem:[%s11440_s12 + $0x488] sm:$0xf0] }
 0x236   : > { %4926 = vmatmul.bf16.gmra.mxu3 %v11549_v53  ;;  %4954 = vmatmul.bf16.gmra.mxu0 %v11623_v7  ;;  %v6797_v60 = vadd.f32 %v6796_v4, %v6725_v19  ;;  %v8406_v19 = vor.u32 %v10388_v2, %v8405_v30  ;;  %v9665_v2 = vld [vmem:[%s11440_s12 + $0xe28] sm:$0xf] }
 0x237   : > { %5110 = vmatpush.bf16.msra.mxu2 %v10146_v63  ;;  %5081 = vmatpush.bf16.msra.mxu1 %v9726_v26 }
 0x238   : > { %4880 = vmatmul.bf16.gmra.mxu1 %v11542_v48  ;;  %4908 = vmatmul.bf16.gmra.mxu2 %v11627_v11  ;;  %v6798_v23 = vadd.f32 %v6797_v60, %v6740_v58  ;;  %v8825_v58 = vld [vmem:[%s11440_s12 + $0x798] sm:$0xf] }
 0x239   : > { %v4703_v29 = vpop.f32.mrf.mxu3  ;;  %v8345_v60 = vld [vmem:[%s11440_s12 + $0x3d8] sm:$0xf] }
 0x23a   : > { %v12465_v36 = vadd.f32 %v4703_v29, %v12381_v18  ;;  %v8466_v29 = vor.u32 %v10403_v33, %v8465_v22  ;;  %v6501_v18 = vrot.slane %v6500_v54, 4  ;;  %v6800_v13 = vadd.f32 %v6799_v1, %v6798_v23  ;;  %v10373_v1 = vld [vmem:[%s11440_s12 + $0x410] sm:$0xf0] }
 0x23b   : > { %v12468_v57 = vpop.f32.mrf.mxu2  ;;  %v12472_v32 = vpop.f32.mrf.mxu0  ;;  %v8826_v23 = vor.u32 %v10493_v15, %v8825_v58 }
 0x23c   : > { %15501 = vst [vmem:[#allocation57_spill] sm:$0xff] %v12465_v36  ;;  %5030 = vmatpush.bf16.msra.mxu3 %v8466_v29  ;;  %v6502_v24 = vadd.f32 %v6501_v18, %v6500_v54  ;;  %v6801_v38 = vrot.slane %v6800_v13, 4 }
 0x23d   : > { %v4659_v63 = vpop.f32.mrf.mxu1  ;;  %5060 = vmatpush.bf16.msra.mxu0 %v8826_v23  ;;  %v9605_v23 = vld [vmem:[%s11440_s12 + $0xdb0] sm:$0xf] }
 0x23e   : > { %v8346_v63 = vor.u32 %v10373_v1, %v8345_v60  ;;  %v6503_v54 = vrot.slane %v6502_v24, 2  ;;  %v6802_v29 = vadd.f32 %v6801_v38, %v6800_v13 }
 0x240   : > { %5031 = vmatpush.bf16.msra.mxu3 %v8406_v19  ;;  %v6504_v18 = vadd.f32 %v6503_v54, %v6502_v24  ;;  %v10703_v19 = vld [vmem:[%s11440_s12 + $0xe60] sm:$0xf0] }
 0x241   : > { %v4705_v44 = vpop.f32.mrf.mxu3  ;;  %v9666_v58 = vor.u32 %v10703_v19, %v9665_v2  ;;  %v10025_v19 = vld [vmem:[%s11440_s12 + $0x10f8] sm:$0xf] }
 0x242   : > { %v12477_v4 = vadd.f32 %v4705_v44, %v12395_v14  ;;  %v6505_v60 = vrot.slane %v6504_v18, 1 }
 0x243   : > { %v4687_v28 = vpop.f32.mrf.mxu2  ;;  %v12482_v26 = vpop.f32.mrf.mxu0  ;;  %5082 = vmatpush.bf16.msra.mxu1 %v9666_v58 }
 0x244   : > { %15502 = vst [vmem:[#allocation58_spill] sm:$0xff] %v12477_v4  ;;  %5032 = vmatpush.bf16.msra.mxu3 %v8346_v63  ;;  %v10688_v63 = vld [vmem:[%s11440_s12 + $0xde8] sm:$0xf0] }
 0x245   : > { %v4754_v33 = vpop.f32.mrf.mxu1 }
 0x246   : > { %v4755_v22 = vadd.f32 %v4754_v33, %v12397_v17  ;;  %4931 = vmatmul.bf16.gmra.mxu3 %v11597_v10  ;;  %4959 = vmatmul.bf16.gmra.mxu0 %v11653_v61  ;;  %v6803_v17 = vrot.slane %v6802_v29, 2  ;;  %v10808_v33 = vld [vmem:[%s11440_s12 + $0x11a8] sm:$0xf0] }
 0x248   : > { %4977 = vmatmul.bf16.vlgmr.msrb.gmra.mxu1 %v11591_v6  ;;  %5005 = vmatmul.bf16.vlgmr.msrb.gmra.mxu2 %v11501_v41  ;;  %v6804_v24 = vadd.f32 %v6803_v17, %v6802_v29  ;;  %v9545_v29 = vld [vmem:[%s11440_s12 + $0xd38] sm:$0xf]  ;;  %v4630_v17 = vadd.f32 %v12356_v50, %v12374_v56  ;;  %v9965_v50 = vld [vmem:[%s11440_s12 + $0x1080] sm:$0xf]  ;;  %v10778_v56 = vld [vmem:[%s11440_s12 + $0x10b8] sm:$0xf0] }
 0x249   : > { %v4708_v14 = vpop.f32.mrf.mxu3 }
 0x24a   : > { %v12491_v30 = vadd.f32 %v4708_v14, %v12412_v39  ;;  %v10085_v39 = vld [vmem:[%s11440_s12 + $0x1170] sm:$0xf]  ;;  %v6506_v14 = vadd.f32 %v6505_v60, %v6504_v18 }
 0x24b   : > { %v4782_v13 = vpop.f32.mrf.mxu2  ;;  %v12497_v38 = vpop.f32.mrf.mxu0  ;;  %v10086_v1 = vor.u32 %v10808_v33, %v10085_v39 }
 0x24c   : > { %15503 = vst [vmem:[#allocation59_spill] sm:$0xff] %v12491_v30  ;;  %v12495_v44 = vadd.f32 %v4782_v13, %v4755_v22  ;;  %v9606_v22 = vor.u32 %v10688_v63, %v9605_v23  ;;  %v6805_v13 = vrot.slane %v6804_v24, 1  ;;  %v12518_v63 = vmul.f32 0.020408163, %v6506_v14 }
 0x24d   : > { %v4756_v28 = vpop.f32.mrf.mxu1  ;;  %5111 = vmatpush.bf16.msra.mxu2 %v10086_v1 }
 0x24e   : > { %v4757_v15 = vadd.f32 %v4756_v28, %v12414_v43  ;;  %v10793_v28 = vld [vmem:[%s11440_s12 + $0x1130] sm:$0xf0]  ;;  %5083 = vmatpush.bf16.msra.mxu1 %v9606_v22  ;;  %v6806_v1 = vadd.f32 %v6805_v13, %v6804_v24  ;;  %v10658_v22 = vld [vmem:[%s11440_s12 + $0xcf8] sm:$0xf0] }
 0x24f   : > { %v10026_v60 = vor.u32 %v10793_v28, %v10025_v19  ;;  %v6995_v19 = vmul.f32 %v12518_v63, %v12518_v63  ;;  %v6666_v28 = vmul.f32 %v12410_v31, %v12410_v31 }
 0x251   : > { %v4710_v54 = vpop.f32.mrf.mxu3  ;;  %5112 = vmatpush.bf16.msra.mxu2 %v10026_v60  ;;  %v9905_v60 = vld [vmem:[%s11440_s12 + $0x1008] sm:$0xf] }
 0x252   : > { %v12505_v2 = vadd.f32 %v4710_v54, %v12443_v51  ;;  %v10673_v51 = vld [vmem:[%s11440_s12 + $0xd70] sm:$0xf0]  ;;  %v4658_v54 = vadd.f32 %v12439_v27, %v4630_v17  ;;  %v9966_v27 = vor.u32 %v10778_v56, %v9965_v50  ;;  %v6696_v17 = vmul.f32 %v12465_v36, %v12465_v36 }
 0x253   : > { %v4784_v43 = vpop.f32.mrf.mxu2  ;;  %v12514_v39 = vpop.f32.mrf.mxu0  ;;  %v9546_v23 = vor.u32 %v10673_v51, %v9545_v29  ;;  %v10763_v51 = vld [vmem:[%s11440_s12 + $0x1040] sm:$0xf0] }
 0x254   : > { %15504 = vst [vmem:[#allocation60_spill] sm:$0xff] %v12505_v2  ;;  %v12512_v58 = vadd.f32 %v4784_v43, %v4757_v15  ;;  %v9485_v15 = vld [vmem:[%s11440_s12 + $0xcc0] sm:$0xf]  ;;  %v4686_v24 = vadd.f32 %v12468_v57, %v4658_v54  ;;  %v6980_v43 = vmul.f32 0.020408163, %v6806_v1  ;;  %v6507_v57 = vadd.f32 %v12433_v37, %v12410_v31 }
 0x255   : > { %v4759_v18 = vpop.f32.mrf.mxu1  ;;  %5084 = vmatpush.bf16.msra.mxu1 %v9546_v23  ;;  %v9486_v13 = vor.u32 %v10658_v22, %v9485_v15  ;;  %5113 = vmatpush.bf16.msra.mxu2 %v9966_v27  ;;  %v9425_v23 = vld [vmem:[%s11440_s12 + $0xc48] sm:$0xf]  ;;  %v9906_v15 = vor.u32 %v10763_v51, %v9905_v60  ;;  %v6711_v22 = vmul.f32 %v12477_v4, %v12477_v4  ;;  %v10748_v60 = vld [vmem:[%s11440_s12 + $0xfc8] sm:$0xf0]  ;;  %v9365_v51 = vld [vmem:[%s11440_s12 + $0xbd0] sm:$0xf] }
 0x256   : > { %v4760_v33 = vadd.f32 %v4759_v18, %v12441_v21  ;;  %4936 = vmatmul.bf16.gmra.mxu3 %v11629_v12  ;;  %4964 = vmatmul.bf16.gmra.mxu0 %v11675_v34  ;;  %v6681_v21 = vmul.f32 %v12433_v37, %v12433_v37  ;;  %v6508_v27 = vadd.f32 %v6507_v57, %v12465_v36  ;;  %v9247_v37 = vld [vmem:[%s11440_s12 + $0xb1c] sm:$0xf0] }
 0x258   : > { %4982 = vmatmul.bf16.gmra.mxu1 %v11625_v8  ;;  %5010 = vmatmul.bf16.gmra.mxu2 %v11540_v45  ;;  %v6807_v1 = vadd.f32 %v6681_v21, %v6666_v28  ;;  %v7010_v28 = vsub.f32 %v6980_v43, %v6995_v19  ;;  %v6741_v43 = vmul.f32 %v12505_v2, %v12505_v2 }
 0x259   : > { %v4713_v14 = vpop.f32.mrf.mxu3  ;;  %5085 = vmatpush.bf16.msra.mxu1 %v9486_v13  ;;  %5114 = vmatpush.bf16.msra.mxu2 %v9906_v15  ;;  %v9845_v13 = vld [vmem:[%s11440_s12 + $0xf90] sm:$0xf] }
 0x25a   : > { %v4714_v29 = vadd.f32 %v4713_v14, %v4686_v24  ;;  %v10643_v24 = vld [vmem:[%s11440_s12 + $0xc80] sm:$0xf0]  ;;  %v9846_v57 = vor.u32 %v10748_v60, %v9845_v13 }
 0x25b   : > { %v4787_v18 = vpop.f32.mrf.mxu2  ;;  %v4743_v50 = vpop.f32.mrf.mxu0  ;;  %v9426_v21 = vor.u32 %v10643_v24, %v9425_v23  ;;  %v7025_v23 = vmax.f32 %v7010_v28, 0.0  ;;  %v9305_v28 = vld [vmem:[%s11440_s12 + $0xb58] sm:$0xf] }
 0x25c   : > { %6350 = vst [vmem:[%s11916_s25 + $0x2e8] sm:$0x1] %v4714_v29  ;;  %v12544_v54 = vadd.f32 %v4787_v18, %v4760_v33  ;;  %v6808_v33 = vadd.f32 %v6807_v1, %v6696_v17  ;;  %v6509_v29 = vadd.f32 %v6508_v27, %v12477_v4  ;;  %v6726_v18 = vmul.f32 %v12491_v30, %v12491_v30  ;;  %v10628_v50 = vld [vmem:[%s11440_s12 + $0xc08] sm:$0xf0]  ;;  %v9785_v27 = vld [vmem:[%s11440_s12 + $0xf18] sm:$0xf] }
 0x25d   : > { %v4761_v56 = vpop.f32.mrf.mxu1  ;;  %5086 = vmatpush.bf16.msra.mxu1 %v9426_v21  ;;  %v9366_v17 = vor.u32 %v10628_v50, %v9365_v51  ;;  %5115 = vmatpush.bf16.msra.mxu2 %v9846_v57  ;;  %v10733_v21 = vld [vmem:[%s11440_s12 + $0xf50] sm:$0xf0] }
 0x25e   : > { %v4762_v14 = vadd.f32 %v4761_v56, %v12472_v32  ;;  %v6809_v36 = vadd.f32 %v6808_v33, %v6711_v22  ;;  %v6510_v32 = vadd.f32 %v6509_v29, %v12491_v30  ;;  %v9786_v51 = vor.u32 %v10733_v21, %v9785_v27  ;;  %v10613_v57 = vld [vmem:[%s11440_s12 + $0xb90] sm:$0xf0] }
 0x25f   : > { %v10381_v4 = vld [vmem:[%s11440_s12 + $0x454] sm:$0xf] }
 0x260   : > { %v6810_v1 = vadd.f32 %v6809_v36, %v6726_v18  ;;  %v6511_v56 = vadd.f32 %v6510_v32, %v12505_v2  ;;  %v9306_v32 = vor.u32 %v10613_v57, %v9305_v28  ;;  %v10456_v57 = vld [vmem:[%s11440_s12 + $0x6ac] sm:$0xf] }
 0x261   : > { %v4715_v19 = vpop.f32.mrf.mxu3  ;;  %5087 = vmatpush.bf16.msra.mxu1 %v9366_v17  ;;  %5116 = vmatpush.bf16.msra.mxu2 %v9786_v51 }
 0x262   : > { %v6811_v36 = vadd.f32 %v6810_v1, %v6741_v43  ;;  %v12571_v19 = vadd.f32 0.001, %v7025_v23  ;;  %v10471_v43 = vld [vmem:[%s11440_s12 + $0x724] sm:$0xf]  ;;  %v8767_v1 = vld [vmem:[%s11440_s12 + $0x75c] sm:$0xf0] }
 0x263   : > { %v6455_v15 = vld [vmem:[%s11916_s25 + $0x2e8] sm:$0x1]  ;;  %v4789_v24 = vpop.f32.mrf.mxu2  ;;  %v4838_v60 = vpop.f32.mrf.mxu0 }
 0x264   : > { %v6512_v22 = vsel %vm6472_vm0, %v6455_v15, 0.0  ;;  %v6756_v33 = vmul.f32 %v6455_v15, %v6455_v15  ;;  %v12566_v29 = vadd.f32 %v4789_v24, %v4762_v14  ;;  %v10351_v23 = vld [vmem:[%s11440_s12 + $0x364] sm:$0xf]  ;;  %10963 = vrsqrt.f32 %v12571_v19 }
 0x265   : > { %v4764_v13 = vpop.f32.mrf.mxu1  ;;  %v6513_v18 = vadd.f32 %v6512_v22, %v6511_v56  ;;  %v8287_v56 = vld [vmem:[%s11440_s12 + $0x39c] sm:$0xf0]  ;;  %5088 = vmatpush.bf16.msra.mxu1 %v9306_v32  ;;  %vm7079_vm8 = vweird.f32 %v12571_v19 }
 0x266   : > { %v4765_v50 = vadd.f32 %v4764_v13, %v12482_v26  ;;  %v6812_v14 = vsel %vm6472_vm0, %v6756_v33, 0.0  ;;  %5033 = vmatmul.bf16.vlgmr.msra.gmra.mxu3 %v11508_v46  ;;  %5061 = vmatmul.bf16.vlgmr.msra.gmra.mxu0 %v11510_v47  ;;  %v8770_v26 = vor.u32 %v10471_v43, %v8767_v1  ;;  %v8290_v22 = vor.u32 %v10351_v23, %v8287_v56  ;;  %v8227_v1 = vld [vmem:[%s11440_s12 + $0x324] sm:$0xf0] }
 0x267   : > { %v6514_v17 = vrot.slane %v6513_v18, 4  ;;  %v6813_v15 = vadd.f32 %v6812_v14, %v6811_v36  ;;  %v8707_v36 = vld [vmem:[%s11440_s12 + $0x6e4] sm:$0xf0] }
 0x268   : > { %4987 = vmatmul.bf16.gmra.mxu1 %v11655_v62  ;;  %5015 = vmatmul.bf16.gmra.mxu2 %v11503_v42  ;;  %v8710_v43 = vor.u32 %v10456_v57, %v8707_v36 }
 0x269   : > { %v6515_v24 = vadd.f32 %v6514_v17, %v6513_v18  ;;  %v6814_v27 = vrot.slane %v6813_v15, 4  ;;  %v4810_v21 = vpop.f32.mrf.mxu3  ;;  %5165 = vmatpush.bf16.msrb.mxu0 %v8770_v26  ;;  %5137 = vmatpush.bf16.msrb.mxu3 %v8290_v22  ;;  %v10441_v22 = vld [vmem:[%s11440_s12 + $0x634] sm:$0xf] }
 0x26a   : > { %v4811_v33 = vadd.f32 %v4810_v21, %v12495_v44  ;;  %v10336_v44 = vld [vmem:[%s11440_s12 + $0x2ec] sm:$0xf]  ;;  %v12597_v2 = vpop.eup %10963 }
 0x26b   : > { %v6516_v13 = vrot.slane %v6515_v24, 2  ;;  %v6815_v51 = vadd.f32 %v6814_v27, %v6813_v15  ;;  %v4792_v28 = vpop.f32.mrf.mxu2  ;;  %v4840_v17 = vpop.f32.mrf.mxu0  ;;  %v8230_v56 = vor.u32 %v10336_v44, %v8227_v1  ;;  %v10426_v44 = vld [vmem:[%s11440_s12 + $0x5bc] sm:$0xf]  ;;  %v8587_v1 = vld [vmem:[%s11440_s12 + $0x5f4] sm:$0xf0]  ;;  %vm7080_vm7 = vweird.f32 %v12597_v2 }
 0x26c   : > { %v12586_v32 = vadd.f32 %v4792_v28, %v4765_v50  ;;  %v12588_v18 = vadd.f32 %v4838_v60, %v4811_v33  ;;  %v8647_v50 = vld [vmem:[%s11440_s12 + $0x66c] sm:$0xf0]  ;;  %v10321_v33 = vld [vmem:[%s11440_s12 + $0x274] sm:$0xf]  ;;  %vm7081_vm9 = vmor %vm7079_vm8, %vm7080_vm7 }
 0x26d   : > { %v4766_v14 = vpop.f32.mrf.mxu1  ;;  %v6517_v26 = vadd.f32 %v6516_v13, %v6515_v24  ;;  %v6816_v23 = vrot.slane %v6815_v51, 2  ;;  %5166 = vmatpush.bf16.msrb.mxu0 %v8710_v43  ;;  %5138 = vmatpush.bf16.msrb.mxu3 %v8230_v56  ;;  %v8650_v60 = vor.u32 %v10441_v22, %v8647_v50  ;;  %v8167_v28 = vld [vmem:[%s11440_s12 + $0x2ac] sm:$0xf0]  ;;  %v10411_v22 = vld [vmem:[%s11440_s12 + $0x544] sm:$0xf] }
 0x26e   : > { %15505 = vst [vmem:[#allocation61_spill] sm:$0xff] %v12588_v18  ;;  %v4767_v15 = vadd.f32 %v4766_v14, %v12497_v38  ;;  %v8170_v13 = vor.u32 %v10321_v33, %v8167_v28  ;;  %v8527_v50 = vld [vmem:[%s11440_s12 + $0x57c] sm:$0xf0] }
 0x26f   : > { %v6518_v27 = vrot.slane %v6517_v26, 1  ;;  %v6817_v21 = vadd.f32 %v6816_v23, %v6815_v51 }
 0x271   : > { %v6519_v57 = vadd.f32 %v6518_v27, %v6517_v26  ;;  %v6818_v36 = vrot.slane %v6817_v21, 1  ;;  %v4812_v24 = vpop.f32.mrf.mxu3  ;;  %5167 = vmatpush.bf16.msrb.mxu0 %v8650_v60  ;;  %5139 = vmatpush.bf16.msrb.mxu3 %v8170_v13  ;;  %v7074_v26 = vmul.f32 %v12597_v2, %v12571_v19  ;;  %v10711_v60 = vld [vmem:[%s11440_s12 + $0xea4] sm:$0xf]  ;;  %v10396_v13 = vld [vmem:[%s11440_s12 + $0x4cc] sm:$0xf] }
 0x272   : > { %v4813_v38 = vadd.f32 %v4812_v24, %v12512_v58  ;;  %v8107_v24 = vld [vmem:[%s11440_s12 + $0x234] sm:$0xf0] }
 0x273   : > { %v6819_v51 = vadd.f32 %v6818_v36, %v6817_v21  ;;  %v12600_v14 = vmul.f32 0.020408163, %v6519_v57  ;;  %v4794_v43 = vpop.f32.mrf.mxu2  ;;  %v4843_v27 = vpop.f32.mrf.mxu0  ;;  %v8590_v21 = vor.u32 %v10426_v44, %v8587_v1  ;;  %v10306_v57 = vld [vmem:[%s11440_s12 + $0x1fc] sm:$0xf]  ;;  %v10291_v44 = vld [vmem:[%s11440_s12 + $0x184] sm:$0xf]  ;;  %v7075_v30 = vmul.f32 %v12597_v2, %v7074_v26 }
 0x274   : > { %v12606_v23 = vadd.f32 %v4794_v43, %v4767_v15  ;;  %v12608_v56 = vadd.f32 %v4840_v17, %v4813_v38  ;;  %v9727_v15 = vld [vmem:[%s11440_s12 + $0xedc] sm:$0xf0]  ;;  %v8530_v17 = vor.u32 %v10411_v22, %v8527_v50  ;;  %v8467_v43 = vld [vmem:[%s11440_s12 + $0x504] sm:$0xf0]  ;;  %v8407_v26 = vld [vmem:[%s11440_s12 + $0x48c] sm:$0xf0] }
 0x275   : > { %v12610_v58 = vpop.f32.mrf.mxu1  ;;  %v6981_v33 = vmul.f32 0.020408163, %v6819_v51  ;;  %v6996_v28 = vmul.f32 %v12600_v14, %v12600_v14  ;;  %5168 = vmatpush.bf16.msrb.mxu0 %v8590_v21  ;;  %v9730_v36 = vor.u32 %v10711_v60, %v9727_v15  ;;  %v8110_v51 = vor.u32 %v10306_v57, %v8107_v24  ;;  %v8047_v1 = vld [vmem:[%s11440_s12 + $0x1bc] sm:$0xf0]  ;;  %v10696_v21 = vld [vmem:[%s11440_s12 + $0xe2c] sm:$0xf] }
 0x276   : > { %15506 = vst [vmem:[#allocation62_spill] sm:$0xff] %v12608_v56  ;;  %5038 = vmatmul.bf16.gmra.mxu3 %v11547_v52  ;;  %5066 = vmatmul.bf16.gmra.mxu0 %v11549_v53  ;;  %v9667_v22 = vld [vmem:[%s11440_s12 + $0xe64] sm:$0xf0]  ;;  %v10591_v15 = vld [vmem:[%s11440_s12 + $0xae4] sm:$0xf]  ;;  %v8470_v24 = vor.u32 %v10396_v13, %v8467_v43 }
 0x277   : > { %v7011_v38 = vsub.f32 %v6981_v33, %v6996_v28  ;;  %5221 = vmatpush.bf16.msrb.mxu2 %v9730_v36  ;;  %5140 = vmatpush.bf16.msrb.mxu3 %v8110_v51  ;;  %v9670_v33 = vor.u32 %v10696_v21, %v9667_v22  ;;  %v8050_v28 = vor.u32 %v10291_v44, %v8047_v1  ;;  %v7987_v36 = vld [vmem:[%s11440_s12 + $0x144] sm:$0xf0]  ;;  %v7076_v51 = vmul.f32 0.5, %v7075_v30  ;;  %v10261_v13 = vld [vmem:[%s11440_s12 + $0x94] sm:$0xf] }
 0x278   : > { %4992 = vmatmul.bf16.gmra.mxu1 %v11677_v35  ;;  %5020 = vmatmul.bf16.gmra.mxu2 %v11542_v48 }
 0x279   : > { %v7026_v50 = vmax.f32 %v7011_v38, 0.0  ;;  %v4815_v60 = vpop.f32.mrf.mxu3  ;;  %5169 = vmatpush.bf16.msrb.mxu0 %v8530_v17  ;;  %v9250_v38 = vor.u32 %v10591_v15, %v9247_v37  ;;  %v8410_v17 = vor.u32 %v10381_v4, %v8407_v26  ;;  %v7927_v37 = vld [vmem:[%s11440_s12 + $0xcc] sm:$0xf0]  ;;  %v7077_v43 = vsub.f32 1.5, %v7076_v51 }
 0x27a   : > { %v4816_v57 = vadd.f32 %v4815_v60, %v12544_v54  ;;  %v7990_v54 = vor.u32 %v10276_v55, %v7987_v36  ;;  %v7930_v30 = vor.u32 %v10261_v13, %v7927_v37  ;;  %v10366_v55 = vld [vmem:[%s11440_s12 + $0x3dc] sm:$0xf]  ;;  %v7867_v36 = vld [vmem:[%s11440_s12 + $0x54] sm:$0xf0] }
 0x27b   : > { %v12636_v31 = vadd.f32 0.001, %v7026_v50  ;;  %v12638_v16 = vpop.f32.mrf.mxu2  ;;  %v4845_v1 = vpop.f32.mrf.mxu0  ;;  %5222 = vmatpush.bf16.msrb.mxu2 %v9670_v33  ;;  %5141 = vmatpush.bf16.msrb.mxu3 %v8050_v28  ;;  %v8347_v33 = vld [vmem:[%s11440_s12 + $0x414] sm:$0xf0]  ;;  %v10246_v28 = vld [vmem:[%s11440_s12 + $0x1c] sm:$0xf]  ;;  %v7078_v4 = vmul.f32 %v12597_v2, %v7077_v43 }
 0x27c   : > { %v12642_v21 = vadd.f32 %v4843_v27, %v4816_v57  ;;  %5193 = vmatpush.bf16.msrb.mxu1 %v9250_v38  ;;  %v8350_v38 = vor.u32 %v10366_v55, %v8347_v33 }
 0x27d   : > { %v4771_v44 = vpop.f32.mrf.mxu1  ;;  %10965 = vrsqrt.f32 %v12636_v31  ;;  %5170 = vmatpush.bf16.msrb.mxu0 %v8470_v24  ;;  %vm7089_vm11 = vweird.f32 %v12636_v31 }
 0x27e   : > { %15507 = vst [vmem:[#allocation63_spill] sm:$0xff] %v12642_v21  ;;  %v10989_v44 = vld [vmem:[%s12023_s0] sm:$0xff] }
 0x27f   : > { %5142 = vmatpush.bf16.msrb.mxu3 %v7990_v54  ;;  %v7209_v54 = vperm.slane %v10989_v44, 2 }
 0x281   : > { %v4817_v22 = vpop.f32.mrf.mxu3  ;;  %5171 = vmatpush.bf16.msrb.mxu0 %v8410_v17 }
 0x282   : > { %v4818_v27 = vadd.f32 %v4817_v22, %v12566_v29  ;;  %v7870_v29 = vor.u32 %v10246_v28, %v7867_v36  ;;  %v7210_v22 = vperm.slane %v10989_v44, 3  ;;  %v9607_v36 = vld [vmem:[%s11440_s12 + $0xdec] sm:$0xf0] }
 0x283   : > { %v10966_v50 = vpop.eup %10965  ;;  %v4799_v60 = vpop.f32.mrf.mxu2  ;;  %5143 = vmatpush.bf16.msrb.mxu3 %v7930_v30 }
 0x284   : > { %v7084_v15 = vmul.f32 %v10966_v50, %v12636_v31  ;;  %v12654_v57 = vadd.f32 %v4845_v1, %v4818_v27  ;;  %v4848_v24 = vpop.f32.mrf.mxu0  ;;  %v7082_v1 = vsel %vm7081_vm9, %v12597_v2, %v7078_v4  ;;  %vm7090_vm10 = vweird.f32 %v10966_v50  ;;  %v10576_v27 = vld [vmem:[%s11440_s12 + $0xa6c] sm:$0xf]  ;;  %v9187_v2 = vld [vmem:[%s11440_s12 + $0xaa4] sm:$0xf0] }
 0x285   : > { %v4866_v26 = vpop.f32.mrf.mxu1  ;;  %5172 = vmatpush.bf16.msrb.mxu0 %v8350_v38  ;;  %v12667_v43 = vmul.f32 %v7209_v54, %v7082_v1  ;;  %vm7091_vm12 = vmor %vm7089_vm11, %vm7090_vm10  ;;  %v10681_v38 = vld [vmem:[%s11440_s12 + $0xdb4] sm:$0xf] }
 0x286   : > { %15508 = vst [vmem:[#allocation64_spill] sm:$0xff] %v12654_v57  ;;  %v7085_v51 = vmul.f32 %v10966_v50, %v7084_v15  ;;  %5043 = vmatmul.bf16.gmra.mxu3 %v11595_v9  ;;  %5071 = vmatmul.bf16.gmra.mxu0 %v11597_v10 }
 0x287   : > { %5144 = vmatpush.bf16.msrb.mxu3 %v7870_v29  ;;  %15509 = vst [vmem:[#allocation65_spill] sm:$0xff] %v12667_v43  ;;  %v10561_v29 = vld [vmem:[%s11440_s12 + $0x9f4] sm:$0xf] }
 0x288   : > { %5089 = vmatmul.bf16.vlgmr.msra.gmra.mxu1 %v11589_v5  ;;  %v7086_v17 = vmul.f32 0.5, %v7085_v51  ;;  %5117 = vmatmul.bf16.vlgmr.msra.gmra.mxu2 %v11591_v6  ;;  %v9610_v51 = vor.u32 %v10681_v38, %v9607_v36  ;;  %v9487_v38 = vld [vmem:[%s11440_s12 + $0xcfc] sm:$0xf0]  ;;  %v10531_v36 = vld [vmem:[%s11440_s12 + $0x904] sm:$0xf] }
 0x289   : > { %v4820_v19 = vpop.f32.mrf.mxu3 }
 0x28a   : > { %v7087_v13 = vsub.f32 1.5, %v7086_v17  ;;  %v4821_v37 = vadd.f32 %v4820_v19, %v12586_v32  ;;  %v9190_v32 = vor.u32 %v10576_v27, %v9187_v2  ;;  %5223 = vmatpush.bf16.msrb.mxu2 %v9610_v51  ;;  %v10666_v19 = vld [vmem:[%s11440_s12 + $0xd3c] sm:$0xf]  ;;  %v9067_v27 = vld [vmem:[%s11440_s12 + $0x9b4] sm:$0xf0] }
 0x28b   : > { %v4894_v30 = vpop.f32.mrf.mxu2 }
 0x28c   : > { %v7088_v60 = vmul.f32 %v10966_v50, %v7087_v13  ;;  %v12672_v55 = vadd.f32 %v4848_v24, %v4821_v37  ;;  %v12674_v33 = vadd.f32 %v4894_v30, %v4866_v26  ;;  %v4850_v28 = vpop.f32.mrf.mxu0  ;;  %5194 = vmatpush.bf16.msrb.mxu1 %v9190_v32  ;;  %v9127_v24 = vld [vmem:[%s11440_s12 + $0xa2c] sm:$0xf0]  ;;  %v7256_v26 = vmul.f32 %v12667_v43, %v12518_v63  ;;  %v9547_v13 = vld [vmem:[%s11440_s12 + $0xd74] sm:$0xf0]  ;;  %v10546_v37 = vld [vmem:[%s11440_s12 + $0x97c] sm:$0xf] }
 0x28d   : > { %v4868_v4 = vpop.f32.mrf.mxu1  ;;  %v9130_v54 = vor.u32 %v10561_v29, %v9127_v24 }
 0x28e   : > { %15510 = vst [vmem:[#allocation66_spill] sm:$0xff] %v12672_v55  ;;  %v7092_v15 = vsel %vm7091_vm12, %v10966_v50, %v7088_v60  ;;  %v7285_v2 = vrot.slane %v7256_v26, 6  ;;  %v9070_v60 = vor.u32 %v10546_v37, %v9067_v27  ;;  %v8947_v37 = vld [vmem:[%s11440_s12 + $0x8c4] sm:$0xf0] }
 0x28f   : > { %v12676_v31 = vmul.f32 %v7210_v22, %v7092_v15  ;;  %v4770_v15 = vadd.f32 %v12610_v58, %v12514_v39  ;;  %v9007_v39 = vld [vmem:[%s11440_s12 + $0x93c] sm:$0xf0] }
 0x290   : > { %5195 = vmatpush.bf16.msrb.mxu1 %v9130_v54  ;;  %v9010_v26 = vor.u32 %v10531_v36, %v9007_v39  ;;  %v10606_v36 = vld [vmem:[%s11440_s12 + $0xb5c] sm:$0xf] }
 0x291   : > { %15511 = vst [vmem:[#allocation67_spill] sm:$0xff] %v12676_v31  ;;  %v4822_v44 = vpop.f32.mrf.mxu3  ;;  %v7257_v1 = vmul.f32 %v12676_v31, %v12600_v14  ;;  %v4798_v29 = vadd.f32 %v12638_v16, %v4770_v15  ;;  %v10636_v16 = vld [vmem:[%s11440_s12 + $0xc4c] sm:$0xf]  ;;  %v8887_v15 = vld [vmem:[%s11440_s12 + $0x84c] sm:$0xf0] }
 0x292   : > { %v4823_v50 = vadd.f32 %v4822_v44, %v12606_v23  ;;  %v9550_v23 = vor.u32 %v10666_v19, %v9547_v13 }
 0x293   : > { %v4896_v17 = vpop.f32.mrf.mxu2  ;;  %v7286_v32 = vrot.slane %v7257_v1, 5  ;;  %v9427_v1 = vld [vmem:[%s11440_s12 + $0xc84] sm:$0xf0] }
 0x294   : > { %v12690_v22 = vadd.f32 %v4850_v28, %v4823_v50  ;;  %v4853_v30 = vpop.f32.mrf.mxu0  ;;  %v12693_v14 = vadd.f32 %v4896_v17, %v4868_v4  ;;  %v10651_v28 = vld [vmem:[%s11440_s12 + $0xcc4] sm:$0xf]  ;;  %5196 = vmatpush.bf16.msrb.mxu1 %v9070_v60  ;;  %5224 = vmatpush.bf16.msrb.mxu2 %v9550_v23  ;;  %v10516_v50 = vld [vmem:[%s11440_s12 + $0x88c] sm:$0xf]  ;;  %v9430_v27 = vor.u32 %v10636_v16, %v9427_v1  ;;  %v10621_v23 = vld [vmem:[%s11440_s12 + $0xbd4] sm:$0xf] }
 0x295   : > { %v4871_v63 = vpop.f32.mrf.mxu1  ;;  %v7299_v4 = vsel %vm7298_vm13, %v7285_v2, %v7286_v32  ;;  %v9490_v24 = vor.u32 %v10651_v28, %v9487_v38  ;;  %v8950_v2 = vor.u32 %v10516_v50, %v8947_v37  ;;  %v9367_v60 = vld [vmem:[%s11440_s12 + $0xc0c] sm:$0xf0]  ;;  %v10501_v32 = vld [vmem:[%s11440_s12 + $0x814] sm:$0xf]  ;;  %v8293_v16 = vld [vmem:[%s11440_s12 + $0x368] sm:$0xf] }
 0x296   : > { %15512 = vst [vmem:[#allocation68_spill] sm:$0xff] %v12690_v22  ;;  %5048 = vmatmul.bf16.gmra.mxu3 %v11627_v11  ;;  %5076 = vmatmul.bf16.gmra.mxu0 %v11629_v12  ;;  %v12709_v58 = vsel %vm7300_vm14, %v12293_v3, %v7299_v4  ;;  %v8890_v28 = vor.u32 %v10501_v32, %v8887_v15  ;;  %v9307_v4 = vld [vmem:[%s11440_s12 + $0xb94] sm:$0xf0]  ;;  %v10359_v1 = vld [vmem:[%s11440_s12 + $0x3a0] sm:$0xf0] }
 0x297   : > { %15513 = vst [vmem:[#allocation69_spill] sm:$0xff] %v12709_v58  ;;  %v10831_v50 = vld [vmem:[%s11440_s12 + $0x1264] sm:$0xf] }
 0x298   : > { %5094 = vmatmul.bf16.gmra.mxu1 %v11623_v7  ;;  %5122 = vmatmul.bf16.gmra.mxu2 %v11625_v8 }
 0x299   : > { %v4825_v51 = vpop.f32.mrf.mxu3  ;;  %5197 = vmatpush.bf16.msrb.mxu1 %v9010_v26  ;;  %5225 = vmatpush.bf16.msrb.mxu2 %v9490_v24  ;;  %v8827_v26 = vld [vmem:[%s11440_s12 + $0x7d4] sm:$0xf0] }
 0x29a   : > { %v4826_v44 = vadd.f32 %v4825_v51, %v4798_v29  ;;  %v10486_v29 = vld [vmem:[%s11440_s12 + $0x79c] sm:$0xf] }
 0x29b   : > { %v4899_v54 = vpop.f32.mrf.mxu2 }
 0x29c   : > { %v4854_v17 = vadd.f32 %v4853_v30, %v4826_v44  ;;  %v12714_v19 = vadd.f32 %v4899_v54, %v4871_v63  ;;  %v4855_v13 = vpop.f32.mrf.mxu0  ;;  %v9370_v63 = vor.u32 %v10621_v23, %v9367_v60  ;;  %v9310_v44 = vor.u32 %v10606_v36, %v9307_v4  ;;  %v8233_v23 = vld [vmem:[%s11440_s12 + $0x2f0] sm:$0xf]  ;;  %v10344_v60 = vld [vmem:[%s11440_s12 + $0x328] sm:$0xf0] }
 0x29d   : > { %v4873_v3 = vpop.f32.mrf.mxu1  ;;  %5198 = vmatpush.bf16.msrb.mxu1 %v8950_v2  ;;  %5226 = vmatpush.bf16.msrb.mxu2 %v9430_v27  ;;  %v8830_v54 = vor.u32 %v10486_v29, %v8827_v26  ;;  %v10207_v13 = vld [vmem:[%s11440_s12 + $0x129c] sm:$0xf0]  ;;  %v10329_v29 = vld [vmem:[%s11440_s12 + $0x2b0] sm:$0xf0] }
 0x29e   : > { %6351 = vst [vmem:[%s11916_s25 + $0x2f0] sm:$0x1] %v4854_v17  ;;  %v8294_v17 = vor.u32 %v10359_v1, %v8293_v16  ;;  %v10210_v37 = vor.u32 %v10831_v50, %v10207_v13 }
 0x2a0   : > { %5277 = vmatpush.bf16.msra.mxu0 %v8294_v17  ;;  %5249 = vmatpush.bf16.msra.mxu3 %v10210_v37  ;;  %v10314_v17 = vld [vmem:[%s11440_s12 + $0x238] sm:$0xf0] }
 0x2a1   : > { %v4827_v30 = vpop.f32.mrf.mxu3  ;;  %5199 = vmatpush.bf16.msrb.mxu1 %v8890_v28  ;;  %5227 = vmatpush.bf16.msrb.mxu2 %v9370_v63  ;;  %v8234_v63 = vor.u32 %v10344_v60, %v8233_v23  ;;  %v10816_v28 = vld [vmem:[%s11440_s12 + $0x11ec] sm:$0xf]  ;;  %v10786_v23 = vld [vmem:[%s11440_s12 + $0x10fc] sm:$0xf] }
 0x2a3   : > { %v4901_v38 = vpop.f32.mrf.mxu2 }
 0x2a4   : > { %v12725_v39 = vadd.f32 %v4901_v38, %v4873_v3  ;;  %v4950_v24 = vpop.f32.mrf.mxu0  ;;  %v10147_v38 = vld [vmem:[%s11440_s12 + $0x1224] sm:$0xf0]  ;;  %5278 = vmatpush.bf16.msra.mxu0 %v8234_v63 }
 0x2a5   : > { %v4876_v51 = vpop.f32.mrf.mxu1  ;;  %5200 = vmatpush.bf16.msrb.mxu1 %v8830_v54  ;;  %5228 = vmatpush.bf16.msrb.mxu2 %v9310_v44  ;;  %v10150_v4 = vor.u32 %v10816_v28, %v10147_v38  ;;  %v10801_v44 = vld [vmem:[%s11440_s12 + $0x1174] sm:$0xf]  ;;  %v8053_v63 = vld [vmem:[%s11440_s12 + $0x188] sm:$0xf]  ;;  %v10599_v38 = vld [vmem:[%s11440_s12 + $0xb20] sm:$0xf0] }
 0x2a6   : > { %5145 = vmatmul.bf16.vlgmr.msrb.gmra.mxu3 %v11501_v41  ;;  %5173 = vmatmul.bf16.vlgmr.msrb.gmra.mxu0 %v11508_v46  ;;  %v9253_v28 = vld [vmem:[%s11440_s12 + $0xae8] sm:$0xf] }
 0x2a7   : > { %5250 = vmatpush.bf16.msra.mxu3 %v10150_v4  ;;  %v7993_v4 = vld [vmem:[%s11440_s12 + $0x110] sm:$0xf] }
 0x2a8   : > { %5099 = vmatmul.bf16.gmra.mxu1 %v11653_v61  ;;  %5127 = vmatmul.bf16.gmra.mxu2 %v11655_v62 }
 0x2a9   : > { %v4922_v3 = vpop.f32.mrf.mxu3 }
 0x2aa   : > { %v4923_v27 = vadd.f32 %v4922_v3, %v12674_v33  ;;  %v8173_v33 = vld [vmem:[%s11440_s12 + $0x278] sm:$0xf] }
 0x2ab   : > { %v4904_v2 = vpop.f32.mrf.mxu2  ;;  %v8174_v26 = vor.u32 %v10329_v29, %v8173_v33  ;;  %v9254_v33 = vor.u32 %v10599_v38, %v9253_v28  ;;  %v10284_v29 = vld [vmem:[%s11440_s12 + $0x148] sm:$0xf0] }
 0x2ac   : > { %v12739_v32 = vadd.f32 %v4904_v2, %v4876_v51  ;;  %v4952_v30 = vpop.f32.mrf.mxu0  ;;  %v12743_v36 = vadd.f32 %v4950_v24, %v4923_v27  ;;  %v10087_v51 = vld [vmem:[%s11440_s12 + $0x11ac] sm:$0xf0]  ;;  %v8113_v24 = vld [vmem:[%s11440_s12 + $0x200] sm:$0xf] }
 0x2ad   : > { %v4878_v15 = vpop.f32.mrf.mxu1  ;;  %v10090_v16 = vor.u32 %v10801_v44, %v10087_v51  ;;  %5279 = vmatpush.bf16.msra.mxu0 %v8174_v26  ;;  %v8114_v27 = vor.u32 %v10314_v17, %v8113_v24  ;;  %v9193_v26 = vld [vmem:[%s11440_s12 + $0xa70] sm:$0xf]  ;;  %v10584_v44 = vld [vmem:[%s11440_s12 + $0xaa8] sm:$0xf0]  ;;  %5333 = vmatpush.bf16.msra.mxu2 %v9254_v33 }
 0x2ae   : > { %v9194_v24 = vor.u32 %v10584_v44, %v9193_v26  ;;  %v10756_v33 = vld [vmem:[%s11440_s12 + $0x100c] sm:$0xf] }
 0x2af   : > { %5251 = vmatpush.bf16.msra.mxu3 %v10090_v16  ;;  %v10771_v16 = vld [vmem:[%s11440_s12 + $0x1084] sm:$0xf] }
 0x2b1   : > { %v4924_v54 = vpop.f32.mrf.mxu3  ;;  %5280 = vmatpush.bf16.msra.mxu0 %v8114_v27  ;;  %v7933_v27 = vld [vmem:[%s11440_s12 + $0x98] sm:$0xf]  ;;  %5334 = vmatpush.bf16.msra.mxu2 %v9194_v24  ;;  %v10464_v24 = vld [vmem:[%s11440_s12 + $0x6e8] sm:$0xf0] }
 0x2b2   : > { %v4925_v1 = vadd.f32 %v4924_v54, %v12693_v14  ;;  %v10027_v14 = vld [vmem:[%s11440_s12 + $0x1134] sm:$0xf0]  ;;  %v7994_v54 = vor.u32 %v10284_v29, %v7993_v4  ;;  %v9907_v29 = vld [vmem:[%s11440_s12 + $0x1044] sm:$0xf0] }
 0x2b3   : > { %v4906_v50 = vpop.f32.mrf.mxu2  ;;  %v10030_v60 = vor.u32 %v10786_v23, %v10027_v14  ;;  %v8773_v23 = vld [vmem:[%s11440_s12 + $0x728] sm:$0xf]  ;;  %v9910_v26 = vor.u32 %v10756_v33, %v9907_v29 }
 0x2b4   : > { %v12752_v13 = vadd.f32 %v4906_v50, %v4878_v15  ;;  %v4955_v37 = vpop.f32.mrf.mxu0  ;;  %v12756_v2 = vadd.f32 %v4952_v30, %v4925_v1  ;;  %v10299_v15 = vld [vmem:[%s11440_s12 + $0x1c0] sm:$0xf0]  ;;  %v9967_v1 = vld [vmem:[%s11440_s12 + $0x10bc] sm:$0xf0] }
 0x2b5   : > { %v12754_v3 = vpop.f32.mrf.mxu1  ;;  %v8054_v30 = vor.u32 %v10299_v15, %v8053_v63  ;;  %5252 = vmatpush.bf16.msra.mxu3 %v10030_v60  ;;  %v9970_v17 = vor.u32 %v10771_v16, %v9967_v1  ;;  %v10269_v60 = vld [vmem:[%s11440_s12 + $0xd0] sm:$0xf0]  ;;  %v10479_v63 = vld [vmem:[%s11440_s12 + $0x760] sm:$0xf0]  ;;  %v9133_v15 = vld [vmem:[%s11440_s12 + $0x9f8] sm:$0xf] }
 0x2b6   : > { %5150 = vmatmul.bf16.gmra.mxu3 %v11540_v45  ;;  %5178 = vmatmul.bf16.gmra.mxu0 %v11547_v52  ;;  %v7934_v44 = vor.u32 %v10269_v60, %v7933_v27  ;;  %v10741_v16 = vld [vmem:[%s11440_s12 + $0xf94] sm:$0xf] }
 0x2b7   : > { %5281 = vmatpush.bf16.msra.mxu0 %v8054_v30  ;;  %v10569_v30 = vld [vmem:[%s11440_s12 + $0xa30] sm:$0xf0] }
 0x2b8   : > { %5104 = vmatmul.bf16.gmra.mxu1 %v11675_v34  ;;  %5132 = vmatmul.bf16.gmra.mxu2 %v11677_v35 }
 0x2b9   : > { %v4927_v51 = vpop.f32.mrf.mxu3  ;;  %5253 = vmatpush.bf16.msra.mxu3 %v9970_v17  ;;  %v7873_v17 = vld [vmem:[%s11440_s12 + $0x20] sm:$0xf] }
 0x2ba   : > { %v4928_v50 = vadd.f32 %v4927_v51, %v12714_v19  ;;  %v8774_v19 = vor.u32 %v10479_v63, %v8773_v23  ;;  %v9134_v51 = vor.u32 %v10569_v30, %v9133_v15  ;;  %v10254_v23 = vld [vmem:[%s11440_s12 + $0x58] sm:$0xf0]  ;;  %v8713_v63 = vld [vmem:[%s11440_s12 + $0x6b0] sm:$0xf]  ;;  %v9073_v15 = vld [vmem:[%s11440_s12 + $0x980] sm:$0xf] }
 0x2bb   : > { %v12777_v14 = vpop.f32.mrf.mxu2  ;;  %5282 = vmatpush.bf16.msra.mxu0 %v7994_v54  ;;  %v7874_v54 = vor.u32 %v10254_v23, %v7873_v17  ;;  %v8714_v60 = vor.u32 %v10464_v24, %v8713_v63  ;;  %v10726_v30 = vld [vmem:[%s11440_s12 + $0xf1c] sm:$0xf]  ;;  %v10449_v23 = vld [vmem:[%s11440_s12 + $0x670] sm:$0xf0]  ;;  %v6682_v63 = vmul.f32 %v12608_v56, %v12608_v56  ;;  %v9013_v24 = vld [vmem:[%s11440_s12 + $0x908] sm:$0xf] }
 0x2bc   : > { %v4957_v38 = vpop.f32.mrf.mxu0  ;;  %v12782_v4 = vadd.f32 %v4955_v37, %v4928_v50  ;;  %5305 = vmatpush.bf16.msra.mxu1 %v8774_v19  ;;  %v9847_v37 = vld [vmem:[%s11440_s12 + $0xfcc] sm:$0xf0]  ;;  %5335 = vmatpush.bf16.msra.mxu2 %v9134_v51  ;;  %v10554_v19 = vld [vmem:[%s11440_s12 + $0x9b8] sm:$0xf0] }
 0x2bd   : > { %v4883_v28 = vpop.f32.mrf.mxu1  ;;  %5254 = vmatpush.bf16.msra.mxu3 %v9910_v26  ;;  %v9850_v1 = vor.u32 %v10741_v16, %v9847_v37  ;;  %v9787_v16 = vld [vmem:[%s11440_s12 + $0xf54] sm:$0xf0]  ;;  %v10839_v37 = vld [vmem:[%s11440_s12 + $0x12a0] sm:$0xf0] }
 0x2be   : > { %v9790_v51 = vor.u32 %v10726_v30, %v9787_v16  ;;  %v6697_v16 = vmul.f32 %v12642_v21, %v12642_v21 }
 0x2bf   : > { %5283 = vmatpush.bf16.msra.mxu0 %v7934_v44  ;;  %v9074_v44 = vor.u32 %v10554_v19, %v9073_v15 }
 0x2c0   : > { %5306 = vmatpush.bf16.msra.mxu1 %v8714_v60  ;;  %v6520_v60 = vadd.f32 %v12608_v56, %v12588_v18  ;;  %v10307_v56 = vld [vmem:[%s11440_s12 + $0x204] sm:$0xf] }
 0x2c1   : > { %v4929_v50 = vpop.f32.mrf.mxu3  ;;  %5255 = vmatpush.bf16.msra.mxu3 %v9850_v1  ;;  %5336 = vmatpush.bf16.msra.mxu2 %v9074_v44  ;;  %v8653_v1 = vld [vmem:[%s11440_s12 + $0x638] sm:$0xf] }
 0x2c2   : > { %v4930_v28 = vadd.f32 %v4929_v50, %v12725_v39 }
 0x2c3   : > { %v4911_v27 = vpop.f32.mrf.mxu2  ;;  %5284 = vmatpush.bf16.msra.mxu0 %v7874_v54  ;;  %v8654_v54 = vor.u32 %v10449_v23, %v8653_v1  ;;  %v10824_v23 = vld [vmem:[%s11440_s12 + $0x1228] sm:$0xf0] }
 0x2c4   : > { %v4960_v33 = vpop.f32.mrf.mxu0  ;;  %v12797_v26 = vadd.f32 %v4957_v38, %v4930_v28  ;;  %v10539_v27 = vld [vmem:[%s11440_s12 + $0x940] sm:$0xf0] }
 0x2c5   : > { %v4978_v29 = vpop.f32.mrf.mxu1  ;;  %5256 = vmatpush.bf16.msra.mxu3 %v9790_v51  ;;  %5307 = vmatpush.bf16.msra.mxu1 %v8654_v54  ;;  %v6521_v51 = vadd.f32 %v6520_v60, %v12642_v21  ;;  %v10434_v60 = vld [vmem:[%s11440_s12 + $0x5f8] sm:$0xf0]  ;;  %v9675_v21 = vld [vmem:[%s11440_s12 + $0xe6c] sm:$0xf0] }
 0x2c6   : > { %v12801_v39 = vadd.f32 %v4978_v29, %v12743_v36  ;;  %5155 = vmatmul.bf16.gmra.mxu3 %v11503_v42  ;;  %5183 = vmatmul.bf16.gmra.mxu0 %v11595_v9  ;;  %v10213_v36 = vld [vmem:[%s11440_s12 + $0x1268] sm:$0xf]  ;;  %v6667_v29 = vmul.f32 %v12588_v18, %v12588_v18  ;;  %v8115_v18 = vld [vmem:[%s11440_s12 + $0x23c] sm:$0xf0] }
 0x2c7   : > { %v10214_v17 = vor.u32 %v10839_v37, %v10213_v36  ;;  %v6712_v36 = vmul.f32 %v12654_v57, %v12654_v57  ;;  %v6456_v37 = vld [vmem:[%s11916_s25 + $0x2f0] sm:$0x1] }
 0x2c8   : > { %15514 = vst [vmem:[#allocation70_spill] sm:$0xff] %v12801_v39  ;;  %5201 = vmatmul.bf16.vlgmr.msrb.gmra.mxu1 %v11510_v47  ;;  %5229 = vmatmul.bf16.vlgmr.msrb.gmra.mxu2 %v11589_v5 }
 0x2c9   : > { %v4932_v38 = vpop.f32.mrf.mxu3  ;;  %5389 = vmatpush.bf16.msrb.mxu0 %v10214_v17  ;;  %v10153_v17 = vld [vmem:[%s11440_s12 + $0x11f0] sm:$0xf] }
 0x2ca   : > { %v4933_v50 = vadd.f32 %v4932_v38, %v12739_v32  ;;  %v9014_v32 = vor.u32 %v10539_v27, %v9013_v24  ;;  %v6522_v38 = vadd.f32 %v6521_v51, %v12654_v57  ;;  %v6727_v24 = vmul.f32 %v12672_v55, %v12672_v55 }
 0x2cb   : > { %v12814_v28 = vpop.f32.mrf.mxu2  ;;  %v10154_v27 = vor.u32 %v10824_v23, %v10153_v17 }
 0x2cc   : > { %v4962_v15 = vpop.f32.mrf.mxu0  ;;  %v12820_v30 = vadd.f32 %v4960_v33, %v4933_v50  ;;  %5337 = vmatpush.bf16.msra.mxu2 %v9014_v32  ;;  %v6820_v33 = vadd.f32 %v6682_v63, %v6667_v29  ;;  %v6523_v54 = vadd.f32 %v6522_v38, %v12672_v55  ;;  %v6757_v32 = vmul.f32 %v6456_v37, %v6456_v37 }
 0x2cd   : > { %v4980_v19 = vpop.f32.mrf.mxu1  ;;  %v6742_v38 = vmul.f32 %v12690_v22, %v12690_v22  ;;  %5390 = vmatpush.bf16.msrb.mxu0 %v10154_v27  ;;  %v8473_v27 = vld [vmem:[%s11440_s12 + $0x4d0] sm:$0xf] }
 0x2ce   : > { %v12827_v44 = vadd.f32 %v4980_v19, %v12756_v2  ;;  %v6821_v1 = vadd.f32 %v6820_v33, %v6697_v16  ;;  %v8593_v2 = vld [vmem:[%s11440_s12 + $0x5c0] sm:$0xf]  ;;  %v6525_v19 = vsel %vm6472_vm0, %v6456_v37, 0.0  ;;  %v8953_v16 = vld [vmem:[%s11440_s12 + $0x890] sm:$0xf]  ;;  %v6524_v57 = vadd.f32 %v6523_v54, %v12690_v22 }
 0x2cf   : > { %v8594_v51 = vor.u32 %v10434_v60, %v8593_v2  ;;  %v10524_v33 = vld [vmem:[%s11440_s12 + $0x8c8] sm:$0xf0]  ;;  %v10374_v22 = vld [vmem:[%s11440_s12 + $0x418] sm:$0xf0] }
 0x2d0   : > { %15515 = vst [vmem:[#allocation71_spill] sm:$0xff] %v12827_v44  ;;  %v6822_v58 = vadd.f32 %v6821_v1, %v6712_v36  ;;  %v8954_v37 = vor.u32 %v10524_v33, %v8953_v16  ;;  %v6526_v23 = vadd.f32 %v6525_v19, %v6524_v57  ;;  %v6825_v36 = vsel %vm6472_vm0, %v6757_v32, 0.0  ;;  %v10419_v1 = vld [vmem:[%s11440_s12 + $0x580] sm:$0xf0]  ;;  %v10404_v60 = vld [vmem:[%s11440_s12 + $0x508] sm:$0xf0] }
 0x2d1   : > { %v4934_v50 = vpop.f32.mrf.mxu3  ;;  %5308 = vmatpush.bf16.msra.mxu1 %v8594_v51  ;;  %v8474_v51 = vor.u32 %v10404_v60, %v8473_v27 }
 0x2d2   : > { %v4935_v63 = vadd.f32 %v4934_v50, %v12752_v13  ;;  %v6823_v17 = vadd.f32 %v6822_v58, %v6727_v24  ;;  %5338 = vmatpush.bf16.msra.mxu2 %v8954_v37  ;;  %v10509_v37 = vld [vmem:[%s11440_s12 + $0x850] sm:$0xf0] }
 0x2d3   : > { %v12843_v29 = vpop.f32.mrf.mxu2 }
 0x2d4   : > { %v12850_v55 = vpop.f32.mrf.mxu0  ;;  %v12852_v50 = vadd.f32 %v4962_v15, %v4935_v63  ;;  %v8533_v15 = vld [vmem:[%s11440_s12 + $0x548] sm:$0xf]  ;;  %v6824_v54 = vadd.f32 %v6823_v17, %v6742_v38  ;;  %v8413_v17 = vld [vmem:[%s11440_s12 + $0x458] sm:$0xf] }
 0x2d5   : > { %v4983_v13 = vpop.f32.mrf.mxu1  ;;  %v8534_v58 = vor.u32 %v10419_v1, %v8533_v15  ;;  %v10389_v15 = vld [vmem:[%s11440_s12 + $0x490] sm:$0xf0] }
 0x2d6   : > { %v12855_v2 = vadd.f32 %v4983_v13, %v12782_v4  ;;  %5160 = vmatmul.bf16.gmra.mxu3 %v11542_v48  ;;  %5188 = vmatmul.bf16.gmra.mxu0 %v11627_v11  ;;  %v6527_v4 = vrot.slane %v6526_v23, 4  ;;  %v6826_v24 = vadd.f32 %v6825_v36, %v6824_v54  ;;  %v8893_v13 = vld [vmem:[%s11440_s12 + $0x818] sm:$0xf]  ;;  %v8414_v54 = vor.u32 %v10389_v15, %v8413_v17 }
 0x2d7   : > { %5309 = vmatpush.bf16.msra.mxu1 %v8534_v58  ;;  %v8894_v36 = vor.u32 %v10509_v37, %v8893_v13 }
 0x2d8   : > { %15516 = vst [vmem:[#allocation72_spill] sm:$0xff] %v12855_v2  ;;  %5206 = vmatmul.bf16.gmra.mxu1 %v11549_v53  ;;  %5234 = vmatmul.bf16.gmra.mxu2 %v11623_v7  ;;  %v6528_v33 = vadd.f32 %v6527_v4, %v6526_v23  ;;  %v6827_v38 = vrot.slane %v6826_v24, 4  ;;  %v10494_v23 = vld [vmem:[%s11440_s12 + $0x7d8] sm:$0xf0]  ;;  %v8353_v4 = vld [vmem:[%s11440_s12 + $0x3e0] sm:$0xf] }
 0x2d9   : > { %v12864_v57 = vpop.f32.mrf.mxu3  ;;  %5339 = vmatpush.bf16.msra.mxu2 %v8894_v36  ;;  %v8354_v37 = vor.u32 %v10374_v22, %v8353_v4 }
 0x2da   : > { %v6529_v58 = vrot.slane %v6528_v33, 2 }
 0x2db   : > { %v12866_v63 = vpop.f32.mrf.mxu2  ;;  %5310 = vmatpush.bf16.msra.mxu1 %v8474_v51 }
 0x2dc   : > { %v4967_v19 = vpop.f32.mrf.mxu0  ;;  %v6530_v17 = vadd.f32 %v6529_v58, %v6528_v33  ;;  %v9673_v58 = vld [vmem:[%s11440_s12 + $0xe30] sm:$0xf] }
 0x2dd   : > { %v4985_v32 = vpop.f32.mrf.mxu1  ;;  %v6828_v19 = vadd.f32 %v6827_v38, %v6826_v24  ;;  %v9733_v24 = vld [vmem:[%s11440_s12 + $0xea8] sm:$0xf]  ;;  %v10719_v38 = vld [vmem:[%s11440_s12 + $0xee0] sm:$0xf0] }
 0x2de   : > { %v12871_v16 = vadd.f32 %v4985_v32, %v12797_v26  ;;  %v8833_v26 = vld [vmem:[%s11440_s12 + $0x7a0] sm:$0xf]  ;;  %v9734_v36 = vor.u32 %v10719_v38, %v9733_v24  ;;  %v10093_v38 = vld [vmem:[%s11440_s12 + $0x1178] sm:$0xf] }
 0x2df   : > { %5311 = vmatpush.bf16.msra.mxu1 %v8414_v54  ;;  %v8834_v51 = vor.u32 %v10494_v23, %v8833_v26  ;;  %v6829_v15 = vrot.slane %v6828_v19, 2  ;;  %v10704_v26 = vld [vmem:[%s11440_s12 + $0xe68] sm:$0xf0] }
 0x2e0   : > { %15517 = vst [vmem:[#allocation73_spill] sm:$0xff] %v12871_v16  ;;  %5361 = vmatpush.bf16.msrb.mxu3 %v9734_v36  ;;  %v10809_v36 = vld [vmem:[%s11440_s12 + $0x11b0] sm:$0xf0] }
 0x2e1   : > { %v4939_v1 = vpop.f32.mrf.mxu3  ;;  %5340 = vmatpush.bf16.msra.mxu2 %v8834_v51  ;;  %v6830_v22 = vadd.f32 %v6829_v15, %v6828_v19 }
 0x2e2   : > { %v6531_v1 = vrot.slane %v6530_v17, 1 }
 0x2e3   : > { %v12877_v27 = vpop.f32.mrf.mxu2  ;;  %5312 = vmatpush.bf16.msra.mxu1 %v8354_v37  ;;  %v4910_v37 = vadd.f32 %v12777_v14, %v12754_v3  ;;  %v6831_v15 = vrot.slane %v6830_v22, 1 }
 0x2e4   : > { %v5062_v32 = vpop.f32.mrf.mxu0 }
 0x2e5   : > { %v4988_v60 = vpop.f32.mrf.mxu1  ;;  %v4938_v24 = vadd.f32 %v12864_v57, %v4910_v37  ;;  %v6832_v3 = vadd.f32 %v6831_v15, %v6830_v22  ;;  %v9553_v37 = vld [vmem:[%s11440_s12 + $0xd40] sm:$0xf]  ;;  %v6668_v15 = vmul.f32 %v12801_v39, %v12801_v39 }
 0x2e6   : > { %v12884_v13 = vadd.f32 %v4988_v60, %v12820_v30  ;;  %5257 = vmatmul.bf16.vlgmr.msra.gmra.mxu3 %v11591_v6  ;;  %5285 = vmatmul.bf16.vlgmr.msra.gmra.mxu0 %v11501_v41  ;;  %v9674_v60 = vor.u32 %v10704_v26, %v9673_v58  ;;  %v10094_v58 = vor.u32 %v10809_v36, %v10093_v38 }
 0x2e8   : > { %15518 = vst [vmem:[#allocation74_spill] sm:$0xff] %v12884_v13  ;;  %5211 = vmatmul.bf16.gmra.mxu1 %v11597_v10  ;;  %5239 = vmatmul.bf16.gmra.mxu2 %v11653_v61 }
 0x2e9   : > { %v5034_v30 = vpop.f32.mrf.mxu3  ;;  %5362 = vmatpush.bf16.msrb.mxu3 %v9674_v60  ;;  %5391 = vmatpush.bf16.msrb.mxu0 %v10094_v58  ;;  %v10794_v60 = vld [vmem:[%s11440_s12 + $0x1138] sm:$0xf0]  ;;  %v6982_v58 = vmul.f32 0.020408163, %v6832_v3  ;;  %v9973_v3 = vld [vmem:[%s11440_s12 + $0x1088] sm:$0xf] }
 0x2ea   : > { %v5035_v33 = vadd.f32 %v5034_v30, %v12814_v28  ;;  %v6532_v28 = vadd.f32 %v6531_v1, %v6530_v17  ;;  %v9613_v30 = vld [vmem:[%s11440_s12 + $0xdb8] sm:$0xf]  ;;  %v6683_v17 = vmul.f32 %v12827_v44, %v12827_v44  ;;  %v4966_v1 = vadd.f32 %v12850_v55, %v4938_v24 }
 0x2eb   : > { %v12893_v54 = vpop.f32.mrf.mxu2 }
 0x2ec   : > { %v5064_v4 = vpop.f32.mrf.mxu0  ;;  %v12897_v51 = vadd.f32 %v5062_v32, %v5035_v33  ;;  %v10689_v32 = vld [vmem:[%s11440_s12 + $0xdf0] sm:$0xf0]  ;;  %v12909_v14 = vmul.f32 0.020408163, %v6532_v28 }
 0x2ed   : > { %v4990_v23 = vpop.f32.mrf.mxu1  ;;  %v9614_v26 = vor.u32 %v10689_v32, %v9613_v30  ;;  %v6698_v30 = vmul.f32 %v12855_v2, %v12855_v2 }
 0x2ee   : > { %v12902_v19 = vadd.f32 %v4990_v23, %v12852_v50  ;;  %v10033_v23 = vld [vmem:[%s11440_s12 + $0x1100] sm:$0xf]  ;;  %v6997_v32 = vmul.f32 %v12909_v14, %v12909_v14 }
 0x2ef   : > { %5363 = vmatpush.bf16.msrb.mxu3 %v9614_v26  ;;  %v10034_v22 = vor.u32 %v10794_v60, %v10033_v23  ;;  %v6713_v26 = vmul.f32 %v12871_v16, %v12871_v16  ;;  %v10659_v60 = vld [vmem:[%s11440_s12 + $0xd00] sm:$0xf0] }
 0x2f0   : > { %15519 = vst [vmem:[#allocation75_spill] sm:$0xff] %v12902_v19 }
 0x2f1   : > { %v5036_v33 = vpop.f32.mrf.mxu3  ;;  %5392 = vmatpush.bf16.msrb.mxu0 %v10034_v22 }
 0x2f2   : > { %v5037_v50 = vadd.f32 %v5036_v33, %v12843_v29  ;;  %v10674_v29 = vld [vmem:[%s11440_s12 + $0xd78] sm:$0xf0]  ;;  %v6833_v33 = vadd.f32 %v6683_v17, %v6668_v15  ;;  %v9493_v17 = vld [vmem:[%s11440_s12 + $0xcc8] sm:$0xf] }
 0x2f3   : > { %v12914_v57 = vpop.f32.mrf.mxu2  ;;  %v9554_v24 = vor.u32 %v10674_v29, %v9553_v37  ;;  %v9494_v22 = vor.u32 %v10659_v60, %v9493_v17  ;;  %v7012_v29 = vsub.f32 %v6982_v58, %v6997_v32  ;;  %v6743_v58 = vmul.f32 %v12902_v19, %v12902_v19 }
 0x2f4   : > { %v5067_v36 = vpop.f32.mrf.mxu0  ;;  %v12920_v28 = vadd.f32 %v5064_v4, %v5037_v50  ;;  %v6533_v4 = vadd.f32 %v12827_v44, %v12801_v39  ;;  %v10779_v50 = vld [vmem:[%s11440_s12 + $0x10c0] sm:$0xf0]  ;;  %v6834_v37 = vadd.f32 %v6833_v33, %v6698_v30  ;;  %v10697_v39 = vld [vmem:[%s11440_s12 + $0xe34] sm:$0xf] }
 0x2f5   : > { %v4993_v38 = vpop.f32.mrf.mxu1  ;;  %v9974_v23 = vor.u32 %v10779_v50, %v9973_v3  ;;  %5364 = vmatpush.bf16.msrb.mxu3 %v9554_v24  ;;  %v9913_v24 = vld [vmem:[%s11440_s12 + $0x1010] sm:$0xf]  ;;  %v10764_v3 = vld [vmem:[%s11440_s12 + $0x1048] sm:$0xf0] }
 0x2f6   : > { %v4994_v55 = vadd.f32 %v4993_v38, %v4966_v1  ;;  %5262 = vmatmul.bf16.gmra.mxu3 %v11625_v8  ;;  %5290 = vmatmul.bf16.gmra.mxu0 %v11540_v45  ;;  %v6534_v1 = vadd.f32 %v6533_v4, %v12855_v2  ;;  %v6835_v2 = vadd.f32 %v6834_v37, %v6713_v26  ;;  %v9433_v50 = vld [vmem:[%s11440_s12 + $0xc50] sm:$0xf] }
 0x2f7   : > { %5393 = vmatpush.bf16.msrb.mxu0 %v9974_v23  ;;  %v7027_v23 = vmax.f32 %v7012_v29, 0.0 }
 0x2f8   : > { %6352 = vst [vmem:[%s11916_s25 + $0x2f8] sm:$0x1] %v4994_v55  ;;  %5216 = vmatmul.bf16.gmra.mxu1 %v11629_v12  ;;  %5244 = vmatmul.bf16.gmra.mxu2 %v11675_v34  ;;  %v6535_v15 = vadd.f32 %v6534_v1, %v12871_v16  ;;  %v6728_v55 = vmul.f32 %v12884_v13, %v12884_v13  ;;  %v9853_v16 = vld [vmem:[%s11440_s12 + $0xf98] sm:$0xf] }
 0x2f9   : > { %v5039_v38 = vpop.f32.mrf.mxu3  ;;  %v9914_v1 = vor.u32 %v10764_v3, %v9913_v24  ;;  %5365 = vmatpush.bf16.msrb.mxu3 %v9494_v22  ;;  %v10629_v3 = vld [vmem:[%s11440_s12 + $0xc10] sm:$0xf0] }
 0x2fa   : > { %v5040_v4 = vadd.f32 %v5039_v38, %v12866_v63  ;;  %v6536_v30 = vadd.f32 %v6535_v15, %v12884_v13  ;;  %v10644_v63 = vld [vmem:[%s11440_s12 + $0xc88] sm:$0xf0]  ;;  %v6836_v60 = vadd.f32 %v6835_v2, %v6728_v55 }
 0x2fb   : > { %v12947_v44 = vpop.f32.mrf.mxu2  ;;  %v9434_v26 = vor.u32 %v10644_v63, %v9433_v50  ;;  %5394 = vmatpush.bf16.msrb.mxu0 %v9914_v1  ;;  %v12966_v50 = vadd.f32 0.001, %v7027_v23 }
 0x2fc   : > { %v5069_v33 = vpop.f32.mrf.mxu0  ;;  %v12955_v17 = vadd.f32 %v5067_v36, %v5040_v4  ;;  %v6537_v37 = vadd.f32 %v6536_v30, %v12902_v19  ;;  %v6837_v24 = vadd.f32 %v6836_v60, %v6743_v58  ;;  %v9373_v4 = vld [vmem:[%s11440_s12 + $0xbd8] sm:$0xf]  ;;  %v9793_v60 = vld [vmem:[%s11440_s12 + $0xf20] sm:$0xf]  ;;  %v8535_v19 = vld [vmem:[%s11440_s12 + $0x584] sm:$0xf0] }
 0x2fd   : > { %v4995_v32 = vpop.f32.mrf.mxu1  ;;  %5366 = vmatpush.bf16.msrb.mxu3 %v9434_v26  ;;  %v9374_v55 = vor.u32 %v10629_v3, %v9373_v4  ;;  %v10614_v4 = vld [vmem:[%s11440_s12 + $0xb98] sm:$0xf0]  ;;  %10967 = vrsqrt.f32 %v12966_v50  ;;  %vm7099_vm1 = vweird.f32 %v12966_v50 }
 0x2fe   : > { %v10749_v32 = vld [vmem:[%s11440_s12 + $0xfd0] sm:$0xf0] }
 0x2ff   : > { %v6457_v38 = vld [vmem:[%s11916_s25 + $0x2f8] sm:$0x1]  ;;  %v9854_v22 = vor.u32 %v10749_v32, %v9853_v16 }
 0x300   : > { %v6538_v15 = vsel %vm6472_vm0, %v6457_v38, 0.0  ;;  %v6758_v13 = vmul.f32 %v6457_v38, %v6457_v38  ;;  %v9313_v38 = vld [vmem:[%s11440_s12 + $0xb60] sm:$0xf] }
 0x301   : > { %v6539_v36 = vadd.f32 %v6538_v15, %v6537_v37  ;;  %v5041_v29 = vpop.f32.mrf.mxu3  ;;  %5395 = vmatpush.bf16.msrb.mxu0 %v9854_v22  ;;  %v10734_v37 = vld [vmem:[%s11440_s12 + $0xf58] sm:$0xf0]  ;;  %5367 = vmatpush.bf16.msrb.mxu3 %v9374_v55 }
 0x302   : > { %v6838_v2 = vsel %vm6472_vm0, %v6758_v13, 0.0  ;;  %v5042_v63 = vadd.f32 %v5041_v29, %v12877_v27  ;;  %v9794_v23 = vor.u32 %v10734_v37, %v9793_v60  ;;  %v9314_v27 = vor.u32 %v10614_v4, %v9313_v38 }
 0x303   : > { %v6540_v30 = vrot.slane %v6539_v36, 4  ;;  %v6839_v1 = vadd.f32 %v6838_v2, %v6837_v24  ;;  %v5023_v58 = vpop.f32.mrf.mxu2  ;;  %v10352_v2 = vld [vmem:[%s11440_s12 + $0x36c] sm:$0xf] }
 0x304   : > { %v5072_v15 = vpop.f32.mrf.mxu0  ;;  %v12972_v32 = vadd.f32 %v5069_v33, %v5042_v63  ;;  %v10472_v33 = vld [vmem:[%s11440_s12 + $0x72c] sm:$0xf] }
 0x305   : > { %v6541_v16 = vadd.f32 %v6540_v30, %v6539_v36  ;;  %v6840_v26 = vrot.slane %v6839_v1, 4  ;;  %v5090_v13 = vpop.f32.mrf.mxu1  ;;  %5396 = vmatpush.bf16.msrb.mxu0 %v9794_v23  ;;  %v8775_v36 = vld [vmem:[%s11440_s12 + $0x764] sm:$0xf0]  ;;  %5368 = vmatpush.bf16.msrb.mxu3 %v9314_v27  ;;  %v12989_v23 = vpop.eup %10967 }
 0x306   : > { %v5091_v24 = vadd.f32 %v5090_v13, %v12897_v51  ;;  %5267 = vmatmul.bf16.gmra.mxu3 %v11655_v62  ;;  %5295 = vmatmul.bf16.gmra.mxu0 %v11503_v42  ;;  %v8778_v55 = vor.u32 %v10472_v33, %v8775_v36  ;;  %v8295_v30 = vld [vmem:[%s11440_s12 + $0x3a4] sm:$0xf0]  ;;  %v8715_v13 = vld [vmem:[%s11440_s12 + $0x6ec] sm:$0xf0]  ;;  %vm7100_vm15 = vweird.f32 %v12989_v23 }
 0x307   : > { %v6542_v22 = vrot.slane %v6541_v16, 2  ;;  %v6841_v3 = vadd.f32 %v6840_v26, %v6839_v1  ;;  %v8298_v63 = vor.u32 %v10352_v2, %v8295_v30  ;;  %v10457_v26 = vld [vmem:[%s11440_s12 + $0x6b4] sm:$0xf]  ;;  %vm13056_vm2 = vmor %vm7099_vm1, %vm7100_vm15  ;;  %vm7304_vm15 = vcmask 1046534  }
 0x308   : > { %5313 = vmatmul.bf16.vlgmr.msra.gmra.mxu1 %v11508_v46  ;;  %5341 = vmatmul.bf16.vlgmr.msra.gmra.mxu2 %v11510_v47  ;;  %vm7306_vm1 = vcmask 1045508  }
 0x309   : > { %v6543_v29 = vadd.f32 %v6542_v22, %v6541_v16  ;;  %v6842_v51 = vrot.slane %v6841_v3, 2  ;;  %v5044_v1 = vpop.f32.mrf.mxu3  ;;  %5445 = vmatpush.bf16.msrb.mxu2 %v8778_v55  ;;  %5417 = vmatpush.bf16.msrb.mxu1 %v8298_v63  ;;  %v10337_v16 = vld [vmem:[%s11440_s12 + $0x2f4] sm:$0xf]  ;;  %v8655_v63 = vld [vmem:[%s11440_s12 + $0x674] sm:$0xf0] }
 0x30a   : > { %v5045_v37 = vadd.f32 %v5044_v1, %v12893_v54  ;;  %v8235_v54 = vld [vmem:[%s11440_s12 + $0x32c] sm:$0xf0] }
 0x30b   : > { %v6544_v58 = vrot.slane %v6543_v29, 1  ;;  %v6843_v60 = vadd.f32 %v6842_v51, %v6841_v3  ;;  %v5118_v38 = vpop.f32.mrf.mxu2  ;;  %v8718_v3 = vor.u32 %v10457_v26, %v8715_v13  ;;  %v8238_v51 = vor.u32 %v10337_v16, %v8235_v54  ;;  %v9735_v16 = vld [vmem:[%s11440_s12 + $0xee4] sm:$0xf0] }
 0x30c   : > { %v12991_v27 = vadd.f32 %v5118_v38, %v5091_v24  ;;  %v5074_v33 = vpop.f32.mrf.mxu0  ;;  %v12995_v55 = vadd.f32 %v5072_v15, %v5045_v37  ;;  %v7094_v24 = vmul.f32 %v12989_v23, %v12966_v50  ;;  %v10712_v37 = vld [vmem:[%s11440_s12 + $0xeac] sm:$0xf] }
 0x30d   : > { %v6545_v4 = vadd.f32 %v6544_v58, %v6543_v29  ;;  %v6844_v22 = vrot.slane %v6843_v60, 1  ;;  %v5092_v36 = vpop.f32.mrf.mxu1  ;;  %5446 = vmatpush.bf16.msrb.mxu2 %v8718_v3  ;;  %v10442_v29 = vld [vmem:[%s11440_s12 + $0x63c] sm:$0xf]  ;;  %5418 = vmatpush.bf16.msrb.mxu1 %v8238_v51  ;;  %v10427_v58 = vld [vmem:[%s11440_s12 + $0x5c4] sm:$0xf]  ;;  %v9738_v54 = vor.u32 %v10712_v37, %v9735_v16 }
 0x30e   : > { %15520 = vst [vmem:[#allocation76_spill] sm:$0xff] %v12991_v27  ;;  %v5093_v2 = vadd.f32 %v5092_v36, %v12920_v28  ;;  %v8658_v15 = vor.u32 %v10442_v29, %v8655_v63  ;;  %v7095_v29 = vmul.f32 %v12989_v23, %v7094_v24 }
 0x30f   : > { %v6845_v30 = vadd.f32 %v6844_v22, %v6843_v60  ;;  %v12997_v1 = vmul.f32 0.020408163, %v6545_v4  ;;  %v8595_v60 = vld [vmem:[%s11440_s12 + $0x5fc] sm:$0xf0]  ;;  %v10322_v4 = vld [vmem:[%s11440_s12 + $0x27c] sm:$0xf]  ;;  %5501 = vmatpush.bf16.msra.mxu0 %v9738_v54 }
 0x310   : > { %v8598_v13 = vor.u32 %v10427_v58, %v8595_v60  ;;  %v8175_v22 = vld [vmem:[%s11440_s12 + $0x2b4] sm:$0xf0] }
 0x311   : > { %v6983_v38 = vmul.f32 0.020408163, %v6845_v30  ;;  %v6998_v28 = vmul.f32 %v12997_v1, %v12997_v1  ;;  %v5046_v26 = vpop.f32.mrf.mxu3  ;;  %5447 = vmatpush.bf16.msrb.mxu2 %v8658_v15  ;;  %v8178_v51 = vor.u32 %v10322_v4, %v8175_v22  ;;  %v10412_v30 = vld [vmem:[%s11440_s12 + $0x54c] sm:$0xf]  ;;  %v8118_v15 = vor.u32 %v10307_v56, %v8115_v18  ;;  %v10397_v18 = vld [vmem:[%s11440_s12 + $0x4d4] sm:$0xf] }
 0x312   : > { %v5047_v3 = vadd.f32 %v5046_v26, %v12914_v57  ;;  %v7096_v26 = vmul.f32 0.5, %v7095_v29  ;;  %v8475_v56 = vld [vmem:[%s11440_s12 + $0x50c] sm:$0xf0]  ;;  %v10292_v22 = vld [vmem:[%s11440_s12 + $0x18c] sm:$0xf] }
 0x313   : > { %v7013_v36 = vsub.f32 %v6983_v38, %v6998_v28  ;;  %v5120_v63 = vpop.f32.mrf.mxu2  ;;  %5419 = vmatpush.bf16.msrb.mxu1 %v8178_v51  ;;  %v9678_v28 = vor.u32 %v10697_v39, %v9675_v21  ;;  %v10592_v21 = vld [vmem:[%s11440_s12 + $0xaec] sm:$0xf] }
 0x314   : > { %v13019_v60 = vadd.f32 %v5120_v63, %v5093_v2  ;;  %v13021_v31 = vpop.f32.mrf.mxu0  ;;  %v13023_v57 = vadd.f32 %v5074_v33, %v5047_v3  ;;  %v8538_v2 = vor.u32 %v10412_v30, %v8535_v19  ;;  %v10682_v19 = vld [vmem:[%s11440_s12 + $0xdbc] sm:$0xf]  ;;  %v9615_v33 = vld [vmem:[%s11440_s12 + $0xdf4] sm:$0xf0]  ;;  %v7097_v51 = vsub.f32 1.5, %v7096_v26 }
 0x315   : > { %v7028_v58 = vmax.f32 %v7013_v36, 0.0  ;;  %v5095_v38 = vpop.f32.mrf.mxu1  ;;  %5448 = vmatpush.bf16.msrb.mxu2 %v8598_v13  ;;  %5502 = vmatpush.bf16.msra.mxu0 %v9678_v28  ;;  %v8478_v13 = vor.u32 %v10397_v18, %v8475_v56  ;;  %v9618_v4 = vor.u32 %v10682_v19, %v9615_v33  ;;  %v8055_v36 = vld [vmem:[%s11440_s12 + $0x1c4] sm:$0xf0]  ;;  %v10382_v18 = vld [vmem:[%s11440_s12 + $0x45c] sm:$0xf] }
 0x316   : > { %15521 = vst [vmem:[#allocation77_spill] sm:$0xff] %v13019_v60  ;;  %v5096_v24 = vadd.f32 %v5095_v38, %v12955_v17  ;;  %5272 = vmatmul.bf16.gmra.mxu3 %v11677_v35  ;;  %5300 = vmatmul.bf16.gmra.mxu0 %v11542_v48  ;;  %v9255_v17 = vld [vmem:[%s11440_s12 + $0xb24] sm:$0xf0]  ;;  %v8058_v54 = vor.u32 %v10292_v22, %v8055_v36  ;;  %v7995_v38 = vld [vmem:[%s11440_s12 + $0x14c] sm:$0xf0] }
 0x317   : > { %v13026_v37 = vadd.f32 0.001, %v7028_v58  ;;  %5420 = vmatpush.bf16.msrb.mxu1 %v8118_v15  ;;  %v9258_v16 = vor.u32 %v10592_v21, %v9255_v17  ;;  %v10277_v58 = vld [vmem:[%s11440_s12 + $0x114] sm:$0xf]  ;;  %v8415_v56 = vld [vmem:[%s11440_s12 + $0x494] sm:$0xf0] }
 0x318   : > { %5318 = vmatmul.bf16.gmra.mxu1 %v11547_v52  ;;  %5346 = vmatmul.bf16.gmra.mxu2 %v11549_v53  ;;  %v7998_v15 = vor.u32 %v10277_v58, %v7995_v38  ;;  %v8418_v19 = vor.u32 %v10382_v18, %v8415_v56  ;;  %v7935_v33 = vld [vmem:[%s11440_s12 + $0xd4] sm:$0xf0]  ;;  %v8355_v58 = vld [vmem:[%s11440_s12 + $0x41c] sm:$0xf0]  ;;  %v10247_v38 = vld [vmem:[%s11440_s12 + $0x24] sm:$0xf] }
 0x319   : > { %10969 = vrsqrt.f32 %v13026_v37  ;;  %v13036_v39 = vpop.f32.mrf.mxu3  ;;  %5449 = vmatpush.bf16.msrb.mxu2 %v8538_v2  ;;  %5473 = vmatpush.bf16.msra.mxu3 %v9258_v16  ;;  %v7875_v56 = vld [vmem:[%s11440_s12 + $0x5c] sm:$0xf0]  ;;  %vm7109_vm4 = vweird.f32 %v13026_v37 }
 0x31a   : > { %5503 = vmatpush.bf16.msra.mxu0 %v9618_v4  ;;  %v13061_v4 = vld [vmem:[%s12023_s0] sm:$0xff] }
 0x31b   : > { %v5123_v3 = vpop.f32.mrf.mxu2  ;;  %5421 = vmatpush.bf16.msrb.mxu1 %v8058_v54  ;;  %15525 = vst [vmem:[#allocation79_spill] sm:$0xff] %v13061_v4  ;;  %v7211_v22 = vperm.slane %v13061_v4, 4 }
 0x31c   : > { %v13043_v30 = vadd.f32 %v5123_v3, %v5096_v24  ;;  %v5079_v29 = vpop.f32.mrf.mxu0  ;;  %v7098_v24 = vmul.f32 %v12989_v23, %v7097_v51 }
 0x31d   : > { %v5097_v63 = vpop.f32.mrf.mxu1  ;;  %5450 = vmatpush.bf16.msrb.mxu2 %v8478_v13 }
 0x31e   : > { %15522 = vst [vmem:[#allocation78_spill] sm:$0xff] %v13043_v30  ;;  %v5098_v28 = vadd.f32 %v5097_v63, %v12972_v32  ;;  %v10262_v32 = vld [vmem:[%s11440_s12 + $0x9c] sm:$0xf]  ;;  %v7102_v54 = vsel %vm13056_vm2, %v12989_v23, %v7098_v24  ;;  %v10367_v63 = vld [vmem:[%s11440_s12 + $0x3e4] sm:$0xf]  ;;  %vm7308_vm2 = vcmask 1043456  }
 0x31f   : > { %v10970_v2 = vpop.eup %10969  ;;  %5422 = vmatpush.bf16.msrb.mxu1 %v7998_v15  ;;  %v7938_v13 = vor.u32 %v10262_v32, %v7935_v33  ;;  %v8358_v18 = vor.u32 %v10367_v63, %v8355_v58  ;;  %v9135_v63 = vld [vmem:[%s11440_s12 + $0xa34] sm:$0xf0] }
 0x320   : > { %v7104_v26 = vmul.f32 %v10970_v2, %v13026_v37  ;;  %vm7110_vm3 = vweird.f32 %v10970_v2 }
 0x321   : > { %v5051_v17 = vpop.f32.mrf.mxu3  ;;  %5451 = vmatpush.bf16.msrb.mxu2 %v8418_v19  ;;  %vm7111_vm5 = vmor %vm7109_vm4, %vm7110_vm3 }
 0x322   : > { %v7105_v21 = vmul.f32 %v10970_v2, %v7104_v26  ;;  %v7878_v17 = vor.u32 %v10247_v38, %v7875_v56 }
 0x323   : > { %v5125_v3 = vpop.f32.mrf.mxu2  ;;  %5423 = vmatpush.bf16.msrb.mxu1 %v7938_v13 }
 0x324   : > { %v7106_v36 = vmul.f32 0.5, %v7105_v21  ;;  %v13067_v51 = vadd.f32 %v5125_v3, %v5098_v28  ;;  %v5174_v29 = vpop.f32.mrf.mxu0  ;;  %v7212_v21 = vperm.slane %v13061_v4, 5  ;;  %v13079_v28 = vmul.f32 %v7211_v22, %v7102_v54  ;;  %v10577_v22 = vld [vmem:[%s11440_s12 + $0xa74] sm:$0xf] }
 0x325   : > { %v5100_v50 = vpop.f32.mrf.mxu1  ;;  %5452 = vmatpush.bf16.msrb.mxu2 %v8358_v18 }
 0x326   : > { %15526 = vst [vmem:[#allocation80_spill] sm:$0xff] %v13067_v51  ;;  %v7107_v15 = vsub.f32 1.5, %v7106_v36  ;;  %v5101_v26 = vadd.f32 %v5100_v50, %v12995_v55  ;;  %5369 = vmatmul.bf16.vlgmr.msrb.gmra.mxu3 %v11589_v5  ;;  %5397 = vmatmul.bf16.vlgmr.msrb.gmra.mxu0 %v11591_v6  ;;  %v9195_v36 = vld [vmem:[%s11440_s12 + $0xaac] sm:$0xf0]  ;;  %v7258_v3 = vmul.f32 %v13079_v28, %v12909_v14 }
 0x327   : > { %15527 = vst [vmem:[#allocation81_spill] sm:$0xff] %v13079_v28  ;;  %5424 = vmatpush.bf16.msrb.mxu1 %v7878_v17  ;;  %v9198_v50 = vor.u32 %v10577_v22, %v9195_v36  ;;  %v9495_v22 = vld [vmem:[%s11440_s12 + $0xd04] sm:$0xf0]  ;;  %v10532_v36 = vld [vmem:[%s11440_s12 + $0x90c] sm:$0xf] }
 0x328   : > { %v7108_v23 = vmul.f32 %v10970_v2, %v7107_v15  ;;  %5323 = vmatmul.bf16.gmra.mxu1 %v11595_v9  ;;  %5351 = vmatmul.bf16.gmra.mxu2 %v11597_v10  ;;  %v7287_v58 = vrot.slane %v7258_v3, 4  ;;  %v9855_v28 = vld [vmem:[%s11440_s12 + $0xfd4] sm:$0xf0] }
 0x329   : > { %v5146_v24 = vpop.f32.mrf.mxu3  ;;  %5474 = vmatpush.bf16.msra.mxu3 %v9198_v50 }
 0x32a   : > { %v7112_v55 = vsel %vm7111_vm5, %v10970_v2, %v7108_v23  ;;  %v13084_v37 = vadd.f32 %v5174_v29, %v5146_v24  ;;  %v10562_v29 = vld [vmem:[%s11440_s12 + $0x9fc] sm:$0xf]  ;;  %v10667_v23 = vld [vmem:[%s11440_s12 + $0xd44] sm:$0xf] }
 0x32b   : > { %v13082_v19 = vmul.f32 %v7212_v21, %v7112_v55  ;;  %v5128_v32 = vpop.f32.mrf.mxu2  ;;  %v9555_v55 = vld [vmem:[%s11440_s12 + $0xd7c] sm:$0xf0]  ;;  %v10547_v24 = vld [vmem:[%s11440_s12 + $0x984] sm:$0xf] }
 0x32c   : > { %v13086_v33 = vadd.f32 %v5128_v32, %v5101_v26  ;;  %v5176_v16 = vpop.f32.mrf.mxu0  ;;  %v9138_v26 = vor.u32 %v10562_v29, %v9135_v63  ;;  %v9558_v32 = vor.u32 %v10667_v23, %v9555_v55  ;;  %v8955_v55 = vld [vmem:[%s11440_s12 + $0x8cc] sm:$0xf0] }
 0x32d   : > { %15528 = vst [vmem:[#allocation82_spill] sm:$0xff] %v13082_v19  ;;  %v5102_v13 = vpop.f32.mrf.mxu1  ;;  %v7259_v2 = vmul.f32 %v13082_v19, %v12997_v1 }
 0x32e   : > { %15529 = vst [vmem:[#allocation83_spill] sm:$0xff] %v13086_v33  ;;  %v5103_v54 = vadd.f32 %v5102_v13, %v13023_v57  ;;  %5475 = vmatpush.bf16.msra.mxu3 %v9138_v26  ;;  %v5050_v57 = vadd.f32 %v13036_v39, %v12947_v44  ;;  %v9075_v13 = vld [vmem:[%s11440_s12 + $0x9bc] sm:$0xf0]  ;;  %5504 = vmatpush.bf16.msra.mxu0 %v9558_v32  ;;  %v10652_v39 = vld [vmem:[%s11440_s12 + $0xccc] sm:$0xf] }
 0x32f   : > { %v7288_v38 = vrot.slane %v7259_v2, 3  ;;  %v9498_v2 = vor.u32 %v10652_v39, %v9495_v22  ;;  %v10637_v26 = vld [vmem:[%s11440_s12 + $0xc54] sm:$0xf]  ;;  %v10502_v32 = vld [vmem:[%s11440_s12 + $0x81c] sm:$0xf] }
 0x330   : > { %v5078_v44 = vadd.f32 %v13021_v31, %v5050_v57  ;;  %v10517_v57 = vld [vmem:[%s11440_s12 + $0x894] sm:$0xf] }
 0x331   : > { %v5148_v15 = vpop.f32.mrf.mxu3  ;;  %v13100_v14 = vsel %vm7302_vm6, %v7287_v58, %v7288_v38 }
 0x332   : > { %v13097_v18 = vadd.f32 %v5176_v16, %v5148_v15  ;;  %15530 = vst [vmem:[#allocation84_spill] sm:$0xff] %v13100_v14  ;;  %v9078_v16 = vor.u32 %v10547_v24, %v9075_v13  ;;  %5505 = vmatpush.bf16.msra.mxu0 %v9498_v2  ;;  %v9375_v24 = vld [vmem:[%s11440_s12 + $0xc14] sm:$0xf0] }
 0x333   : > { %v5130_v1 = vpop.f32.mrf.mxu2  ;;  %v8721_v14 = vld [vmem:[%s11440_s12 + $0x6b8] sm:$0xf] }
 0x334   : > { %v13104_v56 = vadd.f32 %v5130_v1, %v5103_v54  ;;  %v5179_v17 = vpop.f32.mrf.mxu0  ;;  %5476 = vmatpush.bf16.msra.mxu3 %v9078_v16  ;;  %v9015_v54 = vld [vmem:[%s11440_s12 + $0x944] sm:$0xf0]  ;;  %v9435_v1 = vld [vmem:[%s11440_s12 + $0xc8c] sm:$0xf0] }
 0x335   : > { %v5105_v21 = vpop.f32.mrf.mxu1  ;;  %v9018_v31 = vor.u32 %v10532_v36, %v9015_v54  ;;  %v9438_v23 = vor.u32 %v10637_v26, %v9435_v1  ;;  %v10607_v54 = vld [vmem:[%s11440_s12 + $0xb64] sm:$0xf]  ;;  %v8301_v26 = vld [vmem:[%s11440_s12 + $0x370] sm:$0xf]  ;;  %v10360_v1 = vld [vmem:[%s11440_s12 + $0x3a8] sm:$0xf0] }
 0x336   : > { %15531 = vst [vmem:[#allocation85_spill] sm:$0xff] %v13104_v56  ;;  %5374 = vmatmul.bf16.gmra.mxu3 %v11623_v7  ;;  %5402 = vmatmul.bf16.gmra.mxu0 %v11625_v8  ;;  %v5106_v50 = vadd.f32 %v5105_v21, %v5078_v44  ;;  %v8958_v21 = vor.u32 %v10517_v57, %v8955_v55  ;;  %v8895_v44 = vld [vmem:[%s11440_s12 + $0x854] sm:$0xf0]  ;;  %v10215_v55 = vld [vmem:[%s11440_s12 + $0x12a4] sm:$0xf0] }
 0x337   : > { %5506 = vmatpush.bf16.msra.mxu0 %v9438_v23  ;;  %v8898_v22 = vor.u32 %v10502_v32, %v8895_v44  ;;  %v10832_v23 = vld [vmem:[%s11440_s12 + $0x126c] sm:$0xf]  ;;  %v8241_v44 = vld [vmem:[%s11440_s12 + $0x2f8] sm:$0xf] }
 0x338   : > { %5328 = vmatmul.bf16.gmra.mxu1 %v11627_v11  ;;  %5356 = vmatmul.bf16.gmra.mxu2 %v11629_v12 }
 0x339   : > { %v5151_v3 = vpop.f32.mrf.mxu3  ;;  %5477 = vmatpush.bf16.msra.mxu3 %v9018_v31  ;;  %v10487_v31 = vld [vmem:[%s11440_s12 + $0x7a4] sm:$0xf] }
 0x33a   : > { %v13119_v29 = vadd.f32 %v5179_v17, %v5151_v3  ;;  %v10622_v17 = vld [vmem:[%s11440_s12 + $0xbdc] sm:$0xf] }
 0x33b   : > { %v5133_v63 = vpop.f32.mrf.mxu2  ;;  %v9378_v16 = vor.u32 %v10622_v17, %v9375_v24  ;;  %v10218_v17 = vor.u32 %v10832_v23, %v10215_v55 }
 0x33c   : > { %v5134_v58 = vadd.f32 %v5133_v63, %v5106_v50  ;;  %v5181_v15 = vpop.f32.mrf.mxu0  ;;  %v9315_v50 = vld [vmem:[%s11440_s12 + $0xb9c] sm:$0xf0] }
 0x33d   : > { %v5107_v38 = vpop.f32.mrf.mxu1  ;;  %5478 = vmatpush.bf16.msra.mxu3 %v8958_v21  ;;  %5507 = vmatpush.bf16.msra.mxu0 %v9378_v16 }
 0x33e   : > { %6353 = vst [vmem:[%s11916_s25 + $0x300] sm:$0x1] %v5134_v58  ;;  %v9318_v58 = vor.u32 %v10607_v54, %v9315_v50  ;;  %v8835_v38 = vld [vmem:[%s11440_s12 + $0x7dc] sm:$0xf0]  ;;  %5529 = vmatpush.bf16.msra.mxu1 %v10218_v17  ;;  %v8121_v17 = vld [vmem:[%s11440_s12 + $0x208] sm:$0xf] }
 0x341   : > { %v5153_v13 = vpop.f32.mrf.mxu3  ;;  %5479 = vmatpush.bf16.msra.mxu3 %v8898_v22  ;;  %5508 = vmatpush.bf16.msra.mxu0 %v9318_v58  ;;  %v10345_v22 = vld [vmem:[%s11440_s12 + $0x330] sm:$0xf0]  ;;  %v10330_v58 = vld [vmem:[%s11440_s12 + $0x2b8] sm:$0xf0] }
 0x342   : > { %v13130_v39 = vadd.f32 %v5181_v15, %v5153_v13  ;;  %v8838_v15 = vor.u32 %v10487_v31, %v8835_v38  ;;  %v8242_v54 = vor.u32 %v10345_v22, %v8241_v44  ;;  %v8181_v31 = vld [vmem:[%s11440_s12 + $0x280] sm:$0xf] }
 0x343   : > { %v5135_v36 = vpop.f32.mrf.mxu2  ;;  %v8182_v38 = vor.u32 %v10330_v58, %v8181_v31  ;;  %v10035_v22 = vld [vmem:[%s11440_s12 + $0x113c] sm:$0xf0]  ;;  %v9201_v31 = vld [vmem:[%s11440_s12 + $0xa78] sm:$0xf]  ;;  %v10585_v58 = vld [vmem:[%s11440_s12 + $0xab0] sm:$0xf0] }
 0x344   : > { %v5184_v3 = vpop.f32.mrf.mxu0  ;;  %v10817_v36 = vld [vmem:[%s11440_s12 + $0x11f4] sm:$0xf] }
 0x345   : > { %v5202_v2 = vpop.f32.mrf.mxu1  ;;  %5480 = vmatpush.bf16.msra.mxu3 %v8838_v15  ;;  %v10802_v15 = vld [vmem:[%s11440_s12 + $0x117c] sm:$0xf] }
 0x346   : > { %v5203_v63 = vadd.f32 %v5202_v2, %v13084_v37  ;;  %5379 = vmatmul.bf16.gmra.mxu3 %v11653_v61  ;;  %5407 = vmatmul.bf16.gmra.mxu0 %v11655_v62  ;;  %v8302_v37 = vor.u32 %v10360_v1, %v8301_v26  ;;  %v10095_v26 = vld [vmem:[%s11440_s12 + $0x11b4] sm:$0xf0] }
 0x348   : > { %5425 = vmatmul.bf16.vlgmr.msrb.gmra.mxu1 %v11501_v41  ;;  %5453 = vmatmul.bf16.vlgmr.msrb.gmra.mxu2 %v11508_v46 }
 0x349   : > { %v5156_v57 = vpop.f32.mrf.mxu3  ;;  %5557 = vmatpush.bf16.msra.mxu2 %v8302_v37 }
 0x34a   : > { %v13145_v21 = vadd.f32 %v5184_v3, %v5156_v57  ;;  %v10155_v3 = vld [vmem:[%s11440_s12 + $0x122c] sm:$0xf0] }
 0x34b   : > { %v5230_v24 = vpop.f32.mrf.mxu2  ;;  %v10158_v50 = vor.u32 %v10817_v36, %v10155_v3  ;;  %v9261_v36 = vld [vmem:[%s11440_s12 + $0xaf0] sm:$0xf] }
 0x34c   : > { %v13147_v32 = vadd.f32 %v5230_v24, %v5203_v63  ;;  %v5186_v13 = vpop.f32.mrf.mxu0  ;;  %v10315_v24 = vld [vmem:[%s11440_s12 + $0x240] sm:$0xf0] }
 0x34d   : > { %v5204_v16 = vpop.f32.mrf.mxu1  ;;  %5558 = vmatpush.bf16.msra.mxu2 %v8242_v54  ;;  %5530 = vmatpush.bf16.msra.mxu1 %v10158_v50  ;;  %v8122_v44 = vor.u32 %v10315_v24, %v8121_v17  ;;  %v8061_v54 = vld [vmem:[%s11440_s12 + $0x190] sm:$0xf]  ;;  %v9141_v17 = vld [vmem:[%s11440_s12 + $0xa00] sm:$0xf] }
 0x34e   : > { %v5205_v2 = vadd.f32 %v5204_v16, %v13097_v18  ;;  %v10098_v18 = vor.u32 %v10802_v15, %v10095_v26  ;;  %v10787_v16 = vld [vmem:[%s11440_s12 + $0x1104] sm:$0xf] }
 0x34f   : > { %v10038_v3 = vor.u32 %v10787_v16, %v10035_v22  ;;  %v10570_v16 = vld [vmem:[%s11440_s12 + $0xa38] sm:$0xf0]  ;;  %v10772_v22 = vld [vmem:[%s11440_s12 + $0x108c] sm:$0xf] }
 0x351   : > { %v5158_v63 = vpop.f32.mrf.mxu3  ;;  %5559 = vmatpush.bf16.msra.mxu2 %v8182_v38  ;;  %5531 = vmatpush.bf16.msra.mxu1 %v10098_v18  ;;  %v10285_v38 = vld [vmem:[%s11440_s12 + $0x150] sm:$0xf0]  ;;  %v9202_v18 = vor.u32 %v10585_v58, %v9201_v31  ;;  %v9142_v58 = vor.u32 %v10570_v16, %v9141_v17  ;;  %v7881_v17 = vld [vmem:[%s11440_s12 + $0x28] sm:$0xf]  ;;  %v10255_v16 = vld [vmem:[%s11440_s12 + $0x60] sm:$0xf0] }
 0x352   : > { %v13158_v1 = vadd.f32 %v5186_v13, %v5158_v63  ;;  %v8001_v63 = vld [vmem:[%s11440_s12 + $0x118] sm:$0xf] }
 0x353   : > { %v5232_v57 = vpop.f32.mrf.mxu2  ;;  %v8002_v31 = vor.u32 %v10285_v38, %v8001_v63 }
 0x354   : > { %v13160_v37 = vadd.f32 %v5232_v57, %v5205_v2  ;;  %v13162_v23 = vpop.f32.mrf.mxu0  ;;  %v10600_v2 = vld [vmem:[%s11440_s12 + $0xb28] sm:$0xf0]  ;;  %v8781_v57 = vld [vmem:[%s11440_s12 + $0x730] sm:$0xf] }
 0x355   : > { %v5207_v55 = vpop.f32.mrf.mxu1  ;;  %v9262_v50 = vor.u32 %v10600_v2, %v9261_v36  ;;  %5532 = vmatpush.bf16.msra.mxu1 %v10038_v3  ;;  %5560 = vmatpush.bf16.msra.mxu2 %v8122_v44  ;;  %v9975_v36 = vld [vmem:[%s11440_s12 + $0x10c4] sm:$0xf0] }
 0x356   : > { %v13168_v13 = vadd.f32 %v5207_v55, %v13119_v29  ;;  %5384 = vmatmul.bf16.gmra.mxu3 %v11675_v34  ;;  %5412 = vmatmul.bf16.gmra.mxu0 %v11677_v35  ;;  %v10300_v29 = vld [vmem:[%s11440_s12 + $0x1c8] sm:$0xf0]  ;;  %v9978_v3 = vor.u32 %v10772_v22, %v9975_v36  ;;  %v10465_v22 = vld [vmem:[%s11440_s12 + $0x6f0] sm:$0xf0]  ;;  %v9081_v36 = vld [vmem:[%s11440_s12 + $0x988] sm:$0xf] }
 0x357   : > { %5613 = vmatpush.bf16.msrb.mxu0 %v9262_v50  ;;  %v8062_v26 = vor.u32 %v10300_v29, %v8061_v54  ;;  %v10480_v55 = vld [vmem:[%s11440_s12 + $0x768] sm:$0xf0]  ;;  %v7941_v54 = vld [vmem:[%s11440_s12 + $0xa0] sm:$0xf]  ;;  %v10757_v29 = vld [vmem:[%s11440_s12 + $0x1014] sm:$0xf]  ;;  %v8722_v19 = vor.u32 %v10465_v22, %v8721_v14 }
 0x358   : > { %5430 = vmatmul.bf16.gmra.mxu1 %v11540_v45  ;;  %5458 = vmatmul.bf16.gmra.mxu2 %v11547_v52  ;;  %v8782_v24 = vor.u32 %v10480_v55, %v8781_v57  ;;  %v10270_v57 = vld [vmem:[%s11440_s12 + $0xd8] sm:$0xf0]  ;;  %v9915_v55 = vld [vmem:[%s11440_s12 + $0x104c] sm:$0xf0] }
 0x359   : > { %v13183_v15 = vpop.f32.mrf.mxu3  ;;  %5561 = vmatpush.bf16.msra.mxu2 %v8062_v26  ;;  %5533 = vmatpush.bf16.msra.mxu1 %v9978_v3  ;;  %v9918_v52 = vor.u32 %v10757_v29, %v9915_v55  ;;  %v7942_v63 = vor.u32 %v10270_v57, %v7941_v54  ;;  %v10727_v29 = vld [vmem:[%s11440_s12 + $0xf24] sm:$0xf]  ;;  %v7882_v54 = vor.u32 %v10255_v16, %v7881_v17  ;;  %v10540_v57 = vld [vmem:[%s11440_s12 + $0x948] sm:$0xf0]  ;;  %v8601_v17 = vld [vmem:[%s11440_s12 + $0x5c8] sm:$0xf] }
 0x35a   : > { %5585 = vmatpush.bf16.msrb.mxu3 %v8782_v24  ;;  %v10742_v24 = vld [vmem:[%s11440_s12 + $0xf9c] sm:$0xf]  ;;  %v10435_v16 = vld [vmem:[%s11440_s12 + $0x600] sm:$0xf0] }
 0x35b   : > { %v13191_v2 = vpop.f32.mrf.mxu2  ;;  %5614 = vmatpush.bf16.msrb.mxu0 %v9202_v18  ;;  %v9858_v26 = vor.u32 %v10742_v24, %v9855_v28 }
 0x35c   : > { %v5191_v44 = vpop.f32.mrf.mxu0 }
 0x35d   : > { %v13193_v50 = vpop.f32.mrf.mxu1  ;;  %v10555_v44 = vld [vmem:[%s11440_s12 + $0x9c0] sm:$0xf0]  ;;  %5562 = vmatpush.bf16.msra.mxu2 %v8002_v31  ;;  %5534 = vmatpush.bf16.msra.mxu1 %v9918_v52  ;;  %v8661_v31 = vld [vmem:[%s11440_s12 + $0x640] sm:$0xf] }
 0x35e   : > { %v9082_v38 = vor.u32 %v10555_v44, %v9081_v36  ;;  %5586 = vmatpush.bf16.msrb.mxu3 %v8722_v19  ;;  %v9021_v19 = vld [vmem:[%s11440_s12 + $0x910] sm:$0xf] }
 0x35f   : > { %5615 = vmatpush.bf16.msrb.mxu0 %v9142_v58  ;;  %v10450_v58 = vld [vmem:[%s11440_s12 + $0x678] sm:$0xf0]  ;;  %v9022_v22 = vor.u32 %v10540_v57, %v9021_v19  ;;  %v6669_v19 = vmul.f32 %v12991_v27, %v12991_v27 }
 0x360   : > { %v8662_v28 = vor.u32 %v10450_v58, %v8661_v31  ;;  %v10525_v31 = vld [vmem:[%s11440_s12 + $0x8d0] sm:$0xf0]  ;;  %v6546_v58 = vadd.f32 %v13019_v60, %v12991_v27  ;;  %v9741_v27 = vld [vmem:[%s11440_s12 + $0xeb0] sm:$0xf] }
 0x361   : > { %v5163_v4 = vpop.f32.mrf.mxu3  ;;  %5563 = vmatpush.bf16.msra.mxu2 %v7942_v63  ;;  %5535 = vmatpush.bf16.msra.mxu1 %v9858_v26  ;;  %v10221_v63 = vld [vmem:[%s11440_s12 + $0x1270] sm:$0xf] }
 0x362   : > { %v9795_v4 = vld [vmem:[%s11440_s12 + $0xf5c] sm:$0xf0]  ;;  %5587 = vmatpush.bf16.msrb.mxu3 %v8662_v28  ;;  %v6547_v57 = vadd.f32 %v6546_v58, %v13043_v30  ;;  %v8541_v58 = vld [vmem:[%s11440_s12 + $0x550] sm:$0xf] }
 0x363   : > { %v13205_v18 = vpop.f32.mrf.mxu2  ;;  %5616 = vmatpush.bf16.msrb.mxu0 %v9082_v38  ;;  %v9798_v52 = vor.u32 %v10727_v29, %v9795_v4  ;;  %v10840_v38 = vld [vmem:[%s11440_s12 + $0x12a8] sm:$0xf0]  ;;  %v8961_v29 = vld [vmem:[%s11440_s12 + $0x898] sm:$0xf]  ;;  %v8602_v4 = vor.u32 %v10435_v16, %v8601_v17  ;;  %v6714_v17 = vmul.f32 %v13067_v51, %v13067_v51  ;;  %v13254_v16 = vld [vmem:[%s11916_s25 + $0x300] sm:$0x1] }
 0x364   : > { %v13211_v14 = vpop.f32.mrf.mxu0  ;;  %v10222_v26 = vor.u32 %v10840_v38, %v10221_v63  ;;  %15533 = vst [vmem:[#allocation87_spill] sm:$0xff] %v13254_v16 }
 0x365   : > { %v13209_v3 = vpop.f32.mrf.mxu1  ;;  %5564 = vmatpush.bf16.msra.mxu2 %v7882_v54  ;;  %5536 = vmatpush.bf16.msra.mxu1 %v9798_v52  ;;  %v8962_v54 = vor.u32 %v10525_v31, %v8961_v29  ;;  %v6684_v52 = vmul.f32 %v13019_v60, %v13019_v60  ;;  %v10161_v31 = vld [vmem:[%s11440_s12 + $0x11f8] sm:$0xf]  ;;  %v10510_v60 = vld [vmem:[%s11440_s12 + $0x858] sm:$0xf0] }
 0x366   : > { %5481 = vmatmul.bf16.vlgmr.msra.gmra.mxu3 %v11510_v47  ;;  %5509 = vmatmul.bf16.vlgmr.msra.gmra.mxu0 %v11589_v5 }
 0x367   : > { %5617 = vmatpush.bf16.msrb.mxu0 %v9022_v22  ;;  %5588 = vmatpush.bf16.msrb.mxu3 %v8602_v4  ;;  %v6699_v22 = vmul.f32 %v13043_v30, %v13043_v30  ;;  %v6846_v38 = vadd.f32 %v6684_v52, %v6669_v19  ;;  %v6729_v19 = vmul.f32 %v13086_v33, %v13086_v33  ;;  %v8901_v30 = vld [vmem:[%s11440_s12 + $0x820] sm:$0xf] }
 0x368   : > { %5435 = vmatmul.bf16.gmra.mxu1 %v11503_v42  ;;  %5463 = vmatmul.bf16.gmra.mxu2 %v11595_v9  ;;  %v6759_v9 = vmul.f32 %v13254_v16, %v13254_v16 }
 0x369   : > { %v13223_v55 = vpop.f32.mrf.mxu3  ;;  %5669 = vmatpush.bf16.msrb.mxu2 %v10222_v26  ;;  %v6548_v26 = vadd.f32 %v6547_v57, %v13067_v51  ;;  %v6847_v5 = vadd.f32 %v6846_v38, %v6699_v22  ;;  %v6551_v57 = vsel %vm6472_vm0, %v13254_v16, 0.0  ;;  %v8902_v16 = vor.u32 %v10510_v60, %v8901_v30 }
 0x36b   : > { %v13225_v36 = vpop.f32.mrf.mxu2  ;;  %5618 = vmatpush.bf16.msrb.mxu0 %v8962_v54  ;;  %v10825_v54 = vld [vmem:[%s11440_s12 + $0x1230] sm:$0xf0]  ;;  %v6549_v52 = vadd.f32 %v6548_v26, %v13086_v33  ;;  %v6848_v51 = vadd.f32 %v6847_v5, %v6714_v17  ;;  %v6744_v33 = vmul.f32 %v13104_v56, %v13104_v56  ;;  %v6851_v5 = vsel %vm6472_vm0, %v6759_v9, 0.0 }
 0x36c   : > { %v13229_v24 = vpop.f32.mrf.mxu0  ;;  %v10162_v22 = vor.u32 %v10825_v54, %v10161_v31  ;;  %v9742_v31 = vor.u32 %v10720_v25, %v9741_v27 }
 0x36d   : > { %v13227_v44 = vpop.f32.mrf.mxu1  ;;  %15532 = vst [vmem:[#allocation86_spill] sm:$0xff] %v13229_v24  ;;  %v10420_v24 = vld [vmem:[%s11440_s12 + $0x588] sm:$0xf0]  ;;  %v6550_v26 = vadd.f32 %v6549_v52, %v13104_v56  ;;  %v6849_v0 = vadd.f32 %v6848_v51, %v6729_v19 }
 0x36e   : > { %v8542_v38 = vor.u32 %v10420_v24, %v8541_v58  ;;  %5670 = vmatpush.bf16.msrb.mxu2 %v10162_v22  ;;  %5641 = vmatpush.bf16.msrb.mxu1 %v9742_v31 }
 0x36f   : > { %5619 = vmatpush.bf16.msrb.mxu0 %v8902_v16  ;;  %v6850_v17 = vadd.f32 %v6849_v0, %v6744_v33 }
 0x370   : > { %5589 = vmatpush.bf16.msrb.mxu3 %v8542_v38 }
 0x371   : > { %v13241_v28 = vpop.f32.mrf.mxu3 }
 0x373   : > { %v13248_v63 = vpop.f32.mrf.mxu2 }
 0x374   : > { %v13258_v4 = vpop.f32.mrf.mxu0 }
 0x375   : > { %v13256_v29 = vpop.f32.mrf.mxu1 }
 0x376   : > { %5486 = vmatmul.bf16.gmra.mxu3 %v11549_v53  ;;  %5514 = vmatmul.bf16.gmra.mxu0 %v11623_v7  ;;  %v6552_v7 = vadd.f32 %v6551_v57, %v6550_v26 }
 0x378   : > { %5440 = vmatmul.bf16.gmra.mxu1 %v11542_v48  ;;  %5468 = vmatmul.bf16.gmra.mxu2 %v11627_v11  ;;  %v6553_v52 = vrot.slane %v6552_v7, 4  ;;  %v6852_v11 = vadd.f32 %v6851_v5, %v6850_v17  ;;  %v5190_v17 = vadd.f32 %v13162_v23, %v13183_v15  ;;  %v13317_v23 = vadd.f32 %v13223_v55, %v13147_v32 }
 0x379   : > { %v5263_v53 = vpop.f32.mrf.mxu3 }
 0x37a   : > { %v6554_v43 = vadd.f32 %v6553_v52, %v6552_v7  ;;  %v6853_v22 = vrot.slane %v6852_v11, 4  ;;  %v5218_v15 = vadd.f32 %v13256_v29, %v5190_v17  ;;  %v6670_v29 = vmul.f32 %v13317_v23, %v13317_v23 }
 0x37b   : > { %v5245_v24 = vpop.f32.mrf.mxu2 }
 0x37c   : > { %v13283_v58 = vpop.f32.mrf.mxu0  ;;  %v6555_v27 = vrot.slane %v6554_v43, 2  ;;  %v6854_v9 = vadd.f32 %v6853_v22, %v6852_v11  ;;  %v5210_v22 = vadd.f32 %v13193_v50, %v13130_v39  ;;  %v5215_v50 = vadd.f32 %v13227_v44, %v13158_v1 }
 0x37d   : > { %v5219_v54 = vpop.f32.mrf.mxu1  ;;  %15534 = vst [vmem:[#allocation88_spill] sm:$0xff] %v13283_v58  ;;  %v15572_v58 = vld [vmem:[#allocation59_spill] sm:$0xff] }
 0x37e   : > { %v6556_v51 = vadd.f32 %v6555_v27, %v6554_v43  ;;  %v6855_v7 = vrot.slane %v6854_v9, 2  ;;  %v5236_v43 = vadd.f32 %v13191_v2, %v13168_v13  ;;  %v5238_v39 = vadd.f32 %v13205_v18, %v5210_v22 }
 0x37f   : > { %v5246_v2 = vadd.f32 %v5245_v24, %v5218_v15 }
 0x380   : > { %v6856_v11 = vadd.f32 %v6855_v7, %v6854_v9  ;;  %v13324_v13 = vadd.f32 %v5263_v53, %v5236_v43 }
 0x381   : > { %v5265_v56 = vpop.f32.mrf.mxu3 }
 0x382   : > { %v6857_v5 = vrot.slane %v6856_v11, 1  ;;  %v13332_v55 = vadd.f32 %v5265_v56, %v5238_v39  ;;  %v6700_v1 = vmul.f32 %v13324_v13, %v13324_v13 }
 0x383   : > { %v5247_v38 = vpop.f32.mrf.mxu2 }
 0x384   : > { %v13285_v60 = vpop.f32.mrf.mxu0  ;;  %v13308_v38 = vadd.f32 %v13241_v28, %v13160_v37  ;;  %v5213_v37 = vadd.f32 %v13209_v3, %v13145_v21 }
 0x385   : > { %v5314_v30 = vpop.f32.mrf.mxu1 }
 0x386   : > { %v5315_v25 = vadd.f32 %v5314_v30, %v13211_v14  ;;  %5491 = vmatmul.bf16.gmra.mxu3 %v11597_v10  ;;  %5519 = vmatmul.bf16.gmra.mxu0 %v11653_v61  ;;  %v6557_v14 = vrot.slane %v6556_v51, 1  ;;  %v5241_v32 = vadd.f32 %v13225_v36, %v5213_v37  ;;  %v6685_v53 = vmul.f32 %v13308_v38, %v13308_v38  ;;  %v15583_v61 = vld [vmem:[#allocation68_spill] sm:$0xff] }
 0x387   : > { %v6559_v56 = vadd.f32 %v13308_v38, %v13317_v23 }
 0x388   : > { %5537 = vmatmul.bf16.vlgmr.msra.gmra.mxu1 %v11591_v6  ;;  %5565 = vmatmul.bf16.vlgmr.msra.gmra.mxu2 %v11501_v41  ;;  %v6558_v31 = vadd.f32 %v6557_v14, %v6556_v51  ;;  %v6715_v51 = vmul.f32 %v13332_v55, %v13332_v55  ;;  %v6859_v7 = vadd.f32 %v6685_v53, %v6670_v29 }
 0x389   : > { %v5268_v0 = vpop.f32.mrf.mxu3  ;;  %v6560_v9 = vadd.f32 %v6559_v56, %v13324_v13 }
 0x38a   : > { %v13313_v27 = vmul.f32 0.020408163, %v6558_v31  ;;  %v13341_v36 = vadd.f32 %v5268_v0, %v5241_v32  ;;  %v6860_v14 = vadd.f32 %v6859_v7, %v6700_v1 }
 0x38b   : > { %v5342_v33 = vpop.f32.mrf.mxu2  ;;  %v6561_v0 = vadd.f32 %v6560_v9, %v13332_v55  ;;  %v8481_v9 = vld [vmem:[%s11440_s12 + $0x4d8] sm:$0xf] }
 0x38c   : > { %v13292_v16 = vadd.f32 %v5342_v33, %v5315_v25  ;;  %v13294_v19 = vpop.f32.mrf.mxu0  ;;  %v6858_v25 = vadd.f32 %v6857_v5, %v6856_v11  ;;  %v6999_v3 = vmul.f32 %v13313_v27, %v13313_v27  ;;  %v6730_v33 = vmul.f32 %v13341_v36, %v13341_v36 }
 0x38d   : > { %15535 = vst [vmem:[#allocation89_spill] sm:$0xff] %v13294_v19  ;;  %v13296_v57 = vpop.f32.mrf.mxu1  ;;  %v6562_v11 = vadd.f32 %v6561_v0, %v13341_v36  ;;  %v10041_v19 = vld [vmem:[%s11440_s12 + $0x1108] sm:$0xf] }
 0x38e   : > { %15536 = vst [vmem:[#allocation90_spill] sm:$0xff] %v13296_v57  ;;  %v6984_v21 = vmul.f32 0.020408163, %v6858_v25 }
 0x391   : > { %v5270_v26 = vpop.f32.mrf.mxu3 }
 0x393   : > { %v13369_v32 = vpop.f32.mrf.mxu2 }
 0x394   : > { %v13300_v54 = vpop.f32.mrf.mxu0  ;;  %15537 = vst [vmem:[#allocation91_spill] sm:$0xff] %v13369_v32  ;;  %v15573_v32 = vld [vmem:[#allocation60_spill] sm:$0xff] }
 0x395   : > { %v5319_v52 = vpop.f32.mrf.mxu1 }
 0x396   : > { %v13311_v30 = vadd.f32 %v5319_v52, %v13258_v4  ;;  %5496 = vmatmul.bf16.gmra.mxu3 %v11629_v12  ;;  %5524 = vmatmul.bf16.gmra.mxu0 %v11675_v34  ;;  %v5243_v4 = vadd.f32 %v13248_v63, %v5215_v50  ;;  %v7014_v63 = vsub.f32 %v6984_v21, %v6999_v3  ;;  %v10645_v12 = vld [vmem:[%s11440_s12 + $0xc90] sm:$0xf0] }
 0x398   : > { %5542 = vmatmul.bf16.gmra.mxu1 %v11625_v8  ;;  %5570 = vmatmul.bf16.gmra.mxu2 %v11540_v45  ;;  %v13348_v24 = vadd.f32 %v5270_v26, %v5243_v4  ;;  %v6861_v26 = vadd.f32 %v6860_v14, %v6715_v51  ;;  %v7029_v17 = vmax.f32 %v7014_v63, 0.0  ;;  %v10405_v51 = vld [vmem:[%s11440_s12 + $0x510] sm:$0xf0]  ;;  %v15585_v8 = vld [vmem:[#allocation70_spill] sm:$0xff] }
 0x399   : > { %v5273_v18 = vpop.f32.mrf.mxu3  ;;  %v8482_v0 = vor.u32 %v10405_v51, %v8481_v9 }
 0x39a   : > { %v5274_v28 = vadd.f32 %v5273_v18, %v5246_v2  ;;  %v6745_v31 = vmul.f32 %v13348_v24, %v13348_v24  ;;  %v6563_v43 = vadd.f32 %v6562_v11, %v13348_v24  ;;  %v6862_v22 = vadd.f32 %v6861_v26, %v6730_v33 }
 0x39b   : > { %v13367_v2 = vadd.f32 0.001, %v7029_v17  ;;  %v5347_v63 = vpop.f32.mrf.mxu2  ;;  %5590 = vmatpush.bf16.msrb.mxu3 %v8482_v0 }
 0x39c   : > { %6354 = vst [vmem:[%s11916_s25 + $0x308] sm:$0x1] %v5274_v28  ;;  %v5303_v44 = vpop.f32.mrf.mxu0  ;;  %v6863_v37 = vadd.f32 %v6862_v22, %v6745_v31  ;;  %v13380_v11 = vadd.f32 %v5347_v63, %v13311_v30  ;;  %v10390_v22 = vld [vmem:[%s11440_s12 + $0x498] sm:$0xf0]  ;;  %v13409_v63 = vmul.f32 %v12050_v59, %v11819_v49 }
 0x39d   : > { %10971 = vrsqrt.f32 %v13367_v2  ;;  %v13382_v31 = vpop.f32.mrf.mxu1  ;;  %vm7119_vm8 = vweird.f32 %v13367_v2 }
 0x39e   : > { %15538 = vst [vmem:[#allocation92_spill] sm:$0xff] %v13382_v31  ;;  %v15571_v31 = vld [vmem:[#allocation82_spill] sm:$0xff] }
 0x3a1   : > { %v5275_v5 = vpop.f32.mrf.mxu3 }
 0x3a3   : > { %v13360_v52 = vld [vmem:[%s11916_s25 + $0x308] sm:$0x1]  ;;  %v13377_v7 = vpop.eup %10971 }
 0x3a4   : > { %v6564_v25 = vsel %vm6472_vm0, %v13360_v52, 0.0  ;;  %v6760_v15 = vmul.f32 %v13360_v52, %v13360_v52  ;;  %v7114_v26 = vmul.f32 %v13377_v7, %v13367_v2  ;;  %vm7120_vm7 = vweird.f32 %v13377_v7  ;;  %v15562_v2 = vld [vmem:[#allocation54_spill] sm:$0xff] }
 0x3a5   : > { %v6565_v39 = vadd.f32 %v6564_v25, %v6563_v43  ;;  %v8421_v43 = vld [vmem:[%s11440_s12 + $0x460] sm:$0xf]  ;;  %vm13488_vm9 = vmor %vm7119_vm8, %vm7120_vm7 }
 0x3a6   : > { %v6864_v50 = vsel %vm6472_vm0, %v6760_v15, 0.0  ;;  %v7115_v30 = vmul.f32 %v13377_v7, %v7114_v26  ;;  %v13415_v26 = vmul.f32 %v12050_v59, %v11840_v20 }
 0x3a7   : > { %v6566_v18 = vrot.slane %v6565_v39, 4  ;;  %v6865_v53 = vadd.f32 %v6864_v50, %v6863_v37  ;;  %v8841_v50 = vld [vmem:[%s11440_s12 + $0x7a8] sm:$0xf] }
 0x3a8   : > { %5547 = vmatmul.bf16.gmra.mxu1 %v11655_v62  ;;  %5575 = vmatmul.bf16.gmra.mxu2 %v11503_v42  ;;  %v15577_v62 = vld [vmem:[#allocation62_spill] sm:$0xff] }
 0x3a9   : > { %v6567_v21 = vadd.f32 %v6566_v18, %v6565_v39  ;;  %v6866_v3 = vrot.slane %v6865_v53, 4  ;;  %v8422_v39 = vor.u32 %v10390_v22, %v8421_v43  ;;  %v10495_v18 = vld [vmem:[%s11440_s12 + $0x7e0] sm:$0xf0] }
 0x3ab   : > { %v6568_v28 = vrot.slane %v6567_v21, 2  ;;  %v6867_v29 = vadd.f32 %v6866_v3, %v6865_v53  ;;  %5591 = vmatpush.bf16.msrb.mxu3 %v8422_v39  ;;  %v8361_v53 = vld [vmem:[%s11440_s12 + $0x3e8] sm:$0xf]  ;;  %v13397_v3 = vpop.f32.mrf.mxu2  ;;  %v15541_v39 = vld [vmem:[#allocation39_spill] sm:$0xff] }
 0x3ac   : > { %15539 = vst [vmem:[#allocation93_spill] sm:$0xff] %v13397_v3  ;;  %v13424_v49 = vmul.f32 %v12050_v59, %v15541_v39  ;;  %v9621_v39 = vld [vmem:[%s11440_s12 + $0xdc0] sm:$0xf]  ;;  %v10795_v3 = vld [vmem:[%s11440_s12 + $0x1140] sm:$0xf0] }
 0x3ad   : > { %v6569_v4 = vadd.f32 %v6568_v28, %v6567_v21  ;;  %v6868_v56 = vrot.slane %v6867_v29, 2  ;;  %v8842_v21 = vor.u32 %v10495_v18, %v8841_v50  ;;  %v10375_v28 = vld [vmem:[%s11440_s12 + $0x420] sm:$0xf0]  ;;  %v15544_v50 = vld [vmem:[#allocation40_spill] sm:$0xff]  ;;  %v15545_v18 = vld [vmem:[#allocation51_spill] sm:$0xff] }
 0x3af   : > { %v6570_v1 = vrot.slane %v6569_v4, 1  ;;  %v6869_v44 = vadd.f32 %v6868_v56, %v6867_v29  ;;  %5620 = vmatpush.bf16.msrb.mxu0 %v8842_v21  ;;  %v5324_v56 = vpop.f32.mrf.mxu1  ;;  %v15546_v21 = vld [vmem:[#allocation43_spill] sm:$0xff] }
 0x3b0   : > { %v5325_v51 = vadd.f32 %v5324_v56, %v13285_v60  ;;  %v13419_v60 = vmul.f32 %v12050_v59, %v11849_v40 }
 0x3b1   : > { %v6571_v33 = vadd.f32 %v6570_v1, %v6569_v4  ;;  %v6870_v14 = vrot.slane %v6869_v44, 1  ;;  %v8362_v4 = vor.u32 %v10375_v28, %v8361_v53  ;;  %v5398_v1 = vpop.f32.mrf.mxu0  ;;  %v13435_v53 = vmul.f32 %v15545_v18, %v15544_v50 }
 0x3b2   : > { %5621 = vmatmul.bf16.vlgmr.msrb.gmra.mxu0 %v11510_v47  ;;  %v13439_v28 = vmul.f32 %v15545_v18, %v15546_v21  ;;  %v15554_v21 = vld [vmem:[#allocation46_spill] sm:$0xff]  ;;  %v15556_v47 = vld [vmem:[#allocation48_spill] sm:$0xff] }
 0x3b3   : > { %v6871_v5 = vadd.f32 %v6870_v14, %v6869_v44  ;;  %v13386_v17 = vmul.f32 0.020408163, %v6571_v33  ;;  %v7116_v44 = vmul.f32 0.5, %v7115_v30  ;;  %5592 = vmatpush.bf16.msrb.mxu3 %v8362_v4  ;;  %v9681_v33 = vld [vmem:[%s11440_s12 + $0xe38] sm:$0xf] }
 0x3b4   : > { %v10705_v14 = vld [vmem:[%s11440_s12 + $0xe70] sm:$0xf0] }
 0x3b5   : > { %v6985_v25 = vmul.f32 0.020408163, %v6871_v5  ;;  %v7000_v15 = vmul.f32 %v13386_v17, %v13386_v17  ;;  %v7117_v0 = vsub.f32 1.5, %v7116_v44  ;;  %v15540_v5 = vld [vmem:[#allocation65_spill] sm:$0xff]  ;;  %v9682_v22 = vor.u32 %v10705_v14, %v9681_v33  ;;  %v10991_v30 = vld [vmem:[%s11916_s25 + $0x2d0] sm:$0x1] }
 0x3b6   : > { %5593 = vmatmul.bf16.vlgmr.msrb.gmra.mxu3 %v11508_v46  ;;  %v7322_v43 = vperm.slane %v15540_v5, 0  ;;  %v15551_v33 = vld [vmem:[#allocation45_spill] sm:$0xff] }
 0x3b7   : > { %v7015_v37 = vsub.f32 %v6985_v25, %v7000_v15  ;;  %v5352_v25 = vpop.f32.mrf.mxu2  ;;  %v5370_v15 = vpop.f32.mrf.mxu3  ;;  %5642 = vmatpush.bf16.msrb.mxu1 %v9682_v22  ;;  %v13454_v14 = vmul.f32 %v15545_v18, %v15551_v33  ;;  %v7118_v5 = vmul.f32 %v13377_v7, %v7117_v0  ;;  %v10992_v22 = vld [vmem:[%s11916_s25 + $0x2d8] sm:$0x1] }
 0x3b8   : > { %5552 = vmatmul.bf16.gmra.mxu1 %v11677_v35  ;;  %5580 = vmatmul.bf16.gmra.mxu2 %v11542_v48  ;;  %v13430_v20 = vadd.f32 %v5352_v25, %v5325_v51  ;;  %v5371_v40 = vadd.f32 %v5370_v15, %v13292_v16  ;;  %v13446_v44 = vpop.f32.mrf.mxu1  ;;  %v10101_v25 = vld [vmem:[%s11440_s12 + $0x1180] sm:$0xf]  ;;  %v10810_v15 = vld [vmem:[%s11440_s12 + $0x11b8] sm:$0xf0]  ;;  %v13465_v50 = vmul.f32 %v10992_v22, %v15545_v18  ;;  %v15555_v48 = vld [vmem:[#allocation47_spill] sm:$0xff] }
 0x3b9   : > { %v7030_v29 = vmax.f32 %v7015_v37, 0.0  ;;  %v13428_v37 = vmul.f32 %v10991_v30, %v12050_v59  ;;  %v15548_v59 = vld [vmem:[#allocation67_spill] sm:$0xff]  ;;  %15549 = vst [vmem:[#allocation40_spill] sm:$0xff] %v13446_v44  ;;  %v13448_v16 = vpop.f32.mrf.mxu0  ;;  %v10102_v33 = vor.u32 %v10810_v15, %v10101_v25  ;;  %v10690_v0 = vld [vmem:[%s11440_s12 + $0xdf8] sm:$0xf0]  ;;  %v13474_v42 = vmul.f32 %v7322_v43, %v15555_v48 }
 0x3ba   : > { %15543 = vst [vmem:[#allocation39_spill] sm:$0xff] %v13430_v20  ;;  %v7323_v56 = vperm.slane %v15548_v59, 0  ;;  %v13461_v30 = vadd.f32 %v5398_v1, %v5371_v40  ;;  %v13477_v1 = vmul.f32 %v7322_v43, %v15556_v47  ;;  %v9622_v40 = vor.u32 %v10690_v0, %v9621_v39  ;;  %v15561_v48 = vld [vmem:[#allocation79_spill] sm:$0xff]  ;;  %v10993_v0 = vld [vmem:[%s11916_s25 + $0x2e0] sm:$0x1] }
 0x3bb   : > { %v13401_v9 = vadd.f32 0.001, %v7030_v29  ;;  %15542 = vst [vmem:[#allocation65_spill] sm:$0xff] %v13428_v37  ;;  %v15547_v29 = vld [vmem:[#allocation44_spill] sm:$0xff]  ;;  %v7213_v15 = vperm.slane %v15561_v48, 6  ;;  %5671 = vmatpush.bf16.msrb.mxu2 %v10102_v33  ;;  %v13495_v39 = vmul.f32 %v7322_v43, %v15562_v2  ;;  %v7122_v44 = vsel %vm13488_vm9, %v13377_v7, %v7118_v5  ;;  %v15566_v2 = vld [vmem:[#allocation81_spill] sm:$0xff] }
 0x3bc   : > { %v13443_v4 = vmul.f32 %v15545_v18, %v15547_v29  ;;  %15550 = vst [vmem:[#allocation51_spill] sm:$0xff] %v13448_v16  ;;  %v13468_v29 = vmul.f32 %v7322_v43, %v15554_v21  ;;  %v15557_v18 = vld [vmem:[#allocation49_spill] sm:$0xff]  ;;  %v15558_v21 = vld [vmem:[#allocation50_spill] sm:$0xff]  ;;  %5643 = vmatpush.bf16.msrb.mxu1 %v9622_v40  ;;  %v7324_v45 = vperm.slane %v15566_v2, 0  ;;  %v13535_v57 = vmul.f32 %v7323_v56, %v15573_v32  ;;  %v10660_v32 = vld [vmem:[%s11440_s12 + $0xd08] sm:$0xf0] }
 0x3bd   : > { %10973 = vrsqrt.f32 %v13401_v9  ;;  %15552 = vst [vmem:[#allocation43_spill] sm:$0xff] %v13461_v30  ;;  %v13481_v22 = vmul.f32 %v7322_v43, %v15557_v18  ;;  %v13484_v30 = vmul.f32 %v7322_v43, %v15558_v21  ;;  %v13498_v18 = vmul.f32 %v10993_v0, %v7322_v43  ;;  %v15564_v21 = vld [vmem:[#allocation55_spill] sm:$0xff]  ;;  %v9561_v48 = vld [vmem:[%s11440_s12 + $0xd48] sm:$0xf]  ;;  %v10675_v0 = vld [vmem:[%s11440_s12 + $0xd80] sm:$0xf0] }
 0x3be   : > { %15553 = vst [vmem:[#allocation44_spill] sm:$0xff] %v13465_v50  ;;  %v13501_v16 = vmul.f32 %v7323_v56, %v15564_v21  ;;  %v10042_v43 = vor.u32 %v10795_v3, %v10041_v19  ;;  %v15569_v25 = vld [vmem:[#allocation57_spill] sm:$0xff]  ;;  %v15570_v5 = vld [vmem:[#allocation58_spill] sm:$0xff]  ;;  %v9562_v2 = vor.u32 %v10675_v0, %v9561_v48  ;;  %vm7129_vm11 = vweird.f32 %v13401_v9  ;;  %v15592_v20 = vld [vmem:[#allocation75_spill] sm:$0xff] }
 0x3bf   : > { %15563 = vst [vmem:[#allocation67_spill] sm:$0xff] %v13498_v18  ;;  %v13514_v34 = vpop.f32.mrf.mxu2  ;;  %v13516_v21 = vpop.f32.mrf.mxu3  ;;  %v13519_v7 = vmul.f32 %v7323_v56, %v15569_v25  ;;  %v13522_v40 = vmul.f32 %v7323_v56, %v15570_v5  ;;  %v10994_v3 = vld [vmem:[%s12023_s0] sm:$0xff]  ;;  %v13532_v5 = vmul.f32 %v7323_v56, %v15572_v58 }
 0x3c0   : > { %15567 = vst [vmem:[#allocation45_spill] sm:$0xff] %v13514_v34  ;;  %v7214_v34 = vperm.slane %v10994_v3, 7  ;;  %5672 = vmatpush.bf16.msrb.mxu2 %v10042_v43  ;;  %v5329_v25 = vpop.f32.mrf.mxu1  ;;  %5644 = vmatpush.bf16.msrb.mxu1 %v9562_v2  ;;  %v9501_v43 = vld [vmem:[%s11440_s12 + $0xcd0] sm:$0xf]  ;;  %v15576_v0 = vld [vmem:[#allocation61_spill] sm:$0xff]  ;;  %v15602_v37 = vld [vmem:[#allocation84_spill] sm:$0xff] }
 0x3c1   : > { %15568 = vst [vmem:[#allocation46_spill] sm:$0xff] %v13516_v21  ;;  %v13529_v21 = vpop.f32.mrf.mxu0  ;;  %v13547_v3 = vmul.f32 %v7324_v45, %v15576_v0  ;;  %v15601_v18 = vld [vmem:[#allocation83_spill] sm:$0xff] }
 0x3c3   : > { %v13450_v51 = vpop.eup %10973 }
 0x3c4   : > { %v7124_v59 = vmul.f32 %v13450_v51, %v13401_v9  ;;  %vm7130_vm10 = vweird.f32 %v13450_v51  ;;  %v9502_v9 = vor.u32 %v10660_v32, %v9501_v43 }
 0x3c5   : > { %vm7131_vm12 = vmor %vm7129_vm11, %vm7130_vm10 }
 0x3c6   : > { %v7125_v47 = vmul.f32 %v13450_v51, %v7124_v59  ;;  %v15565_v59 = vld [vmem:[#allocation56_spill] sm:$0xff]  ;;  %5645 = vmatpush.bf16.msrb.mxu1 %v9502_v9 }
 0x3c7   : > { %v13510_v33 = vmul.f32 %v7323_v56, %v15565_v59  ;;  %v13525_v59 = vperm.slane %v15571_v31, 0  ;;  %v10995_v31 = vld [vmem:[%s11916_s25 + $0x2e8] sm:$0x1] }
 0x3c8   : > { %v7126_v35 = vmul.f32 0.5, %v7125_v47  ;;  %v7243_v47 = vmul.f32 %v7213_v15, %v7122_v44  ;;  %v13538_v48 = vmul.f32 %v10995_v31, %v7323_v56  ;;  %v9981_v44 = vld [vmem:[%s11440_s12 + $0x1090] sm:$0xf]  ;;  %v13543_v15 = vadd.f32 %v5329_v25, %v13300_v54  ;;  %v15579_v54 = vld [vmem:[#allocation64_spill] sm:$0xff] }
 0x3c9   : > { %v13553_v56 = vmul.f32 %v7324_v45, %v15577_v62  ;;  %v15578_v31 = vld [vmem:[#allocation63_spill] sm:$0xff]  ;;  %v13559_v25 = vmul.f32 %v7324_v45, %v15579_v54  ;;  %v13571_v54 = vmul.f32 %v7324_v45, %v15583_v61  ;;  %v13578_v43 = vmul.f32 %v13525_v59, %v15585_v8  ;;  %v5375_v8 = vpop.f32.mrf.mxu3 }
 0x3ca   : > { %v7127_v19 = vsub.f32 1.5, %v7126_v35  ;;  %15574 = vst [vmem:[#allocation47_spill] sm:$0xff] %v13538_v48  ;;  %v10780_v35 = vld [vmem:[%s11440_s12 + $0x10c8] sm:$0xf0]  ;;  %v13556_v2 = vmul.f32 %v7324_v45, %v15578_v31  ;;  %v7260_v0 = vmul.f32 %v7243_v47, %v13313_v27  ;;  %v15582_v31 = vld [vmem:[#allocation25_spill] sm:$0xff]  ;;  %v5376_v6 = vadd.f32 %v5375_v8, %v13380_v11 }
 0x3cb   : > { %15575 = vst [vmem:[#allocation48_spill] sm:$0xff] %v13543_v15  ;;  %v9982_v58 = vor.u32 %v10780_v35, %v9981_v44  ;;  %v15581_v44 = vld [vmem:[#allocation66_spill] sm:$0xff]  ;;  %5598 = vmatmul.bf16.gmra.mxu3 %v15582_v31  ;;  %v10996_v15 = vld [vmem:[%s11916_s25 + $0x2f0] sm:$0x1]  ;;  %v7326_v31 = vperm.slane %v7243_v47, 0 }
 0x3cc   : > { %v7128_v41 = vmul.f32 %v13450_v51, %v7127_v19  ;;  %v15580_v19 = vld [vmem:[#allocation26_spill] sm:$0xff]  ;;  %v13565_v35 = vmul.f32 %v7324_v45, %v15581_v44  ;;  %v13574_v46 = vmul.f32 %v10996_v15, %v7324_v45  ;;  %v9921_v44 = vld [vmem:[%s11440_s12 + $0x1018] sm:$0xf]  ;;  %v15586_v27 = vld [vmem:[#allocation71_spill] sm:$0xff]  ;;  %v13591_v15 = vpop.f32.mrf.mxu2 }
 0x3cd   : > { %5626 = vmatmul.bf16.gmra.mxu0 %v15580_v19  ;;  %5673 = vmatpush.bf16.msrb.mxu2 %v9982_v58  ;;  %v10765_v19 = vld [vmem:[%s11440_s12 + $0x1050] sm:$0xf0]  ;;  %15588 = vst [vmem:[#allocation50_spill] sm:$0xff] %v13591_v15  ;;  %v13604_v15 = vpop.f32.mrf.mxu0  ;;  %v13641_v50 = vmul.f32 %v7326_v31, %v15601_v18  ;;  %v9321_v18 = vld [vmem:[%s11440_s12 + $0xb68] sm:$0xf] }
 0x3ce   : > { %v7132_v62 = vsel %vm7131_vm12, %v13450_v51, %v7128_v41  ;;  %15584 = vst [vmem:[#allocation49_spill] sm:$0xff] %v13574_v46  ;;  %v9441_v41 = vld [vmem:[%s11440_s12 + $0xc58] sm:$0xf]  ;;  %v13585_v51 = vmul.f32 %v13525_v59, %v15586_v27  ;;  %v9922_v45 = vor.u32 %v10765_v19, %v9921_v44  ;;  %v7289_v19 = vrot.slane %v7260_v0, 2  ;;  %v5331_v44 = vpop.f32.mrf.mxu1  ;;  %v9861_v0 = vld [vmem:[%s11440_s12 + $0xfa0] sm:$0xf] }
 0x3cf   : > { %v7244_v32 = vmul.f32 %v7214_v34, %v7132_v62  ;;  %v15587_v58 = vld [vmem:[#allocation72_spill] sm:$0xff]  ;;  %v15589_v34 = vld [vmem:[#allocation73_spill] sm:$0xff]  ;;  %15591 = vst [vmem:[#allocation79_spill] sm:$0xff] %v13604_v15 }
 0x3d0   : > { %v13589_v61 = vmul.f32 %v13525_v59, %v15587_v58  ;;  %v13596_v62 = vmul.f32 %v13525_v59, %v15589_v34  ;;  %v15590_v58 = vld [vmem:[#allocation74_spill] sm:$0xff]  ;;  %v9442_v34 = vor.u32 %v10645_v12, %v9441_v41  ;;  %v15596_v44 = vld [vmem:[#allocation77_spill] sm:$0xff] }
 0x3d1   : > { %v7261_v9 = vmul.f32 %v7244_v32, %v13386_v17  ;;  %v7327_v27 = vperm.slane %v7244_v32, 0  ;;  %v13602_v47 = vmul.f32 %v13525_v59, %v15590_v58  ;;  %5674 = vmatpush.bf16.msrb.mxu2 %v9922_v45  ;;  %v13608_v17 = vmul.f32 %v13525_v59, %v15592_v20  ;;  %v10997_v32 = vld [vmem:[%s11916_s25 + $0x2f8] sm:$0x1]  ;;  %v9381_v20 = vld [vmem:[%s11440_s12 + $0xbe0] sm:$0xf] }
 0x3d2   : > { %v13612_v11 = vmul.f32 %v10997_v32, %v13525_v59  ;;  %v10750_v58 = vld [vmem:[%s11440_s12 + $0xfd8] sm:$0xf0]  ;;  %v15595_v45 = vld [vmem:[#allocation76_spill] sm:$0xff]  ;;  %v13618_v48 = vmul.f32 %v7326_v31, %v15596_v44  ;;  %5646 = vmatpush.bf16.msrb.mxu1 %v9442_v34  ;;  %v13632_v32 = vadd.f32 %v13529_v21, %v5376_v6  ;;  %v15604_v6 = vld [vmem:[#allocation87_spill] sm:$0xff] }
 0x3d3   : > { %15593 = vst [vmem:[#allocation54_spill] sm:$0xff] %v13608_v17  ;;  %v7290_v8 = vrot.slane %v7261_v9, 1  ;;  %v7341_v46 = vmul.f32 %v7326_v31, %v15595_v45  ;;  %v13621_v12 = vmul.f32 %v7327_v27, %v13348_v24  ;;  %v10630_v41 = vld [vmem:[%s11440_s12 + $0xc18] sm:$0xf0]  ;;  %v9862_v45 = vor.u32 %v10750_v58, %v9861_v0  ;;  %v15599_v24 = vld [vmem:[#allocation78_spill] sm:$0xff]  ;;  %v15600_v34 = vld [vmem:[#allocation80_spill] sm:$0xff] }
 0x3d4   : > { %15594 = vst [vmem:[#allocation55_spill] sm:$0xff] %v13612_v11  ;;  %v7252_v59 = vld [vmem:[%s13627_s26] sm:$0xff]  ;;  %v9382_v44 = vor.u32 %v10630_v41, %v9381_v20  ;;  %v13635_v15 = vmul.f32 %v7326_v31, %v15599_v24  ;;  %v13638_v11 = vmul.f32 %v7326_v31, %v15600_v34  ;;  %v13649_v21 = vmul.f32 %v7326_v31, %v15604_v6  ;;  %v9801_v20 = vld [vmem:[%s11440_s12 + $0xf28] sm:$0xf] }
 0x3d5   : > { %15597 = vst [vmem:[#allocation56_spill] sm:$0xff] %v13621_v12  ;;  %v7305_v9 = vsel %vm7304_vm15, %v7289_v19, %v7290_v8  ;;  %v15603_v17 = vld [vmem:[#allocation85_spill] sm:$0xff]  ;;  %v7342_v58 = vmul.f32 %v7327_v27, %v13317_v23  ;;  %5675 = vmatpush.bf16.msrb.mxu2 %v9862_v45  ;;  %v10735_v41 = vld [vmem:[%s11440_s12 + $0xf60] sm:$0xf0]  ;;  %v7357_v34 = vmul.f32 %v7327_v27, %v13308_v38 }
 0x3d6   : > { %15598 = vst [vmem:[#allocation81_spill] sm:$0xff] %v13632_v32  ;;  %v7307_v12 = vsel %vm7306_vm1, %v15602_v37, %v7305_v9  ;;  %v13646_v19 = vmul.f32 %v7326_v31, %v15603_v17  ;;  %v15605_v8 = vld [vmem:[#allocation69_spill] sm:$0xff]  ;;  %v7372_v37 = vmul.f32 %v7327_v27, %v13324_v13  ;;  %5647 = vmatpush.bf16.msrb.mxu1 %v9382_v44  ;;  %v5359_v17 = vpop.f32.mrf.mxu2  ;;  %v13659_v9 = vpop.f32.mrf.mxu3  ;;  %v10615_v6 = vld [vmem:[%s11440_s12 + $0xba0] sm:$0xf0] }
 0x3d7   : > { %v7309_v0 = vsel %vm7308_vm2, %v15605_v8, %v7307_v12  ;;  %15606 = vst [vmem:[#allocation57_spill] sm:$0xff] %v13659_v9  ;;  %v9802_v31 = vor.u32 %v10735_v41, %v9801_v20  ;;  %v7387_v32 = vmul.f32 %v7327_v27, %v13332_v55  ;;  %v13664_v12 = vmul.f32 %v7327_v27, %v13341_v36  ;;  %v13677_v8 = vpop.f32.mrf.mxu0 }
 0x3d8   : > { %v7318_v24 = vsub.f32 %v7252_v59, %v7309_v0  ;;  %v13667_v23 = vmul.f32 %v7327_v27, %v13360_v52  ;;  %v9322_v45 = vor.u32 %v10615_v6, %v9321_v18  ;;  %15607 = vst [vmem:[#allocation58_spill] sm:$0xff] %v13677_v8  ;;  %v13679_v0 = vpop.f32.mrf.mxu1  ;;  %v15608_v27 = vld [vmem:[#allocation41_spill] sm:$0xff]  ;;  %v15609_v18 = vld [vmem:[#allocation52_spill] sm:$0xff] }
 0x3d9   : > { %5676 = vmatpush.bf16.msrb.mxu2 %v9802_v31 }
 0x3da   : > { %v13669_v59 = vperm.slane %v7318_v24, 0  ;;  %v13671_v38 = vperm.slane %v7318_v24, 1  ;;  %v13673_v13 = vperm.slane %v7318_v24, 2  ;;  %v13675_v44 = vperm.slane %v7318_v24, 3  ;;  %5648 = vmatpush.bf16.msrb.mxu1 %v9322_v45 }
 0x3db   : > { %v13681_v55 = vperm.slane %v7318_v24, 4  ;;  %v13683_v36 = vperm.slane %v7318_v24, 5  ;;  %v13685_v20 = vperm.slane %v7318_v24, 6  ;;  %v13687_v52 = vperm.slane %v7318_v24, 7 }
 0x3dc   : > { %v7472_v41 = vadd.f32 %v13669_v59, %v15608_v27  ;;  %v7473_v17 = vadd.f32 %v13671_v38, %v15609_v18  ;;  %v7474_v6 = vadd.f32 %v13673_v13, %v13468_v29  ;;  %v7475_v9 = vadd.f32 %v13675_v44, %v13501_v16 }
 0x3dd   : > { %v7476_v24 = vadd.f32 %v13681_v55, %v13547_v3  ;;  %v7477_v31 = vadd.f32 %v13683_v36, %v13578_v43  ;;  %v7478_v8 = vadd.f32 %v13685_v20, %v7341_v46  ;;  %v7479_v27 = vadd.f32 %v13687_v52, %v7342_v58  ;;  %5631 = vmatmul.bf16.gmra.mxu0 %v11597_v10 }
 0x3de   : > { %v7487_v29 = vadd.f32 %v13669_v59, %v13409_v63  ;;  %v7488_v16 = vadd.f32 %v13671_v38, %v13435_v53  ;;  %v7489_v45 = vadd.f32 %v13673_v13, %v13474_v42  ;;  %v13712_v3 = vadd.f32 %v13675_v44, %v13510_v33  ;;  %7577 = vst [vmem:[%s11916_s25] sm:$0xff] %v7472_v41  ;;  %v13750_v58 = vpop.f32.mrf.mxu2 }
 0x3df   : > { %v13717_v46 = vadd.f32 %v13681_v55, %v13553_v56  ;;  %v13721_v43 = vadd.f32 %v13683_v36, %v13585_v51  ;;  %v13725_v63 = vadd.f32 %v13685_v20, %v13618_v48  ;;  %v13728_v42 = vadd.f32 %v13687_v52, %v7357_v34  ;;  %7578 = vst [vmem:[%s11916_s25 + $0x8] sm:$0xff] %v7473_v17  ;;  %v13748_v51 = vpop.f32.mrf.mxu3  ;;  %v8783_v17 = vld [vmem:[%s11440_s12 + $0x76c] sm:$0xf0] }
 0x3e0   : > { %v13733_v53 = vadd.f32 %v13669_v59, %v13415_v26  ;;  %v13737_v33 = vadd.f32 %v13671_v38, %v13439_v28  ;;  %v13741_v56 = vadd.f32 %v13673_v13, %v13477_v1  ;;  %v13745_v48 = vadd.f32 %v13675_v44, %v13519_v7  ;;  %7579 = vst [vmem:[%s11916_s25 + $0x10] sm:$0xff] %v7474_v6 }
 0x3e1   : > { %v13754_v26 = vadd.f32 %v13681_v55, %v13556_v2  ;;  %v13758_v28 = vadd.f32 %v13683_v36, %v13589_v61  ;;  %v13762_v1 = vadd.f32 %v13685_v20, %v13635_v15  ;;  %v13765_v7 = vadd.f32 %v13687_v52, %v7372_v37  ;;  %7580 = vst [vmem:[%s11916_s25 + $0x18] sm:$0xff] %v7475_v9  ;;  %v13785_v37 = vpop.f32.mrf.mxu0  ;;  %v13787_v9 = vpop.f32.mrf.mxu1 }
 0x3e2   : > { %v13770_v34 = vadd.f32 %v13669_v59, %v13419_v60  ;;  %v13774_v2 = vadd.f32 %v13671_v38, %v13443_v4  ;;  %v13778_v61 = vadd.f32 %v13673_v13, %v13481_v22  ;;  %v13782_v15 = vadd.f32 %v13675_v44, %v13522_v40  ;;  %7581 = vst [vmem:[%s11916_s25 + $0x20] sm:$0xff] %v7476_v24  ;;  %v15613_v24 = vld [vmem:[#allocation54_spill] sm:$0xff] }
 0x3e3   : > { %15610 = vst [vmem:[#allocation82_spill] sm:$0xff] %v13785_v37  ;;  %v13791_v60 = vadd.f32 %v13681_v55, %v13559_v25  ;;  %v13795_v4 = vadd.f32 %v13683_v36, %v13596_v62  ;;  %v13799_v22 = vadd.f32 %v13685_v20, %v13638_v11  ;;  %v13802_v40 = vadd.f32 %v13687_v52, %v7387_v32 }
 0x3e4   : > { %7582 = vst [vmem:[%s11916_s25 + $0x28] sm:$0xff] %v7477_v31  ;;  %v13807_v41 = vadd.f32 %v13669_v59, %v13424_v49  ;;  %v13811_v25 = vadd.f32 %v13671_v38, %v13454_v14  ;;  %v13815_v62 = vadd.f32 %v13673_v13, %v13484_v30  ;;  %v13819_v11 = vadd.f32 %v13675_v44, %v13532_v5  ;;  %v15611_v5 = vld [vmem:[#allocation42_spill] sm:$0xff] }
 0x3e5   : > { %7583 = vst [vmem:[%s11916_s25 + $0x30] sm:$0xff] %v7478_v8  ;;  %v13824_v32 = vadd.f32 %v13681_v55, %v13565_v35  ;;  %v13828_v49 = vadd.f32 %v13683_v36, %v13602_v47  ;;  %v13832_v14 = vadd.f32 %v13685_v20, %v13641_v50  ;;  %v13836_v30 = vadd.f32 %v13687_v52, %v13664_v12  ;;  %v15612_v8 = vld [vmem:[#allocation53_spill] sm:$0xff]  ;;  %v10473_v12 = vld [vmem:[%s11440_s12 + $0x734] sm:$0xf] }
 0x3e6   : > { %7584 = vst [vmem:[%s11916_s25 + $0x38] sm:$0xff] %v7479_v27  ;;  %v13841_v35 = vadd.f32 %v13669_v59, %v15611_v5  ;;  %v13845_v18 = vadd.f32 %v13671_v38, %v15612_v8  ;;  %v13849_v47 = vadd.f32 %v13673_v13, %v13495_v39  ;;  %v13853_v50 = vadd.f32 %v13675_v44, %v13535_v57  ;;  %v15616_v27 = vld [vmem:[#allocation56_spill] sm:$0xff]  ;;  %v8303_v5 = vld [vmem:[%s11440_s12 + $0x3ac] sm:$0xf0]  ;;  %v15618_v8 = vld [vmem:[#allocation65_spill] sm:$0xff] }
 0x3e7   : > { %7592 = vst [vmem:[%s11916_s25 + $0x78] sm:$0xff] %v7487_v29  ;;  %v13860_v6 = vadd.f32 %v13681_v55, %v13571_v54  ;;  %v13864_v31 = vadd.f32 %v13683_v36, %v15613_v24  ;;  %v13868_v39 = vadd.f32 %v13685_v20, %v13646_v19  ;;  %v13872_v57 = vadd.f32 %v13687_v52, %v15616_v27  ;;  %v10353_v29 = vld [vmem:[%s11440_s12 + $0x374] sm:$0xf]  ;;  %v15620_v19 = vld [vmem:[#allocation67_spill] sm:$0xff] }
 0x3e8   : > { %7593 = vst [vmem:[%s11916_s25 + $0x80] sm:$0xff] %v7488_v16  ;;  %v13879_v54 = vadd.f32 %v13669_v59, %v15618_v8  ;;  %v15619_v24 = vld [vmem:[#allocation44_spill] sm:$0xff]  ;;  %v13887_v37 = vadd.f32 %v13673_v13, %v15620_v19  ;;  %v15621_v27 = vld [vmem:[#allocation47_spill] sm:$0xff]  ;;  %v13898_v59 = vpop.f32.mrf.mxu2  ;;  %v15622_v8 = vld [vmem:[#allocation49_spill] sm:$0xff] }
 0x3e9   : > { %15614 = vst [vmem:[#allocation59_spill] sm:$0xff] %v13864_v31  ;;  %v13883_v10 = vadd.f32 %v13671_v38, %v15619_v24  ;;  %v13891_v16 = vadd.f32 %v13675_v44, %v15621_v27  ;;  %v13896_v31 = vpop.f32.mrf.mxu3  ;;  %v13902_v38 = vadd.f32 %v13681_v55, %v15622_v8  ;;  %v15623_v24 = vld [vmem:[#allocation55_spill] sm:$0xff]  ;;  %v13910_v44 = vadd.f32 %v13685_v20, %v13649_v21  ;;  %v10338_v19 = vld [vmem:[%s11440_s12 + $0x2fc] sm:$0xf]  ;;  %v8243_v27 = vld [vmem:[%s11440_s12 + $0x334] sm:$0xf0]  ;;  %v13922_v8 = vpop.f32.mrf.mxu0 }
 0x3ea   : > { %15615 = vst [vmem:[#allocation60_spill] sm:$0xff] %v13868_v39  ;;  %v8723_v39 = vld [vmem:[%s11440_s12 + $0x6f4] sm:$0xf0]  ;;  %v13906_v13 = vadd.f32 %v13683_v36, %v15623_v24  ;;  %v8786_v55 = vor.u32 %v10473_v12, %v8783_v17  ;;  %v8306_v36 = vor.u32 %v10353_v29, %v8303_v5  ;;  %v5431_v21 = vpop.f32.mrf.mxu1  ;;  %v13934_v17 = vadd.f32 %v13750_v58, %v13679_v0  ;;  %v15628_v0 = vld [vmem:[#allocation58_spill] sm:$0xff]  ;;  %v10428_v24 = vld [vmem:[%s11440_s12 + $0x5cc] sm:$0xf] }
 0x3eb   : > { %15617 = vst [vmem:[#allocation61_spill] sm:$0xff] %v13872_v57  ;;  %v10458_v57 = vld [vmem:[%s11440_s12 + $0x6bc] sm:$0xf] }
 0x3ec   : > { %7594 = vst [vmem:[%s11916_s25 + $0x88] sm:$0xff] %v7489_v45  ;;  %v13914_v45 = vadd.f32 %v13687_v52, %v13667_v23  ;;  %v8726_v20 = vor.u32 %v10458_v57, %v8723_v39  ;;  %5725 = vmatpush.bf16.msra.mxu0 %v8786_v55  ;;  %5697 = vmatpush.bf16.msra.mxu3 %v8306_v36  ;;  %v10443_v23 = vld [vmem:[%s11440_s12 + $0x644] sm:$0xf]  ;;  %v8663_v52 = vld [vmem:[%s11440_s12 + $0x67c] sm:$0xf0]  ;;  %v15626_v57 = vld [vmem:[#allocation27_spill] sm:$0xff] }
 0x3ed   : > { %7595 = vst [vmem:[%s11916_s25 + $0x90] sm:$0xff] %v13712_v3  ;;  %v8246_v3 = vor.u32 %v10338_v19, %v8243_v27  ;;  %v15625_v39 = vld [vmem:[#allocation29_spill] sm:$0xff]  ;;  %5649 = vmatmul.bf16.vlgmr.msrb.gmra.mxu1 %v15626_v57  ;;  %v8666_v29 = vor.u32 %v10443_v23, %v8663_v52  ;;  %v8603_v19 = vld [vmem:[%s11440_s12 + $0x604] sm:$0xf0]  ;;  %v10413_v36 = vld [vmem:[%s11440_s12 + $0x554] sm:$0xf] }
 0x3ee   : > { %7596 = vst [vmem:[%s11916_s25 + $0x98] sm:$0xff] %v13717_v46  ;;  %v15624_v46 = vld [vmem:[#allocation39_spill] sm:$0xff]  ;;  %5603 = vmatmul.bf16.gmra.mxu3 %v15625_v39 }
 0x3ef   : > { %7597 = vst [vmem:[%s11916_s25 + $0xa0] sm:$0xff] %v13721_v43  ;;  %v5381_v12 = vadd.f32 %v13748_v51, %v15624_v46  ;;  %v10323_v43 = vld [vmem:[%s11440_s12 + $0x284] sm:$0xf]  ;;  %v15627_v51 = vld [vmem:[#allocation28_spill] sm:$0xff]  ;;  %v8063_v23 = vld [vmem:[%s11440_s12 + $0x1cc] sm:$0xf0] }
 0x3f0   : > { %7598 = vst [vmem:[%s11916_s25 + $0xa8] sm:$0xff] %v13725_v63  ;;  %v8183_v63 = vld [vmem:[%s11440_s12 + $0x2bc] sm:$0xf0]  ;;  %5677 = vmatmul.bf16.vlgmr.msrb.gmra.mxu2 %v15627_v51  ;;  %5726 = vmatpush.bf16.msra.mxu0 %v8726_v20  ;;  %v5459_v27 = vpop.f32.mrf.mxu2  ;;  %v8543_v20 = vld [vmem:[%s11440_s12 + $0x58c] sm:$0xf0] }
 0x3f1   : > { %7599 = vst [vmem:[%s11916_s25 + $0xb0] sm:$0xff] %v13728_v42  ;;  %v13946_v58 = vadd.f32 %v15628_v0, %v5381_v12  ;;  %v15630_v42 = vld [vmem:[#allocation34_spill] sm:$0xff]  ;;  %5698 = vmatpush.bf16.msra.mxu3 %v8246_v3  ;;  %v13953_v5 = vpop.f32.mrf.mxu3  ;;  %v5415_v55 = vpop.f32.mrf.mxu0  ;;  %v9743_v3 = vld [vmem:[%s11440_s12 + $0xeec] sm:$0xf0]  ;;  %v10698_v12 = vld [vmem:[%s11440_s12 + $0xe3c] sm:$0xf] }
 0x3f2   : > { %7607 = vst [vmem:[%s11916_s25 + $0xf0] sm:$0xff] %v13733_v53  ;;  %5636 = vmatmul.bf16.gmra.mxu0 %v15630_v42  ;;  %v8186_v53 = vor.u32 %v10323_v43, %v8183_v63  ;;  %v13971_v52 = vpop.f32.mrf.mxu1  ;;  %v9683_v43 = vld [vmem:[%s11440_s12 + $0xe74] sm:$0xf0]  ;;  %v13981_v63 = vadd.f32 %v5459_v27, %v5431_v21  ;;  %v10593_v0 = vld [vmem:[%s11440_s12 + $0xaf4] sm:$0xf]  ;;  %v15631_v55 = vld [vmem:[#allocation31_spill] sm:$0xff] }
 0x3f3   : > { %15629 = vst [vmem:[#allocation62_spill] sm:$0xff] %v13946_v58  ;;  %v10398_v21 = vld [vmem:[%s11440_s12 + $0x4dc] sm:$0xf] }
 0x3f4   : > { %7608 = vst [vmem:[%s11916_s25 + $0xf8] sm:$0xff] %v13737_v33  ;;  %v10308_v33 = vld [vmem:[%s11440_s12 + $0x20c] sm:$0xf]  ;;  %5727 = vmatpush.bf16.msra.mxu0 %v8666_v29  ;;  %v9263_v29 = vld [vmem:[%s11440_s12 + $0xb2c] sm:$0xf0] }
 0x3f5   : > { %7609 = vst [vmem:[%s11916_s25 + $0x100] sm:$0xff] %v13741_v56  ;;  %v8123_v56 = vld [vmem:[%s11440_s12 + $0x244] sm:$0xf0]  ;;  %5699 = vmatpush.bf16.msra.mxu3 %v8186_v53  ;;  %v9266_v53 = vor.u32 %v10593_v0, %v9263_v29 }
 0x3f6   : > { %7610 = vst [vmem:[%s11916_s25 + $0x108] sm:$0xff] %v13745_v48  ;;  %v8606_v48 = vor.u32 %v10428_v24, %v8603_v19  ;;  %v8126_v46 = vor.u32 %v10308_v33, %v8123_v56  ;;  %v8003_v33 = vld [vmem:[%s11440_s12 + $0x154] sm:$0xf0] }
 0x3f7   : > { %7611 = vst [vmem:[%s11916_s25 + $0x110] sm:$0xff] %v13754_v26  ;;  %v10293_v26 = vld [vmem:[%s11440_s12 + $0x194] sm:$0xf]  ;;  %5753 = vmatpush.bf16.msra.mxu1 %v9266_v53  ;;  %v9623_v53 = vld [vmem:[%s11440_s12 + $0xdfc] sm:$0xf0] }
 0x3f8   : > { %7612 = vst [vmem:[%s11916_s25 + $0x118] sm:$0xff] %v13758_v28  ;;  %v10713_v28 = vld [vmem:[%s11440_s12 + $0xeb4] sm:$0xf]  ;;  %5728 = vmatpush.bf16.msra.mxu0 %v8606_v48  ;;  %v8066_v19 = vor.u32 %v10293_v26, %v8063_v23  ;;  %v13997_v56 = vpop.f32.mrf.mxu2  ;;  %v10263_v26 = vld [vmem:[%s11440_s12 + $0xa4] sm:$0xf] }
 0x3f9   : > { %7613 = vst [vmem:[%s11916_s25 + $0x120] sm:$0xff] %v13762_v1  ;;  %v9746_v1 = vor.u32 %v10713_v28, %v9743_v3  ;;  %v5387_v24 = vpop.f32.mrf.mxu3  ;;  %5700 = vmatpush.bf16.msra.mxu3 %v8126_v46  ;;  %v15633_v48 = vld [vmem:[#allocation32_spill] sm:$0xff]  ;;  %v10368_v28 = vld [vmem:[%s11440_s12 + $0x3ec] sm:$0xf]  ;;  %v8363_v3 = vld [vmem:[%s11440_s12 + $0x424] sm:$0xf0] }
 0x3fa   : > { %7614 = vst [vmem:[%s11916_s25 + $0x128] sm:$0xff] %v13765_v7  ;;  %v8546_v7 = vor.u32 %v10413_v36, %v8543_v20  ;;  %v5436_v27 = vpop.f32.mrf.mxu1  ;;  %v8423_v36 = vld [vmem:[%s11440_s12 + $0x49c] sm:$0xf0]  ;;  %v10578_v46 = vld [vmem:[%s11440_s12 + $0xa7c] sm:$0xf]  ;;  %v8366_v29 = vor.u32 %v10368_v28, %v8363_v3  ;;  %v15640_v28 = vld [vmem:[#allocation35_spill] sm:$0xff] }
 0x3fb   : > { %7622 = vst [vmem:[%s11916_s25 + $0x168] sm:$0xff] %v13770_v34  ;;  %5781 = vmatpush.bf16.msra.mxu2 %v9746_v1  ;;  %v9686_v34 = vor.u32 %v10698_v12, %v9683_v43  ;;  %v15632_v20 = vld [vmem:[#allocation33_spill] sm:$0xff]  ;;  %v9203_v1 = vld [vmem:[%s11440_s12 + $0xab4] sm:$0xf0]  ;;  %v10248_v12 = vld [vmem:[%s11440_s12 + $0x2c] sm:$0xf] }
 0x3fc   : > { %7623 = vst [vmem:[%s11916_s25 + $0x170] sm:$0xff] %v13774_v2  ;;  %v8483_v2 = vld [vmem:[%s11440_s12 + $0x514] sm:$0xf0]  ;;  %5729 = vmatpush.bf16.msra.mxu0 %v8546_v7  ;;  %v10563_v24 = vld [vmem:[%s11440_s12 + $0xa04] sm:$0xf] }
 0x3fd   : > { %7624 = vst [vmem:[%s11916_s25 + $0x178] sm:$0xff] %v13778_v61  ;;  %v10278_v61 = vld [vmem:[%s11440_s12 + $0x11c] sm:$0xf]  ;;  %5701 = vmatpush.bf16.msra.mxu3 %v8066_v19  ;;  %5654 = vmatmul.bf16.gmra.mxu1 %v15631_v55  ;;  %v10668_v19 = vld [vmem:[%s11440_s12 + $0xd4c] sm:$0xf] }
 0x3fe   : > { %7625 = vst [vmem:[%s11916_s25 + $0x180] sm:$0xff] %v13782_v15  ;;  %v8486_v15 = vor.u32 %v10398_v21, %v8483_v2  ;;  %5608 = vmatmul.bf16.gmra.mxu3 %v15632_v20  ;;  %v9143_v21 = vld [vmem:[%s11440_s12 + $0xa3c] sm:$0xf0]  ;;  %v10653_v3 = vld [vmem:[%s11440_s12 + $0xcd4] sm:$0xf] }
 0x3ff   : > { %7626 = vst [vmem:[%s11916_s25 + $0x188] sm:$0xff] %v13791_v60  ;;  %5782 = vmatpush.bf16.msra.mxu2 %v9686_v34  ;;  %v5510_v60 = vpop.f32.mrf.mxu0  ;;  %v10683_v34 = vld [vmem:[%s11440_s12 + $0xdc4] sm:$0xf] }
 0x400   : > { %7627 = vst [vmem:[%s11916_s25 + $0x190] sm:$0xff] %v13795_v4  ;;  %v10383_v4 = vld [vmem:[%s11440_s12 + $0x464] sm:$0xf]  ;;  %5682 = vmatmul.bf16.gmra.mxu2 %v15633_v48  ;;  %5730 = vmatpush.bf16.msra.mxu0 %v8486_v15  ;;  %v5464_v43 = vpop.f32.mrf.mxu2 }
 0x401   : > { %7628 = vst [vmem:[%s11916_s25 + $0x198] sm:$0xff] %v13799_v22  ;;  %v8006_v22 = vor.u32 %v10278_v61, %v8003_v33  ;;  %v8426_v23 = vor.u32 %v10383_v4, %v8423_v36  ;;  %v5482_v0 = vpop.f32.mrf.mxu3  ;;  %v14045_v2 = vadd.f32 %v5464_v43, %v5436_v27  ;;  %v9563_v61 = vld [vmem:[%s11440_s12 + $0xd84] sm:$0xf0]  ;;  %v10548_v33 = vld [vmem:[%s11440_s12 + $0x98c] sm:$0xf]  ;;  %v15636_v4 = vld [vmem:[#allocation60_spill] sm:$0xff] }
 0x402   : > { %7629 = vst [vmem:[%s11916_s25 + $0x1a0] sm:$0xff] %v13802_v40  ;;  %v7943_v40 = vld [vmem:[%s11440_s12 + $0xdc] sm:$0xf0]  ;;  %v15634_v27 = vld [vmem:[#allocation59_spill] sm:$0xff]  ;;  %v15637_v36 = vld [vmem:[#allocation48_spill] sm:$0xff] }
 0x403   : > { %7637 = vst [vmem:[%s11916_s25 + $0x1e0] sm:$0xff] %v13807_v41  ;;  %5702 = vmatpush.bf16.msra.mxu3 %v8006_v22  ;;  %v7946_v41 = vor.u32 %v10263_v26, %v7943_v40  ;;  %v10533_v43 = vld [vmem:[%s11440_s12 + $0x914] sm:$0xf] }
 0x404   : > { %7638 = vst [vmem:[%s11916_s25 + $0x1e8] sm:$0xff] %v13811_v25  ;;  %v9206_v25 = vor.u32 %v10578_v46, %v9203_v1  ;;  %5731 = vmatpush.bf16.msra.mxu0 %v8426_v23  ;;  %v15639_v23 = vld [vmem:[#allocation61_spill] sm:$0xff] }
 0x405   : > { %7639 = vst [vmem:[%s11916_s25 + $0x1f0] sm:$0xff] %v13815_v62  ;;  %v7883_v62 = vld [vmem:[%s11440_s12 + $0x64] sm:$0xf0] }
 0x406   : > { %7640 = vst [vmem:[%s11916_s25 + $0x1f8] sm:$0xff] %v13819_v11  ;;  %v5483_v11 = vadd.f32 %v5482_v0, %v13934_v17  ;;  %5754 = vmatpush.bf16.msra.mxu1 %v9206_v25  ;;  %v15641_v25 = vld [vmem:[#allocation36_spill] sm:$0xff]  ;;  %v9023_v0 = vld [vmem:[%s11440_s12 + $0x94c] sm:$0xf0] }
 0x407   : > { %7641 = vst [vmem:[%s11916_s25 + $0x200] sm:$0xff] %v13824_v32  ;;  %v14033_v32 = vpop.f32.mrf.mxu1  ;;  %v5512_v7 = vpop.f32.mrf.mxu0  ;;  %5703 = vmatpush.bf16.msra.mxu3 %v7946_v41  ;;  %v9503_v41 = vld [vmem:[%s11440_s12 + $0xd0c] sm:$0xf0] }
 0x408   : > { %7642 = vst [vmem:[%s11916_s25 + $0x208] sm:$0xff] %v13828_v49  ;;  %v7886_v49 = vor.u32 %v10248_v12, %v7883_v62  ;;  %v14039_v17 = vadd.f32 %v5510_v60, %v5483_v11  ;;  %5732 = vmatpush.bf16.msra.mxu0 %v8366_v29  ;;  %v14061_v15 = vpop.f32.mrf.mxu2  ;;  %v15635_v60 = vld [vmem:[#allocation21_spill] sm:$0xff]  ;;  %v15642_v12 = vld [vmem:[#allocation19_spill] sm:$0xff]  ;;  %v9506_v62 = vor.u32 %v10653_v3, %v9503_v41  ;;  %v15648_v3 = vld [vmem:[#allocation92_spill] sm:$0xff] }
 0x409   : > { %7643 = vst [vmem:[%s11916_s25 + $0x210] sm:$0xff] %v13832_v14  ;;  %v9626_v14 = vor.u32 %v10683_v34, %v9623_v53  ;;  %v9026_v11 = vor.u32 %v10533_v43, %v9023_v0  ;;  %v10518_v53 = vld [vmem:[%s11440_s12 + $0x89c] sm:$0xf]  ;;  %v8309_v43 = vld [vmem:[%s11440_s12 + $0x378] sm:$0xf] }
 0x40a   : > { %7644 = vst [vmem:[%s11916_s25 + $0x218] sm:$0xff] %v13836_v30  ;;  %v9146_v30 = vor.u32 %v10563_v24, %v9143_v21  ;;  %v9383_v24 = vld [vmem:[%s11440_s12 + $0xc1c] sm:$0xf0]  ;;  %v10361_v0 = vld [vmem:[%s11440_s12 + $0x3b0] sm:$0xf0] }
 0x40b   : > { %7652 = vst [vmem:[%s11916_s25 + $0x258] sm:$0xff] %v13841_v35  ;;  %5783 = vmatpush.bf16.msra.mxu2 %v9626_v14  ;;  %v5457_v35 = vadd.f32 %v13898_v59, %v13787_v9  ;;  %5704 = vmatpush.bf16.msra.mxu3 %v7886_v49  ;;  %v10623_v14 = vld [vmem:[%s11440_s12 + $0xbe4] sm:$0xf] }
 0x40c   : > { %7653 = vst [vmem:[%s11916_s25 + $0x260] sm:$0xff] %v13845_v18  ;;  %5755 = vmatpush.bf16.msra.mxu1 %v9146_v30  ;;  %v9566_v18 = vor.u32 %v10668_v19, %v9563_v61  ;;  %5733 = vmatmul.bf16.vlgmr.msra.gmra.mxu0 %v15635_v60  ;;  %v8903_v30 = vld [vmem:[%s11440_s12 + $0x85c] sm:$0xf0]  ;;  %v15644_v19 = vld [vmem:[#allocation90_spill] sm:$0xff] }
 0x40d   : > { %7654 = vst [vmem:[%s11916_s25 + $0x268] sm:$0xff] %v13849_v47  ;;  %v9083_v47 = vld [vmem:[%s11440_s12 + $0x9c4] sm:$0xf0]  ;;  %5659 = vmatmul.bf16.gmra.mxu1 %v15640_v28 }
 0x40e   : > { %7655 = vst [vmem:[%s11916_s25 + $0x270] sm:$0xff] %v13853_v50  ;;  %v5484_v50 = vpop.f32.mrf.mxu3  ;;  %v9086_v9 = vor.u32 %v10548_v33, %v9083_v47  ;;  %5705 = vmatmul.bf16.vlgmr.msra.gmra.mxu3 %v15642_v12  ;;  %v9323_v33 = vld [vmem:[%s11440_s12 + $0xba4] sm:$0xf0] }
 0x40f   : > { %7656 = vst [vmem:[%s11916_s25 + $0x278] sm:$0xff] %v13860_v6  ;;  %v5485_v59 = vadd.f32 %v5484_v50, %v5457_v35  ;;  %v15638_v6 = vld [vmem:[#allocation50_spill] sm:$0xff]  ;;  %5784 = vmatpush.bf16.msra.mxu2 %v9566_v18  ;;  %v14070_v26 = vpop.f32.mrf.mxu1  ;;  %v5515_v40 = vpop.f32.mrf.mxu0  ;;  %v10608_v18 = vld [vmem:[%s11440_s12 + $0xb6c] sm:$0xf] }
 0x410   : > { %7657 = vst [vmem:[%s11916_s25 + $0x280] sm:$0xff] %v15634_v27  ;;  %v5358_v22 = vadd.f32 %v15638_v6, %v15637_v36  ;;  %5687 = vmatmul.bf16.gmra.mxu2 %v15641_v25  ;;  %5756 = vmatpush.bf16.msra.mxu1 %v9086_v9  ;;  %v14097_v34 = vpop.f32.mrf.mxu2  ;;  %v15643_v35 = vld [vmem:[#allocation86_spill] sm:$0xff]  ;;  %v9326_v27 = vor.u32 %v10608_v18, %v9323_v33  ;;  %v15646_v36 = vld [vmem:[#allocation25_spill] sm:$0xff]  ;;  %v10163_v18 = vld [vmem:[%s11440_s12 + $0x1234] sm:$0xf0] }
 0x411   : > { %7658 = vst [vmem:[%s11916_s25 + $0x288] sm:$0xff] %v15636_v4  ;;  %v14077_v46 = vadd.f32 %v5512_v7, %v5485_v59  ;;  %v5317_v61 = vadd.f32 %v15644_v19, %v15643_v35  ;;  %v8843_v9 = vld [vmem:[%s11440_s12 + $0x7e4] sm:$0xf0]  ;;  %v15645_v59 = vld [vmem:[#allocation91_spill] sm:$0xff]  ;;  %v10346_v35 = vld [vmem:[%s11440_s12 + $0x338] sm:$0xf0] }
 0x412   : > { %7659 = vst [vmem:[%s11916_s25 + $0x290] sm:$0xff] %v15639_v23  ;;  %v5386_v1 = vadd.f32 %v13953_v5, %v5358_v22  ;;  %v9443_v5 = vld [vmem:[%s11440_s12 + $0xc94] sm:$0xf0] }
 0x413   : > { %7667 = vst [vmem:[%s11916_s25 + $0x2d0] sm:$0x1] %v13879_v54  ;;  %5785 = vmatpush.bf16.msra.mxu2 %v9506_v62  ;;  %v10638_v54 = vld [vmem:[%s11440_s12 + $0xc5c] sm:$0xf]  ;;  %v5345_v4 = vadd.f32 %v15645_v59, %v5317_v61  ;;  %v15647_v23 = vld [vmem:[#allocation88_spill] sm:$0xff] }
 0x414   : > { %7668 = vst [vmem:[%s11916_s25 + $0x2d8] sm:$0x1] %v13883_v10  ;;  %v5414_v29 = vadd.f32 %v13922_v8, %v5386_v1  ;;  %v9446_v7 = vor.u32 %v10638_v54, %v9443_v5  ;;  %5757 = vmatpush.bf16.msra.mxu1 %v9026_v11  ;;  %v5322_v41 = vadd.f32 %v15648_v3, %v15647_v23  ;;  %v15649_v1 = vld [vmem:[#allocation46_spill] sm:$0xff]  ;;  %v15650_v11 = vld [vmem:[#allocation37_spill] sm:$0xff]  ;;  %v15660_v23 = vld [vmem:[#allocation79_spill] sm:$0xff] }
 0x415   : > { %7669 = vst [vmem:[%s11916_s25 + $0x2e0] sm:$0x1] %v13887_v37  ;;  %v8963_v37 = vld [vmem:[%s11440_s12 + $0x8d4] sm:$0xf0]  ;;  %v5373_v62 = vadd.f32 %v15649_v1, %v5345_v4  ;;  %v8310_v5 = vor.u32 %v10361_v0, %v8309_v43  ;;  %v10818_v61 = vld [vmem:[%s11440_s12 + $0x11fc] sm:$0xf] }
 0x416   : > { %7670 = vst [vmem:[%s11916_s25 + $0x2e8] sm:$0x1] %v13891_v16  ;;  %v5487_v10 = vpop.f32.mrf.mxu3  ;;  %v8966_v49 = vor.u32 %v10518_v53, %v8963_v37  ;;  %v15652_v53 = vld [vmem:[#allocation23_spill] sm:$0xff]  ;;  %v15653_v37 = vld [vmem:[#allocation93_spill] sm:$0xff]  ;;  %v8189_v1 = vld [vmem:[%s11440_s12 + $0x288] sm:$0xf] }
 0x417   : > { %7671 = vst [vmem:[%s11916_s25 + $0x2f0] sm:$0x1] %v13902_v38  ;;  %v5488_v16 = vadd.f32 %v5487_v10, %v13981_v63  ;;  %5786 = vmatpush.bf16.msra.mxu2 %v9446_v7  ;;  %v5443_v38 = vpop.f32.mrf.mxu1  ;;  %v14106_v8 = vpop.f32.mrf.mxu0  ;;  %v10503_v63 = vld [vmem:[%s11440_s12 + $0x824] sm:$0xf]  ;;  %v10223_v7 = vld [vmem:[%s11440_s12 + $0x12ac] sm:$0xf0]  ;;  %5837 = vmatpush.bf16.msrb.mxu0 %v8310_v5 }
 0x418   : > { %7672 = vst [vmem:[%s11916_s25 + $0x2f8] sm:$0x1] %v13906_v13  ;;  %v9386_v13 = vor.u32 %v10623_v14, %v9383_v24  ;;  %5758 = vmatpush.bf16.msra.mxu1 %v8966_v49  ;;  %v5471_v47 = vpop.f32.mrf.mxu2  ;;  %v15651_v10 = vld [vmem:[#allocation38_spill] sm:$0xff]  ;;  %v15654_v38 = vld [vmem:[#allocation89_spill] sm:$0xff]  ;;  %v15655_v14 = vld [vmem:[#allocation40_spill] sm:$0xff] }
 0x419   : > { %7673 = vst [vmem:[%s11916_s25 + $0x300] sm:$0x1] %v13910_v44  ;;  %v14112_v21 = vadd.f32 %v5515_v40, %v5488_v16  ;;  %v8906_v44 = vor.u32 %v10503_v63, %v8903_v30  ;;  %v5350_v16 = vadd.f32 %v15653_v37, %v5322_v41  ;;  %v5327_v24 = vadd.f32 %v15655_v14, %v15654_v38  ;;  %v15658_v63 = vld [vmem:[#allocation57_spill] sm:$0xff]  ;;  %v15662_v43 = vld [vmem:[#allocation43_spill] sm:$0xff] }
 0x41a   : > { %7674 = vst [vmem:[%s11916_s25 + $0x308] sm:$0x1] %v13914_v45  ;;  %v10488_v45 = vld [vmem:[%s11440_s12 + $0x7ac] sm:$0xf]  ;;  %v15659_v47 = vld [vmem:[#allocation45_spill] sm:$0xff]  ;;  %v6671_v37 = vmul.f32 %v15662_v43, %v15662_v43 }
 0x41b   : > { %6355 = vst [vmem:[%s11916_s25 + $0x310] sm:$0x1] %v5414_v29  ;;  %5787 = vmatpush.bf16.msra.mxu2 %v9386_v13  ;;  %v8846_v6 = vor.u32 %v10488_v45, %v8843_v9  ;;  %v10833_v29 = vld [vmem:[%s11440_s12 + $0x1274] sm:$0xf]  ;;  %v15656_v13 = vld [vmem:[#allocation51_spill] sm:$0xff]  ;;  %v5378_v30 = vadd.f32 %v15658_v63, %v5350_v16  ;;  %v10166_v9 = vor.u32 %v10818_v61, %v10163_v18  ;;  %v15663_v16 = vld [vmem:[#allocation81_spill] sm:$0xff] }
 0x41c   : > { %5738 = vmatmul.bf16.gmra.mxu0 %v15646_v36  ;;  %5759 = vmatpush.bf16.msra.mxu1 %v8906_v44  ;;  %v10226_v49 = vor.u32 %v10833_v29, %v10223_v7  ;;  %v8249_v44 = vld [vmem:[%s11440_s12 + $0x300] sm:$0xf]  ;;  %v10803_v29 = vld [vmem:[%s11440_s12 + $0x1184] sm:$0xf]  ;;  %v10788_v61 = vld [vmem:[%s11440_s12 + $0x110c] sm:$0xf] }
 0x41d   : > { %5664 = vmatmul.bf16.gmra.mxu1 %v15650_v11  ;;  %v8250_v19 = vor.u32 %v10346_v35, %v8249_v44  ;;  %v14162_v3 = vadd.f32 %v15660_v23, %v5378_v30  ;;  %v10103_v7 = vld [vmem:[%s11440_s12 + $0x11bc] sm:$0xf0]  ;;  %v8129_v30 = vld [vmem:[%s11440_s12 + $0x210] sm:$0xf]  ;;  %v10316_v44 = vld [vmem:[%s11440_s12 + $0x248] sm:$0xf0] }
 0x41e   : > { %v14122_v50 = vpop.f32.mrf.mxu3  ;;  %5710 = vmatmul.bf16.gmra.mxu3 %v15652_v53  ;;  %v10043_v18 = vld [vmem:[%s11440_s12 + $0x1144] sm:$0xf0] }
 0x41f   : > { %5788 = vmatpush.bf16.msra.mxu2 %v9326_v27  ;;  %v5520_v22 = vpop.f32.mrf.mxu0  ;;  %v5538_v40 = vpop.f32.mrf.mxu1  ;;  %5809 = vmatpush.bf16.msrb.mxu3 %v10226_v49  ;;  %v5355_v27 = vadd.f32 %v15659_v47, %v5327_v24  ;;  %15661 = vst [vmem:[#allocation64_spill] sm:$0xff] %v14162_v3  ;;  %v10106_v49 = vor.u32 %v10803_v29, %v10103_v7  ;;  %v15666_v29 = vld [vmem:[#allocation22_spill] sm:$0xff]  ;;  %v8069_v7 = vld [vmem:[%s11440_s12 + $0x198] sm:$0xf] }
 0x420   : > { %v14134_v54 = vadd.f32 %v5538_v40, %v14039_v17  ;;  %5692 = vmatmul.bf16.gmra.mxu2 %v15651_v10  ;;  %5760 = vmatpush.bf16.msra.mxu1 %v8846_v6  ;;  %v14144_v17 = vadd.f32 %v15656_v13, %v5373_v62  ;;  %v14151_v45 = vpop.f32.mrf.mxu2  ;;  %v10331_v62 = vld [vmem:[%s11440_s12 + $0x2c0] sm:$0xf0]  ;;  %v6716_v24 = vmul.f32 %v14162_v3, %v14162_v3 }
 0x421   : > { %5838 = vmatpush.bf16.msrb.mxu0 %v8250_v19  ;;  %v5383_v41 = vadd.f32 %v13896_v31, %v5355_v27  ;;  %v8190_v5 = vor.u32 %v10331_v62, %v8189_v1  ;;  %v6701_v31 = vmul.f32 %v15663_v16, %v15663_v16  ;;  %v15664_v13 = vld [vmem:[#allocation82_spill] sm:$0xff]  ;;  %v8130_v19 = vor.u32 %v10316_v44, %v8129_v30 }
 0x422   : > { %15657 = vst [vmem:[#allocation63_spill] sm:$0xff] %v14144_v17  ;;  %v6686_v40 = vmul.f32 %v14144_v17, %v14144_v17  ;;  %v6572_v0 = vadd.f32 %v14144_v17, %v15662_v43  ;;  %v6460_v14 = vld [vmem:[%s11916_s25 + $0x310] sm:$0x1]  ;;  %v8669_v17 = vld [vmem:[%s11440_s12 + $0x648] sm:$0xf] }
 0x423   : > { %5810 = vmatpush.bf16.msrb.mxu3 %v10166_v9  ;;  %v14182_v63 = vadd.f32 %v15664_v13, %v5383_v41  ;;  %v6731_v9 = vmul.f32 %v13946_v58, %v13946_v58  ;;  %v8009_v13 = vld [vmem:[%s11440_s12 + $0x120] sm:$0xf]  ;;  %v10451_v43 = vld [vmem:[%s11440_s12 + $0x680] sm:$0xf0] }
 0x424   : > { %v6573_v38 = vadd.f32 %v6572_v0, %v15663_v16 }
 0x425   : > { %5839 = vmatpush.bf16.msrb.mxu0 %v8190_v5  ;;  %15665 = vst [vmem:[#allocation66_spill] sm:$0xff] %v14182_v63  ;;  %v6746_v0 = vmul.f32 %v14182_v63, %v14182_v63  ;;  %v6577_v5 = vsel %vm6472_vm0, %v6460_v14, 0.0 }
 0x426   : > { %v5492_v33 = vpop.f32.mrf.mxu3  ;;  %v6574_v35 = vadd.f32 %v6573_v38, %v14162_v3  ;;  %v15667_v38 = vld [vmem:[#allocation20_spill] sm:$0xff] }
 0x427   : > { %v5493_v59 = vadd.f32 %v5492_v33, %v14045_v2  ;;  %v14155_v4 = vpop.f32.mrf.mxu0  ;;  %v14157_v6 = vpop.f32.mrf.mxu1  ;;  %5811 = vmatpush.bf16.msrb.mxu3 %v10106_v49 }
 0x428   : > { %v14191_v47 = vpop.f32.mrf.mxu2  ;;  %v6575_v23 = vadd.f32 %v6574_v35, %v13946_v58  ;;  %v10286_v35 = vld [vmem:[%s11440_s12 + $0x158] sm:$0xf0] }
 0x429   : > { %v14167_v2 = vadd.f32 %v5520_v22, %v5493_v59  ;;  %v6872_v22 = vadd.f32 %v6686_v40, %v6671_v37  ;;  %v6761_v59 = vmul.f32 %v6460_v14, %v6460_v14  ;;  %v10046_v40 = vor.u32 %v10788_v61, %v10043_v18  ;;  %5840 = vmatpush.bf16.msrb.mxu0 %v8130_v19  ;;  %v10301_v37 = vld [vmem:[%s11440_s12 + $0x1d0] sm:$0xf0]  ;;  %v9209_v19 = vld [vmem:[%s11440_s12 + $0xa80] sm:$0xf]  ;;  %v10466_v58 = vld [vmem:[%s11440_s12 + $0x6f8] sm:$0xf0] }
 0x42a   : > { %v6576_v49 = vadd.f32 %v6575_v23, %v14182_v63  ;;  %v8070_v14 = vor.u32 %v10301_v37, %v8069_v7  ;;  %v8010_v18 = vor.u32 %v10286_v35, %v8009_v13  ;;  %v9983_v23 = vld [vmem:[%s11440_s12 + $0x10cc] sm:$0xf0]  ;;  %v10271_v7 = vld [vmem:[%s11440_s12 + $0xe0] sm:$0xf0]  ;;  %v8789_v37 = vld [vmem:[%s11440_s12 + $0x738] sm:$0xf] }
 0x42b   : > { %v6873_v27 = vadd.f32 %v6872_v22, %v6701_v31  ;;  %5812 = vmatpush.bf16.msrb.mxu3 %v10046_v40  ;;  %v9269_v22 = vld [vmem:[%s11440_s12 + $0xaf8] sm:$0xf]  ;;  %v6877_v44 = vsel %vm6472_vm0, %v6761_v59, 0.0  ;;  %v10773_v40 = vld [vmem:[%s11440_s12 + $0x1094] sm:$0xf] }
 0x42c   : > { %5743 = vmatmul.bf16.gmra.mxu0 %v15625_v39  ;;  %v6578_v61 = vadd.f32 %v6577_v5, %v6576_v49  ;;  %v7949_v59 = vld [vmem:[%s11440_s12 + $0xa8] sm:$0xf]  ;;  %v7889_v63 = vld [vmem:[%s11440_s12 + $0x30] sm:$0xf] }
 0x42d   : > { %v6874_v62 = vadd.f32 %v6873_v27, %v6716_v24  ;;  %5761 = vmatmul.bf16.vlgmr.msra.gmra.mxu1 %v15666_v29  ;;  %v10601_v24 = vld [vmem:[%s11440_s12 + $0xb30] sm:$0xf0]  ;;  %5841 = vmatpush.bf16.msrb.mxu0 %v8070_v14  ;;  %v10586_v27 = vld [vmem:[%s11440_s12 + $0xab8] sm:$0xf0]  ;;  %v9149_v49 = vld [vmem:[%s11440_s12 + $0xa08] sm:$0xf] }
 0x42e   : > { %v14189_v33 = vpop.f32.mrf.mxu3  ;;  %5715 = vmatmul.bf16.gmra.mxu3 %v15667_v38  ;;  %v10571_v14 = vld [vmem:[%s11440_s12 + $0xa40] sm:$0xf0]  ;;  %v6579_v35 = vrot.slane %v6578_v61, 4 }
 0x42f   : > { %v14197_v41 = vpop.f32.mrf.mxu0  ;;  %v5543_v1 = vpop.f32.mrf.mxu1  ;;  %v6875_v30 = vadd.f32 %v6874_v62, %v6731_v9  ;;  %v9210_v9 = vor.u32 %v10586_v27, %v9209_v19  ;;  %v9986_v62 = vor.u32 %v10773_v40, %v9983_v23  ;;  %v7950_v19 = vor.u32 %v10271_v7, %v7949_v59  ;;  %v10556_v59 = vld [vmem:[%s11440_s12 + $0x9c8] sm:$0xf0] }
 0x430   : > { %v14206_v31 = vadd.f32 %v5543_v1, %v14112_v21  ;;  %5789 = vmatmul.bf16.vlgmr.msra.gmra.mxu2 %v15626_v57  ;;  %v9270_v21 = vor.u32 %v10601_v24, %v9269_v22  ;;  %v10481_v22 = vld [vmem:[%s11440_s12 + $0x770] sm:$0xf0]  ;;  %v14226_v5 = vpop.f32.mrf.mxu2  ;;  %v6580_v3 = vadd.f32 %v6579_v35, %v6578_v61 }
 0x431   : > { %v6876_v1 = vadd.f32 %v6875_v30, %v6746_v0  ;;  %5813 = vmatpush.bf16.msrb.mxu3 %v9986_v62  ;;  %v8790_v0 = vor.u32 %v10481_v22, %v8789_v37  ;;  %v10758_v30 = vld [vmem:[%s11440_s12 + $0x101c] sm:$0xf]  ;;  %5842 = vmatpush.bf16.msrb.mxu0 %v8010_v18  ;;  %v10256_v62 = vld [vmem:[%s11440_s12 + $0x68] sm:$0xf0]  ;;  %v9863_v37 = vld [vmem:[%s11440_s12 + $0xfdc] sm:$0xf0] }
 0x432   : > { %5893 = vmatpush.bf16.msrb.mxu2 %v9270_v21  ;;  %v9923_v21 = vld [vmem:[%s11440_s12 + $0x1054] sm:$0xf0]  ;;  %v8729_v22 = vld [vmem:[%s11440_s12 + $0x6c0] sm:$0xf]  ;;  %v9089_v18 = vld [vmem:[%s11440_s12 + $0x990] sm:$0xf] }
 0x433   : > { %v6878_v13 = vadd.f32 %v6877_v44, %v6876_v1  ;;  %v9926_v23 = vor.u32 %v10758_v30, %v9923_v21  ;;  %v10743_v44 = vld [vmem:[%s11440_s12 + $0xfa4] sm:$0xf]  ;;  %5865 = vmatpush.bf16.msrb.mxu1 %v8790_v0  ;;  %v9150_v1 = vor.u32 %v10571_v14, %v9149_v49  ;;  %v10728_v30 = vld [vmem:[%s11440_s12 + $0xf2c] sm:$0xf]  ;;  %v8730_v0 = vor.u32 %v10466_v58, %v8729_v22  ;;  %v9803_v21 = vld [vmem:[%s11440_s12 + $0xf64] sm:$0xf0] }
 0x434   : > { %v10229_v49 = vld [vmem:[%s11440_s12 + $0x1278] sm:$0xf]  ;;  %v10841_v14 = vld [vmem:[%s11440_s12 + $0x12b0] sm:$0xf0]  ;;  %v9090_v16 = vor.u32 %v10556_v59, %v9089_v18  ;;  %v9806_v58 = vor.u32 %v10728_v30, %v9803_v21  ;;  %v6581_v22 = vrot.slane %v6580_v3, 2  ;;  %v15668_v18 = vld [vmem:[#allocation26_spill] sm:$0xff] }
 0x435   : > { %v6879_v7 = vrot.slane %v6878_v13, 4  ;;  %5814 = vmatpush.bf16.msrb.mxu3 %v9926_v23  ;;  %5843 = vmatpush.bf16.msrb.mxu0 %v7950_v19  ;;  %v10436_v30 = vld [vmem:[%s11440_s12 + $0x608] sm:$0xf0]  ;;  %v15670_v21 = vld [vmem:[#allocation24_spill] sm:$0xff] }
 0x436   : > { %v14224_v24 = vpop.f32.mrf.mxu3  ;;  %5894 = vmatpush.bf16.msrb.mxu2 %v9210_v9  ;;  %v7890_v9 = vor.u32 %v10256_v62, %v7889_v63  ;;  %v10230_v63 = vor.u32 %v10841_v14, %v10229_v49  ;;  %v10169_v62 = vld [vmem:[%s11440_s12 + $0x1200] sm:$0xf]  ;;  %v6582_v49 = vadd.f32 %v6581_v22, %v6580_v3  ;;  %v5470_v3 = vadd.f32 %v14097_v34, %v14070_v26 }
 0x437   : > { %v5527_v27 = vpop.f32.mrf.mxu0  ;;  %v14232_v40 = vpop.f32.mrf.mxu1  ;;  %5866 = vmatpush.bf16.msrb.mxu1 %v8730_v0  ;;  %v6880_v61 = vadd.f32 %v6879_v7, %v6878_v13  ;;  %v8609_v0 = vld [vmem:[%s11440_s12 + $0x5d0] sm:$0xf]  ;;  %v8969_v13 = vld [vmem:[%s11440_s12 + $0x8a0] sm:$0xf]  ;;  %v10526_v7 = vld [vmem:[%s11440_s12 + $0x8d8] sm:$0xf0] }
 0x438   : > { %v9866_v27 = vor.u32 %v10743_v44, %v9863_v37  ;;  %v14248_v23 = vpop.f32.mrf.mxu2  ;;  %v9029_v44 = vld [vmem:[%s11440_s12 + $0x918] sm:$0xf]  ;;  %v10541_v37 = vld [vmem:[%s11440_s12 + $0x950] sm:$0xf0] }
 0x439   : > { %5844 = vmatpush.bf16.msrb.mxu0 %v7890_v9  ;;  %v8610_v9 = vor.u32 %v10436_v30, %v8609_v0  ;;  %v10421_v0 = vld [vmem:[%s11440_s12 + $0x590] sm:$0xf0] }
 0x43a   : > { %5895 = vmatpush.bf16.msrb.mxu2 %v9150_v1  ;;  %5815 = vmatpush.bf16.msrb.mxu3 %v9866_v27  ;;  %v8670_v1 = vor.u32 %v10451_v43, %v8669_v17  ;;  %v9030_v27 = vor.u32 %v10541_v37, %v9029_v44  ;;  %v6881_v43 = vrot.slane %v6880_v61, 2 }
 0x43c   : > { %5748 = vmatmul.bf16.gmra.mxu0 %v15632_v20  ;;  %5867 = vmatpush.bf16.msrb.mxu1 %v8670_v1  ;;  %v6882_v37 = vadd.f32 %v6881_v43, %v6880_v61  ;;  %v6583_v20 = vrot.slane %v6582_v49, 1  ;;  %v5498_v61 = vadd.f32 %v14224_v24, %v5470_v3 }
 0x43d   : > { %5766 = vmatmul.bf16.gmra.mxu1 %v15668_v18  ;;  %5949 = vmatpush.bf16.msra.mxu0 %v10230_v63  ;;  %v5462_v63 = vadd.f32 %v13997_v56, %v13971_v52 }
 0x43e   : > { %v5499_v57 = vpop.f32.mrf.mxu3  ;;  %5896 = vmatpush.bf16.msrb.mxu2 %v9090_v16  ;;  %5720 = vmatmul.bf16.gmra.mxu3 %v15670_v21  ;;  %v8970_v16 = vor.u32 %v10526_v7, %v8969_v13  ;;  %v6883_v1 = vrot.slane %v6882_v37, 1 }
 0x43f   : > { %v5548_v35 = vpop.f32.mrf.mxu1  ;;  %v5622_v19 = vpop.f32.mrf.mxu0  ;;  %v10826_v57 = vld [vmem:[%s11440_s12 + $0x1238] sm:$0xf0]  ;;  %5816 = vmatpush.bf16.msrb.mxu3 %v9806_v58 }
 0x440   : > { %v14257_v59 = vadd.f32 %v5548_v35, %v14167_v2  ;;  %5794 = vmatmul.bf16.gmra.mxu2 %v15631_v55  ;;  %v10170_v17 = vor.u32 %v10826_v57, %v10169_v62  ;;  %v14265_v2 = vpop.f32.mrf.mxu2  ;;  %5868 = vmatpush.bf16.msrb.mxu1 %v8610_v9  ;;  %v5490_v62 = vadd.f32 %v14122_v50, %v5462_v63 }
 0x441   : > { %v6584_v57 = vadd.f32 %v6583_v20, %v6582_v49  ;;  %v6884_v26 = vadd.f32 %v6883_v1, %v6882_v37  ;;  %v8489_v49 = vld [vmem:[%s11440_s12 + $0x4e0] sm:$0xf] }
 0x442   : > { %15669 = vst [vmem:[#allocation68_spill] sm:$0xff] %v14257_v59  ;;  %5897 = vmatpush.bf16.msrb.mxu2 %v9030_v27  ;;  %5950 = vmatpush.bf16.msra.mxu0 %v10170_v17  ;;  %v8549_v27 = vld [vmem:[%s11440_s12 + $0x558] sm:$0xf] }
 0x443   : > { %v8550_v30 = vor.u32 %v10421_v0, %v8549_v27 }
 0x445   : > { %5869 = vmatpush.bf16.msrb.mxu1 %v8550_v30 }
 0x446   : > { %v5594_v14 = vpop.f32.mrf.mxu3  ;;  %5898 = vmatpush.bf16.msrb.mxu2 %v8970_v16 }
 0x447   : > { %v5595_v44 = vadd.f32 %v5594_v14, %v14151_v45  ;;  %v5550_v35 = vpop.f32.mrf.mxu1  ;;  %v5624_v55 = vpop.f32.mrf.mxu0  ;;  %v14277_v45 = vadd.f32 %v14157_v6, %v14077_v46  ;;  %v5518_v46 = vadd.f32 %v14106_v8, %v5490_v62  ;;  %v14288_v6 = vmul.f32 0.020408163, %v6584_v57 }
 0x448   : > { %v14282_v22 = vpop.f32.mrf.mxu2  ;;  %v6672_v8 = vmul.f32 %v14134_v54, %v14134_v54  ;;  %v6732_v57 = vmul.f32 %v14257_v59, %v14257_v59 }
 0x449   : > { %v14268_v58 = vadd.f32 %v5622_v19, %v5595_v44  ;;  %v5467_v19 = vadd.f32 %v14061_v15, %v14033_v32  ;;  %v6687_v24 = vmul.f32 %v14277_v45, %v14277_v45  ;;  %v15671_v32 = vld [vmem:[#allocation30_spill] sm:$0xff]  ;;  %v5526_v15 = vadd.f32 %v14197_v41, %v5498_v61 }
 0x44a   : > { %v6986_v41 = vmul.f32 0.020408163, %v6884_v26  ;;  %v6585_v7 = vadd.f32 %v14277_v45, %v14134_v54  ;;  %v7001_v43 = vmul.f32 %v14288_v6, %v14288_v6  ;;  %v8429_v26 = vld [vmem:[%s11440_s12 + $0x468] sm:$0xf] }
 0x44b   : > { %v5495_v20 = vadd.f32 %v14189_v33, %v5467_v19  ;;  %v6885_v9 = vadd.f32 %v6687_v24, %v6672_v8 }
 0x44c   : > { %5845 = vmatmul.bf16.vlgmr.msrb.gmra.mxu0 %v15642_v12  ;;  %v6586_v16 = vadd.f32 %v6585_v7, %v14206_v31  ;;  %v8849_v7 = vld [vmem:[%s11440_s12 + $0x7b0] sm:$0xf] }
 0x44d   : > { %5771 = vmatmul.bf16.gmra.mxu1 %v15671_v32  ;;  %v5523_v17 = vadd.f32 %v14155_v4, %v5495_v20 }
 0x44e   : > { %v5596_v52 = vpop.f32.mrf.mxu3  ;;  %5817 = vmatmul.bf16.vlgmr.msrb.gmra.mxu3 %v15627_v51 }
 0x44f   : > { %v5597_v56 = vadd.f32 %v5596_v52, %v14191_v47  ;;  %v5553_v34 = vpop.f32.mrf.mxu1  ;;  %v5627_v50 = vpop.f32.mrf.mxu0  ;;  %v14297_v47 = vadd.f32 %v14232_v40, %v5518_v46  ;;  %v6702_v40 = vmul.f32 %v14206_v31, %v14206_v31  ;;  %v14318_v44 = vadd.f32 %v5550_v35, %v5523_v17  ;;  %v10511_v35 = vld [vmem:[%s11440_s12 + $0x860] sm:$0xf0] }
 0x450   : > { %5799 = vmatmul.bf16.gmra.mxu2 %v15640_v28  ;;  %v5554_v33 = vadd.f32 %v5553_v34, %v5526_v15  ;;  %v14320_v37 = vpop.f32.mrf.mxu2  ;;  %v7016_v52 = vsub.f32 %v6986_v41, %v7001_v43  ;;  %v10391_v15 = vld [vmem:[%s11440_s12 + $0x4a0] sm:$0xf0] }
 0x451   : > { %15672 = vst [vmem:[#allocation70_spill] sm:$0xff] %v14297_v47  ;;  %v14303_v13 = vadd.f32 %v5624_v55, %v5597_v56  ;;  %v10406_v55 = vld [vmem:[%s11440_s12 + $0x518] sm:$0xf0]  ;;  %v6717_v14 = vmul.f32 %v14297_v47, %v14297_v47  ;;  %v6886_v1 = vadd.f32 %v6885_v9, %v6702_v40  ;;  %v6587_v62 = vadd.f32 %v6586_v16, %v14297_v47  ;;  %v8909_v56 = vld [vmem:[%s11440_s12 + $0x828] sm:$0xf] }
 0x452   : > { %6356 = vst [vmem:[%s11916_s25 + $0x318] sm:$0x1] %v5554_v33  ;;  %v8490_v63 = vor.u32 %v10406_v55, %v8489_v49  ;;  %v6747_v34 = vmul.f32 %v14318_v44, %v14318_v44  ;;  %v8910_v24 = vor.u32 %v10511_v35, %v8909_v56  ;;  %v8430_v27 = vor.u32 %v10391_v15, %v8429_v26  ;;  %v10496_v40 = vld [vmem:[%s11440_s12 + $0x7e8] sm:$0xf0]  ;;  %v8369_v16 = vld [vmem:[%s11440_s12 + $0x3f0] sm:$0xf] }
 0x453   : > { %15673 = vst [vmem:[#allocation71_spill] sm:$0xff] %v14318_v44  ;;  %v6588_v46 = vadd.f32 %v6587_v62, %v14257_v59  ;;  %v7031_v30 = vmax.f32 %v7016_v52, 0.0  ;;  %v8850_v55 = vor.u32 %v10496_v40, %v8849_v7  ;;  %v9749_v52 = vld [vmem:[%s11440_s12 + $0xeb8] sm:$0xf]  ;;  %v10721_v56 = vld [vmem:[%s11440_s12 + $0xef0] sm:$0xf0] }
 0x454   : > { %5870 = vmatpush.bf16.msrb.mxu1 %v8490_v63  ;;  %5899 = vmatpush.bf16.msrb.mxu2 %v8910_v24  ;;  %v9689_v24 = vld [vmem:[%s11440_s12 + $0xe40] sm:$0xf]  ;;  %v9629_v7 = vld [vmem:[%s11440_s12 + $0xdc8] sm:$0xf] }
 0x455   : > { %v6589_v8 = vadd.f32 %v6588_v46, %v14318_v44  ;;  %v9750_v46 = vor.u32 %v10721_v56, %v9749_v52 }
 0x456   : > { %v5599_v4 = vpop.f32.mrf.mxu3 }
 0x457   : > { %v5600_v3 = vadd.f32 %v5599_v4, %v14226_v5  ;;  %v5555_v61 = vpop.f32.mrf.mxu1  ;;  %v5629_v19 = vpop.f32.mrf.mxu0  ;;  %v6887_v5 = vadd.f32 %v6886_v1, %v6717_v14  ;;  %v10376_v14 = vld [vmem:[%s11440_s12 + $0x428] sm:$0xf0]  ;;  %5921 = vmatpush.bf16.msra.mxu3 %v9750_v46  ;;  %v10474_v46 = vld [vmem:[%s11440_s12 + $0x73c] sm:$0xf] }
 0x458   : > { %5871 = vmatpush.bf16.msrb.mxu1 %v8430_v27  ;;  %v5583_v9 = vpop.f32.mrf.mxu2  ;;  %5900 = vmatpush.bf16.msrb.mxu2 %v8850_v55  ;;  %v14347_v61 = vadd.f32 0.001, %v7031_v30 }
 0x459   : > { %v14329_v20 = vadd.f32 %v5627_v50, %v5600_v3  ;;  %v6888_v0 = vadd.f32 %v6887_v5, %v6732_v57  ;;  %v6461_v33 = vld [vmem:[%s11916_s25 + $0x318] sm:$0x1]  ;;  %v8370_v3 = vor.u32 %v10376_v14, %v8369_v16  ;;  %v10691_v9 = vld [vmem:[%s11440_s12 + $0xe00] sm:$0xf0] }
 0x45a   : > { %v6590_v50 = vsel %vm6472_vm0, %v6461_v33, 0.0  ;;  %v6762_v41 = vmul.f32 %v6461_v33, %v6461_v33  ;;  %10975 = vrsqrt.f32 %v14347_v61  ;;  %v9630_v55 = vor.u32 %v10691_v9, %v9629_v7 }
 0x45b   : > { %v6889_v17 = vadd.f32 %v6888_v0, %v6747_v34  ;;  %v6591_v43 = vadd.f32 %v6590_v50, %v6589_v8  ;;  %v10109_v50 = vld [vmem:[%s11440_s12 + $0x1188] sm:$0xf]  ;;  %vm7139_vm5 = vweird.f32 %v14347_v61 }
 0x45c   : > { %v6890_v4 = vsel %vm6472_vm0, %v6762_v41, 0.0  ;;  %5850 = vmatmul.bf16.gmra.mxu0 %v15652_v53  ;;  %5872 = vmatpush.bf16.msrb.mxu1 %v8370_v3  ;;  %v10811_v41 = vld [vmem:[%s11440_s12 + $0x11c0] sm:$0xf0]  ;;  %v9989_v3 = vld [vmem:[%s11440_s12 + $0x1098] sm:$0xf] }
 0x45d   : > { %v6592_v1 = vrot.slane %v6591_v43, 4  ;;  %v6891_v62 = vadd.f32 %v6890_v4, %v6889_v17  ;;  %5776 = vmatmul.bf16.gmra.mxu1 %v15630_v42  ;;  %v10049_v4 = vld [vmem:[%s11440_s12 + $0x1110] sm:$0xf] }
 0x45e   : > { %v5601_v49 = vpop.f32.mrf.mxu3  ;;  %5822 = vmatmul.bf16.gmra.mxu3 %v15633_v48 }
 0x45f   : > { %v5602_v63 = vadd.f32 %v5601_v49, %v14248_v23  ;;  %v14345_v57 = vpop.f32.mrf.mxu0  ;;  %v6593_v26 = vadd.f32 %v6592_v1, %v6591_v43  ;;  %v6892_v5 = vrot.slane %v6891_v62, 4  ;;  %v10110_v43 = vor.u32 %v10811_v41, %v10109_v50  ;;  %v10766_v50 = vld [vmem:[%s11440_s12 + $0x1058] sm:$0xf0]  ;;  %v10459_v41 = vld [vmem:[%s11440_s12 + $0x6c4] sm:$0xf] }
 0x460   : > { %5804 = vmatmul.bf16.gmra.mxu2 %v15650_v11  ;;  %v14365_v49 = vpop.eup %10975 }
 0x461   : > { %v14352_v35 = vadd.f32 %v5629_v19, %v5602_v63  ;;  %v6594_v23 = vrot.slane %v6593_v26, 2  ;;  %v6893_v34 = vadd.f32 %v6892_v5, %v6891_v62  ;;  %v10706_v19 = vld [vmem:[%s11440_s12 + $0xe78] sm:$0xf0]  ;;  %5951 = vmatpush.bf16.msra.mxu0 %v10110_v43  ;;  %v10796_v63 = vld [vmem:[%s11440_s12 + $0x1148] sm:$0xf0]  ;;  %v7134_v1 = vmul.f32 %v14365_v49, %v14347_v61 }
 0x462   : > { %v9690_v0 = vor.u32 %v10706_v19, %v9689_v24  ;;  %v10050_v56 = vor.u32 %v10796_v63, %v10049_v4  ;;  %v10781_v5 = vld [vmem:[%s11440_s12 + $0x10d0] sm:$0xf0]  ;;  %v9569_v24 = vld [vmem:[%s11440_s12 + $0xd50] sm:$0xf]  ;;  %v10676_v19 = vld [vmem:[%s11440_s12 + $0xd88] sm:$0xf0]  ;;  %vm7140_vm3 = vweird.f32 %v14365_v49 }
 0x463   : > { %v6595_v15 = vadd.f32 %v6594_v23, %v6593_v26  ;;  %v6894_v27 = vrot.slane %v6893_v34, 2  ;;  %v7135_v43 = vmul.f32 %v14365_v49, %v7134_v1  ;;  %v10354_v4 = vld [vmem:[%s11440_s12 + $0x37c] sm:$0xf]  ;;  %v8311_v63 = vld [vmem:[%s11440_s12 + $0x3b4] sm:$0xf0]  ;;  %vm14467_vm7 = vmor %vm7139_vm5, %vm7140_vm3 }
 0x464   : > { %5922 = vmatpush.bf16.msra.mxu3 %v9690_v0 }
 0x465   : > { %v6596_v8 = vrot.slane %v6595_v15, 1  ;;  %v6895_v33 = vadd.f32 %v6894_v27, %v6893_v34  ;;  %v8791_v34 = vld [vmem:[%s11440_s12 + $0x774] sm:$0xf0]  ;;  %5952 = vmatpush.bf16.msra.mxu0 %v10050_v56  ;;  %v9990_v27 = vor.u32 %v10781_v5, %v9989_v3  ;;  %v10444_v3 = vld [vmem:[%s11440_s12 + $0x64c] sm:$0xf]  ;;  %v8314_v56 = vor.u32 %v10354_v4, %v8311_v63 }
 0x466   : > { %v8794_v0 = vor.u32 %v10474_v46, %v8791_v34  ;;  %v9449_v5 = vld [vmem:[%s11440_s12 + $0xc60] sm:$0xf]  ;;  %v10631_v4 = vld [vmem:[%s11440_s12 + $0xc20] sm:$0xf0]  ;;  %v8611_v63 = vld [vmem:[%s11440_s12 + $0x60c] sm:$0xf0] }
 0x467   : > { %v14359_v30 = vpop.f32.mrf.mxu0  ;;  %v6597_v40 = vadd.f32 %v6596_v8, %v6595_v15  ;;  %v6896_v17 = vrot.slane %v6895_v33, 1  ;;  %v9570_v8 = vor.u32 %v10676_v19, %v9569_v24  ;;  %v9869_v24 = vld [vmem:[%s11440_s12 + $0xfa8] sm:$0xf]  ;;  %v10751_v19 = vld [vmem:[%s11440_s12 + $0xfe0] sm:$0xf0]  ;;  %5977 = vmatpush.bf16.msra.mxu1 %v8314_v56 }
 0x468   : > { %5923 = vmatpush.bf16.msra.mxu3 %v9630_v55  ;;  %6005 = vmatpush.bf16.msra.mxu2 %v8794_v0  ;;  %v14406_v0 = vmul.f32 0.5, %v7135_v43  ;;  %v9329_v56 = vld [vmem:[%s11440_s12 + $0xb70] sm:$0xf] }
 0x469   : > { %v6897_v16 = vadd.f32 %v6896_v17, %v6895_v33  ;;  %v14367_v14 = vmul.f32 0.020408163, %v6597_v40  ;;  %v9929_v33 = vld [vmem:[%s11440_s12 + $0x1020] sm:$0xf]  ;;  %v9509_v40 = vld [vmem:[%s11440_s12 + $0xcd8] sm:$0xf]  ;;  %5953 = vmatpush.bf16.msra.mxu0 %v9990_v27 }
 0x46a   : > { %v5650_v26 = vpop.f32.mrf.mxu1  ;;  %v10661_v17 = vld [vmem:[%s11440_s12 + $0xd10] sm:$0xf0] }
 0x46b   : > { %v6987_v62 = vmul.f32 0.020408163, %v6897_v16  ;;  %v7002_v52 = vmul.f32 %v14367_v14, %v14367_v14  ;;  %v5651_v23 = vadd.f32 %v5650_v26, %v14268_v58  ;;  %v8731_v58 = vld [vmem:[%s11440_s12 + $0x6fc] sm:$0xf0]  ;;  %v9510_v16 = vor.u32 %v10661_v17, %v9509_v40  ;;  %v8671_v26 = vld [vmem:[%s11440_s12 + $0x684] sm:$0xf0] }
 0x46c   : > { %5855 = vmatmul.bf16.gmra.mxu0 %v15667_v38  ;;  %5924 = vmatpush.bf16.msra.mxu3 %v9570_v8  ;;  %v8734_v55 = vor.u32 %v10459_v41, %v8731_v58  ;;  %v9809_v58 = vld [vmem:[%s11440_s12 + $0xf30] sm:$0xf]  ;;  %v10736_v40 = vld [vmem:[%s11440_s12 + $0xf68] sm:$0xf0]  ;;  %v9870_v17 = vor.u32 %v10751_v19, %v9869_v24  ;;  %v10309_v19 = vld [vmem:[%s11440_s12 + $0x214] sm:$0xf] }
 0x46d   : > { %v7017_v15 = vsub.f32 %v6987_v62, %v7002_v52  ;;  %5873 = vmatmul.bf16.vlgmr.msrb.gmra.mxu1 %v15635_v60  ;;  %v9930_v52 = vor.u32 %v10766_v50, %v9929_v33  ;;  %v10339_v33 = vld [vmem:[%s11440_s12 + $0x304] sm:$0xf]  ;;  %v8674_v50 = vor.u32 %v10444_v3, %v8671_v26  ;;  %v10324_v3 = vld [vmem:[%s11440_s12 + $0x28c] sm:$0xf]  ;;  %v10714_v26 = vld [vmem:[%s11440_s12 + $0xebc] sm:$0xf] }
 0x46e   : > { %5827 = vmatmul.bf16.gmra.mxu3 %v15641_v25  ;;  %6006 = vmatpush.bf16.msra.mxu2 %v8734_v55  ;;  %v10429_v55 = vld [vmem:[%s11440_s12 + $0x5d4] sm:$0xf]  ;;  %v10616_v24 = vld [vmem:[%s11440_s12 + $0xba8] sm:$0xf0] }
 0x46f   : > { %v14386_v7 = vpop.f32.mrf.mxu0  ;;  %v7032_v9 = vmax.f32 %v7017_v15, 0.0  ;;  %v10646_v15 = vld [vmem:[%s11440_s12 + $0xc98] sm:$0xf0]  ;;  %5954 = vmatpush.bf16.msra.mxu0 %v9930_v52  ;;  %v9330_v59 = vor.u32 %v10616_v24, %v9329_v56  ;;  %v9271_v24 = vld [vmem:[%s11440_s12 + $0xb34] sm:$0xf0] }
 0x470   : > { %5901 = vmatmul.bf16.vlgmr.msrb.gmra.mxu2 %v15666_v29  ;;  %5925 = vmatpush.bf16.msra.mxu3 %v9510_v16  ;;  %v9450_v41 = vor.u32 %v10646_v15, %v9449_v5  ;;  %v9751_v5 = vld [vmem:[%s11440_s12 + $0xef4] sm:$0xf0]  ;;  %v8131_v15 = vld [vmem:[%s11440_s12 + $0x24c] sm:$0xf0] }
 0x471   : > { %v14398_v62 = vadd.f32 0.001, %v7032_v9  ;;  %v5604_v1 = vpop.f32.mrf.mxu3  ;;  %v9389_v9 = vld [vmem:[%s11440_s12 + $0xbe8] sm:$0xf] }
 0x472   : > { %v5605_v46 = vadd.f32 %v5604_v1, %v14265_v2  ;;  %v5652_v8 = vpop.f32.mrf.mxu1  ;;  %v8191_v1 = vld [vmem:[%s11440_s12 + $0x2c4] sm:$0xf0]  ;;  %6007 = vmatpush.bf16.msra.mxu2 %v8674_v50 }
 0x473   : > { %v5678_v34 = vpop.f32.mrf.mxu2  ;;  %10977 = vrsqrt.f32 %v14398_v62  ;;  %v5653_v2 = vadd.f32 %v5652_v8, %v14303_v13  ;;  %v8194_v52 = vor.u32 %v10324_v3, %v8191_v1  ;;  %5955 = vmatpush.bf16.msra.mxu0 %v9870_v17  ;;  %v7137_v3 = vsub.f32 1.5, %v14406_v0  ;;  %v10699_v17 = vld [vmem:[%s11440_s12 + $0xe44] sm:$0xf] }
 0x474   : > { %v14409_v27 = vadd.f32 %v5678_v34, %v5651_v23  ;;  %v8251_v23 = vld [vmem:[%s11440_s12 + $0x33c] sm:$0xf0]  ;;  %v14420_v16 = vadd.f32 %v14345_v57, %v5605_v46  ;;  %5926 = vmatpush.bf16.msra.mxu3 %v9450_v41  ;;  %v9390_v34 = vor.u32 %v10631_v4, %v9389_v9  ;;  %v9810_v46 = vor.u32 %v10736_v40, %v9809_v58  ;;  %v8551_v9 = vld [vmem:[%s11440_s12 + $0x594] sm:$0xf0] }
 0x475   : > { %v8254_v13 = vor.u32 %v10339_v33, %v8251_v23  ;;  %v8614_v33 = vor.u32 %v10429_v55, %v8611_v63  ;;  %v9754_v41 = vor.u32 %v10714_v26, %v9751_v5  ;;  %v7204_v4 = vld [vmem:[%s12023_s0 + $0x8] sm:$0xff]  ;;  %v9691_v58 = vld [vmem:[%s11440_s12 + $0xe7c] sm:$0xf0]  ;;  %v8134_v40 = vor.u32 %v10309_v19, %v8131_v15 }
 0x476   : > { %15674 = vst [vmem:[#allocation72_spill] sm:$0xff] %v14409_v27  ;;  %v8491_v26 = vld [vmem:[%s11440_s12 + $0x51c] sm:$0xf0]  ;;  %v10594_v5 = vld [vmem:[%s11440_s12 + $0xafc] sm:$0xf]  ;;  %vm7149_vm8 = vweird.f32 %v14398_v62 }
 0x477   : > { %v5639_v43 = vpop.f32.mrf.mxu0  ;;  %5978 = vmatpush.bf16.msra.mxu1 %v8254_v13  ;;  %v10414_v13 = vld [vmem:[%s11440_s12 + $0x55c] sm:$0xf]  ;;  %5956 = vmatpush.bf16.msra.mxu0 %v9810_v46  ;;  %v10684_v19 = vld [vmem:[%s11440_s12 + $0xdcc] sm:$0xf]  ;;  %v9631_v46 = vld [vmem:[%s11440_s12 + $0xe04] sm:$0xf0] }
 0x478   : > { %5927 = vmatpush.bf16.msra.mxu3 %v9390_v34  ;;  %6008 = vmatpush.bf16.msra.mxu2 %v8614_v33  ;;  %v8554_v0 = vor.u32 %v10414_v13, %v8551_v9  ;;  %v7216_v34 = vperm.slane %v7204_v4, 1  ;;  %v10294_v33 = vld [vmem:[%s11440_s12 + $0x19c] sm:$0xf]  ;;  %v9634_v61 = vor.u32 %v10684_v19, %v9631_v46  ;;  %v8431_v46 = vld [vmem:[%s11440_s12 + $0x4a4] sm:$0xf0] }
 0x479   : > { %v14431_v8 = vpop.eup %10977  ;;  %v5606_v57 = vpop.f32.mrf.mxu3 }
 0x47a   : > { %v7144_v23 = vmul.f32 %v14431_v8, %v14398_v62  ;;  %v5607_v50 = vadd.f32 %v5606_v57, %v14282_v22  ;;  %v5655_v44 = vpop.f32.mrf.mxu1  ;;  %vm7150_vm4 = vweird.f32 %v14431_v8  ;;  %v9274_v57 = vor.u32 %v10594_v5, %v9271_v24  ;;  %v10279_v5 = vld [vmem:[%s11440_s12 + $0x124] sm:$0xf] }
 0x47b   : > { %v5680_v43 = vpop.f32.mrf.mxu2  ;;  %5979 = vmatpush.bf16.msra.mxu1 %v8194_v52  ;;  %v5656_v63 = vadd.f32 %v5655_v44, %v14329_v20  ;;  %6061 = vmatpush.bf16.msrb.mxu0 %v9754_v41  ;;  %v9694_v44 = vor.u32 %v10699_v17, %v9691_v58  ;;  %v7138_v20 = vmul.f32 %v14365_v49, %v7137_v3  ;;  %vm7151_vm9 = vmor %vm7149_vm8, %vm7150_vm4 }
 0x47c   : > { %v14440_v1 = vadd.f32 %v5680_v43, %v5653_v2  ;;  %v7145_v55 = vmul.f32 %v14431_v8, %v7144_v23  ;;  %5860 = vmatmul.bf16.gmra.mxu0 %v15670_v21  ;;  %v14448_v22 = vadd.f32 %v14359_v30, %v5607_v50  ;;  %v7215_v2 = vperm.slane %v7204_v4, 0  ;;  %v10399_v30 = vld [vmem:[%s11440_s12 + $0x4e4] sm:$0xf]  ;;  %5928 = vmatpush.bf16.msra.mxu3 %v9330_v59  ;;  %v8071_v23 = vld [vmem:[%s11440_s12 + $0x1d4] sm:$0xf0] }
 0x47d   : > { %5878 = vmatmul.bf16.gmra.mxu1 %v15646_v36  ;;  %6009 = vmatpush.bf16.msra.mxu2 %v8554_v0  ;;  %v8494_v15 = vor.u32 %v10399_v30, %v8491_v26  ;;  %v8074_v13 = vor.u32 %v10294_v33, %v8071_v23  ;;  %v7142_v9 = vsel %vm14467_vm7, %v14365_v49, %v7138_v20  ;;  %v10264_v33 = vld [vmem:[%s11440_s12 + $0xac] sm:$0xf]  ;;  %v7951_v50 = vld [vmem:[%s11440_s12 + $0xe4] sm:$0xf0] }
 0x47e   : > { %15675 = vst [vmem:[#allocation73_spill] sm:$0xff] %v14440_v1  ;;  %v7146_v56 = vmul.f32 0.5, %v7145_v55  ;;  %5832 = vmatmul.bf16.gmra.mxu3 %v15651_v10 }
 0x47f   : > { %5980 = vmatpush.bf16.msra.mxu1 %v8134_v40  ;;  %6062 = vmatpush.bf16.msrb.mxu0 %v9694_v44  ;;  %v14484_v40 = vmul.f32 %v7215_v2, %v7142_v9  ;;  %v10369_v9 = vld [vmem:[%s11440_s12 + $0x3f4] sm:$0xf] }
 0x480   : > { %5906 = vmatmul.bf16.gmra.mxu2 %v15668_v18  ;;  %v7147_v52 = vsub.f32 1.5, %v7146_v56  ;;  %6033 = vmatpush.bf16.msrb.mxu3 %v9274_v57  ;;  %v10384_v57 = vld [vmem:[%s11440_s12 + $0x46c] sm:$0xf] }
 0x481   : > { %v5609_v59 = vpop.f32.mrf.mxu3  ;;  %6010 = vmatpush.bf16.msra.mxu2 %v8494_v15  ;;  %v8434_v23 = vor.u32 %v10384_v57, %v8431_v46  ;;  %v9151_v57 = vld [vmem:[%s11440_s12 + $0xa44] sm:$0xf0] }
 0x482   : > { %v7148_v43 = vmul.f32 %v14431_v8, %v7147_v52  ;;  %v5657_v3 = vpop.f32.mrf.mxu1 }
 0x483   : > { %v5683_v41 = vpop.f32.mrf.mxu2  ;;  %v5658_v62 = vadd.f32 %v5657_v3, %v14352_v35  ;;  %5981 = vmatpush.bf16.msra.mxu1 %v8074_v13  ;;  %6063 = vmatpush.bf16.msrb.mxu0 %v9634_v61  ;;  %v8371_v3 = vld [vmem:[%s11440_s12 + $0x42c] sm:$0xf0] }
 0x484   : > { %v14478_v4 = vadd.f32 %v5683_v41, %v5656_v63  ;;  %v7152_v17 = vsel %vm7151_vm9, %v14431_v8, %v7148_v43  ;;  %v7262_v8 = vmul.f32 %v14484_v40, %v14288_v6  ;;  %v7954_v43 = vor.u32 %v10264_v33, %v7951_v50  ;;  %v9571_v50 = vld [vmem:[%s11440_s12 + $0xd8c] sm:$0xf0] }
 0x485   : > { %v14482_v58 = vmul.f32 %v7216_v34, %v7152_v17  ;;  %6011 = vmatpush.bf16.msra.mxu2 %v8434_v23  ;;  %v10249_v17 = vld [vmem:[%s11440_s12 + $0x34] sm:$0xf] }
 0x486   : > { %15678 = vst [vmem:[#allocation74_spill] sm:$0xff] %v14478_v4  ;;  %v10669_v23 = vld [vmem:[%s11440_s12 + $0xd54] sm:$0xf] }
 0x487   : > { %v7263_v49 = vmul.f32 %v14482_v58, %v14367_v14  ;;  %v15680_v14 = vld [vmem:[#allocation27_spill] sm:$0xff] }
 0x489   : > { %v5734_v55 = vpop.f32.mrf.mxu0  ;;  %v5611_v63 = vpop.f32.mrf.mxu3  ;;  %v7291_v56 = vrot.slane %v7263_v49, 7 }
 0x48a   : > { %v5660_v44 = vpop.f32.mrf.mxu1  ;;  %v8374_v63 = vor.u32 %v10369_v9, %v8371_v3 }
 0x48b   : > { %v5685_v0 = vpop.f32.mrf.mxu2  ;;  %v5661_v20 = vadd.f32 %v5660_v44, %v14420_v16  ;;  %v14495_v2 = vsel %vm6472_vm0, %v7262_v8, %v7291_v56  ;;  %v8011_v16 = vld [vmem:[%s11440_s12 + $0x15c] sm:$0xf0] }
 0x48c   : > { %v14490_v35 = vadd.f32 %v5685_v0, %v5658_v62  ;;  %5957 = vmatmul.bf16.vlgmr.msra.gmra.mxu0 %v15627_v51  ;;  %v8014_v19 = vor.u32 %v10279_v5, %v8011_v16  ;;  %v5610_v62 = vadd.f32 %v5609_v59, %v14320_v37  ;;  %v7891_v0 = vld [vmem:[%s11440_s12 + $0x6c] sm:$0xf0]  ;;  %6012 = vmatpush.bf16.msra.mxu2 %v8374_v63  ;;  %v15683_v56 = vld [vmem:[#allocation33_spill] sm:$0xff] }
 0x48d   : > { %5883 = vmatmul.bf16.gmra.mxu1 %v15625_v39  ;;  %v7894_v8 = vor.u32 %v10249_v17, %v7891_v0  ;;  %v15684_v37 = vld [vmem:[#allocation31_spill] sm:$0xff]  ;;  %v9211_v5 = vld [vmem:[%s11440_s12 + $0xabc] sm:$0xf0]  ;;  %v10654_v63 = vld [vmem:[%s11440_s12 + $0xcdc] sm:$0xf] }
 0x48e   : > { %15679 = vst [vmem:[#allocation75_spill] sm:$0xff] %v14490_v35  ;;  %5929 = vmatmul.bf16.vlgmr.msra.gmra.mxu3 %v15680_v14  ;;  %5982 = vmatpush.bf16.msra.mxu1 %v8014_v19  ;;  %v5638_v44 = vadd.f32 %v14386_v7, %v5610_v62  ;;  %v9091_v17 = vld [vmem:[%s11440_s12 + $0x9cc] sm:$0xf0]  ;;  %v9511_v0 = vld [vmem:[%s11440_s12 + $0xd14] sm:$0xf0] }
 0x490   : > { %5911 = vmatmul.bf16.gmra.mxu2 %v15671_v32 }
 0x491   : > { %v5736_v6 = vpop.f32.mrf.mxu0  ;;  %v5706_v26 = vpop.f32.mrf.mxu3 }
 0x492   : > { %v5735_v34 = vadd.f32 %v5734_v55, %v5706_v26  ;;  %v5662_v24 = vpop.f32.mrf.mxu1  ;;  %5983 = vmatpush.bf16.msra.mxu1 %v7954_v43  ;;  %v10579_v26 = vld [vmem:[%s11440_s12 + $0xa84] sm:$0xf] }
 0x493   : > { %v5688_v30 = vpop.f32.mrf.mxu2  ;;  %v5663_v15 = vadd.f32 %v5662_v24, %v14448_v22  ;;  %v9214_v19 = vor.u32 %v10579_v26, %v9211_v5  ;;  %v10639_v26 = vld [vmem:[%s11440_s12 + $0xc64] sm:$0xf]  ;;  %v9451_v5 = vld [vmem:[%s11440_s12 + $0xc9c] sm:$0xf0] }
 0x494   : > { %v14502_v52 = vadd.f32 %v5688_v30, %v5661_v20 }
 0x495   : > { %6034 = vmatpush.bf16.msrb.mxu3 %v9214_v19 }
 0x496   : > { %15681 = vst [vmem:[#allocation76_spill] sm:$0xff] %v14502_v52  ;;  %5984 = vmatpush.bf16.msra.mxu1 %v7894_v8  ;;  %v10534_v8 = vld [vmem:[%s11440_s12 + $0x91c] sm:$0xf] }
 0x499   : > { %v5739_v41 = vpop.f32.mrf.mxu0  ;;  %v5708_v13 = vpop.f32.mrf.mxu3 }
 0x49a   : > { %v14515_v22 = vadd.f32 %v5736_v6, %v5708_v13  ;;  %v5665_v55 = vpop.f32.mrf.mxu1  ;;  %v10549_v13 = vld [vmem:[%s11440_s12 + $0x994] sm:$0xf] }
 0x49b   : > { %v5690_v61 = vpop.f32.mrf.mxu2  ;;  %v5666_v59 = vadd.f32 %v5665_v55, %v5638_v44  ;;  %v9094_v55 = vor.u32 %v10549_v13, %v9091_v17  ;;  %v9514_v44 = vor.u32 %v10654_v63, %v9511_v0  ;;  %v9331_v63 = vld [vmem:[%s11440_s12 + $0xbac] sm:$0xf0] }
 0x49c   : > { %v14513_v49 = vadd.f32 %v5690_v61, %v5663_v15  ;;  %5962 = vmatmul.bf16.gmra.mxu0 %v15633_v48  ;;  %v10564_v15 = vld [vmem:[%s11440_s12 + $0xa0c] sm:$0xf] }
 0x49d   : > { %5888 = vmatmul.bf16.gmra.mxu1 %v15683_v56  ;;  %v9154_v46 = vor.u32 %v10564_v15, %v9151_v57  ;;  %v9454_v15 = vor.u32 %v10639_v26, %v9451_v5  ;;  %v10519_v57 = vld [vmem:[%s11440_s12 + $0x8a4] sm:$0xf]  ;;  %v8317_v5 = vld [vmem:[%s11440_s12 + $0x380] sm:$0xf] }
 0x49e   : > { %15682 = vst [vmem:[#allocation77_spill] sm:$0xff] %v14513_v49  ;;  %5934 = vmatmul.bf16.gmra.mxu3 %v15684_v37 }
 0x49f   : > { %6035 = vmatpush.bf16.msrb.mxu3 %v9154_v46  ;;  %v8971_v46 = vld [vmem:[%s11440_s12 + $0x8dc] sm:$0xf0] }
 0x4a0   : > { %5916 = vmatmul.bf16.gmra.mxu2 %v15630_v42 }
 0x4a1   : > { %v5741_v20 = vpop.f32.mrf.mxu0  ;;  %v5711_v30 = vpop.f32.mrf.mxu3 }
 0x4a2   : > { %v14525_v24 = vadd.f32 %v5739_v41, %v5711_v30  ;;  %v5667_v7 = vpop.f32.mrf.mxu1  ;;  %v9574_v41 = vor.u32 %v10669_v23, %v9571_v50  ;;  %v8974_v50 = vor.u32 %v10519_v57, %v8971_v46  ;;  %v10347_v57 = vld [vmem:[%s11440_s12 + $0x340] sm:$0xf0]  ;;  %v10834_v46 = vld [vmem:[%s11440_s12 + $0x127c] sm:$0xf] }
 0x4a3   : > { %v5693_v6 = vpop.f32.mrf.mxu2  ;;  %6036 = vmatpush.bf16.msrb.mxu3 %v9094_v55 }
 0x4a4   : > { %v5694_v16 = vadd.f32 %v5693_v6, %v5666_v59  ;;  %6064 = vmatpush.bf16.msrb.mxu0 %v9574_v41  ;;  %v8911_v41 = vld [vmem:[%s11440_s12 + $0x864] sm:$0xf0] }
 0x4a6   : > { %6357 = vst [vmem:[%s11916_s25 + $0x320] sm:$0x1] %v5694_v16 }
 0x4a8   : > { %6065 = vmatpush.bf16.msrb.mxu0 %v9514_v44 }
 0x4a9   : > { %v5744_v33 = vpop.f32.mrf.mxu0  ;;  %v5713_v61 = vpop.f32.mrf.mxu3 }
 0x4aa   : > { %v14533_v9 = vadd.f32 %v5741_v20, %v5713_v61  ;;  %v5762_v3 = vpop.f32.mrf.mxu1  ;;  %v9391_v61 = vld [vmem:[%s11440_s12 + $0xc24] sm:$0xf0] }
 0x4ab   : > { %v5695_v43 = vpop.f32.mrf.mxu2  ;;  %v5763_v62 = vadd.f32 %v5762_v3, %v5735_v34  ;;  %v9031_v34 = vld [vmem:[%s11440_s12 + $0x954] sm:$0xf0] }
 0x4ac   : > { %5967 = vmatmul.bf16.gmra.mxu0 %v15641_v25  ;;  %v9034_v59 = vor.u32 %v10534_v8, %v9031_v34  ;;  %v10624_v43 = vld [vmem:[%s11440_s12 + $0xbec] sm:$0xf] }
 0x4ad   : > { %5985 = vmatmul.bf16.vlgmr.msra.gmra.mxu1 %v15642_v12  ;;  %6066 = vmatpush.bf16.msrb.mxu0 %v9454_v15  ;;  %v9394_v13 = vor.u32 %v10624_v43, %v9391_v61  ;;  %v8197_v43 = vld [vmem:[%s11440_s12 + $0x290] sm:$0xf]  ;;  %v10819_v61 = vld [vmem:[%s11440_s12 + $0x1204] sm:$0xf] }
 0x4ae   : > { %5939 = vmatmul.bf16.gmra.mxu3 %v15640_v28 }
 0x4af   : > { %6037 = vmatpush.bf16.msrb.mxu3 %v9034_v59  ;;  %v10489_v59 = vld [vmem:[%s11440_s12 + $0x7b4] sm:$0xf] }
 0x4b0   : > { %6013 = vmatmul.bf16.vlgmr.msra.gmra.mxu2 %v15635_v60 }
 0x4b1   : > { %v5746_v20 = vpop.f32.mrf.mxu0  ;;  %v5716_v6 = vpop.f32.mrf.mxu3  ;;  %6067 = vmatpush.bf16.msrb.mxu0 %v9394_v13  ;;  %v10171_v13 = vld [vmem:[%s11440_s12 + $0x123c] sm:$0xf0] }
 0x4b2   : > { %v14546_v16 = vadd.f32 %v5744_v33, %v5716_v6  ;;  %v5764_v19 = vpop.f32.mrf.mxu1  ;;  %v10504_v33 = vld [vmem:[%s11440_s12 + $0x82c] sm:$0xf]  ;;  %v8851_v6 = vld [vmem:[%s11440_s12 + $0x7ec] sm:$0xf0] }
 0x4b3   : > { %v5790_v30 = vpop.f32.mrf.mxu2  ;;  %v5765_v23 = vadd.f32 %v5764_v19, %v14515_v22  ;;  %6038 = vmatpush.bf16.msrb.mxu3 %v8974_v50  ;;  %v8914_v3 = vor.u32 %v10504_v33, %v8911_v41  ;;  %v10609_v22 = vld [vmem:[%s11440_s12 + $0xb74] sm:$0xf]  ;;  %v8854_v26 = vor.u32 %v10489_v59, %v8851_v6  ;;  %v10362_v19 = vld [vmem:[%s11440_s12 + $0x3b8] sm:$0xf0]  ;;  %v10332_v33 = vld [vmem:[%s11440_s12 + $0x2c8] sm:$0xf0] }
 0x4b4   : > { %v14548_v7 = vadd.f32 %v5790_v30, %v5763_v62  ;;  %v9334_v34 = vor.u32 %v10609_v22, %v9331_v63  ;;  %v8318_v15 = vor.u32 %v10362_v19, %v8317_v5  ;;  %v10174_v63 = vor.u32 %v10819_v61, %v10171_v13  ;;  %v10804_v6 = vld [vmem:[%s11440_s12 + $0x118c] sm:$0xf]  ;;  %v9217_v5 = vld [vmem:[%s11440_s12 + $0xa88] sm:$0xf]  ;;  %v10482_v61 = vld [vmem:[%s11440_s12 + $0x778] sm:$0xf0] }
 0x4b5   : > { %v8198_v19 = vor.u32 %v10332_v33, %v8197_v43  ;;  %v9157_v13 = vld [vmem:[%s11440_s12 + $0xa10] sm:$0xf]  ;;  %v10572_v43 = vld [vmem:[%s11440_s12 + $0xa48] sm:$0xf0]  ;;  %v8077_v33 = vld [vmem:[%s11440_s12 + $0x1a0] sm:$0xf] }
 0x4b6   : > { %6068 = vmatpush.bf16.msrb.mxu0 %v9334_v34  ;;  %6117 = vmatpush.bf16.msrb.mxu2 %v8318_v15  ;;  %v10587_v15 = vld [vmem:[%s11440_s12 + $0xac0] sm:$0xf0] }
 0x4b7   : > { %6039 = vmatpush.bf16.msrb.mxu3 %v8914_v3  ;;  %v9277_v3 = vld [vmem:[%s11440_s12 + $0xb00] sm:$0xf] }
 0x4b9   : > { %v14557_v17 = vpop.f32.mrf.mxu0  ;;  %v5718_v62 = vpop.f32.mrf.mxu3 }
 0x4ba   : > { %v14561_v0 = vadd.f32 %v5746_v20, %v5718_v62  ;;  %v5767_v44 = vpop.f32.mrf.mxu1  ;;  %v8257_v20 = vld [vmem:[%s11440_s12 + $0x308] sm:$0xf]  ;;  %v10602_v62 = vld [vmem:[%s11440_s12 + $0xb38] sm:$0xf0] }
 0x4bb   : > { %v5792_v55 = vpop.f32.mrf.mxu2  ;;  %v5768_v30 = vadd.f32 %v5767_v44, %v14525_v24  ;;  %6040 = vmatpush.bf16.msrb.mxu3 %v8854_v26  ;;  %v10231_v24 = vld [vmem:[%s11440_s12 + $0x12b4] sm:$0xf0]  ;;  %v9278_v44 = vor.u32 %v10602_v62, %v9277_v3  ;;  %v10111_v26 = vld [vmem:[%s11440_s12 + $0x11c4] sm:$0xf0]  ;;  %v10789_v3 = vld [vmem:[%s11440_s12 + $0x1114] sm:$0xf] }
 0x4bc   : > { %v14563_v8 = vadd.f32 %v5792_v55, %v5765_v23  ;;  %5972 = vmatmul.bf16.gmra.mxu0 %v15651_v10  ;;  %v8258_v23 = vor.u32 %v10347_v57, %v8257_v20  ;;  %v10234_v50 = vor.u32 %v10834_v46, %v10231_v24  ;;  %v8137_v57 = vld [vmem:[%s11440_s12 + $0x218] sm:$0xf]  ;;  %v10317_v46 = vld [vmem:[%s11440_s12 + $0x250] sm:$0xf0]  ;;  %v10114_v24 = vor.u32 %v10804_v6, %v10111_v26 }
 0x4bd   : > { %5990 = vmatmul.bf16.gmra.mxu1 %v15652_v53  ;;  %6173 = vmatpush.bf16.msra.mxu0 %v9278_v44  ;;  %v8737_v44 = vld [vmem:[%s11440_s12 + $0x6c8] sm:$0xf] }
 0x4be   : > { %5944 = vmatmul.bf16.gmra.mxu3 %v15650_v11  ;;  %6089 = vmatpush.bf16.msrb.mxu1 %v10234_v50  ;;  %v8797_v50 = vld [vmem:[%s11440_s12 + $0x740] sm:$0xf] }
 0x4bf   : > { %6118 = vmatpush.bf16.msrb.mxu2 %v8258_v23  ;;  %v8798_v23 = vor.u32 %v10482_v61, %v8797_v50 }
 0x4c0   : > { %6018 = vmatmul.bf16.gmra.mxu2 %v15646_v36 }
 0x4c1   : > { %v5751_v41 = vpop.f32.mrf.mxu0  ;;  %v14584_v55 = vpop.f32.mrf.mxu3  ;;  %6145 = vmatpush.bf16.msra.mxu3 %v8798_v23  ;;  %v10287_v23 = vld [vmem:[%s11440_s12 + $0x160] sm:$0xf0] }
 0x4c2   : > { %v5769_v59 = vpop.f32.mrf.mxu1  ;;  %6090 = vmatpush.bf16.msrb.mxu1 %v10174_v63  ;;  %v10302_v41 = vld [vmem:[%s11440_s12 + $0x1d8] sm:$0xf0]  ;;  %v9158_v63 = vor.u32 %v10572_v43, %v9157_v13  ;;  %v8017_v13 = vld [vmem:[%s11440_s12 + $0x128] sm:$0xf]  ;;  %v9991_v43 = vld [vmem:[%s11440_s12 + $0x10d4] sm:$0xf0] }
 0x4c3   : > { %v5795_v22 = vpop.f32.mrf.mxu2  ;;  %v5770_v20 = vadd.f32 %v5769_v59, %v14533_v9  ;;  %6119 = vmatpush.bf16.msrb.mxu2 %v8198_v19  ;;  %v8138_v9 = vor.u32 %v10317_v46, %v8137_v57  ;;  %v10467_v59 = vld [vmem:[%s11440_s12 + $0x700] sm:$0xf0]  ;;  %v9097_v19 = vld [vmem:[%s11440_s12 + $0x998] sm:$0xf]  ;;  %v8078_v50 = vor.u32 %v10302_v41, %v8077_v33  ;;  %v8018_v33 = vor.u32 %v10287_v23, %v8017_v13 }
 0x4c4   : > { %v14586_v34 = vadd.f32 %v5795_v22, %v5768_v30  ;;  %v9218_v30 = vor.u32 %v10587_v15, %v9217_v5  ;;  %v10051_v22 = vld [vmem:[%s11440_s12 + $0x114c] sm:$0xf0]  ;;  %v8738_v5 = vor.u32 %v10467_v59, %v8737_v44  ;;  %v10557_v15 = vld [vmem:[%s11440_s12 + $0x9d0] sm:$0xf0]  ;;  %v9931_v59 = vld [vmem:[%s11440_s12 + $0x105c] sm:$0xf0] }
 0x4c5   : > { %v10054_v61 = vor.u32 %v10789_v3, %v10051_v22  ;;  %v10759_v3 = vld [vmem:[%s11440_s12 + $0x1024] sm:$0xf]  ;;  %v8677_v22 = vld [vmem:[%s11440_s12 + $0x650] sm:$0xf] }
 0x4c6   : > { %6174 = vmatpush.bf16.msra.mxu0 %v9218_v30  ;;  %6091 = vmatpush.bf16.msrb.mxu1 %v10114_v24  ;;  %v10774_v24 = vld [vmem:[%s11440_s12 + $0x109c] sm:$0xf] }
 0x4c7   : > { %6120 = vmatpush.bf16.msrb.mxu2 %v8138_v9  ;;  %6146 = vmatpush.bf16.msra.mxu3 %v8738_v5  ;;  %v10272_v9 = vld [vmem:[%s11440_s12 + $0xe8] sm:$0xf0]  ;;  %v9994_v41 = vor.u32 %v10774_v24, %v9991_v43  ;;  %v10542_v5 = vld [vmem:[%s11440_s12 + $0x958] sm:$0xf0]  ;;  %v9934_v43 = vor.u32 %v10759_v3, %v9931_v59  ;;  %v6688_v59 = vmul.f32 %v14440_v1, %v14440_v1 }
 0x4c9   : > { %v14602_v62 = vpop.f32.mrf.mxu0  ;;  %v5723_v6 = vpop.f32.mrf.mxu3 }
 0x4ca   : > { %v5772_v46 = vpop.f32.mrf.mxu1  ;;  %6175 = vmatpush.bf16.msra.mxu0 %v9158_v63  ;;  %6092 = vmatpush.bf16.msrb.mxu1 %v10054_v61  ;;  %v10452_v63 = vld [vmem:[%s11440_s12 + $0x688] sm:$0xf0] }
 0x4cb   : > { %v5797_v26 = vpop.f32.mrf.mxu2  ;;  %v5773_v30 = vadd.f32 %v5772_v46, %v14546_v16  ;;  %v7957_v16 = vld [vmem:[%s11440_s12 + $0xb0] sm:$0xf]  ;;  %6121 = vmatpush.bf16.msrb.mxu2 %v8078_v50  ;;  %v8678_v6 = vor.u32 %v10452_v63, %v8677_v22  ;;  %v7897_v22 = vld [vmem:[%s11440_s12 + $0x38] sm:$0xf]  ;;  %v10257_v63 = vld [vmem:[%s11440_s12 + $0x70] sm:$0xf0] }
 0x4cc   : > { %v14609_v57 = vadd.f32 %v5797_v26, %v5770_v20  ;;  %6069 = vmatmul.bf16.vlgmr.msrb.gmra.mxu0 %v15680_v14  ;;  %v9098_v20 = vor.u32 %v10557_v15, %v9097_v19  ;;  %v9037_v26 = vld [vmem:[%s11440_s12 + $0x920] sm:$0xf]  ;;  %v7958_v24 = vor.u32 %v10272_v9, %v7957_v16  ;;  %v10842_v16 = vld [vmem:[%s11440_s12 + $0x12b8] sm:$0xf0] }
 0x4cd   : > { %5995 = vmatmul.bf16.gmra.mxu1 %v15667_v38  ;;  %v9038_v46 = vor.u32 %v10542_v5, %v9037_v26  ;;  %6147 = vmatpush.bf16.msra.mxu3 %v8678_v6  ;;  %v10437_v6 = vld [vmem:[%s11440_s12 + $0x610] sm:$0xf0]  ;;  %v8977_v26 = vld [vmem:[%s11440_s12 + $0x8a8] sm:$0xf]  ;;  %v10527_v5 = vld [vmem:[%s11440_s12 + $0x8e0] sm:$0xf0] }
 0x4ce   : > { %6041 = vmatmul.bf16.vlgmr.msrb.gmra.mxu3 %v15666_v29  ;;  %6176 = vmatpush.bf16.msra.mxu0 %v9098_v20  ;;  %v10744_v20 = vld [vmem:[%s11440_s12 + $0xfac] sm:$0xf]  ;;  %v8978_v3 = vor.u32 %v10527_v5, %v8977_v26  ;;  %v6718_v26 = vmul.f32 %v14490_v35, %v14490_v35  ;;  %v6462_v5 = vld [vmem:[%s11916_s25 + $0x320] sm:$0x1] }
 0x4cf   : > { %6122 = vmatpush.bf16.msrb.mxu2 %v8018_v33  ;;  %6093 = vmatpush.bf16.msrb.mxu1 %v9994_v41  ;;  %v10237_v41 = vld [vmem:[%s11440_s12 + $0x1280] sm:$0xf] }
 0x4d0   : > { %6023 = vmatmul.bf16.gmra.mxu2 %v15625_v39 }
 0x4d1   : > { %v14625_v44 = vpop.f32.mrf.mxu0  ;;  %v5818_v15 = vpop.f32.mrf.mxu3 }
 0x4d2   : > { %v14633_v61 = vadd.f32 %v5818_v15, %v14548_v7  ;;  %v5774_v13 = vpop.f32.mrf.mxu1  ;;  %6177 = vmatpush.bf16.msra.mxu0 %v9038_v46  ;;  %v8617_v7 = vld [vmem:[%s11440_s12 + $0x5d8] sm:$0xf]  ;;  %v7898_v46 = vor.u32 %v10257_v63, %v7897_v22  ;;  %v6703_v22 = vmul.f32 %v14478_v4, %v14478_v4 }
 0x4d3   : > { %v5800_v19 = vpop.f32.mrf.mxu2  ;;  %v5775_v23 = vadd.f32 %v5774_v13, %v14561_v0  ;;  %6123 = vmatpush.bf16.msrb.mxu2 %v7958_v24  ;;  %6094 = vmatpush.bf16.msrb.mxu1 %v9934_v43  ;;  %v8618_v9 = vor.u32 %v10437_v6, %v8617_v7  ;;  %v10729_v13 = vld [vmem:[%s11440_s12 + $0xf34] sm:$0xf]  ;;  %v9811_v24 = vld [vmem:[%s11440_s12 + $0xf6c] sm:$0xf0]  ;;  %v6598_v43 = vadd.f32 %v14440_v1, %v14409_v27 }
 0x4d4   : > { %v14630_v50 = vadd.f32 %v5800_v19, %v5773_v30  ;;  %v9871_v30 = vld [vmem:[%s11440_s12 + $0xfe4] sm:$0xf0]  ;;  %v6673_v7 = vmul.f32 %v14409_v27, %v14409_v27  ;;  %v9814_v63 = vor.u32 %v10729_v13, %v9811_v24  ;;  %v10512_v13 = vld [vmem:[%s11440_s12 + $0x868] sm:$0xf0]  ;;  %v6733_v24 = vmul.f32 %v14502_v52, %v14502_v52 }
 0x4d5   : > { %v9874_v33 = vor.u32 %v10744_v20, %v9871_v30  ;;  %6148 = vmatpush.bf16.msra.mxu3 %v8618_v9 }
 0x4d6   : > { %6178 = vmatpush.bf16.msra.mxu0 %v8978_v3  ;;  %v6898_v6 = vadd.f32 %v6688_v59, %v6673_v7 }
 0x4d7   : > { %6095 = vmatpush.bf16.msrb.mxu1 %v9874_v33  ;;  %6124 = vmatpush.bf16.msrb.mxu2 %v7898_v46  ;;  %v10177_v33 = vld [vmem:[%s11440_s12 + $0x1208] sm:$0xf] }
 0x4d8   : > { %v6899_v3 = vadd.f32 %v6898_v6, %v6703_v22  ;;  %v6603_v6 = vsel %vm6472_vm0, %v6462_v5, 0.0 }
 0x4d9   : > { %v14644_v0 = vpop.f32.mrf.mxu0  ;;  %v5820_v15 = vpop.f32.mrf.mxu3 }
 0x4da   : > { %v14657_v20 = vadd.f32 %v5820_v15, %v14563_v8  ;;  %v14659_v30 = vpop.f32.mrf.mxu1  ;;  %v6599_v8 = vadd.f32 %v6598_v43, %v14478_v4  ;;  %v8917_v15 = vld [vmem:[%s11440_s12 + $0x830] sm:$0xf]  ;;  %v10722_v4 = vld [vmem:[%s11440_s12 + $0xef8] sm:$0xf0]  ;;  %v6900_v22 = vadd.f32 %v6899_v3, %v6718_v26 }
 0x4db   : > { %v5802_v19 = vpop.f32.mrf.mxu2  ;;  %6096 = vmatpush.bf16.msrb.mxu1 %v9814_v63 }
 0x4dc   : > { %v14654_v47 = vadd.f32 %v5802_v19, %v5775_v23  ;;  %6074 = vmatmul.bf16.gmra.mxu0 %v15684_v37  ;;  %v14666_v23 = vor.u32 %v10842_v16, %v10237_v41  ;;  %v6600_v9 = vadd.f32 %v6599_v8, %v14490_v35  ;;  %v10827_v41 = vld [vmem:[%s11440_s12 + $0x1240] sm:$0xf0]  ;;  %v8557_v16 = vld [vmem:[%s11440_s12 + $0x560] sm:$0xf]  ;;  %v10422_v19 = vld [vmem:[%s11440_s12 + $0x598] sm:$0xf0]  ;;  %v8918_v8 = vor.u32 %v10512_v13, %v8917_v15 }
 0x4dd   : > { %6000 = vmatmul.bf16.gmra.mxu1 %v15670_v21  ;;  %v14680_v59 = vor.u32 %v10827_v41, %v10177_v33  ;;  %v8558_v7 = vor.u32 %v10422_v19, %v8557_v16  ;;  %v9757_v35 = vld [vmem:[%s11440_s12 + $0xec0] sm:$0xf]  ;;  %v6763_v33 = vmul.f32 %v6462_v5, %v6462_v5  ;;  %v6901_v26 = vadd.f32 %v6900_v22, %v6733_v24 }
 0x4de   : > { %6046 = vmatmul.bf16.gmra.mxu3 %v15668_v18  ;;  %6229 = vmatpush.bf16.msra.mxu2 %v14666_v23  ;;  %v6601_v46 = vadd.f32 %v6600_v9, %v14502_v52  ;;  %v14695_v27 = vor.u32 %v10722_v4, %v9757_v35  ;;  %v6748_v52 = vmul.f32 %v14513_v49, %v14513_v49 }
 0x4df   : > { %6149 = vmatpush.bf16.msra.mxu3 %v8558_v7  ;;  %6179 = vmatpush.bf16.msra.mxu0 %v8918_v8  ;;  %v6903_v4 = vsel %vm6472_vm0, %v6763_v33, 0.0 }
 0x4e0   : > { %6028 = vmatmul.bf16.gmra.mxu2 %v15683_v56  ;;  %v6602_v9 = vadd.f32 %v6601_v46, %v14513_v49  ;;  %10852 = vmatpush.bf16.msra.mxu1 %v14695_v27  ;;  %v6902_v35 = vadd.f32 %v6901_v26, %v6748_v52  ;;  %v10497_v49 = vld [vmem:[%s11440_s12 + $0x7f0] sm:$0xf0] }
 0x4e1   : > { %v14688_v43 = vpop.f32.mrf.mxu0  ;;  %v5823_v1 = vpop.f32.mrf.mxu3 }
 0x4e2   : > { %v14701_v63 = vadd.f32 %v5823_v1, %v14586_v34  ;;  %v5779_v16 = vpop.f32.mrf.mxu1  ;;  %6230 = vmatpush.bf16.msra.mxu2 %v14680_v59  ;;  %v6604_v5 = vadd.f32 %v6603_v6, %v6602_v9  ;;  %v6904_v19 = vadd.f32 %v6903_v4, %v6902_v35  ;;  %v8497_v9 = vld [vmem:[%s11440_s12 + $0x4e8] sm:$0xf] }
 0x4e3   : > { %v14693_v41 = vpop.f32.mrf.mxu2 }
 0x4e4   : > { %v6605_v3 = vrot.slane %v6604_v5, 4  ;;  %v6905_v8 = vrot.slane %v6904_v19, 4 }
 0x4e6   : > { %v6606_v24 = vadd.f32 %v6605_v3, %v6604_v5  ;;  %v6906_v22 = vadd.f32 %v6905_v8, %v6904_v19  ;;  %v8437_v19 = vld [vmem:[%s11440_s12 + $0x470] sm:$0xf] }
 0x4e8   : > { %v6607_v52 = vrot.slane %v6606_v24, 2  ;;  %v6907_v3 = vrot.slane %v6906_v22, 2 }
 0x4e9   : > { %v14706_v15 = vpop.f32.mrf.mxu0  ;;  %v5825_v1 = vpop.f32.mrf.mxu3 }
 0x4ea   : > { %v14709_v34 = vadd.f32 %v5825_v1, %v14609_v57  ;;  %v5874_v46 = vpop.f32.mrf.mxu1  ;;  %v6608_v35 = vadd.f32 %v6607_v52, %v6606_v24  ;;  %v6908_v8 = vadd.f32 %v6907_v3, %v6906_v22 }
 0x4eb   : > { %v5807_v13 = vpop.f32.mrf.mxu2  ;;  %v5875_v7 = vadd.f32 %v5874_v46, %v14602_v62  ;;  %v10407_v62 = vld [vmem:[%s11440_s12 + $0x520] sm:$0xf0] }
 0x4ec   : > { %6079 = vmatmul.bf16.gmra.mxu0 %v15640_v28  ;;  %v8498_v4 = vor.u32 %v10407_v62, %v8497_v9  ;;  %v10392_v13 = vld [vmem:[%s11440_s12 + $0x4a8] sm:$0xf0]  ;;  %v6609_v46 = vrot.slane %v6608_v35, 1  ;;  %v8377_v9 = vld [vmem:[%s11440_s12 + $0x3f8] sm:$0xf] }
 0x4ed   : > { %6097 = vmatmul.bf16.vlgmr.msrb.gmra.mxu1 %v15627_v51  ;;  %v8438_v1 = vor.u32 %v10392_v13, %v8437_v19  ;;  %v6909_v19 = vrot.slane %v6908_v8, 1  ;;  %v5750_v13 = vadd.f32 %v14557_v17, %v14584_v55 }
 0x4ee   : > { %6051 = vmatmul.bf16.gmra.mxu3 %v15671_v32  ;;  %v6610_v3 = vadd.f32 %v6609_v46, %v6608_v35  ;;  %v10707_v46 = vld [vmem:[%s11440_s12 + $0xe80] sm:$0xf0] }
 0x4ef   : > { %6150 = vmatpush.bf16.msra.mxu3 %v8498_v4 }
 0x4f0   : > { %6125 = vmatmul.bf16.vlgmr.msrb.gmra.mxu2 %v15642_v12 }
 0x4f1   : > { %v14716_v6 = vpop.f32.mrf.mxu0  ;;  %v5828_v57 = vpop.f32.mrf.mxu3 }
 0x4f2   : > { %v14721_v16 = vadd.f32 %v5828_v57, %v14630_v50  ;;  %v5876_v5 = vpop.f32.mrf.mxu1 }
 0x4f3   : > { %v5902_v33 = vpop.f32.mrf.mxu2  ;;  %v5877_v12 = vadd.f32 %v5876_v5, %v14625_v44  ;;  %6151 = vmatpush.bf16.msra.mxu3 %v8438_v1  ;;  %v10377_v5 = vld [vmem:[%s11440_s12 + $0x430] sm:$0xf0]  ;;  %v9697_v1 = vld [vmem:[%s11440_s12 + $0xe48] sm:$0xf] }
 0x4f4   : > { %v14723_v26 = vadd.f32 %v5902_v33, %v5875_v7  ;;  %v8857_v33 = vld [vmem:[%s11440_s12 + $0x7b8] sm:$0xf]  ;;  %v8378_v22 = vor.u32 %v10377_v5, %v8377_v9 }
 0x4f5   : > { %v8858_v52 = vor.u32 %v10497_v49, %v8857_v33  ;;  %v6910_v49 = vadd.f32 %v6909_v19, %v6908_v8  ;;  %v6611_v8 = vadd.f32 %v14657_v20, %v14633_v61  ;;  %v9637_v19 = vld [vmem:[%s11440_s12 + $0xdd0] sm:$0xf] }
 0x4f7   : > { %6180 = vmatpush.bf16.msra.mxu0 %v8858_v52  ;;  %6152 = vmatpush.bf16.msra.mxu3 %v8378_v22  ;;  %v6988_v9 = vmul.f32 0.020408163, %v6910_v49  ;;  %v6612_v5 = vadd.f32 %v6611_v8, %v14701_v63  ;;  %v10117_v22 = vld [vmem:[%s11440_s12 + $0x1190] sm:$0xf]  ;;  %v6734_v49 = vmul.f32 %v14721_v16, %v14721_v16 }
 0x4f9   : > { %v14728_v50 = vpop.f32.mrf.mxu0  ;;  %v5830_v7 = vpop.f32.mrf.mxu3 }
 0x4fa   : > { %v14734_v62 = vadd.f32 %v5830_v7, %v14654_v47  ;;  %v5879_v24 = vpop.f32.mrf.mxu1  ;;  %v5778_v47 = vadd.f32 %v14659_v30, %v5750_v13 }
 0x4fb   : > { %v5904_v57 = vpop.f32.mrf.mxu2  ;;  %v5880_v4 = vadd.f32 %v5879_v24, %v14644_v0  ;;  %6201 = vmatpush.bf16.msrb.mxu0 %v14695_v27  ;;  %10860 = vmatpush.bf16.msrb.mxu3 %v14666_v23  ;;  %v14749_v0 = vmul.f32 0.020408163, %v6610_v3  ;;  %v9698_v23 = vor.u32 %v10707_v46, %v9697_v1  ;;  %v10812_v3 = vld [vmem:[%s11440_s12 + $0x11c8] sm:$0xf0] }
 0x4fc   : > { %v14736_v44 = vadd.f32 %v5904_v57, %v5877_v12  ;;  %6084 = vmatmul.bf16.gmra.mxu0 %v15650_v11  ;;  %v5806_v17 = vadd.f32 %v14693_v41, %v5778_v47  ;;  %v6689_v12 = vmul.f32 %v14657_v20, %v14657_v20  ;;  %v6674_v41 = vmul.f32 %v14633_v61, %v14633_v61 }
 0x4fd   : > { %6102 = vmatmul.bf16.gmra.mxu1 %v15633_v48  ;;  %v6704_v57 = vmul.f32 %v14701_v63, %v14701_v63  ;;  %v7003_v24 = vmul.f32 %v14749_v0, %v14749_v0  ;;  %v6613_v47 = vadd.f32 %v6612_v5, %v14709_v34  ;;  %v6749_v1 = vmul.f32 %v14734_v62, %v14734_v62 }
 0x4fe   : > { %6056 = vmatmul.bf16.gmra.mxu3 %v15630_v42  ;;  %10853 = vmatpush.bf16.msra.mxu1 %v9698_v23  ;;  %v6911_v52 = vadd.f32 %v6689_v12, %v6674_v41  ;;  %v9577_v41 = vld [vmem:[%s11440_s12 + $0xd58] sm:$0xf] }
 0x4ff   : > { %10861 = vmatpush.bf16.msrb.mxu3 %v14680_v59  ;;  %6202 = vmatpush.bf16.msrb.mxu0 %v9698_v23  ;;  %v10692_v59 = vld [vmem:[%s11440_s12 + $0xe08] sm:$0xf0]  ;;  %v10797_v23 = vld [vmem:[%s11440_s12 + $0x1150] sm:$0xf0] }
 0x500   : > { %6130 = vmatmul.bf16.gmra.mxu2 %v15652_v53  ;;  %v6912_v13 = vadd.f32 %v6911_v52, %v6704_v57 }
 0x501   : > { %v5863_v55 = vpop.f32.mrf.mxu0  ;;  %v5833_v35 = vpop.f32.mrf.mxu3 }
 0x502   : > { %v5834_v7 = vadd.f32 %v5833_v35, %v5806_v17  ;;  %v5881_v27 = vpop.f32.mrf.mxu1  ;;  %v9638_v17 = vor.u32 %v10692_v59, %v9637_v19  ;;  %v7018_v55 = vsub.f32 %v6988_v9, %v7003_v24  ;;  %v10677_v24 = vld [vmem:[%s11440_s12 + $0xd90] sm:$0xf0] }
 0x503   : > { %v5907_v30 = vpop.f32.mrf.mxu2  ;;  %v5882_v33 = vadd.f32 %v5881_v27, %v14688_v43  ;;  %v10118_v43 = vor.u32 %v10812_v3, %v10117_v22  ;;  %v10057_v27 = vld [vmem:[%s11440_s12 + $0x1118] sm:$0xf]  ;;  %v9578_v3 = vor.u32 %v10677_v24, %v9577_v41 }
 0x504   : > { %v14756_v53 = vadd.f32 %v5907_v30, %v5880_v4  ;;  %6358 = vst [vmem:[%s11916_s25 + $0x328] sm:$0x1] %v5834_v7  ;;  %v6719_v4 = vmul.f32 %v14709_v34, %v14709_v34  ;;  %v6614_v30 = vadd.f32 %v6613_v47, %v14721_v16  ;;  %10854 = vmatpush.bf16.msra.mxu1 %v9638_v17  ;;  %v7033_v19 = vmax.f32 %v7018_v55, 0.0  ;;  %v9997_v47 = vld [vmem:[%s11440_s12 + $0x10a0] sm:$0xf] }
 0x505   : > { %6231 = vmatpush.bf16.msra.mxu2 %v10118_v43  ;;  %10862 = vmatpush.bf16.msrb.mxu3 %v10118_v43  ;;  %v10058_v57 = vor.u32 %v10797_v23, %v10057_v27  ;;  %v10662_v55 = vld [vmem:[%s11440_s12 + $0xd18] sm:$0xf0] }
 0x506   : > { %v6913_v35 = vadd.f32 %v6912_v13, %v6719_v4  ;;  %6203 = vmatpush.bf16.msrb.mxu0 %v9638_v17  ;;  %v6615_v5 = vadd.f32 %v6614_v30, %v14734_v62 }
 0x508   : > { %v6914_v52 = vadd.f32 %v6913_v35, %v6734_v49  ;;  %v10782_v49 = vld [vmem:[%s11440_s12 + $0x10d8] sm:$0xf0]  ;;  %10855 = vmatpush.bf16.msra.mxu1 %v9578_v3 }
 0x509   : > { %v14779_v12 = vpop.f32.mrf.mxu0  ;;  %v5835_v46 = vpop.f32.mrf.mxu3  ;;  %6232 = vmatpush.bf16.msra.mxu2 %v10058_v57  ;;  %10863 = vmatpush.bf16.msrb.mxu3 %v10058_v57  ;;  %v9998_v17 = vor.u32 %v10782_v49, %v9997_v47  ;;  %v9937_v57 = vld [vmem:[%s11440_s12 + $0x1028] sm:$0xf]  ;;  %v9877_v49 = vld [vmem:[%s11440_s12 + $0xfb0] sm:$0xf] }
 0x50a   : > { %v5884_v9 = vpop.f32.mrf.mxu1  ;;  %v6915_v59 = vadd.f32 %v6914_v52, %v6749_v1  ;;  %6204 = vmatpush.bf16.msrb.mxu0 %v9578_v3  ;;  %v14808_v46 = vadd.f32 0.001, %v7033_v19  ;;  %v9457_v3 = vld [vmem:[%s11440_s12 + $0xc68] sm:$0xf]  ;;  %v10647_v19 = vld [vmem:[%s11440_s12 + $0xca0] sm:$0xf0] }
 0x50b   : > { %v5909_v7 = vpop.f32.mrf.mxu2  ;;  %v14792_v4 = vld [vmem:[%s11916_s25 + $0x328] sm:$0x1]  ;;  %v5885_v22 = vadd.f32 %v5884_v9, %v14706_v15  ;;  %v9517_v15 = vld [vmem:[%s11440_s12 + $0xce0] sm:$0xf] }
 0x50c   : > { %v14787_v8 = vadd.f32 %v5909_v7, %v5882_v33  ;;  %6181 = vmatmul.bf16.vlgmr.msra.gmra.mxu0 %v15666_v29  ;;  %v6616_v33 = vsel %vm6472_vm0, %v14792_v4, 0.0  ;;  %v6764_v43 = vmul.f32 %v14792_v4, %v14792_v4  ;;  %v9518_v1 = vor.u32 %v10662_v55, %v9517_v15  ;;  %v10752_v15 = vld [vmem:[%s11440_s12 + $0xfe8] sm:$0xf0] }
 0x50d   : > { %v6617_v13 = vadd.f32 %v6616_v33, %v6615_v5  ;;  %6107 = vmatmul.bf16.gmra.mxu1 %v15641_v25  ;;  %6233 = vmatpush.bf16.msra.mxu2 %v9998_v17  ;;  %10979 = vrsqrt.f32 %v14808_v46  ;;  %v10632_v55 = vld [vmem:[%s11440_s12 + $0xc28] sm:$0xf0]  ;;  %vm7159_vm11 = vweird.f32 %v14808_v46 }
 0x50e   : > { %v6916_v29 = vsel %vm6472_vm0, %v6764_v43, 0.0  ;;  %6153 = vmatmul.bf16.vlgmr.msra.gmra.mxu3 %v15635_v60  ;;  %v10767_v60 = vld [vmem:[%s11440_s12 + $0x1060] sm:$0xf0]  ;;  %6205 = vmatpush.bf16.msrb.mxu0 %v9518_v1 }
 0x50f   : > { %v6618_v35 = vrot.slane %v6617_v13, 4  ;;  %v6917_v30 = vadd.f32 %v6916_v29, %v6915_v59  ;;  %10864 = vmatpush.bf16.msrb.mxu3 %v9998_v17  ;;  %v9938_v5 = vor.u32 %v10767_v60, %v9937_v57  ;;  %10856 = vmatpush.bf16.msra.mxu1 %v9518_v1  ;;  %v9878_v29 = vor.u32 %v10752_v15, %v9877_v49  ;;  %v9397_v17 = vld [vmem:[%s11440_s12 + $0xbf0] sm:$0xf]  ;;  %v10737_v57 = vld [vmem:[%s11440_s12 + $0xf70] sm:$0xf0] }
 0x510   : > { %6135 = vmatmul.bf16.gmra.mxu2 %v15667_v38 }
 0x511   : > { %v5960_v7 = vpop.f32.mrf.mxu0  ;;  %v6619_v27 = vadd.f32 %v6618_v35, %v6617_v13  ;;  %v6918_v23 = vrot.slane %v6917_v30, 4  ;;  %v5930_v41 = vpop.f32.mrf.mxu3  ;;  %v9458_v13 = vor.u32 %v10647_v19, %v9457_v3  ;;  %6234 = vmatpush.bf16.msra.mxu2 %v9938_v5  ;;  %v9337_v19 = vld [vmem:[%s11440_s12 + $0xb78] sm:$0xf] }
 0x512   : > { %v5931_v24 = vadd.f32 %v5930_v41, %v14723_v26  ;;  %v5886_v52 = vpop.f32.mrf.mxu1  ;;  %v9817_v41 = vld [vmem:[%s11440_s12 + $0xf38] sm:$0xf] }
 0x513   : > { %v5912_v38 = vpop.f32.mrf.mxu2  ;;  %v6620_v33 = vrot.slane %v6619_v27, 2  ;;  %v6919_v43 = vadd.f32 %v6918_v23, %v6917_v30  ;;  %v5887_v59 = vadd.f32 %v5886_v52, %v14716_v6  ;;  %10865 = vmatpush.bf16.msrb.mxu3 %v9938_v5  ;;  %6206 = vmatpush.bf16.msrb.mxu0 %v9458_v13  ;;  %v9398_v30 = vor.u32 %v10632_v55, %v9397_v17  ;;  %v14828_v60 = vpop.eup %10979 }
 0x514   : > { %v14812_v9 = vadd.f32 %v5912_v38, %v5885_v22  ;;  %v14820_v22 = vadd.f32 %v14779_v12, %v5931_v24  ;;  %10857 = vmatpush.bf16.msra.mxu1 %v9458_v13  ;;  %v9818_v3 = vor.u32 %v10737_v57, %v9817_v41  ;;  %vm7160_vm10 = vweird.f32 %v14828_v60 }
 0x515   : > { %v6621_v26 = vadd.f32 %v6620_v33, %v6619_v27  ;;  %v6920_v47 = vrot.slane %v6919_v43, 2  ;;  %6235 = vmatpush.bf16.msra.mxu2 %v9878_v29  ;;  %v10617_v33 = vld [vmem:[%s11440_s12 + $0xbb0] sm:$0xf0]  ;;  %vm14865_vm12 = vmor %vm7159_vm11, %vm7160_vm10 }
 0x517   : > { %v6622_v6 = vrot.slane %v6621_v26, 1  ;;  %v6921_v35 = vadd.f32 %v6920_v47, %v6919_v43  ;;  %10866 = vmatpush.bf16.msrb.mxu3 %v9878_v29  ;;  %6207 = vmatpush.bf16.msrb.mxu0 %v9398_v30 }
 0x518   : > { %10858 = vmatpush.bf16.msra.mxu1 %v9398_v30 }
 0x519   : > { %v5963_v1 = vpop.f32.mrf.mxu0  ;;  %v6623_v12 = vadd.f32 %v6622_v6, %v6621_v26  ;;  %v6922_v27 = vrot.slane %v6921_v35, 1  ;;  %v5932_v38 = vpop.f32.mrf.mxu3  ;;  %v9338_v26 = vor.u32 %v10617_v33, %v9337_v19  ;;  %6236 = vmatpush.bf16.msra.mxu2 %v9818_v3 }
 0x51a   : > { %v5933_v52 = vadd.f32 %v5932_v38, %v14736_v44  ;;  %v14833_v5 = vpop.f32.mrf.mxu1 }
 0x51b   : > { %v5914_v23 = vpop.f32.mrf.mxu2  ;;  %v6923_v43 = vadd.f32 %v6922_v27, %v6921_v35  ;;  %v14837_v13 = vmul.f32 0.020408163, %v6623_v12  ;;  %10867 = vmatpush.bf16.msrb.mxu3 %v9818_v3  ;;  %6208 = vmatpush.bf16.msrb.mxu0 %v9338_v26 }
 0x51c   : > { %v14830_v24 = vadd.f32 %v5914_v23, %v5887_v59  ;;  %6186 = vmatmul.bf16.gmra.mxu0 %v15668_v18  ;;  %v14840_v47 = vadd.f32 %v5960_v7, %v5933_v52  ;;  %v7154_v59 = vmul.f32 %v14828_v60, %v14808_v46  ;;  %10859 = vmatpush.bf16.msra.mxu1 %v9338_v26  ;;  %v14873_v26 = vld [vmem:[%s12023_s0 + $0x8] sm:$0xff] }
 0x51d   : > { %v6989_v44 = vmul.f32 0.020408163, %v6923_v43  ;;  %v7004_v49 = vmul.f32 %v14837_v13, %v14837_v13  ;;  %6112 = vmatmul.bf16.gmra.mxu1 %v15651_v10 }
 0x51e   : > { %6158 = vmatmul.bf16.gmra.mxu3 %v15646_v36  ;;  %v7155_v15 = vmul.f32 %v14828_v60, %v7154_v59 }
 0x51f   : > { %v7019_v18 = vsub.f32 %v6989_v44, %v7004_v49 }
 0x520   : > { %6140 = vmatmul.bf16.gmra.mxu2 %v15670_v21  ;;  %v7156_v27 = vmul.f32 0.5, %v7155_v15 }
 0x521   : > { %v5965_v7 = vpop.f32.mrf.mxu0  ;;  %v7034_v29 = vmax.f32 %v7019_v18, 0.0  ;;  %v5935_v55 = vpop.f32.mrf.mxu3  ;;  %v7218_v18 = vperm.slane %v14873_v26, 3 }
 0x522   : > { %v5936_v6 = vadd.f32 %v5935_v55, %v14756_v53  ;;  %v5891_v35 = vpop.f32.mrf.mxu1  ;;  %v7157_v23 = vsub.f32 1.5, %v7156_v27 }
 0x523   : > { %v14850_v17 = vpop.f32.mrf.mxu2  ;;  %v7049_v30 = vadd.f32 0.001, %v7034_v29 }
 0x524   : > { %v14853_v12 = vadd.f32 %v5963_v1, %v5936_v6  ;;  %v7158_v53 = vmul.f32 %v14828_v60, %v7157_v23 }
 0x525   : > { %10981 = vrsqrt.f32 %v7049_v30  ;;  %vm7169_vm3 = vweird.f32 %v7049_v30 }
 0x526   : > { %15685 = vst [vmem:[#allocation78_spill] sm:$0xff] %v14853_v12  ;;  %v7162_v43 = vsel %vm14865_vm12, %v14828_v60, %v7158_v53 }
 0x529   : > { %v5968_v21 = vpop.f32.mrf.mxu0  ;;  %v5937_v38 = vpop.f32.mrf.mxu3 }
 0x52a   : > { %v5938_v41 = vadd.f32 %v5937_v38, %v14787_v8  ;;  %v5986_v57 = vpop.f32.mrf.mxu1 }
 0x52b   : > { %v5919_v36 = vpop.f32.mrf.mxu2  ;;  %v10982_v52 = vpop.eup %10981 }
 0x52c   : > { %6191 = vmatmul.bf16.gmra.mxu0 %v15671_v32  ;;  %v7164_v3 = vmul.f32 %v10982_v52, %v7049_v30  ;;  %v14857_v19 = vadd.f32 %v5965_v7, %v5938_v41  ;;  %vm7170_vm15 = vweird.f32 %v10982_v52 }
 0x52d   : > { %6214 = vmatmul.bf16.vlgmr.msra.gmra.mxu1 %v15684_v37  ;;  %v7217_v37 = vperm.slane %v14873_v26, 2  ;;  %vm7171_vm4 = vmor %vm7169_vm3, %vm7170_vm15 }
 0x52e   : > { %15686 = vst [vmem:[#allocation80_spill] sm:$0xff] %v14857_v19  ;;  %v7165_v1 = vmul.f32 %v10982_v52, %v7164_v3  ;;  %6163 = vmatmul.bf16.gmra.mxu3 %v15625_v39 }
 0x52f   : > { %v14880_v29 = vmul.f32 %v7217_v37, %v7162_v43 }
 0x530   : > { %6237 = vmatmul.bf16.vlgmr.msra.gmra.mxu2 %v15627_v51  ;;  %v7166_v32 = vmul.f32 0.5, %v7165_v1 }
 0x531   : > { %v5970_v33 = vpop.f32.mrf.mxu0  ;;  %v5940_v59 = vpop.f32.mrf.mxu3 }
 0x532   : > { %v7167_v44 = vsub.f32 1.5, %v7166_v32  ;;  %v5941_v51 = vadd.f32 %v5940_v59, %v14812_v9  ;;  %v5988_v49 = vpop.f32.mrf.mxu1  ;;  %v7264_v9 = vmul.f32 %v14880_v29, %v14749_v0 }
 0x533   : > { %v6014_v39 = vpop.f32.mrf.mxu2 }
 0x534   : > { %v6015_v46 = vadd.f32 %v6014_v39, %v5986_v57  ;;  %v7168_v7 = vmul.f32 %v10982_v52, %v7167_v44  ;;  %v14878_v15 = vadd.f32 %v5968_v21, %v5941_v51  ;;  %v7292_v41 = vrot.slane %v7264_v9, 6 }
 0x536   : > { %15689 = vst [vmem:[#allocation83_spill] sm:$0xff] %v14878_v15  ;;  %v7172_v60 = vsel %vm7171_vm4, %v10982_v52, %v7168_v7  ;;  %v5890_v52 = vadd.f32 %v14833_v5, %v14728_v50 }
 0x537   : > { %v14882_v55 = vmul.f32 %v7218_v18, %v7172_v60 }
 0x539   : > { %v5973_v6 = vpop.f32.mrf.mxu0  ;;  %v5942_v35 = vpop.f32.mrf.mxu3  ;;  %v7265_v23 = vmul.f32 %v14882_v55, %v14837_v13 }
 0x53a   : > { %v5943_v36 = vadd.f32 %v5942_v35, %v14830_v24  ;;  %v5991_v21 = vpop.f32.mrf.mxu1  ;;  %v5918_v24 = vadd.f32 %v14850_v17, %v5890_v52 }
 0x53b   : > { %v6016_v27 = vpop.f32.mrf.mxu2  ;;  %v7293_v57 = vrot.slane %v7265_v23, 5 }
 0x53c   : > { %v6017_v30 = vadd.f32 %v6016_v27, %v5988_v49  ;;  %6196 = vmatmul.bf16.gmra.mxu0 %v15630_v42  ;;  %v14890_v38 = vadd.f32 %v5970_v33, %v5943_v36 }
 0x53d   : > { %6219 = vmatmul.bf16.gmra.mxu1 %v15640_v28  ;;  %v7311_v0 = vsel %vm7298_vm13, %v7292_v41, %v7293_v57 }
 0x53e   : > { %15690 = vst [vmem:[#allocation84_spill] sm:$0xff] %v14890_v38  ;;  %6168 = vmatmul.bf16.gmra.mxu3 %v15683_v56  ;;  %v14901_v42 = vsel %vm7300_vm14, %v14495_v2, %v7311_v0 }
 0x53f   : > { %15691 = vst [vmem:[#allocation85_spill] sm:$0xff] %v14901_v42 }
 0x540   : > { %6242 = vmatmul.bf16.gmra.mxu2 %v15633_v48 }
 0x541   : > { %v5975_v13 = vpop.f32.mrf.mxu0  ;;  %v5945_v28 = vpop.f32.mrf.mxu3 }
 0x542   : > { %v5946_v53 = vadd.f32 %v5945_v28, %v5918_v24  ;;  %v5993_v8 = vpop.f32.mrf.mxu1 }
 0x543   : > { %v6019_v3 = vpop.f32.mrf.mxu2 }
 0x544   : > { %v6020_v1 = vadd.f32 %v6019_v3, %v5991_v21  ;;  %v5974_v32 = vadd.f32 %v5973_v6, %v5946_v53  ;;  %v6624_v3 = vadd.f32 %v14840_v47, %v14820_v22  ;;  %v6690_v53 = vmul.f32 %v14840_v47, %v14840_v47 }
 0x546   : > { %6359 = vst [vmem:[%s11916_s25 + $0x330] sm:$0x1] %v5974_v32  ;;  %v6675_v32 = vmul.f32 %v14820_v22, %v14820_v22 }
 0x549   : > { %v6070_v50 = vpop.f32.mrf.mxu0  ;;  %v5947_v56 = vpop.f32.mrf.mxu3 }
 0x54a   : > { %v5996_v33 = vpop.f32.mrf.mxu1  ;;  %v6705_v56 = vmul.f32 %v14853_v12, %v14853_v12 }
 0x54b   : > { %v6021_v5 = vpop.f32.mrf.mxu2 }
 0x54c   : > { %v6022_v48 = vadd.f32 %v6021_v5, %v5993_v8  ;;  %6209 = vmatmul.bf16.vlgmr.msrb.gmra.mxu0 %v15680_v14  ;;  %v6924_v5 = vadd.f32 %v6690_v53, %v6675_v32 }
 0x54d   : > { %6224 = vmatmul.bf16.gmra.mxu1 %v15650_v11 }
 0x54e   : > { %6252 = vmatmul.bf16.vlgmr.msrb.gmra.mxu3 %v15651_v10 }
 0x550   : > { %6247 = vmatmul.bf16.gmra.mxu2 %v15641_v25 }
 0x551   : > { %v6072_v2 = vpop.f32.mrf.mxu0  ;;  %v6042_v43 = vpop.f32.mrf.mxu3 }
 0x552   : > { %v6043_v59 = vadd.f32 %v6042_v43, %v6015_v46  ;;  %v5998_v39 = vpop.f32.mrf.mxu1  ;;  %v6925_v43 = vadd.f32 %v6924_v5, %v6705_v56 }
 0x553   : > { %v6024_v17 = vpop.f32.mrf.mxu2 }
 0x554   : > { %v6025_v37 = vadd.f32 %v6024_v17, %v5996_v33  ;;  %v6071_v44 = vadd.f32 %v6070_v50, %v6043_v59  ;;  %v6625_v50 = vadd.f32 %v6624_v3, %v14853_v12  ;;  %v6720_v33 = vmul.f32 %v14857_v19, %v14857_v19 }
 0x555   : > { %v6735_v59 = vmul.f32 %v14878_v15, %v14878_v15 }
 0x559   : > { %v6075_v51 = vpop.f32.mrf.mxu0  ;;  %v6044_v18 = vpop.f32.mrf.mxu3 }
 0x55a   : > { %v6045_v60 = vadd.f32 %v6044_v18, %v6017_v30  ;;  %v14908_v6 = vpop.f32.mrf.mxu1 }
 0x55b   : > { %v6026_v49 = vpop.f32.mrf.mxu2 }
 0x55c   : > { %v6027_v7 = vadd.f32 %v6026_v49, %v5998_v39  ;;  %v6073_v14 = vadd.f32 %v6072_v2, %v6045_v60  ;;  %v14929_v2 = vld [vmem:[%s11916_s25 + $0x330] sm:$0x1] }
 0x55d   : > { %15694 = vst [vmem:[#allocation41_spill] sm:$0xff] %v14929_v2  ;;  %v6765_v49 = vmul.f32 %v14929_v2, %v14929_v2 }
 0x561   : > { %v6077_v11 = vpop.f32.mrf.mxu0  ;;  %v6047_v25 = vpop.f32.mrf.mxu3 }
 0x562   : > { %v6048_v10 = vadd.f32 %v6047_v25, %v6020_v1  ;;  %v6003_v27 = vpop.f32.mrf.mxu1  ;;  %v6750_v25 = vmul.f32 %v14890_v38, %v14890_v38 }
 0x563   : > { %v14910_v35 = vpop.f32.mrf.mxu2 }
 0x564   : > { %v6076_v9 = vadd.f32 %v6075_v51, %v6048_v10  ;;  %v6629_v51 = vsel %vm6472_vm0, %v14929_v2, 0.0 }
 0x569   : > { %v6080_v23 = vpop.f32.mrf.mxu0  ;;  %v6049_v46 = vpop.f32.mrf.mxu3 }
 0x56a   : > { %v6050_v21 = vadd.f32 %v6049_v46, %v6022_v48  ;;  %v6098_v41 = vpop.f32.mrf.mxu1  ;;  %v6626_v48 = vadd.f32 %v6625_v50, %v14857_v19  ;;  %v6929_v46 = vsel %vm6472_vm0, %v6765_v49, 0.0 }
 0x56b   : > { %v6031_v36 = vpop.f32.mrf.mxu2  ;;  %v14912_v57 = vadd.f32 %v6098_v41, %v6071_v44 }
 0x56c   : > { %v6078_v52 = vadd.f32 %v6077_v11, %v6050_v21 }
 0x56d   : > { %15692 = vst [vmem:[#allocation87_spill] sm:$0xff] %v14912_v57 }
 0x571   : > { %v6082_v30 = vpop.f32.mrf.mxu0  ;;  %v6052_v0 = vpop.f32.mrf.mxu3 }
 0x572   : > { %v6053_v13 = vadd.f32 %v6052_v0, %v6025_v37  ;;  %v6100_v28 = vpop.f32.mrf.mxu1  ;;  %v6627_v37 = vadd.f32 %v6626_v48, %v14878_v15 }
 0x573   : > { %v6126_v24 = vpop.f32.mrf.mxu2  ;;  %v14918_v1 = vadd.f32 %v6100_v28, %v6073_v14  ;;  %v6926_v14 = vadd.f32 %v6925_v43, %v6720_v33 }
 0x574   : > { %v6081_v8 = vadd.f32 %v6080_v23, %v6053_v13  ;;  %v6628_v11 = vadd.f32 %v6627_v37, %v14890_v38 }
 0x575   : > { %15693 = vst [vmem:[#allocation69_spill] sm:$0xff] %v14918_v1  ;;  %v6927_v23 = vadd.f32 %v6926_v14, %v6735_v59 }
 0x576   : > { %v6630_v36 = vadd.f32 %v6629_v51, %v6628_v11  ;;  %v6030_v11 = vadd.f32 %v14910_v35, %v14908_v6  ;;  %v6691_v6 = vmul.f32 %v14918_v1, %v14918_v1 }
 0x577   : > { %v6928_v21 = vadd.f32 %v6927_v23, %v6750_v25 }
 0x578   : > { %v6631_v0 = vrot.slane %v6630_v36, 4 }
 0x579   : > { %v6085_v17 = vpop.f32.mrf.mxu0  ;;  %v6054_v39 = vpop.f32.mrf.mxu3  ;;  %v6930_v13 = vadd.f32 %v6929_v46, %v6928_v21 }
 0x57a   : > { %v6055_v18 = vadd.f32 %v6054_v39, %v6027_v7  ;;  %v6103_v60 = vpop.f32.mrf.mxu1  ;;  %v6632_v32 = vadd.f32 %v6631_v0, %v6630_v36 }
 0x57b   : > { %v14934_v44 = vpop.f32.mrf.mxu2  ;;  %v14943_v10 = vadd.f32 %v6103_v60, %v6076_v9  ;;  %v6931_v50 = vrot.slane %v6930_v13, 4 }
 0x57c   : > { %v6083_v27 = vadd.f32 %v6082_v30, %v6055_v18  ;;  %v6633_v9 = vrot.slane %v6632_v32, 2 }
 0x57d   : > { %15695 = vst [vmem:[#allocation52_spill] sm:$0xff] %v14943_v10  ;;  %v6932_v5 = vadd.f32 %v6931_v50, %v6930_v13  ;;  %v6706_v50 = vmul.f32 %v14943_v10, %v14943_v10 }
 0x57e   : > { %v6634_v37 = vadd.f32 %v6633_v9, %v6632_v32  ;;  %v6676_v32 = vmul.f32 %v14912_v57, %v14912_v57 }
 0x57f   : > { %v6933_v59 = vrot.slane %v6932_v5, 2 }
 0x580   : > { %v6635_v51 = vrot.slane %v6634_v37, 1 }
 0x581   : > { %v6087_v41 = vpop.f32.mrf.mxu0  ;;  %v6057_v28 = vpop.f32.mrf.mxu3  ;;  %v6934_v49 = vadd.f32 %v6933_v59, %v6932_v5 }
 0x582   : > { %v6105_v3 = vpop.f32.mrf.mxu1  ;;  %v6058_v46 = vadd.f32 %v6057_v28, %v6030_v11  ;;  %v6637_v28 = vadd.f32 %v14918_v1, %v14912_v57 }
 0x583   : > { %v14946_v7 = vpop.f32.mrf.mxu2  ;;  %v14948_v53 = vadd.f32 %v6105_v3, %v6078_v52  ;;  %v6935_v36 = vrot.slane %v6934_v49, 1 }
 0x584   : > { %v6086_v3 = vadd.f32 %v6085_v17, %v6058_v46  ;;  %v6937_v17 = vadd.f32 %v6691_v6, %v6676_v32  ;;  %v6638_v5 = vadd.f32 %v6637_v28, %v14943_v10 }
 0x585   : > { %15696 = vst [vmem:[#allocation42_spill] sm:$0xff] %v14948_v53  ;;  %v6936_v41 = vadd.f32 %v6935_v36, %v6934_v49 }
 0x589   : > { %v6182_v56 = vpop.f32.mrf.mxu0  ;;  %v6059_v30 = vpop.f32.mrf.mxu3 }
 0x58a   : > { %v6108_v33 = vpop.f32.mrf.mxu1  ;;  %v6721_v30 = vmul.f32 %v14948_v53, %v14948_v53 }
 0x58b   : > { %v14950_v48 = vpop.f32.mrf.mxu2  ;;  %v14952_v43 = vadd.f32 %v6108_v33, %v6081_v8  ;;  %v6636_v8 = vadd.f32 %v6635_v51, %v6634_v37  ;;  %v6938_v33 = vadd.f32 %v6937_v17, %v6706_v50  ;;  %v6639_v37 = vadd.f32 %v6638_v5, %v14948_v53 }
 0x58d   : > { %15697 = vst [vmem:[#allocation53_spill] sm:$0xff] %v14952_v43  ;;  %v14966_v0 = vmul.f32 0.020408163, %v6636_v8  ;;  %v6736_v59 = vmul.f32 %v14952_v43, %v14952_v43  ;;  %v6640_v11 = vadd.f32 %v6639_v37, %v14952_v43 }
 0x58f   : > { %v7005_v9 = vmul.f32 %v14966_v0, %v14966_v0 }
 0x591   : > { %v14954_v39 = vpop.f32.mrf.mxu0  ;;  %v6154_v52 = vpop.f32.mrf.mxu3 }
 0x592   : > { %v6155_v60 = vadd.f32 %v6154_v52, %v6126_v24  ;;  %v6110_v14 = vpop.f32.mrf.mxu1 }
 0x593   : > { %v14956_v18 = vpop.f32.mrf.mxu2  ;;  %v14960_v25 = vadd.f32 %v6110_v14, %v6083_v27  ;;  %v6939_v14 = vadd.f32 %v6938_v33, %v6721_v30 }
 0x594   : > { %v14962_v23 = vadd.f32 %v6182_v56, %v6155_v60  ;;  %v6990_v56 = vmul.f32 0.020408163, %v6936_v41 }
 0x595   : > { %15698 = vst [vmem:[#allocation54_spill] sm:$0xff] %v14960_v25  ;;  %v6751_v8 = vmul.f32 %v14960_v25, %v14960_v25  ;;  %v6940_v46 = vadd.f32 %v6939_v14, %v6736_v59  ;;  %v6641_v41 = vadd.f32 %v6640_v11, %v14960_v25 }
 0x596   : > { %v7020_v49 = vsub.f32 %v6990_v56, %v7005_v9 }
 0x597   : > { %v6941_v32 = vadd.f32 %v6940_v46, %v6751_v8 }
 0x598   : > { %v7035_v6 = vmax.f32 %v7020_v49, 0.0 }
 0x599   : > { %v14964_v21 = vpop.f32.mrf.mxu0  ;;  %v14970_v24 = vpop.f32.mrf.mxu3 }
 0x59a   : > { %v6113_v35 = vpop.f32.mrf.mxu1  ;;  %v7050_v5 = vadd.f32 0.001, %v7035_v6 }
 0x59b   : > { %v14968_v13 = vpop.f32.mrf.mxu2  ;;  %v6114_v27 = vadd.f32 %v6113_v35, %v6086_v3 }
 0x59c   : > { %10983 = vrsqrt.f32 %v7050_v5  ;;  %vm7179_vm14 = vweird.f32 %v7050_v5 }
 0x59d   : > { %6360 = vst [vmem:[%s11916_s25 + $0x338] sm:$0x1] %v6114_v27 }
 0x5a1   : > { %v14989_v51 = vpop.f32.mrf.mxu0  ;;  %v14993_v60 = vpop.f32.mrf.mxu3 }
 0x5a2   : > { %v6115_v36 = vpop.f32.mrf.mxu1 }
 0x5a3   : > { %v14991_v52 = vpop.f32.mrf.mxu2 }
 0x5a4   : > { %v15000_v3 = vld [vmem:[%s11916_s25 + $0x338] sm:$0x1] }
 0x5a5   : > { %15699 = vst [vmem:[#allocation56_spill] sm:$0xff] %v15000_v3  ;;  %v6642_v35 = vsel %vm6472_vm0, %v15000_v3, 0.0  ;;  %v6766_v27 = vmul.f32 %v15000_v3, %v15000_v3 }
 0x5a6   : > { %v6643_v28 = vadd.f32 %v6642_v35, %v6641_v41 }
 0x5a7   : > { %v6942_v50 = vsel %vm6472_vm0, %v6766_v27, 0.0 }
 0x5a8   : > { %v6644_v56 = vrot.slane %v6643_v28, 4  ;;  %v6943_v9 = vadd.f32 %v6942_v50, %v6941_v32 }
 0x5a9   : > { %v15007_v17 = vpop.f32.mrf.mxu0  ;;  %v6161_v33 = vpop.f32.mrf.mxu3 }
 0x5aa   : > { %v6645_v37 = vadd.f32 %v6644_v56, %v6643_v28  ;;  %v6944_v59 = vrot.slane %v6943_v9, 4  ;;  %v15009_v49 = vpop.f32.mrf.mxu1  ;;  %v10984_v28 = vpop.eup %10983 }
 0x5ab   : > { %v6143_v30 = vpop.f32.mrf.mxu2  ;;  %v7174_v25 = vmul.f32 %v10984_v28, %v7050_v5  ;;  %vm7180_vm13 = vweird.f32 %v10984_v28  ;;  %v7220_v5 = vperm.slane %v14873_v26, 5 }
 0x5ac   : > { %v6646_v14 = vrot.slane %v6645_v37, 2  ;;  %v6945_v11 = vadd.f32 %v6944_v59, %v6943_v9  ;;  %vm7181_vm5 = vmor %vm7179_vm14, %vm7180_vm13 }
 0x5ae   : > { %v6647_v36 = vadd.f32 %v6646_v14, %v6645_v37  ;;  %v6946_v3 = vrot.slane %v6945_v11, 2 }
 0x5b0   : > { %v6648_v8 = vrot.slane %v6647_v36, 1  ;;  %v6947_v46 = vadd.f32 %v6946_v3, %v6945_v11  ;;  %v7175_v3 = vmul.f32 %v10984_v28, %v7174_v25  ;;  %v7219_v25 = vperm.slane %v14873_v26, 4 }
 0x5b1   : > { %v15011_v41 = vpop.f32.mrf.mxu0  ;;  %v6164_v35 = vpop.f32.mrf.mxu3 }
 0x5b2   : > { %v6649_v32 = vadd.f32 %v6648_v8, %v6647_v36  ;;  %v6948_v6 = vrot.slane %v6947_v46, 1  ;;  %v15015_v50 = vpop.f32.mrf.mxu1  ;;  %v7176_v1 = vmul.f32 0.5, %v7175_v3 }
 0x5b3   : > { %v15013_v27 = vpop.f32.mrf.mxu2 }
 0x5b4   : > { %v6949_v56 = vadd.f32 %v6948_v6, %v6947_v46  ;;  %v6976_v30 = vmul.f32 0.020408163, %v6649_v32  ;;  %v7177_v2 = vsub.f32 1.5, %v7176_v1  ;;  %v6157_v1 = vadd.f32 %v14970_v24, %v14934_v44 }
 0x5b5   : > { %v6165_v24 = vadd.f32 %v6164_v35, %v14956_v18 }
 0x5b6   : > { %v6991_v43 = vmul.f32 0.020408163, %v6949_v56  ;;  %v7006_v9 = vmul.f32 %v6976_v30, %v6976_v30  ;;  %v7178_v6 = vmul.f32 %v10984_v28, %v7177_v2  ;;  %v6160_v2 = vadd.f32 %v14993_v60, %v14946_v7 }
 0x5b8   : > { %v7021_v59 = vsub.f32 %v6991_v43, %v7006_v9  ;;  %v7182_v3 = vsel %vm7181_vm5, %v10984_v28, %v7178_v6  ;;  %v6162_v28 = vadd.f32 %v6161_v33, %v14950_v48  ;;  %v6188_v44 = vadd.f32 %v14964_v21, %v6160_v2 }
 0x5b9   : > { %v6197_v37 = vpop.f32.mrf.mxu0  ;;  %v6166_v14 = vpop.f32.mrf.mxu3 }
 0x5ba   : > { %v7036_v11 = vmax.f32 %v7021_v59, 0.0  ;;  %v6220_v42 = vpop.f32.mrf.mxu1  ;;  %v6190_v21 = vadd.f32 %v14989_v51, %v6162_v28 }
 0x5bb   : > { %v6240_v53 = vpop.f32.mrf.mxu2 }
 0x5bc   : > { %v7051_v10 = vadd.f32 0.001, %v7036_v11 }
 0x5be   : > { %10985 = vrsqrt.f32 %v7051_v10  ;;  %vm7189_vm8 = vweird.f32 %v7051_v10 }
 0x5c1   : > { %v6199_v36 = vpop.f32.mrf.mxu0  ;;  %v6169_v8 = vpop.f32.mrf.mxu3 }
 0x5c2   : > { %v6222_v38 = vpop.f32.mrf.mxu1  ;;  %v6170_v36 = vadd.f32 %v6169_v8, %v14991_v52 }
 0x5c3   : > { %v6243_v57 = vpop.f32.mrf.mxu2 }
 0x5c4   : > { %v10986_v46 = vpop.eup %10985  ;;  %v6198_v8 = vadd.f32 %v6197_v37, %v6170_v36  ;;  %v6193_v37 = vadd.f32 %v15007_v17, %v6165_v24 }
 0x5c5   : > { %v7184_v32 = vmul.f32 %v10986_v46, %v7051_v10  ;;  %vm7190_vm7 = vweird.f32 %v10986_v46  ;;  %v6167_v10 = vadd.f32 %v6166_v14, %v14968_v13  ;;  %v6218_v13 = vadd.f32 %v15015_v50, %v6190_v21 }
 0x5c6   : > { %vm7191_vm9 = vmor %vm7189_vm8, %vm7190_vm7 }
 0x5c7   : > { %v7185_v56 = vmul.f32 %v10986_v46, %v7184_v32  ;;  %v15024_v32 = vmul.f32 %v7219_v25, %v7182_v3 }
 0x5c9   : > { %v6210_v43 = vpop.f32.mrf.mxu0  ;;  %v7186_v9 = vmul.f32 0.5, %v7185_v56  ;;  %v6171_v59 = vpop.f32.mrf.mxu3  ;;  %v6185_v56 = vadd.f32 %v14954_v39, %v6157_v1 }
 0x5ca   : > { %v6225_v15 = vpop.f32.mrf.mxu1  ;;  %v6211_v52 = vadd.f32 %v6210_v43, %v14962_v23 }
 0x5cb   : > { %v6245_v11 = vpop.f32.mrf.mxu2  ;;  %v7187_v19 = vsub.f32 1.5, %v7186_v9  ;;  %v6226_v60 = vadd.f32 %v6225_v15, %v6198_v8 }
 0x5cc   : > { %v15039_v18 = vadd.f32 %v15013_v27, %v6211_v52  ;;  %v15052_v43 = vadd.f32 %v6245_v11, %v6218_v13 }
 0x5cd   : > { %v7188_v12 = vmul.f32 %v10986_v46, %v7187_v19  ;;  %v6216_v19 = vadd.f32 %v15009_v49, %v6188_v44 }
 0x5ce   : > { %v6677_v17 = vmul.f32 %v15039_v18, %v15039_v18 }
 0x5cf   : > { %v7192_v6 = vsel %vm7191_vm9, %v10986_v46, %v7188_v12  ;;  %v7266_v12 = vmul.f32 %v15024_v32, %v14966_v0  ;;  %v15046_v14 = vadd.f32 %v6243_v57, %v6216_v19  ;;  %v6221_v46 = vadd.f32 %v6220_v42, %v6193_v37 }
 0x5d0   : > { %v15031_v7 = vmul.f32 %v7220_v5, %v7192_v6  ;;  %v6195_v0 = vadd.f32 %v15011_v41, %v6167_v10 }
 0x5d1   : > { %v6212_v25 = vpop.f32.mrf.mxu0  ;;  %v6253_v33 = vpop.f32.mrf.mxu3  ;;  %v7294_v27 = vrot.slane %v7266_v12, 4  ;;  %v6707_v41 = vmul.f32 %v15046_v14, %v15046_v14 }
 0x5d2   : > { %v6213_v23 = vadd.f32 %v6212_v25, %v6185_v56  ;;  %v6254_v39 = vadd.f32 %v6253_v33, %v6226_v60  ;;  %v7267_v15 = vmul.f32 %v15031_v7, %v6976_v30  ;;  %v6227_v35 = vpop.f32.mrf.mxu1  ;;  %v6223_v57 = vadd.f32 %v6222_v38, %v6195_v0 }
 0x5d3   : > { %v6248_v48 = vpop.f32.mrf.mxu2  ;;  %v6722_v38 = vmul.f32 %v15052_v43, %v15052_v43 }
 0x5d4   : > { %v15043_v49 = vadd.f32 %v6240_v53, %v6213_v23  ;;  %6361 = vst [vmem:[%s11916_s25 + $0x340] sm:$0x1] %v6254_v39  ;;  %v7295_v50 = vrot.slane %v7267_v15, 3  ;;  %v15059_v42 = vadd.f32 %v6248_v48, %v6221_v46 }
 0x5d6   : > { %v6650_v51 = vadd.f32 %v15043_v49, %v15039_v18  ;;  %v6692_v53 = vmul.f32 %v15043_v49, %v15043_v49  ;;  %v15064_v59 = vsel %vm7302_vm6, %v7294_v27, %v7295_v50  ;;  %v6737_v52 = vmul.f32 %v15059_v42, %v15059_v42 }
 0x5d8   : > { %v6651_v30 = vadd.f32 %v6650_v51, %v15046_v14  ;;  %v6950_v9 = vadd.f32 %v6692_v53, %v6677_v17 }
 0x5d9   : > { %v6255_v36 = vpop.f32.mrf.mxu3 }
 0x5da   : > { %v6652_v3 = vadd.f32 %v6651_v30, %v15052_v43  ;;  %v6951_v2 = vadd.f32 %v6950_v9, %v6707_v41  ;;  %v7328_v9 = vperm.slane %v14484_v40, 0  ;;  %v7329_v36 = vperm.slane %v14482_v58, 0  ;;  %v15705_v40 = vld [vmem:[#allocation66_spill] sm:$0xff] }
 0x5db   : > { %v6250_v11 = vpop.f32.mrf.mxu2  ;;  %v15072_v5 = vld [vmem:[%s11916_s25 + $0x340] sm:$0x1]  ;;  %v7330_v58 = vperm.slane %v14880_v29, 0 }
 0x5dc   : > { %v15067_v1 = vadd.f32 %v6250_v11, %v6223_v57  ;;  %v6653_v28 = vadd.f32 %v6652_v3, %v15059_v42  ;;  %v6952_v8 = vadd.f32 %v6951_v2, %v6722_v38  ;;  %v6767_v44 = vmul.f32 %v15072_v5, %v15072_v5  ;;  %v15700_v38 = vld [vmem:[#allocation43_spill] sm:$0xff]  ;;  %v15706_v29 = vld [vmem:[#allocation70_spill] sm:$0xff] }
 0x5dd   : > { %v6655_v24 = vsel %vm6472_vm0, %v15072_v5, 0.0  ;;  %v15088_v2 = vmul.f32 %v7328_v9, %v15700_v38  ;;  %v7332_v38 = vperm.slane %v15024_v32, 0 }
 0x5de   : > { %v6654_v6 = vadd.f32 %v6653_v28, %v15067_v1  ;;  %v6752_v56 = vmul.f32 %v15067_v1, %v15067_v1  ;;  %v6953_v60 = vadd.f32 %v6952_v8, %v6737_v52  ;;  %v6955_v48 = vsel %vm6472_vm0, %v6767_v44, 0.0  ;;  %v15701_v52 = vld [vmem:[#allocation63_spill] sm:$0xff] }
 0x5df   : > { %v15091_v8 = vmul.f32 %v7328_v9, %v15701_v52 }
 0x5e0   : > { %v6656_v25 = vadd.f32 %v6655_v24, %v6654_v6  ;;  %v6954_v19 = vadd.f32 %v6953_v60, %v6752_v56  ;;  %v15702_v6 = vld [vmem:[#allocation81_spill] sm:$0xff]  ;;  %v15703_v24 = vld [vmem:[#allocation64_spill] sm:$0xff]  ;;  %v15704_v60 = vld [vmem:[#allocation62_spill] sm:$0xff] }
 0x5e1   : > { %v15094_v44 = vmul.f32 %v7328_v9, %v15702_v6  ;;  %v15097_v56 = vmul.f32 %v7328_v9, %v15703_v24  ;;  %v11001_v6 = vld [vmem:[%s11916_s25 + $0x320] sm:$0x1] }
 0x5e2   : > { %v6657_v10 = vrot.slane %v6656_v25, 4  ;;  %v6956_v33 = vadd.f32 %v6955_v48, %v6954_v19  ;;  %v15103_v19 = vmul.f32 %v7328_v9, %v15705_v40  ;;  %v10999_v48 = vld [vmem:[%s11916_s25 + $0x310] sm:$0x1]  ;;  %v15149_v24 = vmul.f32 %v11001_v6, %v7330_v58  ;;  %v15728_v6 = vld [vmem:[#allocation42_spill] sm:$0xff] }
 0x5e4   : > { %v6658_v23 = vadd.f32 %v6657_v10, %v6656_v25  ;;  %v6957_v12 = vrot.slane %v6956_v33, 4  ;;  %v15100_v25 = vmul.f32 %v7328_v9, %v15704_v60  ;;  %15716 = vst [vmem:[#allocation44_spill] sm:$0xff] %v15149_v24 }
 0x5e6   : > { %v6659_v21 = vrot.slane %v6658_v23, 2  ;;  %v6958_v39 = vadd.f32 %v6957_v12, %v6956_v33  ;;  %v15107_v33 = vmul.f32 %v10999_v48, %v7328_v9  ;;  %v15113_v12 = vmul.f32 %v7329_v36, %v14277_v45  ;;  %v11000_v45 = vld [vmem:[%s11916_s25 + $0x318] sm:$0x1] }
 0x5e8   : > { %v6660_v15 = vadd.f32 %v6659_v21, %v6658_v23  ;;  %v6959_v35 = vrot.slane %v6958_v39, 2  ;;  %v15110_v23 = vmul.f32 %v7329_v36, %v14134_v54  ;;  %v7221_v21 = vperm.slane %v14873_v26, 6  ;;  %v15708_v54 = vld [vmem:[#allocation71_spill] sm:$0xff] }
 0x5ea   : > { %v6661_v37 = vrot.slane %v6660_v15, 1  ;;  %v6960_v13 = vadd.f32 %v6959_v35, %v6958_v39  ;;  %v15117_v39 = vmul.f32 %v7329_v36, %v14206_v31  ;;  %v15710_v31 = vld [vmem:[#allocation72_spill] sm:$0xff] }
 0x5eb   : > { %v7345_v26 = vmul.f32 %v7330_v58, %v15710_v31  ;;  %v15721_v31 = vld [vmem:[#allocation84_spill] sm:$0xff] }
 0x5ec   : > { %v6662_v46 = vadd.f32 %v6661_v37, %v6660_v15  ;;  %v6961_v0 = vrot.slane %v6960_v13, 1  ;;  %v7331_v15 = vperm.slane %v14882_v55, 0  ;;  %v15121_v37 = vmul.f32 %v7329_v36, %v15706_v29  ;;  %v15711_v55 = vld [vmem:[#allocation73_spill] sm:$0xff] }
 0x5ee   : > { %v6977_v51 = vmul.f32 0.020408163, %v6662_v46  ;;  %v6962_v27 = vadd.f32 %v6961_v0, %v6960_v13  ;;  %v15707_v13 = vld [vmem:[#allocation68_spill] sm:$0xff]  ;;  %v15127_v0 = vmul.f32 %v7329_v36, %v15708_v54  ;;  %v7346_v60 = vmul.f32 %v7331_v15, %v14633_v61 }
 0x5ef   : > { %v15124_v46 = vmul.f32 %v7329_v36, %v15707_v13  ;;  %v7376_v40 = vmul.f32 %v7331_v15, %v14701_v63  ;;  %v15158_v32 = vmul.f32 %v7331_v15, %v14721_v16  ;;  %v7333_v61 = vperm.slane %v15031_v7, 0  ;;  %v15719_v54 = vld [vmem:[#allocation80_spill] sm:$0xff] }
 0x5f0   : > { %v7007_v17 = vmul.f32 %v6977_v51, %v6977_v51  ;;  %v6992_v53 = vmul.f32 0.020408163, %v6962_v27  ;;  %v15130_v27 = vmul.f32 %v11000_v45, %v7329_v36  ;;  %v7362_v63 = vmul.f32 %v7332_v38, %v14840_v47  ;;  %v7253_v45 = vld [vmem:[%s13627_s26 + $0x8] sm:$0xff] }
 0x5f1   : > { %v7392_v16 = vmul.f32 %v7332_v38, %v15719_v54  ;;  %v15722_v47 = vld [vmem:[#allocation41_spill] sm:$0xff] }
 0x5f2   : > { %v7022_v50 = vsub.f32 %v6992_v53, %v7007_v17  ;;  %15709 = vst [vmem:[#allocation65_spill] sm:$0xff] %v15130_v27  ;;  %v7360_v17 = vmul.f32 %v7330_v58, %v15711_v55  ;;  %v15712_v53 = vld [vmem:[#allocation74_spill] sm:$0xff]  ;;  %v15184_v55 = vmul.f32 %v7332_v38, %v15722_v47  ;;  %v15731_v47 = vld [vmem:[#allocation56_spill] sm:$0xff] }
 0x5f4   : > { %v7037_v57 = vmax.f32 %v7022_v50, 0.0  ;;  %v15136_v50 = vmul.f32 %v7330_v58, %v15712_v53  ;;  %15723 = vst [vmem:[#allocation47_spill] sm:$0xff] %v15184_v55  ;;  %v15724_v53 = vld [vmem:[#allocation87_spill] sm:$0xff]  ;;  %v15197_v55 = vmul.f32 %v7333_v61, %v15731_v47 }
 0x5f6   : > { %v7052_v30 = vadd.f32 0.001, %v7037_v57  ;;  %15732 = vst [vmem:[#allocation49_spill] sm:$0xff] %v15197_v55 }
 0x5f8   : > { %10987 = vrsqrt.f32 %v7052_v30  ;;  %vm7199_vm6 = vweird.f32 %v7052_v30 }
 0x5fe   : > { %v10988_v41 = vpop.eup %10987 }
 0x5ff   : > { %v7194_v11 = vmul.f32 %v10988_v41, %v7052_v30  ;;  %vm7200_vm0 = vweird.f32 %v10988_v41  ;;  %v15713_v30 = vld [vmem:[#allocation75_spill] sm:$0xff] }
 0x600   : > { %vm7201_vm10 = vmor %vm7199_vm6, %vm7200_vm0  ;;  %v15139_v9 = vmul.f32 %v7330_v58, %v15713_v30  ;;  %v15725_v30 = vld [vmem:[#allocation69_spill] sm:$0xff] }
 0x601   : > { %v7195_v3 = vmul.f32 %v10988_v41, %v7194_v11  ;;  %v15714_v11 = vld [vmem:[#allocation76_spill] sm:$0xff] }
 0x603   : > { %v7196_v28 = vmul.f32 0.5, %v7195_v3  ;;  %v15142_v3 = vmul.f32 %v7330_v58, %v15714_v11  ;;  %v7363_v11 = vmul.f32 %v7333_v61, %v15725_v30 }
 0x605   : > { %v7197_v10 = vsub.f32 1.5, %v7196_v28  ;;  %v15715_v28 = vld [vmem:[#allocation77_spill] sm:$0xff] }
 0x606   : > { %v15146_v52 = vmul.f32 %v7330_v58, %v15715_v28  ;;  %v15164_v58 = vmul.f32 %v7331_v15, %v14792_v4  ;;  %v15727_v28 = vld [vmem:[#allocation85_spill] sm:$0xff] }
 0x607   : > { %v7198_v35 = vmul.f32 %v10988_v41, %v7197_v10  ;;  %v15155_v10 = vmul.f32 %v7331_v15, %v14709_v34 }
 0x608   : > { %15717 = vst [vmem:[#allocation67_spill] sm:$0xff] %v15164_v58 }
 0x609   : > { %v7202_v57 = vsel %vm7201_vm10, %v10988_v41, %v7198_v35  ;;  %v7361_v41 = vmul.f32 %v7331_v15, %v14657_v20  ;;  %v7347_v20 = vmul.f32 %v7332_v38, %v14820_v22  ;;  %v15181_v22 = vmul.f32 %v7332_v38, %v15721_v31 }
 0x60a   : > { %v7251_v36 = vmul.f32 %v7221_v21, %v7202_v57  ;;  %v15161_v21 = vmul.f32 %v7331_v15, %v14734_v62  ;;  %v15720_v15 = vld [vmem:[#allocation83_spill] sm:$0xff]  ;;  %v7348_v57 = vmul.f32 %v7333_v61, %v15724_v53 }
 0x60b   : > { %v7407_v7 = vmul.f32 %v7332_v38, %v15720_v15  ;;  %v15730_v15 = vld [vmem:[#allocation54_spill] sm:$0xff] }
 0x60c   : > { %v7268_v48 = vmul.f32 %v7251_v36, %v6977_v51  ;;  %v7334_v35 = vperm.slane %v7251_v36, 0  ;;  %v15718_v51 = vld [vmem:[#allocation78_spill] sm:$0xff]  ;;  %v7423_v31 = vmul.f32 %v7333_v61, %v15730_v15 }
 0x60d   : > { %v7377_v13 = vmul.f32 %v7332_v38, %v15718_v51  ;;  %v15729_v51 = vld [vmem:[#allocation53_spill] sm:$0xff] }
 0x60e   : > { %v7296_v29 = vrot.slane %v7268_v48, 2  ;;  %v7364_v34 = vmul.f32 %v7334_v35, %v15043_v49  ;;  %v15174_v62 = vmul.f32 %v7334_v35, %v15059_v42  ;;  %v15177_v4 = vmul.f32 %v7334_v35, %v15067_v1  ;;  %v15726_v42 = vld [vmem:[#allocation52_spill] sm:$0xff] }
 0x60f   : > { %v7378_v36 = vmul.f32 %v7333_v61, %v15726_v42  ;;  %v7393_v48 = vmul.f32 %v7333_v61, %v15728_v6  ;;  %v7408_v54 = vmul.f32 %v7333_v61, %v15729_v51  ;;  %v7394_v53 = vmul.f32 %v7334_v35, %v15052_v43 }
 0x610   : > { %v7314_v49 = vsel %vm7306_vm1, %v15064_v59, %v7296_v29  ;;  %v7349_v59 = vmul.f32 %v7334_v35, %v15039_v18  ;;  %v7379_v29 = vmul.f32 %v7334_v35, %v15046_v14 }
 0x611   : > { %v7315_v1 = vsel %vm7308_vm2, %v15727_v28, %v7314_v49  ;;  %v7439_v28 = vmul.f32 %v7334_v35, %v15072_v5 }
 0x612   : > { %v7319_v38 = vsub.f32 %v7253_v45, %v7315_v1 }
 0x614   : > { %v7450_v30 = vperm.slane %v7319_v38, 0  ;;  %v7451_v42 = vperm.slane %v7319_v38, 1  ;;  %v7452_v58 = vperm.slane %v7319_v38, 2  ;;  %v7453_v49 = vperm.slane %v7319_v38, 3 }
 0x615   : > { %v7454_v6 = vperm.slane %v7319_v38, 4  ;;  %v7455_v51 = vperm.slane %v7319_v38, 5  ;;  %v7456_v15 = vperm.slane %v7319_v38, 6 }
 0x616   : > { %v7480_v45 = vadd.f32 %v7450_v30, %v15088_v2  ;;  %v7481_v61 = vadd.f32 %v7451_v42, %v15110_v23  ;;  %v7482_v18 = vadd.f32 %v7452_v58, %v7345_v26  ;;  %v7483_v1 = vadd.f32 %v7453_v49, %v7346_v60 }
 0x617   : > { %v7484_v14 = vadd.f32 %v7454_v6, %v7347_v20  ;;  %v7485_v47 = vadd.f32 %v7455_v51, %v7348_v57  ;;  %v7486_v43 = vadd.f32 %v7456_v15, %v7349_v59  ;;  %v7495_v55 = vadd.f32 %v7450_v30, %v15091_v8 }
 0x618   : > { %v7496_v24 = vadd.f32 %v7451_v42, %v15113_v12  ;;  %v7497_v5 = vadd.f32 %v7452_v58, %v7360_v17  ;;  %v7498_v35 = vadd.f32 %v7453_v49, %v7361_v41  ;;  %v7499_v27 = vadd.f32 %v7454_v6, %v7362_v63  ;;  %7585 = vst [vmem:[%s11916_s25 + $0x40] sm:$0xff] %v7480_v45 }
 0x619   : > { %v7500_v38 = vadd.f32 %v7455_v51, %v7363_v11  ;;  %v7501_v2 = vadd.f32 %v7456_v15, %v7364_v34  ;;  %v7510_v23 = vadd.f32 %v7450_v30, %v15094_v44  ;;  %v7511_v26 = vadd.f32 %v7451_v42, %v15117_v39  ;;  %7586 = vst [vmem:[%s11916_s25 + $0x48] sm:$0xff] %v7481_v61 }
 0x61a   : > { %v7512_v60 = vadd.f32 %v7452_v58, %v15136_v50  ;;  %v7513_v20 = vadd.f32 %v7453_v49, %v7376_v40  ;;  %v7514_v57 = vadd.f32 %v7454_v6, %v7377_v13  ;;  %v7515_v8 = vadd.f32 %v7455_v51, %v7378_v36  ;;  %7587 = vst [vmem:[%s11916_s25 + $0x50] sm:$0xff] %v7482_v18 }
 0x61b   : > { %v7516_v12 = vadd.f32 %v7456_v15, %v7379_v29  ;;  %v7525_v17 = vadd.f32 %v7450_v30, %v15097_v56  ;;  %v7526_v41 = vadd.f32 %v7451_v42, %v15121_v37  ;;  %v7527_v63 = vadd.f32 %v7452_v58, %v15139_v9  ;;  %7588 = vst [vmem:[%s11916_s25 + $0x58] sm:$0xff] %v7483_v1 }
 0x61c   : > { %v7528_v44 = vadd.f32 %v7453_v49, %v15155_v10  ;;  %v7529_v39 = vadd.f32 %v7454_v6, %v7392_v16  ;;  %v7530_v34 = vadd.f32 %v7455_v51, %v7393_v48  ;;  %v7531_v11 = vadd.f32 %v7456_v15, %v7394_v53  ;;  %7589 = vst [vmem:[%s11916_s25 + $0x60] sm:$0xff] %v7484_v14  ;;  %v15735_v48 = vld [vmem:[#allocation67_spill] sm:$0xff] }
 0x61d   : > { %v7540_v50 = vadd.f32 %v7450_v30, %v15100_v25  ;;  %v7541_v40 = vadd.f32 %v7451_v42, %v15124_v46  ;;  %v7542_v13 = vadd.f32 %v7452_v58, %v15142_v3  ;;  %v7543_v56 = vadd.f32 %v7453_v49, %v15158_v32  ;;  %7590 = vst [vmem:[%s11916_s25 + $0x68] sm:$0xff] %v7485_v47 }
 0x61e   : > { %v7544_v37 = vadd.f32 %v7454_v6, %v7407_v7  ;;  %v7545_v9 = vadd.f32 %v7455_v51, %v7408_v54  ;;  %v7546_v36 = vadd.f32 %v7456_v15, %v15174_v62  ;;  %v7555_v10 = vadd.f32 %v7450_v30, %v15103_v19  ;;  %7591 = vst [vmem:[%s11916_s25 + $0x70] sm:$0xff] %v7486_v43 }
 0x61f   : > { %v7556_v16 = vadd.f32 %v7451_v42, %v15127_v0  ;;  %v7557_v25 = vadd.f32 %v7452_v58, %v15146_v52  ;;  %v7558_v46 = vadd.f32 %v7453_v49, %v15161_v21  ;;  %v7559_v3 = vadd.f32 %v7454_v6, %v15181_v22  ;;  %7600 = vst [vmem:[%s11916_s25 + $0xb8] sm:$0xff] %v7495_v55  ;;  %v15733_v0 = vld [vmem:[#allocation65_spill] sm:$0xff]  ;;  %v15734_v52 = vld [vmem:[#allocation44_spill] sm:$0xff]  ;;  %v15736_v55 = vld [vmem:[#allocation47_spill] sm:$0xff] }
 0x620   : > { %v7560_v32 = vadd.f32 %v7455_v51, %v7423_v31  ;;  %v7561_v19 = vadd.f32 %v7456_v15, %v15177_v4  ;;  %v7570_v62 = vadd.f32 %v7450_v30, %v15107_v33  ;;  %v7571_v7 = vadd.f32 %v7451_v42, %v15733_v0  ;;  %7601 = vst [vmem:[%s11916_s25 + $0xc0] sm:$0xff] %v7496_v24  ;;  %v15737_v31 = vld [vmem:[#allocation49_spill] sm:$0xff] }
 0x621   : > { %v7572_v21 = vadd.f32 %v7452_v58, %v15734_v52  ;;  %v7573_v22 = vadd.f32 %v7453_v49, %v15735_v48  ;;  %v7574_v54 = vadd.f32 %v7454_v6, %v15736_v55  ;;  %v7575_v4 = vadd.f32 %v7455_v51, %v15737_v31  ;;  %7602 = vst [vmem:[%s11916_s25 + $0xc8] sm:$0xff] %v7497_v5 }
 0x622   : > { %v7576_v33 = vadd.f32 %v7456_v15, %v7439_v28  ;;  %7603 = vst [vmem:[%s11916_s25 + $0xd0] sm:$0xff] %v7498_v35 }
 0x623   : > { %7604 = vst [vmem:[%s11916_s25 + $0xd8] sm:$0xff] %v7499_v27 }
 0x624   : > { %7605 = vst [vmem:[%s11916_s25 + $0xe0] sm:$0xff] %v7500_v38 }
 0x625   : > { %7606 = vst [vmem:[%s11916_s25 + $0xe8] sm:$0xff] %v7501_v2 }
 0x626   : > { %7615 = vst [vmem:[%s11916_s25 + $0x130] sm:$0xff] %v7510_v23 }
 0x627   : > { %7616 = vst [vmem:[%s11916_s25 + $0x138] sm:$0xff] %v7511_v26 }
 0x628   : > { %7617 = vst [vmem:[%s11916_s25 + $0x140] sm:$0xff] %v7512_v60 }
 0x629   : > { %7618 = vst [vmem:[%s11916_s25 + $0x148] sm:$0xff] %v7513_v20 }
 0x62a   : > { %7619 = vst [vmem:[%s11916_s25 + $0x150] sm:$0xff] %v7514_v57 }
 0x62b   : > { %7620 = vst [vmem:[%s11916_s25 + $0x158] sm:$0xff] %v7515_v8 }
 0x62c   : > { %7621 = vst [vmem:[%s11916_s25 + $0x160] sm:$0xff] %v7516_v12 }
 0x62d   : > { %7630 = vst [vmem:[%s11916_s25 + $0x1a8] sm:$0xff] %v7525_v17 }
 0x62e   : > { %7631 = vst [vmem:[%s11916_s25 + $0x1b0] sm:$0xff] %v7526_v41 }
 0x62f   : > { %7632 = vst [vmem:[%s11916_s25 + $0x1b8] sm:$0xff] %v7527_v63 }
 0x630   : > { %7633 = vst [vmem:[%s11916_s25 + $0x1c0] sm:$0xff] %v7528_v44 }
 0x631   : > { %7634 = vst [vmem:[%s11916_s25 + $0x1c8] sm:$0xff] %v7529_v39 }
 0x632   : > { %7635 = vst [vmem:[%s11916_s25 + $0x1d0] sm:$0xff] %v7530_v34 }
 0x633   : > { %7636 = vst [vmem:[%s11916_s25 + $0x1d8] sm:$0xff] %v7531_v11 }
 0x634   : > { %7645 = vst [vmem:[%s11916_s25 + $0x220] sm:$0xff] %v7540_v50 }
 0x635   : > { %7646 = vst [vmem:[%s11916_s25 + $0x228] sm:$0xff] %v7541_v40 }
 0x636   : > { %7647 = vst [vmem:[%s11916_s25 + $0x230] sm:$0xff] %v7542_v13 }
 0x637   : > { %7648 = vst [vmem:[%s11916_s25 + $0x238] sm:$0xff] %v7543_v56 }
 0x638   : > { %7649 = vst [vmem:[%s11916_s25 + $0x240] sm:$0xff] %v7544_v37 }
 0x639   : > { %7650 = vst [vmem:[%s11916_s25 + $0x248] sm:$0xff] %v7545_v9 }
 0x63a   : > { %7651 = vst [vmem:[%s11916_s25 + $0x250] sm:$0xff] %v7546_v36 }
 0x63b   : > { %7660 = vst [vmem:[%s11916_s25 + $0x298] sm:$0xff] %v7555_v10 }
 0x63c   : > { %7661 = vst [vmem:[%s11916_s25 + $0x2a0] sm:$0xff] %v7556_v16 }
 0x63d   : > { %7662 = vst [vmem:[%s11916_s25 + $0x2a8] sm:$0xff] %v7557_v25 }
 0x63e   : > { %7663 = vst [vmem:[%s11916_s25 + $0x2b0] sm:$0xff] %v7558_v46 }
 0x63f   : > { %7664 = vst [vmem:[%s11916_s25 + $0x2b8] sm:$0xff] %v7559_v3 }
 0x640   : > { %7665 = vst [vmem:[%s11916_s25 + $0x2c0] sm:$0xff] %v7560_v32 }
 0x641   : > { %7666 = vst [vmem:[%s11916_s25 + $0x2c8] sm:$0xff] %v7561_v19 }
 0x642   : > { %7675 = vst [vmem:[%s11916_s25 + $0x310] sm:$0x1] %v7570_v62 }
 0x643   : > { %7676 = vst [vmem:[%s11916_s25 + $0x318] sm:$0x1] %v7571_v7 }
 0x644   : > { %7677 = vst [vmem:[%s11916_s25 + $0x320] sm:$0x1] %v7572_v21 }
 0x645   : > { %7678 = vst [vmem:[%s11916_s25 + $0x328] sm:$0x1] %v7573_v22 }
 0x646   : > { %7679 = vst [vmem:[%s11916_s25 + $0x330] sm:$0x1] %v7574_v54 }
 0x647   : > { %7680 = vst [vmem:[%s11916_s25 + $0x338] sm:$0x1] %v7575_v4 }
 0x648   : > { %7681 = vst [vmem:[%s11916_s25 + $0x340] sm:$0x1] %v7576_v33 }
 0x649   : > { %11179 = shalt.err (!%p11176_p10)
}
 0x64a   : > { %s11235_s28 = smov 1920   ;;  %s11236_s7 = smov 3840  }
 0x64b   : > { %s11237_s14 = smov 120  }
 0x64c   : > { %10888 = dma.vmem_to_hbm [thread:$0]  (%p11320_p11), %s7696_s9, 13440, %s7698_s11, %s7683_s22, %s11235_s28, %s11236_s7, %s11237_s14  }
 0x64d PF: > { %s15738_s12 = sld [smem:[#allocation15_spill]]  ;;  %p15740_p0 = scmp.ge.s32.totalorder %s11226_s21, 2 }
 0x64f   : > { %p10908_p8 = pnand %p15740_p0, %p11324_p12 }
 0x651   : > { %p10909_p3 = pneg %p10908_p8 }
 0x653   : > { %s7712_s25 = sand.u32 1, %s15738_s12  }
 0x654   : > { %s7713_s2 = scalar_lea.sflag [#allocation4], %s7712_s25 }
 0x655   : > { %11209 = dma.done.wait (%p10909_p3), %s7713_s2, 13440  }
 0x656   : > { %11211 = vsyncadd (%p10909_p3), %s7713_s2, 4294953856  ;;  %s15741_s21 = sld [smem:[#allocation16_spill]]  ;;  %s15743_s18 = smov %s11218_s19 }
 0x657   : > { %s15742_s0 = sld [smem:[#allocation17_spill]]  ;;  %s15744_s19 = smov %s11222_s20 }
 0x65c   : > { %p17_p4 = scmp.ge.s32.totalorder %s15741_s21, 4  }
 0x65d   : > { %s15745_s20 = smov %s15742_s0 }
 0x65e   :  { %19 = sbr.rel (!%p17_p4) target bundleno = 8 (0x8), region = 114 }
 0x663   :  { %7719 = vsyncpa [#allocation3], 1 }
 0x664   :  { %7721 = vsyncpa [#allocation3 + $0x1], 1 }
 0x665   :  { %7722 = vsyncpa [#allocation6], 1 }
 0x666   :  { %7723 = vsyncpa [#allocation4], 1 }
 0x667   :  { %7725 = vsyncpa [#allocation4 + $0x1], 1 }

</bundles_post_ra>
